<compile_context>
chip_gen: v6e
topology: v6e:2x2x1
jax: 0.10.0
libtpu: 0.0.40
codegen_flags: <defaults>
</compile_context>

<pallas_src>
import functools

import jax
import jax.numpy as jnp
from jax.experimental import pallas as pl
from jax.experimental.pallas import tpu as pltpu

_LANE = 128          # lane width
_SUBLANE_F32 = 8     # f32 sublane count
_SUBLANE_BF16 = 16   # bf16 sublane packing


def _round_up(n, m):
    return ((n + m - 1) // m) * m


# ----------------------------------------------------------------------------
# Fused MLP kernel: unrolled over all layers.
#   refs = (x, w_hbm[0..L-1], bias_concat, alphas, out,
#           w_vmem[0..L-1], dma_sems)
# Weights arrive as raw HBM refs; each layer's HBM->VMEM copy is started at
# kernel entry and awaited right before its matmul (DMA/compute overlap).
# ----------------------------------------------------------------------------
def _mlp_fused_kernel(*refs, n_layers, bias_offsets, bias_widths):
    x_ref = refs[0]
    w_hbm = refs[1:1 + n_layers]                      # ANY/HBM, bf16
    b_ref = refs[1 + n_layers]                        # VMEM, f32 (1, sum_Npad)
    alpha_ref = refs[2 + n_layers]                    # SMEM, f32[n_layers-1]
    o_ref = refs[3 + n_layers]                        # VMEM, f32
    w_vmem = refs[4 + n_layers:4 + 2 * n_layers]      # VMEM scratch, bf16
    sem = refs[4 + 2 * n_layers]                      # DMA sems, (n_layers,)

    # Kick off every layer's weight DMA up front; each has its own semaphore.
    copies = []
    for li in range(n_layers):
        cp = pltpu.make_async_copy(w_hbm[li], w_vmem[li], sem.at[li])
        cp.start()
        copies.append(cp)

    h = x_ref[...]                                    # (B_pad, K0_pad) f32
    for li in range(n_layers):
        copies[li].wait()                             # only this layer's DMA
        w = w_vmem[li][...]                           # (K_pad, N_pad) bf16
        acc = jnp.dot(h.astype(jnp.bfloat16), w,
                      preferred_element_type=jnp.float32)
        off = bias_offsets[li]
        nw = bias_widths[li]
        acc = acc + b_ref[:, off:off + nw]            # f32 bias, row-broadcast
        if li < n_layers - 1:                         # no PReLU after last FC
            a = alpha_ref[li]                         # scalar read from SMEM
            acc = jnp.where(acc >= 0, acc, a * acc)   # PReLU in f32
        h = acc
    o_ref[...] = h.astype(o_ref.dtype)


# ----------------------------------------------------------------------------
# Factory: one-time weight padding / casting, returns a jitted forward fn.
# ----------------------------------------------------------------------------
def make_mlp_forward(params):
    n_layers = len(params)
    in_features = params[0][0].shape[0]
    out_features = params[-1][0].shape[1]

    # K of layer 0 only needs bf16-sublane alignment (16), not 128.
    k0_pad = _round_up(in_features, _SUBLANE_BF16)

    # ---- one-time padding & bf16 cast of weights ----------------------------
    padded_ws = []
    n_pads = []
    for li, (w, _b, _a) in enumerate(params):
        k, n = w.shape
        k_pad = k0_pad if li == 0 else n_pads[li - 1]   # matches prev layer N
        n_pad = _round_up(n, _LANE)                     # lane-dense columns
        n_pads.append(n_pad)
        w_pad = jnp.zeros((k_pad, n_pad), jnp.bfloat16)
        w_pad = w_pad.at[:k, :n].set(w.astype(jnp.bfloat16))
        padded_ws.append(w_pad)

    # ---- one-time bias concat (f32) -----------------------------------------
    bias_offsets, bias_widths, bias_parts = [], [], []
    total = 0
    for li, (w, b, _a) in enumerate(params):
        n = w.shape[1]
        n_pad = n_pads[li]
        bias_parts.append(
            jnp.zeros((n_pad,), jnp.float32).at[:n].set(b.astype(jnp.float32)))
        bias_offsets.append(total)
        bias_widths.append(n_pad)
        total += n_pad
    bias_concat = jnp.concatenate(bias_parts)[None, :]   # (1, sum_Npad) f32

    # ---- PReLU slopes -> SMEM scalar table ----------------------------------
    if n_layers > 1:
        alphas = jnp.stack(
            [jnp.asarray(a, jnp.float32) for (_w, _b, a) in params[:-1]])
    else:
        alphas = jnp.zeros((1,), jnp.float32)

    # ---- specs / scratch (static) -------------------------------------------
    vmem_spec = pl.BlockSpec(memory_space=pltpu.MemorySpace.VMEM)
    smem_spec = pl.BlockSpec(memory_space=pltpu.MemorySpace.SMEM)
    any_spec = pl.BlockSpec(memory_space=pl.ANY)

    in_specs = [vmem_spec] + [any_spec] * n_layers + [vmem_spec, smem_spec]
    scratch_shapes = [pltpu.VMEM(w.shape, jnp.bfloat16) for w in padded_ws]
    scratch_shapes.append(pltpu.SemaphoreType.DMA((n_layers,)))

    n_out_pad = n_pads[-1]
    weight_bytes = sum(int(w.size) * 2 for w in padded_ws)   # bf16 in VMEM

    kernel = functools.partial(
        _mlp_fused_kernel,
        n_layers=n_layers,
        bias_offsets=tuple(bias_offsets),
        bias_widths=tuple(bias_widths),
    )

    def _forward(weights, bias, alpha_tbl, x):
        batch = x.shape[0]
        b_pad = _round_up(max(batch, 1), _SUBLANE_F32)
        x_pad = jnp.zeros((b_pad, k0_pad), jnp.float32)
        x_pad = x_pad.at[:batch, :in_features].set(x.astype(jnp.float32))

        vmem_need = (x_pad.size * 4 + weight_bytes + bias.size * 4
                     + b_pad * n_out_pad * 4)
        # Actual need + margin; never ask for more than 32 MiB (v7x-safe).
        vmem_limit = int(min(max(vmem_need + (8 << 20), 16 << 20), 32 << 20))

        out_pad = pl.pallas_call(
            kernel,
            out_shape=jax.ShapeDtypeStruct((b_pad, n_out_pad), jnp.float32),
            in_specs=in_specs,
            out_specs=vmem_spec,
            scratch_shapes=scratch_shapes,
            compiler_params=pltpu.CompilerParams(vmem_limit_bytes=vmem_limit),
        )(x_pad, *weights, bias, alpha_tbl)

        return out_pad[:batch, :out_features].astype(x.dtype)

    fwd_jit = jax.jit(_forward)
    weights_tuple = tuple(padded_ws)

    def forward(x):
        return fwd_jit(weights_tuple, bias_concat, alphas, x)

    return forward


# ----------------------------------------------------------------------------
# Parameter construction (deterministic, mimics PyTorch Linear/PReLU shapes).
# ----------------------------------------------------------------------------
def init_mlp_params(key, input_size, output_size):
    dims = [input_size, 1280, 1024, 896, 768, 512, 384, 256, 256, 128, 64, 32,
            output_size]
    params = []
    for li in range(len(dims) - 1):
        fan_in, fan_out = dims[li], dims[li + 1]
        key, kw, kb = jax.random.split(key, 3)
        bound = 1.0 / float(jnp.sqrt(jnp.float32(fan_in)))
        # stored as (in, out) so the kernel computes x @ W (== x @ W_pt^T)
        w = jax.random.uniform(kw, (fan_in, fan_out), jnp.float32,
                               minval=-bound, maxval=bound)
        b = jax.random.uniform(kb, (fan_out,), jnp.float32,
                               minval=-bound, maxval=bound)
        a = jnp.float32(0.25)   # PReLU default init (unused for last layer)
        params.append((w, b, a))
    return params


# Pure-JAX reference (weight_dtype=bfloat16 mirrors the kernel's bf16 matmuls).
def mlp_forward_ref(params, x, weight_dtype=jnp.float32):
    n_layers = len(params)
    h = x.astype(jnp.float32)
    for li, (w, b, a) in enumerate(params):
        h = jnp.dot(h.astype(weight_dtype), w.astype(weight_dtype),
                    preferred_element_type=jnp.float32)
        h = h + b.astype(jnp.float32)
        if li < n_layers - 1:
            h = jnp.where(h >= 0, h, a * h)
    return h.astype(x.dtype)


if __name__ == "__main__":
    input_size = 32     # e.g. MPNet planning input (obstacle latent + states)
    output_size = 2
    batch = 4

    key = jax.random.PRNGKey(0)
    kp, kx = jax.random.split(key)
    params = init_mlp_params(kp, input_size, output_size)
    x = jax.random.normal(kx, (batch, input_size), jnp.float32)

    forward = make_mlp_forward(params)
    out = jax.block_until_ready(forward(x))

    ref = mlp_forward_ref(params, x, weight_dtype=jnp.bfloat16)
    assert out.shape == (batch, output_size)
    assert jnp.allclose(out, ref, atol=2e-3, rtol=2e-3), "mismatch vs reference"

    print("KERNEL_OK")
</pallas_src>

<mosaic_0001>
module attributes {stable_mosaic.version = 11 : i64} {
  func.func @_mlp_fused_kernel(%arg0: memref<8x32xf32, #tpu.memory_space<vmem>>, %arg1: memref<32x1280xbf16, #tpu.memory_space<any>>, %arg2: memref<1280x1024xbf16, #tpu.memory_space<any>>, %arg3: memref<1024x896xbf16, #tpu.memory_space<any>>, %arg4: memref<896x768xbf16, #tpu.memory_space<any>>, %arg5: memref<768x512xbf16, #tpu.memory_space<any>>, %arg6: memref<512x384xbf16, #tpu.memory_space<any>>, %arg7: memref<384x256xbf16, #tpu.memory_space<any>>, %arg8: memref<256x256xbf16, #tpu.memory_space<any>>, %arg9: memref<256x128xbf16, #tpu.memory_space<any>>, %arg10: memref<128x128xbf16, #tpu.memory_space<any>>, %arg11: memref<128x128xbf16, #tpu.memory_space<any>>, %arg12: memref<128x128xbf16, #tpu.memory_space<any>>, %arg13: memref<1x5888xf32, #tpu.memory_space<vmem>>, %arg14: memref<11xf32, #tpu.memory_space<smem>>, %arg15: memref<8x128xf32, #tpu.memory_space<vmem>>, %arg16: memref<32x1280xbf16, #tpu.memory_space<vmem>>, %arg17: memref<1280x1024xbf16, #tpu.memory_space<vmem>>, %arg18: memref<1024x896xbf16, #tpu.memory_space<vmem>>, %arg19: memref<896x768xbf16, #tpu.memory_space<vmem>>, %arg20: memref<768x512xbf16, #tpu.memory_space<vmem>>, %arg21: memref<512x384xbf16, #tpu.memory_space<vmem>>, %arg22: memref<384x256xbf16, #tpu.memory_space<vmem>>, %arg23: memref<256x256xbf16, #tpu.memory_space<vmem>>, %arg24: memref<256x128xbf16, #tpu.memory_space<vmem>>, %arg25: memref<128x128xbf16, #tpu.memory_space<vmem>>, %arg26: memref<128x128xbf16, #tpu.memory_space<vmem>>, %arg27: memref<128x128xbf16, #tpu.memory_space<vmem>>, %arg28: memref<12x!tpu.dma_semaphore, #tpu.memory_space<semaphore_mem>>) attributes {dimension_semantics = [], scalar_prefetch = 0 : i64, scratch_operands = 13 : i64, tpu.core_type = #tpu.core_type<tc>} {
    %c0_i32 = arith.constant 0 : i32
    %0 = tpu.memref_slice %arg28[%c0_i32] : memref<12x!tpu.dma_semaphore, #tpu.memory_space<semaphore_mem>> -> memref<1x!tpu.dma_semaphore, #tpu.memory_space<semaphore_mem>>
    %1 = tpu.memref_squeeze %0 : memref<1x!tpu.dma_semaphore, #tpu.memory_space<semaphore_mem>> -> memref<!tpu.dma_semaphore, #tpu.memory_space<semaphore_mem>>
    tpu.enqueue_dma source(%arg1 : memref<32x1280xbf16, #tpu.memory_space<any>>) target(%arg16 : memref<32x1280xbf16, #tpu.memory_space<vmem>>) target_semaphore(%1 : memref<!tpu.dma_semaphore, #tpu.memory_space<semaphore_mem>>)
    %c1_i32 = arith.constant 1 : i32
    %2 = tpu.memref_slice %arg28[%c1_i32] : memref<12x!tpu.dma_semaphore, #tpu.memory_space<semaphore_mem>> -> memref<1x!tpu.dma_semaphore, #tpu.memory_space<semaphore_mem>>
    %3 = tpu.memref_squeeze %2 : memref<1x!tpu.dma_semaphore, #tpu.memory_space<semaphore_mem>> -> memref<!tpu.dma_semaphore, #tpu.memory_space<semaphore_mem>>
    tpu.enqueue_dma source(%arg2 : memref<1280x1024xbf16, #tpu.memory_space<any>>) target(%arg17 : memref<1280x1024xbf16, #tpu.memory_space<vmem>>) target_semaphore(%3 : memref<!tpu.dma_semaphore, #tpu.memory_space<semaphore_mem>>)
    %c2_i32 = arith.constant 2 : i32
    %4 = tpu.memref_slice %arg28[%c2_i32] : memref<12x!tpu.dma_semaphore, #tpu.memory_space<semaphore_mem>> -> memref<1x!tpu.dma_semaphore, #tpu.memory_space<semaphore_mem>>
    %5 = tpu.memref_squeeze %4 : memref<1x!tpu.dma_semaphore, #tpu.memory_space<semaphore_mem>> -> memref<!tpu.dma_semaphore, #tpu.memory_space<semaphore_mem>>
    tpu.enqueue_dma source(%arg3 : memref<1024x896xbf16, #tpu.memory_space<any>>) target(%arg18 : memref<1024x896xbf16, #tpu.memory_space<vmem>>) target_semaphore(%5 : memref<!tpu.dma_semaphore, #tpu.memory_space<semaphore_mem>>)
    %c3_i32 = arith.constant 3 : i32
    %6 = tpu.memref_slice %arg28[%c3_i32] : memref<12x!tpu.dma_semaphore, #tpu.memory_space<semaphore_mem>> -> memref<1x!tpu.dma_semaphore, #tpu.memory_space<semaphore_mem>>
    %7 = tpu.memref_squeeze %6 : memref<1x!tpu.dma_semaphore, #tpu.memory_space<semaphore_mem>> -> memref<!tpu.dma_semaphore, #tpu.memory_space<semaphore_mem>>
    tpu.enqueue_dma source(%arg4 : memref<896x768xbf16, #tpu.memory_space<any>>) target(%arg19 : memref<896x768xbf16, #tpu.memory_space<vmem>>) target_semaphore(%7 : memref<!tpu.dma_semaphore, #tpu.memory_space<semaphore_mem>>)
    %c4_i32 = arith.constant 4 : i32
    %8 = tpu.memref_slice %arg28[%c4_i32] : memref<12x!tpu.dma_semaphore, #tpu.memory_space<semaphore_mem>> -> memref<1x!tpu.dma_semaphore, #tpu.memory_space<semaphore_mem>>
    %9 = tpu.memref_squeeze %8 : memref<1x!tpu.dma_semaphore, #tpu.memory_space<semaphore_mem>> -> memref<!tpu.dma_semaphore, #tpu.memory_space<semaphore_mem>>
    tpu.enqueue_dma source(%arg5 : memref<768x512xbf16, #tpu.memory_space<any>>) target(%arg20 : memref<768x512xbf16, #tpu.memory_space<vmem>>) target_semaphore(%9 : memref<!tpu.dma_semaphore, #tpu.memory_space<semaphore_mem>>)
    %c5_i32 = arith.constant 5 : i32
    %10 = tpu.memref_slice %arg28[%c5_i32] : memref<12x!tpu.dma_semaphore, #tpu.memory_space<semaphore_mem>> -> memref<1x!tpu.dma_semaphore, #tpu.memory_space<semaphore_mem>>
    %11 = tpu.memref_squeeze %10 : memref<1x!tpu.dma_semaphore, #tpu.memory_space<semaphore_mem>> -> memref<!tpu.dma_semaphore, #tpu.memory_space<semaphore_mem>>
    tpu.enqueue_dma source(%arg6 : memref<512x384xbf16, #tpu.memory_space<any>>) target(%arg21 : memref<512x384xbf16, #tpu.memory_space<vmem>>) target_semaphore(%11 : memref<!tpu.dma_semaphore, #tpu.memory_space<semaphore_mem>>)
    %c6_i32 = arith.constant 6 : i32
    %12 = tpu.memref_slice %arg28[%c6_i32] : memref<12x!tpu.dma_semaphore, #tpu.memory_space<semaphore_mem>> -> memref<1x!tpu.dma_semaphore, #tpu.memory_space<semaphore_mem>>
    %13 = tpu.memref_squeeze %12 : memref<1x!tpu.dma_semaphore, #tpu.memory_space<semaphore_mem>> -> memref<!tpu.dma_semaphore, #tpu.memory_space<semaphore_mem>>
    tpu.enqueue_dma source(%arg7 : memref<384x256xbf16, #tpu.memory_space<any>>) target(%arg22 : memref<384x256xbf16, #tpu.memory_space<vmem>>) target_semaphore(%13 : memref<!tpu.dma_semaphore, #tpu.memory_space<semaphore_mem>>)
    %c7_i32 = arith.constant 7 : i32
    %14 = tpu.memref_slice %arg28[%c7_i32] : memref<12x!tpu.dma_semaphore, #tpu.memory_space<semaphore_mem>> -> memref<1x!tpu.dma_semaphore, #tpu.memory_space<semaphore_mem>>
    %15 = tpu.memref_squeeze %14 : memref<1x!tpu.dma_semaphore, #tpu.memory_space<semaphore_mem>> -> memref<!tpu.dma_semaphore, #tpu.memory_space<semaphore_mem>>
    tpu.enqueue_dma source(%arg8 : memref<256x256xbf16, #tpu.memory_space<any>>) target(%arg23 : memref<256x256xbf16, #tpu.memory_space<vmem>>) target_semaphore(%15 : memref<!tpu.dma_semaphore, #tpu.memory_space<semaphore_mem>>)
    %c8_i32 = arith.constant 8 : i32
    %16 = tpu.memref_slice %arg28[%c8_i32] : memref<12x!tpu.dma_semaphore, #tpu.memory_space<semaphore_mem>> -> memref<1x!tpu.dma_semaphore, #tpu.memory_space<semaphore_mem>>
    %17 = tpu.memref_squeeze %16 : memref<1x!tpu.dma_semaphore, #tpu.memory_space<semaphore_mem>> -> memref<!tpu.dma_semaphore, #tpu.memory_space<semaphore_mem>>
    tpu.enqueue_dma source(%arg9 : memref<256x128xbf16, #tpu.memory_space<any>>) target(%arg24 : memref<256x128xbf16, #tpu.memory_space<vmem>>) target_semaphore(%17 : memref<!tpu.dma_semaphore, #tpu.memory_space<semaphore_mem>>)
    %c9_i32 = arith.constant 9 : i32
    %18 = tpu.memref_slice %arg28[%c9_i32] : memref<12x!tpu.dma_semaphore, #tpu.memory_space<semaphore_mem>> -> memref<1x!tpu.dma_semaphore, #tpu.memory_space<semaphore_mem>>
    %19 = tpu.memref_squeeze %18 : memref<1x!tpu.dma_semaphore, #tpu.memory_space<semaphore_mem>> -> memref<!tpu.dma_semaphore, #tpu.memory_space<semaphore_mem>>
    tpu.enqueue_dma source(%arg10 : memref<128x128xbf16, #tpu.memory_space<any>>) target(%arg25 : memref<128x128xbf16, #tpu.memory_space<vmem>>) target_semaphore(%19 : memref<!tpu.dma_semaphore, #tpu.memory_space<semaphore_mem>>)
    %c10_i32 = arith.constant 10 : i32
    %20 = tpu.memref_slice %arg28[%c10_i32] : memref<12x!tpu.dma_semaphore, #tpu.memory_space<semaphore_mem>> -> memref<1x!tpu.dma_semaphore, #tpu.memory_space<semaphore_mem>>
    %21 = tpu.memref_squeeze %20 : memref<1x!tpu.dma_semaphore, #tpu.memory_space<semaphore_mem>> -> memref<!tpu.dma_semaphore, #tpu.memory_space<semaphore_mem>>
    tpu.enqueue_dma source(%arg11 : memref<128x128xbf16, #tpu.memory_space<any>>) target(%arg26 : memref<128x128xbf16, #tpu.memory_space<vmem>>) target_semaphore(%21 : memref<!tpu.dma_semaphore, #tpu.memory_space<semaphore_mem>>)
    %c11_i32 = arith.constant 11 : i32
    %22 = tpu.memref_slice %arg28[%c11_i32] : memref<12x!tpu.dma_semaphore, #tpu.memory_space<semaphore_mem>> -> memref<1x!tpu.dma_semaphore, #tpu.memory_space<semaphore_mem>>
    %23 = tpu.memref_squeeze %22 : memref<1x!tpu.dma_semaphore, #tpu.memory_space<semaphore_mem>> -> memref<!tpu.dma_semaphore, #tpu.memory_space<semaphore_mem>>
    tpu.enqueue_dma source(%arg12 : memref<128x128xbf16, #tpu.memory_space<any>>) target(%arg27 : memref<128x128xbf16, #tpu.memory_space<vmem>>) target_semaphore(%23 : memref<!tpu.dma_semaphore, #tpu.memory_space<semaphore_mem>>)
    %c0 = arith.constant 0 : index
    %c0_0 = arith.constant 0 : index
    %24 = vector.load %arg0[%c0, %c0_0] : memref<8x32xf32, #tpu.memory_space<vmem>>, vector<8x32xf32>
    %c0_i32_1 = arith.constant 0 : i32
    %25 = tpu.memref_slice %arg28[%c0_i32_1] : memref<12x!tpu.dma_semaphore, #tpu.memory_space<semaphore_mem>> -> memref<1x!tpu.dma_semaphore, #tpu.memory_space<semaphore_mem>>
    %26 = tpu.memref_squeeze %25 : memref<1x!tpu.dma_semaphore, #tpu.memory_space<semaphore_mem>> -> memref<!tpu.dma_semaphore, #tpu.memory_space<semaphore_mem>>
    tpu.wait_dma2 semaphore(%26 : memref<!tpu.dma_semaphore, #tpu.memory_space<semaphore_mem>>) src(%arg1 : memref<32x1280xbf16, #tpu.memory_space<any>>) dst(%arg16 : memref<32x1280xbf16, #tpu.memory_space<vmem>>)
    %c0_2 = arith.constant 0 : index
    %c0_3 = arith.constant 0 : index
    %27 = vector.load %arg16[%c0_2, %c0_3] : memref<32x1280xbf16, #tpu.memory_space<vmem>>, vector<32x1280xbf16>
    %28 = arith.truncf %24 : vector<8x32xf32> to vector<8x32xbf16>
    %cst = arith.constant dense<0.000000e+00> : vector<8x1280xf32>
    %29 = tpu.matmul %28, %27, %cst {dimension_numbers = #tpu.dot_dimension_numbers<[1], [0], [0], [1], [0, 0, 1, 1], [], []>} : vector<8x32xbf16>, vector<32x1280xbf16>, vector<8x1280xf32> -> vector<8x1280xf32>
    %c0_4 = arith.constant 0 : index
    %c0_5 = arith.constant 0 : index
    %30 = vector.load %arg13[%c0_4, %c0_5] : memref<1x5888xf32, #tpu.memory_space<vmem>>, vector<1x1280xf32>
    %31 = vector.broadcast %30 : vector<1x1280xf32> to vector<8x1280xf32>
    %32 = arith.addf %29, %31 : vector<8x1280xf32>
    %c0_6 = arith.constant 0 : index
    %33 = memref.load %arg14[%c0_6] : memref<11xf32, #tpu.memory_space<smem>>
    %cst_7 = arith.constant 0.000000e+00 : f32
    %34 = vector.broadcast %cst_7 : f32 to vector<8x1280xf32>
    %35 = arith.cmpf oge, %32, %34 : vector<8x1280xf32>
    %36 = vector.broadcast %33 : f32 to vector<8x1280xf32>
    %37 = arith.mulf %36, %32 : vector<8x1280xf32>
    %38 = arith.select %35, %32, %37 : vector<8x1280xi1>, vector<8x1280xf32>
    %c1_i32_8 = arith.constant 1 : i32
    %39 = tpu.memref_slice %arg28[%c1_i32_8] : memref<12x!tpu.dma_semaphore, #tpu.memory_space<semaphore_mem>> -> memref<1x!tpu.dma_semaphore, #tpu.memory_space<semaphore_mem>>
    %40 = tpu.memref_squeeze %39 : memref<1x!tpu.dma_semaphore, #tpu.memory_space<semaphore_mem>> -> memref<!tpu.dma_semaphore, #tpu.memory_space<semaphore_mem>>
    tpu.wait_dma2 semaphore(%40 : memref<!tpu.dma_semaphore, #tpu.memory_space<semaphore_mem>>) src(%arg2 : memref<1280x1024xbf16, #tpu.memory_space<any>>) dst(%arg17 : memref<1280x1024xbf16, #tpu.memory_space<vmem>>)
    %c0_9 = arith.constant 0 : index
    %c0_10 = arith.constant 0 : index
    %41 = vector.load %arg17[%c0_9, %c0_10] : memref<1280x1024xbf16, #tpu.memory_space<vmem>>, vector<1280x1024xbf16>
    %42 = arith.truncf %38 : vector<8x1280xf32> to vector<8x1280xbf16>
    %cst_11 = arith.constant dense<0.000000e+00> : vector<8x1024xf32>
    %43 = tpu.matmul %42, %41, %cst_11 {dimension_numbers = #tpu.dot_dimension_numbers<[1], [0], [0], [1], [0, 0, 1, 1], [], []>} : vector<8x1280xbf16>, vector<1280x1024xbf16>, vector<8x1024xf32> -> vector<8x1024xf32>
    %c0_12 = arith.constant 0 : index
    %c1280 = arith.constant 1280 : index
    %44 = vector.load %arg13[%c0_12, %c1280] : memref<1x5888xf32, #tpu.memory_space<vmem>>, vector<1x1024xf32>
    %45 = vector.broadcast %44 : vector<1x1024xf32> to vector<8x1024xf32>
    %46 = arith.addf %43, %45 : vector<8x1024xf32>
    %c1 = arith.constant 1 : index
    %47 = memref.load %arg14[%c1] : memref<11xf32, #tpu.memory_space<smem>>
    %cst_13 = arith.constant 0.000000e+00 : f32
    %48 = vector.broadcast %cst_13 : f32 to vector<8x1024xf32>
    %49 = arith.cmpf oge, %46, %48 : vector<8x1024xf32>
    %50 = vector.broadcast %47 : f32 to vector<8x1024xf32>
    %51 = arith.mulf %50, %46 : vector<8x1024xf32>
    %52 = arith.select %49, %46, %51 : vector<8x1024xi1>, vector<8x1024xf32>
    %c2_i32_14 = arith.constant 2 : i32
    %53 = tpu.memref_slice %arg28[%c2_i32_14] : memref<12x!tpu.dma_semaphore, #tpu.memory_space<semaphore_mem>> -> memref<1x!tpu.dma_semaphore, #tpu.memory_space<semaphore_mem>>
    %54 = tpu.memref_squeeze %53 : memref<1x!tpu.dma_semaphore, #tpu.memory_space<semaphore_mem>> -> memref<!tpu.dma_semaphore, #tpu.memory_space<semaphore_mem>>
    tpu.wait_dma2 semaphore(%54 : memref<!tpu.dma_semaphore, #tpu.memory_space<semaphore_mem>>) src(%arg3 : memref<1024x896xbf16, #tpu.memory_space<any>>) dst(%arg18 : memref<1024x896xbf16, #tpu.memory_space<vmem>>)
    %c0_15 = arith.constant 0 : index
    %c0_16 = arith.constant 0 : index
    %55 = vector.load %arg18[%c0_15, %c0_16] : memref<1024x896xbf16, #tpu.memory_space<vmem>>, vector<1024x896xbf16>
    %56 = arith.truncf %52 : vector<8x1024xf32> to vector<8x1024xbf16>
    %cst_17 = arith.constant dense<0.000000e+00> : vector<8x896xf32>
    %57 = tpu.matmul %56, %55, %cst_17 {dimension_numbers = #tpu.dot_dimension_numbers<[1], [0], [0], [1], [0, 0, 1, 1], [], []>} : vector<8x1024xbf16>, vector<1024x896xbf16>, vector<8x896xf32> -> vector<8x896xf32>
    %c0_18 = arith.constant 0 : index
    %c2304 = arith.constant 2304 : index
    %58 = vector.load %arg13[%c0_18, %c2304] : memref<1x5888xf32, #tpu.memory_space<vmem>>, vector<1x896xf32>
    %59 = vector.broadcast %58 : vector<1x896xf32> to vector<8x896xf32>
    %60 = arith.addf %57, %59 : vector<8x896xf32>
    %c2 = arith.constant 2 : index
    %61 = memref.load %arg14[%c2] : memref<11xf32, #tpu.memory_space<smem>>
    %cst_19 = arith.constant 0.000000e+00 : f32
    %62 = vector.broadcast %cst_19 : f32 to vector<8x896xf32>
    %63 = arith.cmpf oge, %60, %62 : vector<8x896xf32>
    %64 = vector.broadcast %61 : f32 to vector<8x896xf32>
    %65 = arith.mulf %64, %60 : vector<8x896xf32>
    %66 = arith.select %63, %60, %65 : vector<8x896xi1>, vector<8x896xf32>
    %c3_i32_20 = arith.constant 3 : i32
    %67 = tpu.memref_slice %arg28[%c3_i32_20] : memref<12x!tpu.dma_semaphore, #tpu.memory_space<semaphore_mem>> -> memref<1x!tpu.dma_semaphore, #tpu.memory_space<semaphore_mem>>
    %68 = tpu.memref_squeeze %67 : memref<1x!tpu.dma_semaphore, #tpu.memory_space<semaphore_mem>> -> memref<!tpu.dma_semaphore, #tpu.memory_space<semaphore_mem>>
    tpu.wait_dma2 semaphore(%68 : memref<!tpu.dma_semaphore, #tpu.memory_space<semaphore_mem>>) src(%arg4 : memref<896x768xbf16, #tpu.memory_space<any>>) dst(%arg19 : memref<896x768xbf16, #tpu.memory_space<vmem>>)
    %c0_21 = arith.constant 0 : index
    %c0_22 = arith.constant 0 : index
    %69 = vector.load %arg19[%c0_21, %c0_22] : memref<896x768xbf16, #tpu.memory_space<vmem>>, vector<896x768xbf16>
    %70 = arith.truncf %66 : vector<8x896xf32> to vector<8x896xbf16>
    %cst_23 = arith.constant dense<0.000000e+00> : vector<8x768xf32>
    %71 = tpu.matmul %70, %69, %cst_23 {dimension_numbers = #tpu.dot_dimension_numbers<[1], [0], [0], [1], [0, 0, 1, 1], [], []>} : vector<8x896xbf16>, vector<896x768xbf16>, vector<8x768xf32> -> vector<8x768xf32>
    %c0_24 = arith.constant 0 : index
    %c3200 = arith.constant 3200 : index
    %72 = vector.load %arg13[%c0_24, %c3200] : memref<1x5888xf32, #tpu.memory_space<vmem>>, vector<1x768xf32>
    %73 = vector.broadcast %72 : vector<1x768xf32> to vector<8x768xf32>
    %74 = arith.addf %71, %73 : vector<8x768xf32>
    %c3 = arith.constant 3 : index
    %75 = memref.load %arg14[%c3] : memref<11xf32, #tpu.memory_space<smem>>
    %cst_25 = arith.constant 0.000000e+00 : f32
    %76 = vector.broadcast %cst_25 : f32 to vector<8x768xf32>
    %77 = arith.cmpf oge, %74, %76 : vector<8x768xf32>
    %78 = vector.broadcast %75 : f32 to vector<8x768xf32>
    %79 = arith.mulf %78, %74 : vector<8x768xf32>
    %80 = arith.select %77, %74, %79 : vector<8x768xi1>, vector<8x768xf32>
    %c4_i32_26 = arith.constant 4 : i32
    %81 = tpu.memref_slice %arg28[%c4_i32_26] : memref<12x!tpu.dma_semaphore, #tpu.memory_space<semaphore_mem>> -> memref<1x!tpu.dma_semaphore, #tpu.memory_space<semaphore_mem>>
    %82 = tpu.memref_squeeze %81 : memref<1x!tpu.dma_semaphore, #tpu.memory_space<semaphore_mem>> -> memref<!tpu.dma_semaphore, #tpu.memory_space<semaphore_mem>>
    tpu.wait_dma2 semaphore(%82 : memref<!tpu.dma_semaphore, #tpu.memory_space<semaphore_mem>>) src(%arg5 : memref<768x512xbf16, #tpu.memory_space<any>>) dst(%arg20 : memref<768x512xbf16, #tpu.memory_space<vmem>>)
    %c0_27 = arith.constant 0 : index
    %c0_28 = arith.constant 0 : index
    %83 = vector.load %arg20[%c0_27, %c0_28] : memref<768x512xbf16, #tpu.memory_space<vmem>>, vector<768x512xbf16>
    %84 = arith.truncf %80 : vector<8x768xf32> to vector<8x768xbf16>
    %cst_29 = arith.constant dense<0.000000e+00> : vector<8x512xf32>
    %85 = tpu.matmul %84, %83, %cst_29 {dimension_numbers = #tpu.dot_dimension_numbers<[1], [0], [0], [1], [0, 0, 1, 1], [], []>} : vector<8x768xbf16>, vector<768x512xbf16>, vector<8x512xf32> -> vector<8x512xf32>
    %c0_30 = arith.constant 0 : index
    %c3968 = arith.constant 3968 : index
    %86 = vector.load %arg13[%c0_30, %c3968] : memref<1x5888xf32, #tpu.memory_space<vmem>>, vector<1x512xf32>
    %87 = vector.broadcast %86 : vector<1x512xf32> to vector<8x512xf32>
    %88 = arith.addf %85, %87 : vector<8x512xf32>
    %c4 = arith.constant 4 : index
    %89 = memref.load %arg14[%c4] : memref<11xf32, #tpu.memory_space<smem>>
    %cst_31 = arith.constant 0.000000e+00 : f32
    %90 = vector.broadcast %cst_31 : f32 to vector<8x512xf32>
    %91 = arith.cmpf oge, %88, %90 : vector<8x512xf32>
    %92 = vector.broadcast %89 : f32 to vector<8x512xf32>
    %93 = arith.mulf %92, %88 : vector<8x512xf32>
    %94 = arith.select %91, %88, %93 : vector<8x512xi1>, vector<8x512xf32>
    %c5_i32_32 = arith.constant 5 : i32
    %95 = tpu.memref_slice %arg28[%c5_i32_32] : memref<12x!tpu.dma_semaphore, #tpu.memory_space<semaphore_mem>> -> memref<1x!tpu.dma_semaphore, #tpu.memory_space<semaphore_mem>>
    %96 = tpu.memref_squeeze %95 : memref<1x!tpu.dma_semaphore, #tpu.memory_space<semaphore_mem>> -> memref<!tpu.dma_semaphore, #tpu.memory_space<semaphore_mem>>
    tpu.wait_dma2 semaphore(%96 : memref<!tpu.dma_semaphore, #tpu.memory_space<semaphore_mem>>) src(%arg6 : memref<512x384xbf16, #tpu.memory_space<any>>) dst(%arg21 : memref<512x384xbf16, #tpu.memory_space<vmem>>)
    %c0_33 = arith.constant 0 : index
    %c0_34 = arith.constant 0 : index
    %97 = vector.load %arg21[%c0_33, %c0_34] : memref<512x384xbf16, #tpu.memory_space<vmem>>, vector<512x384xbf16>
    %98 = arith.truncf %94 : vector<8x512xf32> to vector<8x512xbf16>
    %cst_35 = arith.constant dense<0.000000e+00> : vector<8x384xf32>
    %99 = tpu.matmul %98, %97, %cst_35 {dimension_numbers = #tpu.dot_dimension_numbers<[1], [0], [0], [1], [0, 0, 1, 1], [], []>} : vector<8x512xbf16>, vector<512x384xbf16>, vector<8x384xf32> -> vector<8x384xf32>
    %c0_36 = arith.constant 0 : index
    %c4480 = arith.constant 4480 : index
    %100 = vector.load %arg13[%c0_36, %c4480] : memref<1x5888xf32, #tpu.memory_space<vmem>>, vector<1x384xf32>
    %101 = vector.broadcast %100 : vector<1x384xf32> to vector<8x384xf32>
    %102 = arith.addf %99, %101 : vector<8x384xf32>
    %c5 = arith.constant 5 : index
    %103 = memref.load %arg14[%c5] : memref<11xf32, #tpu.memory_space<smem>>
    %cst_37 = arith.constant 0.000000e+00 : f32
    %104 = vector.broadcast %cst_37 : f32 to vector<8x384xf32>
    %105 = arith.cmpf oge, %102, %104 : vector<8x384xf32>
    %106 = vector.broadcast %103 : f32 to vector<8x384xf32>
    %107 = arith.mulf %106, %102 : vector<8x384xf32>
    %108 = arith.select %105, %102, %107 : vector<8x384xi1>, vector<8x384xf32>
    %c6_i32_38 = arith.constant 6 : i32
    %109 = tpu.memref_slice %arg28[%c6_i32_38] : memref<12x!tpu.dma_semaphore, #tpu.memory_space<semaphore_mem>> -> memref<1x!tpu.dma_semaphore, #tpu.memory_space<semaphore_mem>>
    %110 = tpu.memref_squeeze %109 : memref<1x!tpu.dma_semaphore, #tpu.memory_space<semaphore_mem>> -> memref<!tpu.dma_semaphore, #tpu.memory_space<semaphore_mem>>
    tpu.wait_dma2 semaphore(%110 : memref<!tpu.dma_semaphore, #tpu.memory_space<semaphore_mem>>) src(%arg7 : memref<384x256xbf16, #tpu.memory_space<any>>) dst(%arg22 : memref<384x256xbf16, #tpu.memory_space<vmem>>)
    %c0_39 = arith.constant 0 : index
    %c0_40 = arith.constant 0 : index
    %111 = vector.load %arg22[%c0_39, %c0_40] : memref<384x256xbf16, #tpu.memory_space<vmem>>, vector<384x256xbf16>
    %112 = arith.truncf %108 : vector<8x384xf32> to vector<8x384xbf16>
    %cst_41 = arith.constant dense<0.000000e+00> : vector<8x256xf32>
    %113 = tpu.matmul %112, %111, %cst_41 {dimension_numbers = #tpu.dot_dimension_numbers<[1], [0], [0], [1], [0, 0, 1, 1], [], []>} : vector<8x384xbf16>, vector<384x256xbf16>, vector<8x256xf32> -> vector<8x256xf32>
    %c0_42 = arith.constant 0 : index
    %c4864 = arith.constant 4864 : index
    %114 = vector.load %arg13[%c0_42, %c4864] : memref<1x5888xf32, #tpu.memory_space<vmem>>, vector<1x256xf32>
    %115 = vector.broadcast %114 : vector<1x256xf32> to vector<8x256xf32>
    %116 = arith.addf %113, %115 : vector<8x256xf32>
    %c6 = arith.constant 6 : index
    %117 = memref.load %arg14[%c6] : memref<11xf32, #tpu.memory_space<smem>>
    %cst_43 = arith.constant 0.000000e+00 : f32
    %118 = vector.broadcast %cst_43 : f32 to vector<8x256xf32>
    %119 = arith.cmpf oge, %116, %118 : vector<8x256xf32>
    %120 = vector.broadcast %117 : f32 to vector<8x256xf32>
    %121 = arith.mulf %120, %116 : vector<8x256xf32>
    %122 = arith.select %119, %116, %121 : vector<8x256xi1>, vector<8x256xf32>
    %c7_i32_44 = arith.constant 7 : i32
    %123 = tpu.memref_slice %arg28[%c7_i32_44] : memref<12x!tpu.dma_semaphore, #tpu.memory_space<semaphore_mem>> -> memref<1x!tpu.dma_semaphore, #tpu.memory_space<semaphore_mem>>
    %124 = tpu.memref_squeeze %123 : memref<1x!tpu.dma_semaphore, #tpu.memory_space<semaphore_mem>> -> memref<!tpu.dma_semaphore, #tpu.memory_space<semaphore_mem>>
    tpu.wait_dma2 semaphore(%124 : memref<!tpu.dma_semaphore, #tpu.memory_space<semaphore_mem>>) src(%arg8 : memref<256x256xbf16, #tpu.memory_space<any>>) dst(%arg23 : memref<256x256xbf16, #tpu.memory_space<vmem>>)
    %c0_45 = arith.constant 0 : index
    %c0_46 = arith.constant 0 : index
    %125 = vector.load %arg23[%c0_45, %c0_46] : memref<256x256xbf16, #tpu.memory_space<vmem>>, vector<256x256xbf16>
    %126 = arith.truncf %122 : vector<8x256xf32> to vector<8x256xbf16>
    %cst_47 = arith.constant dense<0.000000e+00> : vector<8x256xf32>
    %127 = tpu.matmul %126, %125, %cst_47 {dimension_numbers = #tpu.dot_dimension_numbers<[1], [0], [0], [1], [0, 0, 1, 1], [], []>} : vector<8x256xbf16>, vector<256x256xbf16>, vector<8x256xf32> -> vector<8x256xf32>
    %c0_48 = arith.constant 0 : index
    %c5120 = arith.constant 5120 : index
    %128 = vector.load %arg13[%c0_48, %c5120] : memref<1x5888xf32, #tpu.memory_space<vmem>>, vector<1x256xf32>
    %129 = vector.broadcast %128 : vector<1x256xf32> to vector<8x256xf32>
    %130 = arith.addf %127, %129 : vector<8x256xf32>
    %c7 = arith.constant 7 : index
    %131 = memref.load %arg14[%c7] : memref<11xf32, #tpu.memory_space<smem>>
    %cst_49 = arith.constant 0.000000e+00 : f32
    %132 = vector.broadcast %cst_49 : f32 to vector<8x256xf32>
    %133 = arith.cmpf oge, %130, %132 : vector<8x256xf32>
    %134 = vector.broadcast %131 : f32 to vector<8x256xf32>
    %135 = arith.mulf %134, %130 : vector<8x256xf32>
    %136 = arith.select %133, %130, %135 : vector<8x256xi1>, vector<8x256xf32>
    %c8_i32_50 = arith.constant 8 : i32
    %137 = tpu.memref_slice %arg28[%c8_i32_50] : memref<12x!tpu.dma_semaphore, #tpu.memory_space<semaphore_mem>> -> memref<1x!tpu.dma_semaphore, #tpu.memory_space<semaphore_mem>>
    %138 = tpu.memref_squeeze %137 : memref<1x!tpu.dma_semaphore, #tpu.memory_space<semaphore_mem>> -> memref<!tpu.dma_semaphore, #tpu.memory_space<semaphore_mem>>
    tpu.wait_dma2 semaphore(%138 : memref<!tpu.dma_semaphore, #tpu.memory_space<semaphore_mem>>) src(%arg9 : memref<256x128xbf16, #tpu.memory_space<any>>) dst(%arg24 : memref<256x128xbf16, #tpu.memory_space<vmem>>)
    %c0_51 = arith.constant 0 : index
    %c0_52 = arith.constant 0 : index
    %139 = vector.load %arg24[%c0_51, %c0_52] : memref<256x128xbf16, #tpu.memory_space<vmem>>, vector<256x128xbf16>
    %140 = arith.truncf %136 : vector<8x256xf32> to vector<8x256xbf16>
    %cst_53 = arith.constant dense<0.000000e+00> : vector<8x128xf32>
    %141 = tpu.matmul %140, %139, %cst_53 {dimension_numbers = #tpu.dot_dimension_numbers<[1], [0], [0], [1], [0, 0, 1, 1], [], []>} : vector<8x256xbf16>, vector<256x128xbf16>, vector<8x128xf32> -> vector<8x128xf32>
    %c0_54 = arith.constant 0 : index
    %c5376 = arith.constant 5376 : index
    %142 = vector.load %arg13[%c0_54, %c5376] : memref<1x5888xf32, #tpu.memory_space<vmem>>, vector<1x128xf32>
    %143 = vector.broadcast %142 : vector<1x128xf32> to vector<8x128xf32>
    %144 = arith.addf %141, %143 : vector<8x128xf32>
    %c8 = arith.constant 8 : index
    %145 = memref.load %arg14[%c8] : memref<11xf32, #tpu.memory_space<smem>>
    %cst_55 = arith.constant 0.000000e+00 : f32
    %146 = vector.broadcast %cst_55 : f32 to vector<8x128xf32>
    %147 = arith.cmpf oge, %144, %146 : vector<8x128xf32>
    %148 = vector.broadcast %145 : f32 to vector<8x128xf32>
    %149 = arith.mulf %148, %144 : vector<8x128xf32>
    %150 = arith.select %147, %144, %149 : vector<8x128xi1>, vector<8x128xf32>
    %c9_i32_56 = arith.constant 9 : i32
    %151 = tpu.memref_slice %arg28[%c9_i32_56] : memref<12x!tpu.dma_semaphore, #tpu.memory_space<semaphore_mem>> -> memref<1x!tpu.dma_semaphore, #tpu.memory_space<semaphore_mem>>
    %152 = tpu.memref_squeeze %151 : memref<1x!tpu.dma_semaphore, #tpu.memory_space<semaphore_mem>> -> memref<!tpu.dma_semaphore, #tpu.memory_space<semaphore_mem>>
    tpu.wait_dma2 semaphore(%152 : memref<!tpu.dma_semaphore, #tpu.memory_space<semaphore_mem>>) src(%arg10 : memref<128x128xbf16, #tpu.memory_space<any>>) dst(%arg25 : memref<128x128xbf16, #tpu.memory_space<vmem>>)
    %c0_57 = arith.constant 0 : index
    %c0_58 = arith.constant 0 : index
    %153 = vector.load %arg25[%c0_57, %c0_58] : memref<128x128xbf16, #tpu.memory_space<vmem>>, vector<128x128xbf16>
    %154 = arith.truncf %150 : vector<8x128xf32> to vector<8x128xbf16>
    %cst_59 = arith.constant dense<0.000000e+00> : vector<8x128xf32>
    %155 = tpu.matmul %154, %153, %cst_59 {dimension_numbers = #tpu.dot_dimension_numbers<[1], [0], [0], [1], [0, 0, 1, 1], [], []>} : vector<8x128xbf16>, vector<128x128xbf16>, vector<8x128xf32> -> vector<8x128xf32>
    %c0_60 = arith.constant 0 : index
    %c5504 = arith.constant 5504 : index
    %156 = vector.load %arg13[%c0_60, %c5504] : memref<1x5888xf32, #tpu.memory_space<vmem>>, vector<1x128xf32>
    %157 = vector.broadcast %156 : vector<1x128xf32> to vector<8x128xf32>
    %158 = arith.addf %155, %157 : vector<8x128xf32>
    %c9 = arith.constant 9 : index
    %159 = memref.load %arg14[%c9] : memref<11xf32, #tpu.memory_space<smem>>
    %cst_61 = arith.constant 0.000000e+00 : f32
    %160 = vector.broadcast %cst_61 : f32 to vector<8x128xf32>
    %161 = arith.cmpf oge, %158, %160 : vector<8x128xf32>
    %162 = vector.broadcast %159 : f32 to vector<8x128xf32>
    %163 = arith.mulf %162, %158 : vector<8x128xf32>
    %164 = arith.select %161, %158, %163 : vector<8x128xi1>, vector<8x128xf32>
    %c10_i32_62 = arith.constant 10 : i32
    %165 = tpu.memref_slice %arg28[%c10_i32_62] : memref<12x!tpu.dma_semaphore, #tpu.memory_space<semaphore_mem>> -> memref<1x!tpu.dma_semaphore, #tpu.memory_space<semaphore_mem>>
    %166 = tpu.memref_squeeze %165 : memref<1x!tpu.dma_semaphore, #tpu.memory_space<semaphore_mem>> -> memref<!tpu.dma_semaphore, #tpu.memory_space<semaphore_mem>>
    tpu.wait_dma2 semaphore(%166 : memref<!tpu.dma_semaphore, #tpu.memory_space<semaphore_mem>>) src(%arg11 : memref<128x128xbf16, #tpu.memory_space<any>>) dst(%arg26 : memref<128x128xbf16, #tpu.memory_space<vmem>>)
    %c0_63 = arith.constant 0 : index
    %c0_64 = arith.constant 0 : index
    %167 = vector.load %arg26[%c0_63, %c0_64] : memref<128x128xbf16, #tpu.memory_space<vmem>>, vector<128x128xbf16>
    %168 = arith.truncf %164 : vector<8x128xf32> to vector<8x128xbf16>
    %cst_65 = arith.constant dense<0.000000e+00> : vector<8x128xf32>
    %169 = tpu.matmul %168, %167, %cst_65 {dimension_numbers = #tpu.dot_dimension_numbers<[1], [0], [0], [1], [0, 0, 1, 1], [], []>} : vector<8x128xbf16>, vector<128x128xbf16>, vector<8x128xf32> -> vector<8x128xf32>
    %c0_66 = arith.constant 0 : index
    %c5632 = arith.constant 5632 : index
    %170 = vector.load %arg13[%c0_66, %c5632] : memref<1x5888xf32, #tpu.memory_space<vmem>>, vector<1x128xf32>
    %171 = vector.broadcast %170 : vector<1x128xf32> to vector<8x128xf32>
    %172 = arith.addf %169, %171 : vector<8x128xf32>
    %c10 = arith.constant 10 : index
    %173 = memref.load %arg14[%c10] : memref<11xf32, #tpu.memory_space<smem>>
    %cst_67 = arith.constant 0.000000e+00 : f32
    %174 = vector.broadcast %cst_67 : f32 to vector<8x128xf32>
    %175 = arith.cmpf oge, %172, %174 : vector<8x128xf32>
    %176 = vector.broadcast %173 : f32 to vector<8x128xf32>
    %177 = arith.mulf %176, %172 : vector<8x128xf32>
    %178 = arith.select %175, %172, %177 : vector<8x128xi1>, vector<8x128xf32>
    %c11_i32_68 = arith.constant 11 : i32
    %179 = tpu.memref_slice %arg28[%c11_i32_68] : memref<12x!tpu.dma_semaphore, #tpu.memory_space<semaphore_mem>> -> memref<1x!tpu.dma_semaphore, #tpu.memory_space<semaphore_mem>>
    %180 = tpu.memref_squeeze %179 : memref<1x!tpu.dma_semaphore, #tpu.memory_space<semaphore_mem>> -> memref<!tpu.dma_semaphore, #tpu.memory_space<semaphore_mem>>
    tpu.wait_dma2 semaphore(%180 : memref<!tpu.dma_semaphore, #tpu.memory_space<semaphore_mem>>) src(%arg12 : memref<128x128xbf16, #tpu.memory_space<any>>) dst(%arg27 : memref<128x128xbf16, #tpu.memory_space<vmem>>)
    %c0_69 = arith.constant 0 : index
    %c0_70 = arith.constant 0 : index
    %181 = vector.load %arg27[%c0_69, %c0_70] : memref<128x128xbf16, #tpu.memory_space<vmem>>, vector<128x128xbf16>
    %182 = arith.truncf %178 : vector<8x128xf32> to vector<8x128xbf16>
    %cst_71 = arith.constant dense<0.000000e+00> : vector<8x128xf32>
    %183 = tpu.matmul %182, %181, %cst_71 {dimension_numbers = #tpu.dot_dimension_numbers<[1], [0], [0], [1], [0, 0, 1, 1], [], []>} : vector<8x128xbf16>, vector<128x128xbf16>, vector<8x128xf32> -> vector<8x128xf32>
    %c0_72 = arith.constant 0 : index
    %c5760 = arith.constant 5760 : index
    %184 = vector.load %arg13[%c0_72, %c5760] : memref<1x5888xf32, #tpu.memory_space<vmem>>, vector<1x128xf32>
    %185 = vector.broadcast %184 : vector<1x128xf32> to vector<8x128xf32>
    %186 = arith.addf %183, %185 : vector<8x128xf32>
    %c0_73 = arith.constant 0 : index
    %c0_74 = arith.constant 0 : index
    %187 = vector.load %arg15[%c0_73, %c0_74] : memref<8x128xf32, #tpu.memory_space<vmem>>, vector<8x128xf32>
    tpu.vector_store %arg15[%c0_73, %c0_74], %186 {strides = array<i32>} : memref<8x128xf32, #tpu.memory_space<vmem>>, vector<8x128xf32>,
    return
  }
}

</mosaic_0001>

<bundles_post_ra>
// kernel: _forward.1
= control target key start
LH: loop header
LB: loop body
LE: loop exit
PB: predicated region body
PF: predicated region fallthrough
CT: control target
= control target key end

     0   :  { %20 = vsyncpa [#allocation16], 0  ;;  %s19916_s0 = inlined_call_operand.vmem [shape: f32[8,32], index: 0, kind: input, shape index: {}]   ;;  %s19917_s1 = inlined_call_operand.hbm [shape: bf16[32,1280], index: 1, kind: input, shape index: {}]   ;;  %s19918_s2 = inlined_call_operand.hbm [shape: bf16[1280,1024], index: 2, kind: input, shape index: {}]   ;;  %s19919_s3 = inlined_call_operand.hbm [shape: bf16[1024,896], index: 3, kind: input, shape index: {}]   ;;  %s19920_s4 = inlined_call_operand.hbm [shape: bf16[896,768], index: 4, kind: input, shape index: {}]   ;;  %s19921_s5 = inlined_call_operand.hbm [shape: bf16[768,512], index: 5, kind: input, shape index: {}]   ;;  %s19922_s6 = inlined_call_operand.hbm [shape: bf16[512,384], index: 6, kind: input, shape index: {}]   ;;  %s19923_s7 = inlined_call_operand.hbm [shape: bf16[384,256], index: 7, kind: input, shape index: {}]   ;;  %s19924_s8 = inlined_call_operand.hbm [shape: bf16[256,256], index: 8, kind: input, shape index: {}]   ;;  %s19925_s9 = inlined_call_operand.hbm [shape: bf16[256,128], index: 9, kind: input, shape index: {}]   ;;  %s19926_s10 = inlined_call_operand.hbm [shape: bf16[128,128], index: 10, kind: input, shape index: {}]   ;;  %s19927_s11 = inlined_call_operand.hbm [shape: bf16[128,128], index: 11, kind: input, shape index: {}]   ;;  %s19928_s12 = inlined_call_operand.hbm [shape: bf16[128,128], index: 12, kind: input, shape index: {}]   ;;  %s19929_s13 = inlined_call_operand.hbm [shape: f32[1,5888], index: 13, kind: input, shape index: {}]   ;;  %s19930_s14 = inlined_call_operand.hbm [shape: f32[11], index: 14, kind: input, shape index: {}]   ;;  %s19931_s15 = inlined_call_operand.vmem [shape: f32[8,128], index: 15, kind: output, shape index: {}]  }
   0x1   :  { %21 = vsyncpa [#allocation17], 0  ;;  %s19224_s18 = smov [#allocation15]  }
   0x2   :  { %s30_s19 = sshll.u32 %s19224_s18, 4  ;;  %s31_s19 = int_to_ptr.vmem [resolvable:$true] %s30_s19 }
   0x3   :  { %s18936_s20 = scalar_lea.vmem %s31_s19, 736  ;;  %p18941_p1 = scmp.lt.s32.totalorder %s31_s19, %s31_s19 }
   0x4   :  { %p18937_p0 = scmp.ne.s32.totalorder %s31_s19, %s18936_s20  ;;  %p18942_p2 = scmp.lt.s32.totalorder %s18936_s20, %s18936_s20 }
   0x6   :  { %p18943_p3 = por %p18942_p2, %p18941_p1 }
   0x8   :  { %p18944_p4 = pnand %p18943_p3, %p18937_p0 }
   0xa   :  { %18947 = shalt.err (!%p18944_p4)
}
   0xb   :  { %33 = dma.hbm_to_vmem [thread:$0]  %s19929_s13, 736, %s31_s19, [#allocation16]  }
   0xc   :  { %s19225_s23 = smov [#allocation18]  }
   0xd   :  { %41 = dma.hbm_to_smem %s19930_s14, 16, %s19225_s23, [#allocation17]  }
   0xe   :  { %19196 = dma.done.wait [#allocation16], 736  }
   0xf   :  { %19197 = vsyncadd [#allocation16], 4294966560 }
  0x10   :  { %19198 = dma.done.wait [#allocation17], 16  }
  0x11   :  { %19199 = vsyncadd [#allocation17], 4294967280 }
  0x12   :  { %48 = sfence }
  0x13   :  { %v19330_v0 = vld [vmem:[%s19916_s0] sm:$0xff]  ;;  %s19226_s28 = smov [#allocation2]   ;;  %s19227_s30 = smov [#allocation3]  }
  0x14   :  { %s57_s29 = sshll.u32 %s19226_s28, 4  ;;  %s69_s16 = sshll.u32 %s19227_s30, 4  ;;  %s58_s29 = int_to_ptr.vmem [resolvable:$true] %s57_s29  ;;  %s70_s16 = int_to_ptr.vmem [resolvable:$true] %s69_s16 }
  0x15   :  { %s18964_s13 = scalar_lea.vmem %s58_s29, 2560  ;;  %p18969_p6 = scmp.lt.s32.totalorder %s58_s29, %s58_s29 }
  0x16   :  { %p18965_p5 = scmp.ne.s32.totalorder %s58_s29, %s18964_s13  ;;  %p18970_p7 = scmp.lt.s32.totalorder %s18964_s13, %s18964_s13 }
  0x18   :  { %p18971_p8 = por %p18970_p7, %p18969_p6 }
  0x1a   :  { %p18972_p9 = pnand %p18971_p8, %p18965_p5 }
  0x1c   :  { %18975 = shalt.err (!%p18972_p9)  }
  0x1d   :  { %60 = dma.hbm_to_vmem [thread:$0]  %s19917_s1, 2560, %s58_s29, [#allocation14] }
  0x1e   :  { %s18984_s18 = scalar_lea.vmem %s70_s16, 81920  ;;  %p18989_p11 = scmp.lt.s32.totalorder %s70_s16, %s70_s16 }
  0x1f   :  { %p18985_p10 = scmp.ne.s32.totalorder %s70_s16, %s18984_s18  ;;  %p18990_p12 = scmp.lt.s32.totalorder %s18984_s18, %s18984_s18 }
  0x21   :  { %p18991_p13 = por %p18990_p12, %p18989_p11 }
  0x23   :  { %p18992_p0 = pnand %p18991_p13, %p18985_p10 }
  0x25   :  { %18995 = shalt.err (!%p18992_p0)  }
  0x26   :  { %72 = dma.hbm_to_vmem [thread:$0]  %s19918_s2, 81920, %s70_s16, [#allocation14 + $0x1] }
  0x27   :  { %s19228_s20 = smov [#allocation4]   ;;  %s19229_s22 = smov [#allocation5]  }
  0x28   :  { %s81_s21 = sshll.u32 %s19228_s20, 4  ;;  %s93_s23 = sshll.u32 %s19229_s22, 4  ;;  %s82_s21 = int_to_ptr.vmem [resolvable:$true] %s81_s21  ;;  %s94_s23 = int_to_ptr.vmem [resolvable:$true] %s93_s23 }
  0x29   :  { %s19004_s24 = scalar_lea.vmem %s82_s21, 57344  ;;  %p19009_p2 = scmp.lt.s32.totalorder %s82_s21, %s82_s21 }
  0x2a   :  { %p19005_p1 = scmp.ne.s32.totalorder %s82_s21, %s19004_s24  ;;  %p19010_p3 = scmp.lt.s32.totalorder %s19004_s24, %s19004_s24 }
  0x2c   :  { %p19011_p4 = por %p19010_p3, %p19009_p2 }
  0x2e   :  { %p19012_p5 = pnand %p19011_p4, %p19005_p1 }
  0x30   :  { %19015 = shalt.err (!%p19012_p5)  }
  0x31   :  { %84 = dma.hbm_to_vmem [thread:$0]  %s19919_s3, 57344, %s82_s21, [#allocation14 + $0x2] }
  0x32   :  { %s19024_s26 = scalar_lea.vmem %s94_s23, 43008  ;;  %p19029_p7 = scmp.lt.s32.totalorder %s94_s23, %s94_s23 }
  0x33   :  { %p19025_p6 = scmp.ne.s32.totalorder %s94_s23, %s19024_s26  ;;  %p19030_p8 = scmp.lt.s32.totalorder %s19024_s26, %s19024_s26 }
  0x35   :  { %p19031_p9 = por %p19030_p8, %p19029_p7 }
  0x37   :  { %p19032_p10 = pnand %p19031_p9, %p19025_p6 }
  0x39   :  { %19035 = shalt.err (!%p19032_p10)  }
  0x3a   :  { %96 = dma.hbm_to_vmem [thread:$0]  %s19920_s4, 43008, %s94_s23, [#allocation14 + $0x3] }
  0x3b   :  { %s19230_s28 = smov [#allocation6]   ;;  %s19231_s30 = smov [#allocation7]  }
  0x3c   :  { %s105_s29 = sshll.u32 %s19230_s28, 4  ;;  %s117_s16 = sshll.u32 %s19231_s30, 4  ;;  %s106_s29 = int_to_ptr.vmem [resolvable:$true] %s105_s29  ;;  %s118_s16 = int_to_ptr.vmem [resolvable:$true] %s117_s16 }
  0x3d   :  { %s19044_s13 = scalar_lea.vmem %s106_s29, 24576  ;;  %p19049_p12 = scmp.lt.s32.totalorder %s106_s29, %s106_s29 }
  0x3e   :  { %p19045_p11 = scmp.ne.s32.totalorder %s106_s29, %s19044_s13  ;;  %p19050_p13 = scmp.lt.s32.totalorder %s19044_s13, %s19044_s13 }
  0x40   :  { %p19051_p0 = por %p19050_p13, %p19049_p12 }
  0x42   :  { %p19052_p1 = pnand %p19051_p0, %p19045_p11 }
  0x44   :  { %19055 = shalt.err (!%p19052_p1)  }
  0x45   :  { %108 = dma.hbm_to_vmem [thread:$0]  %s19921_s5, 24576, %s106_s29, [#allocation14 + $0x4] }
  0x46   :  { %s19064_s17 = scalar_lea.vmem %s118_s16, 12288  ;;  %p19069_p3 = scmp.lt.s32.totalorder %s118_s16, %s118_s16 }
  0x47   :  { %p19065_p2 = scmp.ne.s32.totalorder %s118_s16, %s19064_s17  ;;  %p19070_p4 = scmp.lt.s32.totalorder %s19064_s17, %s19064_s17 }
  0x49   :  { %p19071_p5 = por %p19070_p4, %p19069_p3 }
  0x4b   :  { %p19072_p6 = pnand %p19071_p5, %p19065_p2 }
  0x4d   :  { %19075 = shalt.err (!%p19072_p6)  }
  0x4e   :  { %120 = dma.hbm_to_vmem [thread:$0]  %s19922_s6, 12288, %s118_s16, [#allocation14 + $0x5] }
  0x4f   :  { %s19232_s0 = smov [#allocation8]   ;;  %s19233_s20 = smov [#allocation9]  }
  0x50   :  { %s129_s19 = sshll.u32 %s19232_s0, 4  ;;  %s141_s21 = sshll.u32 %s19233_s20, 4  ;;  %s130_s19 = int_to_ptr.vmem [resolvable:$true] %s129_s19  ;;  %s142_s21 = int_to_ptr.vmem [resolvable:$true] %s141_s21 }
  0x51   :  { %s19084_s22 = scalar_lea.vmem %s130_s19, 6144  ;;  %p19089_p8 = scmp.lt.s32.totalorder %s130_s19, %s130_s19 }
  0x52   :  { %p19085_p7 = scmp.ne.s32.totalorder %s130_s19, %s19084_s22  ;;  %p19090_p9 = scmp.lt.s32.totalorder %s19084_s22, %s19084_s22 }
  0x54   :  { %p19091_p10 = por %p19090_p9, %p19089_p8 }
  0x56   :  { %p19092_p11 = pnand %p19091_p10, %p19085_p7 }
  0x58   :  { %19095 = shalt.err (!%p19092_p11)  }
  0x59   :  { %132 = dma.hbm_to_vmem [thread:$0]  %s19923_s7, 6144, %s130_s19, [#allocation14 + $0x6] }
  0x5a   :  { %s19104_s24 = scalar_lea.vmem %s142_s21, 4096  ;;  %p19109_p13 = scmp.lt.s32.totalorder %s142_s21, %s142_s21 }
  0x5b   :  { %p19105_p12 = scmp.ne.s32.totalorder %s142_s21, %s19104_s24  ;;  %p19110_p0 = scmp.lt.s32.totalorder %s19104_s24, %s19104_s24 }
  0x5d   :  { %p19111_p1 = por %p19110_p0, %p19109_p13 }
  0x5f   :  { %p19112_p2 = pnand %p19111_p1, %p19105_p12 }
  0x61   :  { %19115 = shalt.err (!%p19112_p2)  }
  0x62   :  { %144 = dma.hbm_to_vmem [thread:$0]  %s19924_s8, 4096, %s142_s21, [#allocation14 + $0x7] }
  0x63   :  { %s19234_s25 = smov [#allocation10]   ;;  %s19235_s2 = smov [#allocation11]  }
  0x64   :  { %s153_s26 = sshll.u32 %s19234_s25, 4  ;;  %s165_s27 = sshll.u32 %s19235_s2, 4  ;;  %s154_s26 = int_to_ptr.vmem [resolvable:$true] %s153_s26  ;;  %s166_s27 = int_to_ptr.vmem [resolvable:$true] %s165_s27 }
  0x65   :  { %s19124_s28 = scalar_lea.vmem %s154_s26, 2048  ;;  %p19129_p4 = scmp.lt.s32.totalorder %s154_s26, %s154_s26 }
  0x66   :  { %p19125_p3 = scmp.ne.s32.totalorder %s154_s26, %s19124_s28  ;;  %p19130_p5 = scmp.lt.s32.totalorder %s19124_s28, %s19124_s28 }
  0x68   :  { %p19131_p6 = por %p19130_p5, %p19129_p4 }
  0x6a   :  { %p19132_p7 = pnand %p19131_p6, %p19125_p3 }
  0x6c   :  { %19135 = shalt.err (!%p19132_p7)  }
  0x6d   :  { %156 = dma.hbm_to_vmem [thread:$0]  %s19925_s9, 2048, %s154_s26, [#allocation14 + $0x8] }
  0x6e   :  { %s19144_s30 = scalar_lea.vmem %s166_s27, 1024  ;;  %p19149_p9 = scmp.lt.s32.totalorder %s166_s27, %s166_s27 }
  0x6f   :  { %p19145_p8 = scmp.ne.s32.totalorder %s166_s27, %s19144_s30  ;;  %p19150_p10 = scmp.lt.s32.totalorder %s19144_s30, %s19144_s30 }
  0x71   :  { %p19151_p11 = por %p19150_p10, %p19149_p9 }
  0x73   :  { %p19152_p12 = pnand %p19151_p11, %p19145_p8 }
  0x75   :  { %19155 = shalt.err (!%p19152_p12)  }
  0x76   :  { %168 = dma.hbm_to_vmem [thread:$0]  %s19926_s10, 1024, %s166_s27, [#allocation14 + $0x9] }
  0x77   :  { %s19236_s13 = smov [#allocation12]   ;;  %s19237_s14 = smov [#allocation13]  }
  0x78   :  { %s177_s3 = sshll.u32 %s19236_s13, 4  ;;  %s189_s17 = sshll.u32 %s19237_s14, 4  ;;  %s178_s3 = int_to_ptr.vmem [resolvable:$true] %s177_s3  ;;  %s190_s17 = int_to_ptr.vmem [resolvable:$true] %s189_s17 }
  0x79   :  { %s19164_s4 = scalar_lea.vmem %s178_s3, 1024  ;;  %p19169_p0 = scmp.lt.s32.totalorder %s178_s3, %s178_s3 }
  0x7a   :  { %p19165_p13 = scmp.ne.s32.totalorder %s178_s3, %s19164_s4  ;;  %p19170_p1 = scmp.lt.s32.totalorder %s19164_s4, %s19164_s4 }
  0x7c   :  { %p19171_p2 = por %p19170_p1, %p19169_p0 }
  0x7e   :  { %p19172_p3 = pnand %p19171_p2, %p19165_p13 }
  0x80   :  { %19175 = shalt.err (!%p19172_p3)  }
  0x81   :  { %180 = dma.hbm_to_vmem [thread:$0]  %s19927_s11, 1024, %s178_s3, [#allocation14 + $0xa] }
  0x82   :  { %s19184_s0 = scalar_lea.vmem %s190_s17, 1024  ;;  %p19189_p5 = scmp.lt.s32.totalorder %s190_s17, %s190_s17 }
  0x83   :  { %p19185_p4 = scmp.ne.s32.totalorder %s190_s17, %s19184_s0  ;;  %p19190_p6 = scmp.lt.s32.totalorder %s19184_s0, %s19184_s0 }
  0x85   :  { %p19191_p7 = por %p19190_p6, %p19189_p5 }
  0x87   :  { %p19192_p8 = pnand %p19191_p7, %p19185_p4 }
  0x89   :  { %19195 = shalt.err (!%p19192_p8)  }
  0x8a   :  { %192 = dma.hbm_to_vmem [thread:$0]  %s19928_s12, 1024, %s190_s17, [#allocation14 + $0xb] }
  0x8b   :  { %19200 = dma.done.wait [#allocation14], 2560 }
  0x8c   :  { %19201 = vsyncadd [#allocation14], 4294964736  ;;  %v19238_v1 = vmov 0   ;;  %v17175_v2 = vld [vmem:[#allocation2 + $0x54] ss:$40 sps:$4 sm:$0xff]   ;;  %v218_v10 = vpack.c.bf16 %v19330_v0, %v19330_v0  ;;  %vm373_vm0 = vcmask 261120   ;;  %v223_v23 = vlaneseq }
  0x8d   :  { %409 = vmatprep.mubr.bf16.mxu0 %v19238_v1  ;;  %450 = vmatprep.mubr.bf16.mxu1 %v19238_v1  ;;  %v17177_v3 = vld [vmem:[#allocation2 + $0x50] ss:$40 sps:$4 sm:$0xff]   ;;  %v17178_v4 = vld [vmem:[#allocation2 + $0x5c] ss:$40 sps:$4 sm:$0xff]   ;;  %v17183_v7 = vld [vmem:[#allocation2] ss:$40 sps:$4 sm:$0xff]  }
  0x8e   :  { %389 = vmatprep.subr.bf16.mxu0 %v17175_v2  ;;  %v17180_v5 = vld [vmem:[#allocation2 + $0x4] ss:$40 sps:$4 sm:$0xff]   ;;  %v17182_v6 = vld [vmem:[#allocation2 + $0x58] ss:$40 sps:$4 sm:$0xff]   ;;  %430 = vmatprep.subr.bf16.mxu1 %v17178_v4  ;;  %v17186_v9 = vld [vmem:[#allocation2 + $0x8] ss:$40 sps:$4 sm:$0xff]  }
  0x8f   :  { %390 = vmatpush1.bf16.msra.mxu0 %v17177_v3  ;;  %v17184_v8 = vld [vmem:[#allocation2 + $0xc] ss:$40 sps:$4 sm:$0xff]   ;;  %431 = vmatpush1.bf16.msra.mxu1 %v17182_v6  ;;  %v17187_v12 = vld [vmem:[#allocation2 + $0x60] ss:$40 sps:$4 sm:$0xff]   ;;  %v17198_v16 = vld [vmem:[#allocation2 + $0x1c] ss:$40 sps:$4 sm:$0xff]  }
  0x90   :  { %391 = vmatprep.subr.bf16.mxu0 %v17180_v5  ;;  %432 = vmatprep.subr.bf16.mxu1 %v17184_v8  ;;  %v17189_v11 = vld [vmem:[#allocation2 + $0x64] ss:$40 sps:$4 sm:$0xff]   ;;  %v17190_v14 = vld [vmem:[#allocation2 + $0x68] ss:$40 sps:$4 sm:$0xff]   ;;  %v17195_v15 = vld [vmem:[#allocation2 + $0x14] ss:$40 sps:$4 sm:$0xff]  }
  0x91   :  { %v17192_v13 = vld [vmem:[#allocation2 + $0x6c] ss:$40 sps:$4 sm:$0xff]   ;;  %v17193_v17 = vld [vmem:[#allocation2 + $0x10] ss:$40 sps:$4 sm:$0xff]   ;;  %v17202_v22 = vld [vmem:[#allocation2 + $0x20] ss:$40 sps:$4 sm:$0xff]  }
  0x92   :  { %v17201_v18 = vld [vmem:[#allocation2 + $0x74] ss:$40 sps:$4 sm:$0xff]   ;;  %v17196_v19 = vld [vmem:[#allocation2 + $0x18] ss:$40 sps:$4 sm:$0xff]   ;;  %v17204_v21 = vld [vmem:[#allocation2 + $0x24] ss:$40 sps:$4 sm:$0xff]  }
  0x93   :  { %392 = vmatpush1.bf16.msra.mxu0 %v17183_v7  ;;  %433 = vmatpush1.bf16.msra.mxu1 %v17186_v9  ;;  %v17199_v20 = vld [vmem:[#allocation2 + $0x70] ss:$40 sps:$4 sm:$0xff]   ;;  %v19380_v24 = vshrl.u32 %v223_v23, 7  ;;  %s582_s11 = sld [smem:[#allocation18]]  ;;  %v219_v26 = vld [vmem:[#allocation15] sm:$0xff] }
  0x94   :  { %471 = vmatprep.subr.bf16.mxu0 %v17189_v11  ;;  %512 = vmatprep.subr.bf16.mxu1 %v17192_v13  ;;  %v220_v63 = vld [vmem:[#allocation15 + $0x8] sm:$0x3] }
  0x95   :  { %v19383_v25 = vsub.s32 0, %v19380_v24  ;;  %v19386_v27 = vsub.s32 1, %v19380_v24  ;;  %v19389_v28 = vsub.s32 2, %v19380_v24  ;;  %v19393_v30 = vsub.s32 3, %v19380_v24 }
  0x96   :  { %15054 = vmatmul.mubr.msk.bf16.vlgmr.msra.gmra.mxu0 %vm373_vm0, %v218_v10  ;;  %15055 = vmatmul.mubr.msk.bf16.vlgmr.msra.gmra.mxu1 %vm373_vm0, %v218_v10  ;;  %v19400_v35 = vsub.s32 4, %v19380_v24  ;;  %v19404_v40 = vsub.s32 5, %v19380_v24  ;;  %v19407_v41 = vsub.s32 6, %v19380_v24  ;;  %v253_v54 = vsub.s32 7, %v19380_v24 }
  0x97   :  { %472 = vmatpush1.bf16.msra.mxu0 %v17187_v12  ;;  %491 = vmatprep.mubr.bf16.mxu0 %v19238_v1  ;;  %v226_v29 = vrot.slane %v219_v26, %v19383_v25  ;;  %v230_v31 = vrot.slane %v219_v26, %v19386_v27  ;;  %v234_v32 = vrot.slane %v219_v26, %v19389_v28 }
  0x98   :  { %473 = vmatprep.subr.bf16.mxu0 %v17195_v15  ;;  %513 = vmatpush1.bf16.msra.mxu1 %v17190_v14  ;;  %v238_v39 = vrot.slane %v219_v26, %v19393_v30  ;;  %v242_v47 = vrot.slane %v219_v26, %v19400_v35  ;;  %v246_v56 = vrot.slane %v219_v26, %v19404_v40 }
  0x99   :  { %532 = vmatprep.mubr.bf16.mxu1 %v19238_v1  ;;  %514 = vmatprep.subr.bf16.mxu1 %v17198_v16  ;;  %v19397_v34 = vstv %s582_s11  ;;  %v250_v57 = vrot.slane %v219_v26, %v19407_v41  ;;  %v254_v4 = vrot.slane %v219_v26, %v253_v54 }
  0x9b   :  { %474 = vmatpush1.bf16.msra.mxu0 %v17193_v17 }
  0x9c   :  { %553 = vmatprep.subr.bf16.mxu0 %v17201_v18  ;;  %515 = vmatpush1.bf16.msra.mxu1 %v17196_v19  ;;  %v262_v18 = vrot.slane %v220_v63, %v19386_v27 }
  0x9e   :  { %15056 = vmatmul.mubr.msk.bf16.vlgmr.msra.gmra.mxu0 %vm373_vm0, %v218_v10 }
  0x9f   :  { %554 = vmatpush1.bf16.msra.mxu0 %v17199_v20  ;;  %573 = vmatprep.mubr.bf16.mxu0 %v19238_v1 }
  0xa0   :  { %15057 = vmatmul.mubr.msk.bf16.vlgmr.msra.gmra.mxu1 %vm373_vm0, %v218_v10  ;;  %555 = vmatprep.subr.bf16.mxu0 %v17204_v21 }
  0xa3   :  { %556 = vmatpush1.bf16.msra.mxu0 %v17202_v22 }
  0xa6   :  { %15058 = vmatmul.mubr.msk.bf16.vlgmr.msra.gmra.mxu0 %vm373_vm0, %v218_v10  ;;  %v258_v10 = vrot.slane %v220_v63, %v19383_v25 }
 0x156   :  { %v411_v33 = vpop.f32.mrf.mxu0  ;;  %v452_v38 = vpop.f32.mrf.mxu1 }
 0x157   :  { %v412_v36 = vadd.f32 %v411_v33, %v226_v29  ;;  %v453_v44 = vadd.f32 %v452_v38, %v234_v32 }
 0x158   :  { %v413_v37 = vpop.f32.mrf.mxu0  ;;  %v454_v46 = vpop.f32.mrf.mxu1 }
 0x159   :  { %vm583_vm1 = vcmp.ge.f32.partialorder %v412_v36, 0.0  ;;  %v594_v42 = vmul.f32 %v19397_v34, %v412_v36  ;;  %v414_v43 = vadd.f32 %v413_v37, %v230_v31  ;;  %vm585_vm3 = vcmp.ge.f32.partialorder %v453_v44, 0.0 }
 0x15a   :  { %v415_v45 = vpop.f32.mrf.mxu0  ;;  %v596_v50 = vmul.f32 %v19397_v34, %v453_v44  ;;  %v455_v51 = vadd.f32 %v454_v46, %v238_v39  ;;  %v456_v53 = vpop.f32.mrf.mxu1 }
 0x15b   :  { %v19411_v48 = vsel %vm583_vm1, %v412_v36, %v594_v42  ;;  %vm584_vm2 = vcmp.ge.f32.partialorder %v414_v43, 0.0  ;;  %v595_v49 = vmul.f32 %v19397_v34, %v414_v43 }
 0x15c   :  { %v416_v52 = vpop.f32.mrf.mxu0  ;;  %v19418_v58 = vsel %vm585_vm3, %v453_v44, %v596_v50  ;;  %vm586_vm4 = vcmp.ge.f32.partialorder %v455_v51, 0.0  ;;  %v597_v59 = vmul.f32 %v19397_v34, %v455_v51  ;;  %v457_v61 = vpop.f32.mrf.mxu1 }
 0x15d   :  { %v605_v55 = vsel %vm584_vm2, %v414_v43, %v595_v49 }
 0x15e   :  { %v493_v60 = vpop.f32.mrf.mxu0  ;;  %v607_v0 = vsel %vm586_vm4, %v455_v51, %v597_v59 }
 0x15f   :  { %v494_v62 = vadd.f32 %v493_v60, %v242_v47 }
 0x160   :  { %v495_v2 = vpop.f32.mrf.mxu0  ;;  %v534_v3 = vpop.f32.mrf.mxu1 }
 0x161   :  { %vm587_vm5 = vcmp.ge.f32.partialorder %v494_v62, 0.0  ;;  %v598_v5 = vmul.f32 %v19397_v34, %v494_v62  ;;  %v496_v6 = vadd.f32 %v495_v2, %v246_v56  ;;  %v535_v7 = vadd.f32 %v534_v3, %v250_v57 }
 0x162   :  { %v497_v8 = vpop.f32.mrf.mxu0  ;;  %v536_v9 = vpop.f32.mrf.mxu1 }
 0x163   :  { %v19425_v11 = vsel %vm587_vm5, %v494_v62, %v598_v5  ;;  %vm588_vm6 = vcmp.ge.f32.partialorder %v496_v6, 0.0  ;;  %v599_v12 = vmul.f32 %v19397_v34, %v496_v6  ;;  %vm589_vm7 = vcmp.ge.f32.partialorder %v535_v7, 0.0 }
 0x164   :  { %v600_v13 = vmul.f32 %v19397_v34, %v535_v7  ;;  %v537_v14 = vadd.f32 %v536_v9, %v254_v4  ;;  %v498_v15 = vpop.f32.mrf.mxu0  ;;  %v538_v16 = vpop.f32.mrf.mxu1 }
 0x165   :  { %v19429_v17 = vsel %vm588_vm6, %v496_v6, %v599_v12 }
 0x166   :  { %v19432_v19 = vsel %vm589_vm7, %v535_v7, %v600_v13  ;;  %vm590_vm8 = vcmp.ge.f32.partialorder %v537_v14, 0.0  ;;  %v601_v20 = vmul.f32 %v19397_v34, %v537_v14  ;;  %v575_v21 = vpop.f32.mrf.mxu0  ;;  %v539_v22 = vpop.f32.mrf.mxu1 }
 0x167   :  { %v576_v23 = vadd.f32 %v575_v21, %v258_v10 }
 0x168   :  { %v19435_v26 = vsel %vm590_vm8, %v537_v14, %v601_v20  ;;  %v577_v29 = vpop.f32.mrf.mxu0 }
 0x169   :  { %vm591_vm9 = vcmp.ge.f32.partialorder %v576_v23, 0.0  ;;  %v602_v31 = vmul.f32 %v19397_v34, %v576_v23  ;;  %v578_v32 = vadd.f32 %v577_v29, %v262_v18 }
 0x16a   :  { %v579_v33 = vpop.f32.mrf.mxu0 }
 0x16b   :  { %v19438_v36 = vsel %vm591_vm9, %v576_v23, %v602_v31  ;;  %vm592_vm10 = vcmp.ge.f32.partialorder %v578_v32, 0.0  ;;  %v603_v37 = vmul.f32 %v19397_v34, %v578_v32 }
 0x16c   :  { %v580_v38 = vpop.f32.mrf.mxu0 }
 0x16d   :  { %v19441_v39 = vsel %vm592_vm10, %v578_v32, %v603_v37 }
 0x16e   :  { %19202 = dma.done.wait [#allocation14 + $0x1], 81920 }
 0x16f   :  { %19203 = vsyncadd [#allocation14 + $0x1], 4294885376  ;;  %v19443_v42 = vpack.c.bf16 %v605_v55, %v605_v55  ;;  %v19445_v43 = vpack.c.bf16 %v607_v0, %v607_v0  ;;  %v674_v44 = vld [vmem:[#allocation3 + $0x1c0] sm:$0xff]  ;;  %s15699_s12 = sld [smem:[#allocation18 + $0x1]] }
 0x170   :  { %v678_v45 = vld [vmem:[#allocation3 + $0x1e0] sm:$0xff] }
 0x171   :  { %4542 = vmatprep.mubr.bf16.mxu1 %v19443_v42  ;;  %4583 = vmatprep.mubr.bf16.mxu0 %v19445_v43  ;;  %v802_v46 = vld [vmem:[#allocation3 + $0x5c0] sm:$0xff]  ;;  %v15116_v47 = vcombine.high %v674_v44, %v678_v45  ;;  %v15115_v50 = vcombine.low %v674_v44, %v678_v45 }
 0x172   :  { %v806_v49 = vld [vmem:[#allocation3 + $0x5e0] sm:$0xff] }
 0x173   :  { %v666_v34 = vld [vmem:[#allocation3 + $0x180] sm:$0xff]  ;;  %v15244_v52 = vcombine.high %v802_v46, %v806_v49  ;;  %v15243_v53 = vcombine.low %v802_v46, %v806_v49  ;;  %4510 = vmatprep.subr.bf16.mxu1 %v15116_v47 }
 0x174   :  { %v670_v51 = vld [vmem:[#allocation3 + $0x1a0] sm:$0xff]  ;;  %4511 = vmatpush1.bf16.msra.mxu1 %v15115_v50 }
 0x175   :  { %v15108_v56 = vcombine.high %v666_v34, %v670_v51  ;;  %v794_v57 = vld [vmem:[#allocation3 + $0x580] sm:$0xff]  ;;  %4551 = vmatprep.subr.bf16.mxu0 %v15244_v52  ;;  %v15107_v0 = vcombine.low %v666_v34, %v670_v51 }
 0x176   :  { %v798_v55 = vld [vmem:[#allocation3 + $0x5a0] sm:$0xff]  ;;  %4552 = vmatpush1.bf16.msra.mxu0 %v15243_v53 }
 0x177   :  { %v658_v59 = vld [vmem:[#allocation3 + $0x140] sm:$0xff]  ;;  %v15236_v60 = vcombine.high %v794_v57, %v798_v55  ;;  %4512 = vmatprep.subr.bf16.mxu1 %v15108_v56  ;;  %v15235_v2 = vcombine.low %v794_v57, %v798_v55 }
 0x178   :  { %v662_v61 = vld [vmem:[#allocation3 + $0x160] sm:$0xff]  ;;  %4513 = vmatpush1.bf16.msra.mxu1 %v15107_v0 }
 0x179   :  { %v786_v62 = vld [vmem:[#allocation3 + $0x540] sm:$0xff]  ;;  %v15100_v3 = vcombine.high %v658_v59, %v662_v61  ;;  %4553 = vmatprep.subr.bf16.mxu0 %v15236_v60  ;;  %v15099_v9 = vcombine.low %v658_v59, %v662_v61 }
 0x17a   :  { %v790_v63 = vld [vmem:[#allocation3 + $0x560] sm:$0xff]  ;;  %4554 = vmatpush1.bf16.msra.mxu0 %v15235_v2 }
 0x17b   :  { %v15228_v4 = vcombine.high %v786_v62, %v790_v63  ;;  %v650_v5 = vld [vmem:[#allocation3 + $0x100] sm:$0xff]  ;;  %4514 = vmatprep.subr.bf16.mxu1 %v15100_v3  ;;  %v15227_v10 = vcombine.low %v786_v62, %v790_v63 }
 0x17c   :  { %v654_v6 = vld [vmem:[#allocation3 + $0x120] sm:$0xff]  ;;  %4515 = vmatpush1.bf16.msra.mxu1 %v15099_v9 }
 0x17d   :  { %v778_v7 = vld [vmem:[#allocation3 + $0x500] sm:$0xff]  ;;  %v15092_v12 = vcombine.high %v650_v5, %v654_v6  ;;  %4555 = vmatprep.subr.bf16.mxu0 %v15228_v4  ;;  %v15091_v20 = vcombine.low %v650_v5, %v654_v6 }
 0x17e   :  { %v782_v8 = vld [vmem:[#allocation3 + $0x520] sm:$0xff]  ;;  %4556 = vmatpush1.bf16.msra.mxu0 %v15227_v10 }
 0x17f   :  { %v15220_v13 = vcombine.high %v778_v7, %v782_v8  ;;  %v642_v14 = vld [vmem:[#allocation3 + $0xc0] sm:$0xff]  ;;  %4516 = vmatprep.subr.bf16.mxu1 %v15092_v12  ;;  %v15219_v21 = vcombine.low %v778_v7, %v782_v8 }
 0x180   :  { %v646_v15 = vld [vmem:[#allocation3 + $0xe0] sm:$0xff]  ;;  %4517 = vmatpush1.bf16.msra.mxu1 %v15091_v20 }
 0x181   :  { %v770_v16 = vld [vmem:[#allocation3 + $0x4c0] sm:$0xff]  ;;  %v15084_v22 = vcombine.high %v642_v14, %v646_v15  ;;  %4557 = vmatprep.subr.bf16.mxu0 %v15220_v13  ;;  %v15083_v37 = vcombine.low %v642_v14, %v646_v15 }
 0x182   :  { %v774_v18 = vld [vmem:[#allocation3 + $0x4e0] sm:$0xff]  ;;  %4558 = vmatpush1.bf16.msra.mxu0 %v15219_v21 }
 0x183   :  { %v15212_v23 = vcombine.high %v770_v16, %v774_v18  ;;  %v634_v29 = vld [vmem:[#allocation3 + $0x80] sm:$0xff]  ;;  %4518 = vmatprep.subr.bf16.mxu1 %v15084_v22  ;;  %v15211_v38 = vcombine.low %v770_v16, %v774_v18 }
 0x184   :  { %v638_v31 = vld [vmem:[#allocation3 + $0xa0] sm:$0xff]  ;;  %4519 = vmatpush1.bf16.msra.mxu1 %v15083_v37 }
 0x185   :  { %v762_v32 = vld [vmem:[#allocation3 + $0x480] sm:$0xff]  ;;  %v15076_v44 = vcombine.high %v634_v29, %v638_v31  ;;  %4559 = vmatprep.subr.bf16.mxu0 %v15212_v23  ;;  %v15075_v34 = vcombine.low %v634_v29, %v638_v31 }
 0x186   :  { %v766_v33 = vld [vmem:[#allocation3 + $0x4a0] sm:$0xff]  ;;  %4560 = vmatpush1.bf16.msra.mxu0 %v15211_v38 }
 0x187   :  { %v15204_v45 = vcombine.high %v762_v32, %v766_v33  ;;  %v626_v46 = vld [vmem:[#allocation3 + $0x40] sm:$0xff]  ;;  %4520 = vmatprep.subr.bf16.mxu1 %v15076_v44  ;;  %v15203_v51 = vcombine.low %v762_v32, %v766_v33 }
 0x188   :  { %v630_v47 = vld [vmem:[#allocation3 + $0x60] sm:$0xff]  ;;  %4521 = vmatpush1.bf16.msra.mxu1 %v15075_v34 }
 0x189   :  { %v754_v49 = vld [vmem:[#allocation3 + $0x440] sm:$0xff]  ;;  %v15068_v52 = vcombine.high %v626_v46, %v630_v47  ;;  %4561 = vmatprep.subr.bf16.mxu0 %v15204_v45  ;;  %v15067_v60 = vcombine.low %v626_v46, %v630_v47 }
 0x18a   :  { %v758_v50 = vld [vmem:[#allocation3 + $0x460] sm:$0xff]  ;;  %4562 = vmatpush1.bf16.msra.mxu0 %v15203_v51 }
 0x18b   :  { %v15196_v53 = vcombine.high %v754_v49, %v758_v50  ;;  %v618_v56 = vld [vmem:[#allocation3] sm:$0xff]  ;;  %4522 = vmatprep.subr.bf16.mxu1 %v15068_v52  ;;  %v15195_v61 = vcombine.low %v754_v49, %v758_v50 }
 0x18c   :  { %v622_v57 = vld [vmem:[#allocation3 + $0x20] sm:$0xff]  ;;  %4523 = vmatpush1.bf16.msra.mxu1 %v15067_v60 }
 0x18d   :  { %v746_v55 = vld [vmem:[#allocation3 + $0x400] sm:$0xff]  ;;  %v15060_v62 = vcombine.high %v618_v56, %v622_v57  ;;  %4563 = vmatprep.subr.bf16.mxu0 %v15196_v53  ;;  %v15059_v5 = vcombine.low %v618_v56, %v622_v57 }
 0x18e   :  { %v750_v59 = vld [vmem:[#allocation3 + $0x420] sm:$0xff]  ;;  %4564 = vmatpush1.bf16.msra.mxu0 %v15195_v61 }
 0x18f   :  { %v15188_v63 = vcombine.high %v746_v55, %v750_v59  ;;  %v738_v0 = vld [vmem:[#allocation3 + $0x3c0] sm:$0xff]  ;;  %4524 = vmatprep.subr.bf16.mxu1 %v15060_v62  ;;  %v15187_v6 = vcombine.low %v746_v55, %v750_v59 }
 0x190   :  { %v742_v2 = vld [vmem:[#allocation3 + $0x3e0] sm:$0xff]  ;;  %4525 = vmatpush1.bf16.msra.mxu1 %v15059_v5 }
 0x191   :  { %v866_v3 = vld [vmem:[#allocation3 + $0x7c0] sm:$0xff]  ;;  %v15180_v7 = vcombine.high %v738_v0, %v742_v2  ;;  %4565 = vmatprep.subr.bf16.mxu0 %v15188_v63  ;;  %v15179_v14 = vcombine.low %v738_v0, %v742_v2 }
 0x192   :  { %v870_v4 = vld [vmem:[#allocation3 + $0x7e0] sm:$0xff]  ;;  %4566 = vmatpush1.bf16.msra.mxu0 %v15187_v6 }
 0x193   :  { %v15308_v8 = vcombine.high %v866_v3, %v870_v4  ;;  %v730_v9 = vld [vmem:[#allocation3 + $0x380] sm:$0xff]  ;;  %4526 = vmatprep.subr.bf16.mxu1 %v15180_v7  ;;  %v15307_v15 = vcombine.low %v866_v3, %v870_v4 }
 0x194   :  { %v734_v10 = vld [vmem:[#allocation3 + $0x3a0] sm:$0xff]  ;;  %4527 = vmatpush2.bf16.msra.mxu1 %v15179_v14 }
 0x195   :  { %v858_v12 = vld [vmem:[#allocation3 + $0x780] sm:$0xff]  ;;  %v15172_v16 = vcombine.high %v730_v9, %v734_v10  ;;  %4567 = vmatprep.subr.bf16.mxu0 %v15308_v8  ;;  %v15171_v29 = vcombine.low %v730_v9, %v734_v10 }
 0x196   :  { %v862_v13 = vld [vmem:[#allocation3 + $0x7a0] sm:$0xff]  ;;  %4568 = vmatpush2.bf16.msra.mxu0 %v15307_v15 }
 0x197   :  { %v15300_v18 = vcombine.high %v858_v12, %v862_v13  ;;  %v722_v20 = vld [vmem:[#allocation3 + $0x340] sm:$0xff]  ;;  %4528 = vmatprep.subr.bf16.mxu1 %v15172_v16  ;;  %v15299_v31 = vcombine.low %v858_v12, %v862_v13 }
 0x198   :  { %v726_v21 = vld [vmem:[#allocation3 + $0x360] sm:$0xff]  ;;  %4529 = vmatpush2.bf16.msra.mxu1 %v15171_v29 }
 0x199   :  { %v850_v22 = vld [vmem:[#allocation3 + $0x740] sm:$0xff]  ;;  %v15164_v32 = vcombine.high %v722_v20, %v726_v21  ;;  %4569 = vmatprep.subr.bf16.mxu0 %v15300_v18  ;;  %v15163_v46 = vcombine.low %v722_v20, %v726_v21 }
 0x19a   :  { %v854_v23 = vld [vmem:[#allocation3 + $0x760] sm:$0xff]  ;;  %4570 = vmatpush2.bf16.msra.mxu0 %v15299_v31 }
 0x19b   :  { %v15292_v33 = vcombine.high %v850_v22, %v854_v23  ;;  %v714_v37 = vld [vmem:[#allocation3 + $0x300] sm:$0xff]  ;;  %4530 = vmatprep.subr.bf16.mxu1 %v15164_v32  ;;  %v15291_v47 = vcombine.low %v850_v22, %v854_v23 }
 0x19c   :  { %v718_v38 = vld [vmem:[#allocation3 + $0x320] sm:$0xff]  ;;  %4531 = vmatpush2.bf16.msra.mxu1 %v15163_v46 }
 0x19d   :  { %v842_v44 = vld [vmem:[#allocation3 + $0x700] sm:$0xff]  ;;  %v15156_v49 = vcombine.high %v714_v37, %v718_v38  ;;  %4571 = vmatprep.subr.bf16.mxu0 %v15292_v33  ;;  %v15155_v56 = vcombine.low %v714_v37, %v718_v38 }
 0x19e   :  { %v846_v45 = vld [vmem:[#allocation3 + $0x720] sm:$0xff]  ;;  %4572 = vmatpush2.bf16.msra.mxu0 %v15291_v47 }
 0x19f   :  { %v15284_v50 = vcombine.high %v842_v44, %v846_v45  ;;  %v706_v34 = vld [vmem:[#allocation3 + $0x2c0] sm:$0xff]  ;;  %4532 = vmatprep.subr.bf16.mxu1 %v15156_v49  ;;  %v15283_v57 = vcombine.low %v842_v44, %v846_v45  ;;  %v19451_v49 = vpack.c.bf16 %v19411_v48, %v19411_v48  ;;  %v19459_v48 = vpack.c.bf16 %v19429_v17, %v19429_v17 }
 0x1a0   :  { %v710_v51 = vld [vmem:[#allocation3 + $0x2e0] sm:$0xff]  ;;  %4533 = vmatpush2.bf16.msra.mxu1 %v15155_v56 }
 0x1a1   :  { %v834_v52 = vld [vmem:[#allocation3 + $0x6c0] sm:$0xff]  ;;  %v15148_v55 = vcombine.high %v706_v34, %v710_v51  ;;  %4573 = vmatprep.subr.bf16.mxu0 %v15284_v50  ;;  %v15147_v0 = vcombine.low %v706_v34, %v710_v51  ;;  %v19455_v51 = vpack.c.bf16 %v19418_v58, %v19418_v58  ;;  %v19464_v58 = vpack.c.bf16 %v19435_v26, %v19435_v26 }
 0x1a2   :  { %v838_v53 = vld [vmem:[#allocation3 + $0x6e0] sm:$0xff]  ;;  %4574 = vmatpush2.bf16.msra.mxu0 %v15283_v57 }
 0x1a3   :  { %v15276_v59 = vcombine.high %v834_v52, %v838_v53  ;;  %v698_v60 = vld [vmem:[#allocation3 + $0x280] sm:$0xff]  ;;  %4534 = vmatprep.subr.bf16.mxu1 %v15148_v55  ;;  %v15275_v2 = vcombine.low %v834_v52, %v838_v53 }
 0x1a4   :  { %v702_v61 = vld [vmem:[#allocation3 + $0x2a0] sm:$0xff]  ;;  %4535 = vmatpush2.bf16.msra.mxu1 %v15147_v0 }
 0x1a5   :  { %v826_v62 = vld [vmem:[#allocation3 + $0x680] sm:$0xff]  ;;  %v15140_v3 = vcombine.high %v698_v60, %v702_v61  ;;  %4575 = vmatprep.subr.bf16.mxu0 %v15276_v59  ;;  %v15139_v9 = vcombine.low %v698_v60, %v702_v61 }
 0x1a6   :  { %v830_v63 = vld [vmem:[#allocation3 + $0x6a0] sm:$0xff]  ;;  %4576 = vmatpush2.bf16.msra.mxu0 %v15275_v2 }
 0x1a7   :  { %v15268_v4 = vcombine.high %v826_v62, %v830_v63  ;;  %v690_v5 = vld [vmem:[#allocation3 + $0x240] sm:$0xff]  ;;  %4536 = vmatprep.subr.bf16.mxu1 %v15140_v3  ;;  %v15267_v10 = vcombine.low %v826_v62, %v830_v63 }
 0x1a8   :  { %v694_v6 = vld [vmem:[#allocation3 + $0x260] sm:$0xff]  ;;  %4537 = vmatpush2.bf16.msra.mxu1 %v15139_v9 }
 0x1a9   :  { %v818_v7 = vld [vmem:[#allocation3 + $0x640] sm:$0xff]  ;;  %v15132_v12 = vcombine.high %v690_v5, %v694_v6  ;;  %4577 = vmatprep.subr.bf16.mxu0 %v15268_v4  ;;  %v15131_v20 = vcombine.low %v690_v5, %v694_v6 }
 0x1aa   :  { %v822_v8 = vld [vmem:[#allocation3 + $0x660] sm:$0xff]  ;;  %4578 = vmatpush2.bf16.msra.mxu0 %v15267_v10 }
 0x1ab   :  { %v15260_v13 = vcombine.high %v818_v7, %v822_v8  ;;  %v682_v14 = vld [vmem:[#allocation3 + $0x200] sm:$0xff]  ;;  %4538 = vmatprep.subr.bf16.mxu1 %v15132_v12  ;;  %v15259_v21 = vcombine.low %v818_v7, %v822_v8 }
 0x1ac   :  { %v686_v15 = vld [vmem:[#allocation3 + $0x220] sm:$0xff]  ;;  %4539 = vmatpush2.bf16.msra.mxu1 %v15131_v20 }
 0x1ad   :  { %v810_v16 = vld [vmem:[#allocation3 + $0x600] sm:$0xff]  ;;  %v15124_v22 = vcombine.high %v682_v14, %v686_v15  ;;  %4579 = vmatprep.subr.bf16.mxu0 %v15260_v13  ;;  %v15123_v37 = vcombine.low %v682_v14, %v686_v15 }
 0x1ae   :  { %v814_v18 = vld [vmem:[#allocation3 + $0x620] sm:$0xff]  ;;  %4580 = vmatpush2.bf16.msra.mxu0 %v15259_v21 }
 0x1af   :  { %v15252_v23 = vcombine.high %v810_v16, %v814_v18  ;;  %v930_v29 = vld [vmem:[#allocation3 + $0x9c0] sm:$0xff]  ;;  %4540 = vmatprep.subr.bf16.mxu1 %v15124_v22  ;;  %v15251_v38 = vcombine.low %v810_v16, %v814_v18 }
 0x1b0   :  { %v934_v31 = vld [vmem:[#allocation3 + $0x9e0] sm:$0xff]  ;;  %4541 = vmatpush2.bf16.msra.mxu1 %v15123_v37 }
 0x1b1   :  { %v1058_v32 = vld [vmem:[#allocation3 + $0xdc0] sm:$0xff]  ;;  %v15372_v44 = vcombine.high %v930_v29, %v934_v31  ;;  %4581 = vmatprep.subr.bf16.mxu0 %v15252_v23  ;;  %v15371_v52 = vcombine.low %v930_v29, %v934_v31 }
 0x1b2   :  { %v1062_v33 = vld [vmem:[#allocation3 + $0xde0] sm:$0xff]  ;;  %4582 = vmatpush2.bf16.msra.mxu0 %v15251_v38 }
 0x1b3   :  { %v15500_v45 = vcombine.high %v1058_v32, %v1062_v33  ;;  %v922_v46 = vld [vmem:[#allocation3 + $0x980] sm:$0xff]  ;;  %4592 = vmatprep.subr.bf16.mxu1 %v15372_v44  ;;  %v15499_v53 = vcombine.low %v1058_v32, %v1062_v33  ;;  %4543 = vmatmul.mubr.bf16.vlgmr.msra.gmra.mxu1 %v19451_v49 }
 0x1b4   :  { %v926_v47 = vld [vmem:[#allocation3 + $0x9a0] sm:$0xff]  ;;  %4593 = vmatpush1.bf16.msra.mxu1 %v15371_v52  ;;  %4624 = vmatprep.mubr.bf16.mxu1 %v19459_v48 }
 0x1b5   :  { %v1050_v50 = vld [vmem:[#allocation3 + $0xd80] sm:$0xff]  ;;  %v15364_v56 = vcombine.high %v922_v46, %v926_v47  ;;  %4633 = vmatprep.subr.bf16.mxu0 %v15500_v45  ;;  %4584 = vmatmul.mubr.bf16.vlgmr.msra.gmra.mxu0 %v19455_v51  ;;  %v15363_v62 = vcombine.low %v922_v46, %v926_v47 }
 0x1b6   :  { %v1054_v34 = vld [vmem:[#allocation3 + $0xda0] sm:$0xff]  ;;  %4634 = vmatpush1.bf16.msra.mxu0 %v15499_v53  ;;  %4665 = vmatprep.mubr.bf16.mxu0 %v19464_v58 }
 0x1b7   :  { %v15492_v57 = vcombine.high %v1050_v50, %v1054_v34  ;;  %v914_v55 = vld [vmem:[#allocation3 + $0x940] sm:$0xff]  ;;  %4594 = vmatprep.subr.bf16.mxu1 %v15364_v56  ;;  %v15491_v63 = vcombine.low %v1050_v50, %v1054_v34 }
 0x1b8   :  { %v918_v59 = vld [vmem:[#allocation3 + $0x960] sm:$0xff]  ;;  %4595 = vmatpush1.bf16.msra.mxu1 %v15363_v62 }
 0x1b9   :  { %v1042_v60 = vld [vmem:[#allocation3 + $0xd40] sm:$0xff]  ;;  %v15356_v0 = vcombine.high %v914_v55, %v918_v59  ;;  %4635 = vmatprep.subr.bf16.mxu0 %v15492_v57  ;;  %v15355_v26 = vcombine.low %v914_v55, %v918_v59 }
 0x1ba   :  { %v1046_v61 = vld [vmem:[#allocation3 + $0xd60] sm:$0xff]  ;;  %4636 = vmatpush1.bf16.msra.mxu0 %v15491_v63 }
 0x1bb   :  { %v15484_v2 = vcombine.high %v1042_v60, %v1046_v61  ;;  %v906_v17 = vld [vmem:[#allocation3 + $0x900] sm:$0xff]  ;;  %4596 = vmatprep.subr.bf16.mxu1 %v15356_v0  ;;  %v15483_v6 = vcombine.low %v1042_v60, %v1046_v61 }
 0x1bc   :  { %v910_v3 = vld [vmem:[#allocation3 + $0x920] sm:$0xff]  ;;  %4597 = vmatpush1.bf16.msra.mxu1 %v15355_v26 }
 0x1bd   :  { %v1034_v4 = vld [vmem:[#allocation3 + $0xd00] sm:$0xff]  ;;  %v15348_v7 = vcombine.high %v906_v17, %v910_v3  ;;  %4637 = vmatprep.subr.bf16.mxu0 %v15484_v2  ;;  %v15347_v14 = vcombine.low %v906_v17, %v910_v3 }
 0x1be   :  { %v1038_v5 = vld [vmem:[#allocation3 + $0xd20] sm:$0xff]  ;;  %4638 = vmatpush1.bf16.msra.mxu0 %v15483_v6 }
 0x1bf   :  { %v15476_v8 = vcombine.high %v1034_v4, %v1038_v5  ;;  %v898_v9 = vld [vmem:[#allocation3 + $0x8c0] sm:$0xff]  ;;  %4598 = vmatprep.subr.bf16.mxu1 %v15348_v7  ;;  %v15475_v15 = vcombine.low %v1034_v4, %v1038_v5 }
 0x1c0   :  { %v902_v10 = vld [vmem:[#allocation3 + $0x8e0] sm:$0xff]  ;;  %4599 = vmatpush1.bf16.msra.mxu1 %v15347_v14 }
 0x1c1   :  { %v1026_v12 = vld [vmem:[#allocation3 + $0xcc0] sm:$0xff]  ;;  %v15340_v16 = vcombine.high %v898_v9, %v902_v10  ;;  %4639 = vmatprep.subr.bf16.mxu0 %v15476_v8  ;;  %v15339_v29 = vcombine.low %v898_v9, %v902_v10 }
 0x1c2   :  { %v1030_v13 = vld [vmem:[#allocation3 + $0xce0] sm:$0xff]  ;;  %4640 = vmatpush1.bf16.msra.mxu0 %v15475_v15 }
 0x1c3   :  { %v15468_v18 = vcombine.high %v1026_v12, %v1030_v13  ;;  %v890_v20 = vld [vmem:[#allocation3 + $0x880] sm:$0xff]  ;;  %4600 = vmatprep.subr.bf16.mxu1 %v15340_v16  ;;  %v15467_v31 = vcombine.low %v1026_v12, %v1030_v13 }
 0x1c4   :  { %v894_v21 = vld [vmem:[#allocation3 + $0x8a0] sm:$0xff]  ;;  %4601 = vmatpush1.bf16.msra.mxu1 %v15339_v29 }
 0x1c5   :  { %v1018_v22 = vld [vmem:[#allocation3 + $0xc80] sm:$0xff]  ;;  %v15332_v32 = vcombine.high %v890_v20, %v894_v21  ;;  %4641 = vmatprep.subr.bf16.mxu0 %v15468_v18  ;;  %v15331_v46 = vcombine.low %v890_v20, %v894_v21 }
 0x1c6   :  { %v1022_v23 = vld [vmem:[#allocation3 + $0xca0] sm:$0xff]  ;;  %4642 = vmatpush1.bf16.msra.mxu0 %v15467_v31 }
 0x1c7   :  { %v15460_v33 = vcombine.high %v1018_v22, %v1022_v23  ;;  %v882_v37 = vld [vmem:[#allocation3 + $0x840] sm:$0xff]  ;;  %4602 = vmatprep.subr.bf16.mxu1 %v15332_v32  ;;  %v15459_v47 = vcombine.low %v1018_v22, %v1022_v23 }
 0x1c8   :  { %v886_v38 = vld [vmem:[#allocation3 + $0x860] sm:$0xff]  ;;  %4603 = vmatpush1.bf16.msra.mxu1 %v15331_v46 }
 0x1c9   :  { %v1010_v44 = vld [vmem:[#allocation3 + $0xc40] sm:$0xff]  ;;  %v15324_v50 = vcombine.high %v882_v37, %v886_v38  ;;  %4643 = vmatprep.subr.bf16.mxu0 %v15460_v33  ;;  %v15323_v55 = vcombine.low %v882_v37, %v886_v38 }
 0x1ca   :  { %v1014_v45 = vld [vmem:[#allocation3 + $0xc60] sm:$0xff]  ;;  %4644 = vmatpush1.bf16.msra.mxu0 %v15459_v47 }
 0x1cb   :  { %v15452_v34 = vcombine.high %v1010_v44, %v1014_v45  ;;  %v874_v52 = vld [vmem:[#allocation3 + $0x800] sm:$0xff]  ;;  %4604 = vmatprep.subr.bf16.mxu1 %v15324_v50  ;;  %v15451_v59 = vcombine.low %v1010_v44, %v1014_v45 }
 0x1cc   :  { %v878_v53 = vld [vmem:[#allocation3 + $0x820] sm:$0xff]  ;;  %4605 = vmatpush1.bf16.msra.mxu1 %v15323_v55 }
 0x1cd   :  { %v1002_v56 = vld [vmem:[#allocation3 + $0xc00] sm:$0xff]  ;;  %v15316_v60 = vcombine.high %v874_v52, %v878_v53  ;;  %4645 = vmatprep.subr.bf16.mxu0 %v15452_v34  ;;  %v15315_v17 = vcombine.low %v874_v52, %v878_v53 }
 0x1ce   :  { %v1006_v57 = vld [vmem:[#allocation3 + $0xc20] sm:$0xff]  ;;  %4646 = vmatpush1.bf16.msra.mxu0 %v15451_v59 }
 0x1cf   :  { %v15444_v61 = vcombine.high %v1002_v56, %v1006_v57  ;;  %v994_v62 = vld [vmem:[#allocation3 + $0xbc0] sm:$0xff]  ;;  %4606 = vmatprep.subr.bf16.mxu1 %v15316_v60  ;;  %v15443_v3 = vcombine.low %v1002_v56, %v1006_v57 }
 0x1d0   :  { %v998_v63 = vld [vmem:[#allocation3 + $0xbe0] sm:$0xff]  ;;  %4607 = vmatpush1.bf16.msra.mxu1 %v15315_v17 }
 0x1d1   :  { %v1122_v0 = vld [vmem:[#allocation3 + $0xfc0] sm:$0xff]  ;;  %v15436_v4 = vcombine.high %v994_v62, %v998_v63  ;;  %4647 = vmatprep.subr.bf16.mxu0 %v15444_v61  ;;  %v15435_v9 = vcombine.low %v994_v62, %v998_v63 }
 0x1d2   :  { %v1126_v2 = vld [vmem:[#allocation3 + $0xfe0] sm:$0xff]  ;;  %4648 = vmatpush1.bf16.msra.mxu0 %v15443_v3 }
 0x1d3   :  { %v15564_v5 = vcombine.high %v1122_v0, %v1126_v2  ;;  %v986_v26 = vld [vmem:[#allocation3 + $0xb80] sm:$0xff]  ;;  %4608 = vmatprep.subr.bf16.mxu1 %v15436_v4  ;;  %v15563_v10 = vcombine.low %v1122_v0, %v1126_v2 }
 0x1d4   :  { %v990_v6 = vld [vmem:[#allocation3 + $0xba0] sm:$0xff]  ;;  %4609 = vmatpush2.bf16.msra.mxu1 %v15435_v9 }
 0x1d5   :  { %v1114_v7 = vld [vmem:[#allocation3 + $0xf80] sm:$0xff]  ;;  %v15428_v12 = vcombine.high %v986_v26, %v990_v6  ;;  %4649 = vmatprep.subr.bf16.mxu0 %v15564_v5  ;;  %v15427_v20 = vcombine.low %v986_v26, %v990_v6 }
 0x1d6   :  { %v1118_v8 = vld [vmem:[#allocation3 + $0xfa0] sm:$0xff]  ;;  %4650 = vmatpush2.bf16.msra.mxu0 %v15563_v10 }
 0x1d7   :  { %v15556_v13 = vcombine.high %v1114_v7, %v1118_v8  ;;  %v978_v14 = vld [vmem:[#allocation3 + $0xb40] sm:$0xff]  ;;  %4610 = vmatprep.subr.bf16.mxu1 %v15428_v12  ;;  %v15555_v21 = vcombine.low %v1114_v7, %v1118_v8 }
 0x1d8   :  { %v982_v15 = vld [vmem:[#allocation3 + $0xb60] sm:$0xff]  ;;  %4611 = vmatpush2.bf16.msra.mxu1 %v15427_v20 }
 0x1d9   :  { %v1106_v16 = vld [vmem:[#allocation3 + $0xf40] sm:$0xff]  ;;  %v15420_v22 = vcombine.high %v978_v14, %v982_v15  ;;  %4651 = vmatprep.subr.bf16.mxu0 %v15556_v13  ;;  %v15419_v37 = vcombine.low %v978_v14, %v982_v15 }
 0x1da   :  { %v1110_v18 = vld [vmem:[#allocation3 + $0xf60] sm:$0xff]  ;;  %4652 = vmatpush2.bf16.msra.mxu0 %v15555_v21 }
 0x1db   :  { %v15548_v23 = vcombine.high %v1106_v16, %v1110_v18  ;;  %v970_v29 = vld [vmem:[#allocation3 + $0xb00] sm:$0xff]  ;;  %4612 = vmatprep.subr.bf16.mxu1 %v15420_v22  ;;  %v15547_v38 = vcombine.low %v1106_v16, %v1110_v18  ;;  %v675_v22 = vld [vmem:[#allocation3 + $0x1c8] sm:$0xff] }
 0x1dc   :  { %v974_v31 = vld [vmem:[#allocation3 + $0xb20] sm:$0xff]  ;;  %4613 = vmatpush2.bf16.msra.mxu1 %v15419_v37 }
 0x1dd   :  { %v1098_v32 = vld [vmem:[#allocation3 + $0xf00] sm:$0xff]  ;;  %v15412_v44 = vcombine.high %v970_v29, %v974_v31  ;;  %4653 = vmatprep.subr.bf16.mxu0 %v15548_v23  ;;  %v15411_v52 = vcombine.low %v970_v29, %v974_v31  ;;  %v679_v23 = vld [vmem:[#allocation3 + $0x1e8] sm:$0xff] }
 0x1de   :  { %v1102_v33 = vld [vmem:[#allocation3 + $0xf20] sm:$0xff]  ;;  %4654 = vmatpush2.bf16.msra.mxu0 %v15547_v38 }
 0x1df   :  { %v15540_v45 = vcombine.high %v1098_v32, %v1102_v33  ;;  %v962_v46 = vld [vmem:[#allocation3 + $0xac0] sm:$0xff]  ;;  %4614 = vmatprep.subr.bf16.mxu1 %v15412_v44  ;;  %v15539_v53 = vcombine.low %v1098_v32, %v1102_v33  ;;  %v15118_v33 = vcombine.high %v675_v22, %v679_v23  ;;  %v19471_v44 = vpack.c.bf16 %v19425_v11, %v19425_v11 }
 0x1e0   :  { %v966_v47 = vld [vmem:[#allocation3 + $0xae0] sm:$0xff]  ;;  %4615 = vmatpush2.bf16.msra.mxu1 %v15411_v52  ;;  %v19479_v11 = vpack.c.bf16 %v19441_v39, %v19441_v39  ;;  %v651_v39 = vld [vmem:[#allocation3 + $0x108] sm:$0xff] }
 0x1e1   :  { %v1090_v50 = vld [vmem:[#allocation3 + $0xec0] sm:$0xff]  ;;  %v15404_v56 = vcombine.high %v962_v46, %v966_v47  ;;  %4655 = vmatprep.subr.bf16.mxu0 %v15540_v45  ;;  %v15403_v62 = vcombine.low %v962_v46, %v966_v47  ;;  %v667_v45 = vld [vmem:[#allocation3 + $0x188] sm:$0xff]  ;;  %v19475_v47 = vpack.c.bf16 %v19432_v19, %v19432_v19 }
 0x1e2   :  { %v1094_v34 = vld [vmem:[#allocation3 + $0xee0] sm:$0xff]  ;;  %4656 = vmatpush2.bf16.msra.mxu0 %v15539_v53  ;;  %v671_v46 = vld [vmem:[#allocation3 + $0x1a8] sm:$0xff] }
 0x1e3   :  { %v15532_v57 = vcombine.high %v1090_v50, %v1094_v34  ;;  %v954_v55 = vld [vmem:[#allocation3 + $0xa80] sm:$0xff]  ;;  %4616 = vmatprep.subr.bf16.mxu1 %v15404_v56  ;;  %v15531_v63 = vcombine.low %v1090_v50, %v1094_v34  ;;  %v15117_v34 = vcombine.low %v675_v22, %v679_v23  ;;  %v15110_v53 = vcombine.high %v667_v45, %v671_v46 }
 0x1e4   :  { %v958_v59 = vld [vmem:[#allocation3 + $0xaa0] sm:$0xff]  ;;  %4617 = vmatpush2.bf16.msra.mxu1 %v15403_v62 }
 0x1e5   :  { %v1082_v60 = vld [vmem:[#allocation3 + $0xe80] sm:$0xff]  ;;  %v15396_v0 = vcombine.high %v954_v55, %v958_v59  ;;  %4657 = vmatprep.subr.bf16.mxu0 %v15532_v57  ;;  %v15395_v26 = vcombine.low %v954_v55, %v958_v59  ;;  %v659_v55 = vld [vmem:[#allocation3 + $0x148] sm:$0xff] }
 0x1e6   :  { %v1086_v61 = vld [vmem:[#allocation3 + $0xea0] sm:$0xff]  ;;  %4658 = vmatpush2.bf16.msra.mxu0 %v15531_v63  ;;  %v663_v59 = vld [vmem:[#allocation3 + $0x168] sm:$0xff] }
 0x1e7   :  { %v15524_v2 = vcombine.high %v1082_v60, %v1086_v61  ;;  %v946_v17 = vld [vmem:[#allocation3 + $0xa40] sm:$0xff]  ;;  %4618 = vmatprep.subr.bf16.mxu1 %v15396_v0  ;;  %v15523_v6 = vcombine.low %v1082_v60, %v1086_v61  ;;  %v15109_v60 = vcombine.low %v667_v45, %v671_v46  ;;  %v15102_v62 = vcombine.high %v659_v55, %v663_v59 }
 0x1e8   :  { %v950_v3 = vld [vmem:[#allocation3 + $0xa60] sm:$0xff]  ;;  %4619 = vmatpush2.bf16.msra.mxu1 %v15395_v26 }
 0x1e9   :  { %v1074_v4 = vld [vmem:[#allocation3 + $0xe40] sm:$0xff]  ;;  %v15388_v7 = vcombine.high %v946_v17, %v950_v3  ;;  %4659 = vmatprep.subr.bf16.mxu0 %v15524_v2  ;;  %v15387_v14 = vcombine.low %v946_v17, %v950_v3  ;;  %v655_v2 = vld [vmem:[#allocation3 + $0x128] sm:$0xff]  ;;  %v15101_v3 = vcombine.low %v659_v55, %v663_v59 }
 0x1ea   :  { %v1078_v5 = vld [vmem:[#allocation3 + $0xe60] sm:$0xff]  ;;  %4660 = vmatpush2.bf16.msra.mxu0 %v15523_v6 }
 0x1eb   :  { %v15516_v8 = vcombine.high %v1074_v4, %v1078_v5  ;;  %v938_v9 = vld [vmem:[#allocation3 + $0xa00] sm:$0xff]  ;;  %4620 = vmatprep.subr.bf16.mxu1 %v15388_v7  ;;  %v15515_v15 = vcombine.low %v1074_v4, %v1078_v5  ;;  %v15094_v5 = vcombine.high %v651_v39, %v655_v2  ;;  %v643_v7 = vld [vmem:[#allocation3 + $0xc8] sm:$0xff] }
 0x1ec   :  { %v942_v10 = vld [vmem:[#allocation3 + $0xa20] sm:$0xff]  ;;  %4621 = vmatpush2.bf16.msra.mxu1 %v15387_v14 }
 0x1ed   :  { %v1066_v12 = vld [vmem:[#allocation3 + $0xe00] sm:$0xff]  ;;  %v15380_v16 = vcombine.high %v938_v9, %v942_v10  ;;  %4661 = vmatprep.subr.bf16.mxu0 %v15516_v8  ;;  %v15379_v29 = vcombine.low %v938_v9, %v942_v10  ;;  %v647_v8 = vld [vmem:[#allocation3 + $0xe8] sm:$0xff]  ;;  %v15093_v10 = vcombine.low %v651_v39, %v655_v2 }
 0x1ee   :  { %v1070_v13 = vld [vmem:[#allocation3 + $0xe20] sm:$0xff]  ;;  %4662 = vmatpush2.bf16.msra.mxu0 %v15515_v15 }
 0x1ef   :  { %v15508_v18 = vcombine.high %v1066_v12, %v1070_v13  ;;  %v1186_v20 = vld [vmem:[#allocation3 + $0x11c0] sm:$0xff]  ;;  %4622 = vmatprep.subr.bf16.mxu1 %v15380_v16  ;;  %v15507_v31 = vcombine.low %v1066_v12, %v1070_v13  ;;  %v15086_v13 = vcombine.high %v643_v7, %v647_v8  ;;  %v635_v16 = vld [vmem:[#allocation3 + $0x88] sm:$0xff] }
 0x1f0   :  { %v1190_v21 = vld [vmem:[#allocation3 + $0x11e0] sm:$0xff]  ;;  %4623 = vmatpush2.bf16.msra.mxu1 %v15379_v29 }
 0x1f1   :  { %v15628_v32 = vcombine.high %v1186_v20, %v1190_v21  ;;  %4663 = vmatprep.subr.bf16.mxu0 %v15508_v18  ;;  %v1178_v37 = vld [vmem:[#allocation3 + $0x1180] sm:$0xff]  ;;  %v15627_v50 = vcombine.low %v1186_v20, %v1190_v21  ;;  %v639_v18 = vld [vmem:[#allocation3 + $0xa8] sm:$0xff]  ;;  %v15085_v21 = vcombine.low %v643_v7, %v647_v8 }
 0x1f2   :  { %v1182_v38 = vld [vmem:[#allocation3 + $0x11a0] sm:$0xff]  ;;  %4664 = vmatpush2.bf16.msra.mxu0 %v15507_v31  ;;  %v15078_v23 = vcombine.high %v635_v16, %v639_v18 }
 0x1f3   :  { %4674 = vmatprep.subr.bf16.mxu1 %v15628_v32  ;;  %v15620_v52 = vcombine.high %v1178_v37, %v1182_v38  ;;  %4715 = vmatprep.subr.bf16.mxu0 %v15118_v33  ;;  %v1170_v56 = vld [vmem:[#allocation3 + $0x1140] sm:$0xff]  ;;  %v15619_v19 = vcombine.low %v1178_v37, %v1182_v38  ;;  %v627_v32 = vld [vmem:[#allocation3 + $0x48] sm:$0xff]  ;;  %v15077_v38 = vcombine.low %v635_v16, %v639_v18 }
 0x1f4   :  { %v1174_v57 = vld [vmem:[#allocation3 + $0x1160] sm:$0xff]  ;;  %4625 = vmatmul.mubr.bf16.vlgmr.msra.gmra.mxu1 %v19471_v44  ;;  %v631_v33 = vld [vmem:[#allocation3 + $0x68] sm:$0xff] }
 0x1f5   :  { %4666 = vmatmul.mubr.bf16.vlgmr.msra.gmra.mxu0 %v19475_v47  ;;  %4675 = vmatpush1.bf16.msra.mxu1 %v15627_v50  ;;  %v15612_v61 = vcombine.high %v1170_v56, %v1174_v57  ;;  %v1162_v63 = vld [vmem:[#allocation3 + $0x1100] sm:$0xff]  ;;  %v15611_v17 = vcombine.low %v1170_v56, %v1174_v57  ;;  %v15070_v46 = vcombine.high %v627_v32, %v631_v33 }
 0x1f6   :  { %4716 = vmatpush1.bf16.msra.mxu0 %v15117_v34  ;;  %4676 = vmatprep.subr.bf16.mxu1 %v15620_v52  ;;  %v1166_v0 = vld [vmem:[#allocation3 + $0x1120] sm:$0xff]  ;;  %v619_v52 = vld [vmem:[#allocation3 + $0x8] sm:$0xff]  ;;  %v15069_v57 = vcombine.low %v627_v32, %v631_v33 }
 0x1f7   :  { %4717 = vmatprep.subr.bf16.mxu0 %v15110_v53  ;;  %4706 = vmatprep.mubr.bf16.mxu1 %v19479_v11  ;;  %v15604_v4 = vcombine.high %v1162_v63, %v1166_v0  ;;  %v1154_v26 = vld [vmem:[#allocation3 + $0x10c0] sm:$0xff]  ;;  %v15603_v9 = vcombine.low %v1162_v63, %v1166_v0  ;;  %v623_v53 = vld [vmem:[#allocation3 + $0x28] sm:$0xff] }
 0x1f8   :  { %4747 = vmatprep.mubr.bf16.mxu0 %v19443_v42  ;;  %v1158_v6 = vld [vmem:[#allocation3 + $0x10e0] sm:$0xff]  ;;  %v15062_v59 = vcombine.high %v619_v52, %v623_v53  ;;  %v15061_v0 = vcombine.low %v619_v52, %v623_v53 }
 0x1f9   :  { %4677 = vmatpush1.bf16.msra.mxu1 %v15619_v19  ;;  %v15596_v12 = vcombine.high %v1154_v26, %v1158_v6  ;;  %v1146_v14 = vld [vmem:[#allocation3 + $0x1080] sm:$0xff]  ;;  %v15595_v20 = vcombine.low %v1154_v26, %v1158_v6 }
 0x1fa   :  { %4718 = vmatpush1.bf16.msra.mxu0 %v15109_v60  ;;  %4678 = vmatprep.subr.bf16.mxu1 %v15612_v61  ;;  %v1150_v15 = vld [vmem:[#allocation3 + $0x10a0] sm:$0xff]  ;;  %v739_v61 = vld [vmem:[#allocation3 + $0x3c8] sm:$0xff] }
 0x1fb   :  { %4719 = vmatprep.subr.bf16.mxu0 %v15102_v62  ;;  %v15588_v22 = vcombine.high %v1146_v14, %v1150_v15  ;;  %v1138_v29 = vld [vmem:[#allocation3 + $0x1040] sm:$0xff]  ;;  %v15587_v37 = vcombine.low %v1146_v14, %v1150_v15  ;;  %v743_v62 = vld [vmem:[#allocation3 + $0x3e8] sm:$0xff] }
 0x1fc   :  { %v1142_v31 = vld [vmem:[#allocation3 + $0x1060] sm:$0xff]  ;;  %v15182_v2 = vcombine.high %v739_v61, %v743_v62  ;;  %v15181_v6 = vcombine.low %v739_v61, %v743_v62 }
 0x1fd   :  { %4679 = vmatpush1.bf16.msra.mxu1 %v15611_v17  ;;  %v15580_v45 = vcombine.high %v1138_v29, %v1142_v31  ;;  %v1130_v50 = vld [vmem:[#allocation3 + $0x1000] sm:$0xff]  ;;  %v15579_v56 = vcombine.low %v1138_v29, %v1142_v31 }
 0x1fe   :  { %4720 = vmatpush1.bf16.msra.mxu0 %v15101_v3  ;;  %4680 = vmatprep.subr.bf16.mxu1 %v15604_v4  ;;  %v1134_v34 = vld [vmem:[#allocation3 + $0x1020] sm:$0xff]  ;;  %v731_v4 = vld [vmem:[#allocation3 + $0x388] sm:$0xff] }
 0x1ff   :  { %4721 = vmatprep.subr.bf16.mxu0 %v15094_v5  ;;  %v15572_v55 = vcombine.high %v1130_v50, %v1134_v34  ;;  %v1250_v19 = vld [vmem:[#allocation3 + $0x13c0] sm:$0xff]  ;;  %v15571_v63 = vcombine.low %v1130_v50, %v1134_v34  ;;  %v735_v5 = vld [vmem:[#allocation3 + $0x3a8] sm:$0xff] }
 0x200   :  { %v1254_v60 = vld [vmem:[#allocation3 + $0x13e0] sm:$0xff]  ;;  %v15174_v8 = vcombine.high %v731_v4, %v735_v5  ;;  %v15173_v15 = vcombine.low %v731_v4, %v735_v5 }
 0x201   :  { %4681 = vmatpush1.bf16.msra.mxu1 %v15603_v9  ;;  %v15692_v39 = vcombine.high %v1250_v19, %v1254_v60  ;;  %v1242_v17 = vld [vmem:[#allocation3 + $0x1380] sm:$0xff]  ;;  %v15691_v26 = vcombine.low %v1250_v19, %v1254_v60 }
 0x202   :  { %4722 = vmatpush1.bf16.msra.mxu0 %v15093_v10  ;;  %4682 = vmatprep.subr.bf16.mxu1 %v15596_v12  ;;  %v1246_v3 = vld [vmem:[#allocation3 + $0x13a0] sm:$0xff]  ;;  %v723_v12 = vld [vmem:[#allocation3 + $0x348] sm:$0xff] }
 0x203   :  { %4723 = vmatprep.subr.bf16.mxu0 %v15086_v13  ;;  %v15684_v7 = vcombine.high %v1242_v17, %v1246_v3  ;;  %v1234_v9 = vld [vmem:[#allocation3 + $0x1340] sm:$0xff]  ;;  %v727_v13 = vld [vmem:[#allocation3 + $0x368] sm:$0xff]  ;;  %v15683_v14 = vcombine.low %v1242_v17, %v1246_v3 }
 0x204   :  { %v1238_v10 = vld [vmem:[#allocation3 + $0x1360] sm:$0xff]  ;;  %v15166_v18 = vcombine.high %v723_v12, %v727_v13  ;;  %v15165_v31 = vcombine.low %v723_v12, %v727_v13 }
 0x205   :  { %4683 = vmatpush1.bf16.msra.mxu1 %v15595_v20  ;;  %v15676_v16 = vcombine.high %v1234_v9, %v1238_v10  ;;  %v1226_v20 = vld [vmem:[#allocation3 + $0x1300] sm:$0xff]  ;;  %v15675_v29 = vcombine.low %v1234_v9, %v1238_v10 }
 0x206   :  { %4724 = vmatpush1.bf16.msra.mxu0 %v15085_v21  ;;  %4684 = vmatprep.subr.bf16.mxu1 %v15588_v22  ;;  %v1230_v21 = vld [vmem:[#allocation3 + $0x1320] sm:$0xff]  ;;  %v715_v22 = vld [vmem:[#allocation3 + $0x308] sm:$0xff] }
 0x207   :  { %4725 = vmatprep.subr.bf16.mxu0 %v15078_v23  ;;  %v719_v23 = vld [vmem:[#allocation3 + $0x328] sm:$0xff]  ;;  %v15668_v32 = vcombine.high %v1226_v20, %v1230_v21  ;;  %v15667_v50 = vcombine.low %v1226_v20, %v1230_v21 }
 0x208   :  { %v15158_v33 = vcombine.high %v715_v22, %v719_v23  ;;  %v15157_v34 = vcombine.low %v715_v22, %v719_v23 }
 0x209   :  { %4685 = vmatpush1.bf16.msra.mxu1 %v15587_v37  ;;  %v1218_v37 = vld [vmem:[#allocation3 + $0x12c0] sm:$0xff] }
 0x20a   :  { %4726 = vmatpush1.bf16.msra.mxu0 %v15077_v38  ;;  %4686 = vmatprep.subr.bf16.mxu1 %v15580_v45  ;;  %v1222_v38 = vld [vmem:[#allocation3 + $0x12e0] sm:$0xff]  ;;  %v707_v45 = vld [vmem:[#allocation3 + $0x2c8] sm:$0xff] }
 0x20b   :  { %4727 = vmatprep.subr.bf16.mxu0 %v15070_v46  ;;  %v711_v46 = vld [vmem:[#allocation3 + $0x2e8] sm:$0xff]  ;;  %v15660_v52 = vcombine.high %v1218_v37, %v1222_v38  ;;  %v15659_v19 = vcombine.low %v1218_v37, %v1222_v38 }
 0x20c   :  { %v15150_v53 = vcombine.high %v707_v45, %v711_v46  ;;  %v15149_v60 = vcombine.low %v707_v45, %v711_v46  ;;  %v927_v37 = vld [vmem:[#allocation3 + $0x9a8] sm:$0xff] }
 0x20d   :  { %4687 = vmatpush1.bf16.msra.mxu1 %v15579_v56  ;;  %v1210_v56 = vld [vmem:[#allocation3 + $0x1280] sm:$0xff] }
 0x20e   :  { %4728 = vmatpush1.bf16.msra.mxu0 %v15069_v57  ;;  %4688 = vmatprep.subr.bf16.mxu1 %v15572_v55  ;;  %v1214_v57 = vld [vmem:[#allocation3 + $0x12a0] sm:$0xff]  ;;  %v699_v55 = vld [vmem:[#allocation3 + $0x288] sm:$0xff] }
 0x20f   :  { %4729 = vmatprep.subr.bf16.mxu0 %v15062_v59  ;;  %v703_v59 = vld [vmem:[#allocation3 + $0x2a8] sm:$0xff]  ;;  %v15652_v61 = vcombine.high %v1210_v56, %v1214_v57  ;;  %v15651_v17 = vcombine.low %v1210_v56, %v1214_v57 }
 0x210   :  { %v15142_v62 = vcombine.high %v699_v55, %v703_v59  ;;  %v15141_v3 = vcombine.low %v699_v55, %v703_v59  ;;  %v919_v56 = vld [vmem:[#allocation3 + $0x968] sm:$0xff] }
 0x211   :  { %4689 = vmatpush1.bf16.msra.mxu1 %v15571_v63  ;;  %v1202_v63 = vld [vmem:[#allocation3 + $0x1240] sm:$0xff] }
 0x212   :  { %4730 = vmatpush1.bf16.msra.mxu0 %v15061_v0  ;;  %4690 = vmatprep.subr.bf16.mxu1 %v15692_v39  ;;  %v1206_v0 = vld [vmem:[#allocation3 + $0x1260] sm:$0xff]  ;;  %v691_v39 = vld [vmem:[#allocation3 + $0x248] sm:$0xff] }
 0x213   :  { %4731 = vmatprep.subr.bf16.mxu0 %v15182_v2  ;;  %v695_v2 = vld [vmem:[#allocation3 + $0x268] sm:$0xff]  ;;  %v15644_v4 = vcombine.high %v1202_v63, %v1206_v0  ;;  %v15643_v9 = vcombine.low %v1202_v63, %v1206_v0 }
 0x214   :  { %v15134_v5 = vcombine.high %v691_v39, %v695_v2  ;;  %v15133_v10 = vcombine.low %v691_v39, %v695_v2 }
 0x215   :  { %4691 = vmatpush2.bf16.msra.mxu1 %v15691_v26  ;;  %v1194_v26 = vld [vmem:[#allocation3 + $0x1200] sm:$0xff] }
 0x216   :  { %4732 = vmatpush2.bf16.msra.mxu0 %v15181_v6  ;;  %4692 = vmatprep.subr.bf16.mxu1 %v15684_v7  ;;  %v1198_v6 = vld [vmem:[#allocation3 + $0x1220] sm:$0xff]  ;;  %v683_v7 = vld [vmem:[#allocation3 + $0x208] sm:$0xff] }
 0x217   :  { %4733 = vmatprep.subr.bf16.mxu0 %v15174_v8  ;;  %v687_v8 = vld [vmem:[#allocation3 + $0x228] sm:$0xff]  ;;  %v15636_v12 = vcombine.high %v1194_v26, %v1198_v6  ;;  %v15635_v20 = vcombine.low %v1194_v26, %v1198_v6 }
 0x218   :  { %v15126_v13 = vcombine.high %v683_v7, %v687_v8  ;;  %v15125_v21 = vcombine.low %v683_v7, %v687_v8 }
 0x219   :  { %4693 = vmatpush2.bf16.msra.mxu1 %v15683_v14  ;;  %v803_v14 = vld [vmem:[#allocation3 + $0x5c8] sm:$0xff] }
 0x21a   :  { %4734 = vmatpush2.bf16.msra.mxu0 %v15173_v15  ;;  %4694 = vmatprep.subr.bf16.mxu1 %v15676_v16  ;;  %v807_v15 = vld [vmem:[#allocation3 + $0x5e8] sm:$0xff] }
 0x21b   :  { %4735 = vmatprep.subr.bf16.mxu0 %v15166_v18  ;;  %v931_v16 = vld [vmem:[#allocation3 + $0x9c8] sm:$0xff]  ;;  %v15246_v22 = vcombine.high %v803_v14, %v807_v15  ;;  %v15245_v38 = vcombine.low %v803_v14, %v807_v15 }
 0x21c   :  { %v935_v18 = vld [vmem:[#allocation3 + $0x9e8] sm:$0xff] }
 0x21d   :  { %4695 = vmatpush2.bf16.msra.mxu1 %v15675_v29  ;;  %v15374_v23 = vcombine.high %v931_v16, %v935_v18  ;;  %v795_v29 = vld [vmem:[#allocation3 + $0x588] sm:$0xff]  ;;  %v15373_v45 = vcombine.low %v931_v16, %v935_v18 }
 0x21e   :  { %4736 = vmatpush2.bf16.msra.mxu0 %v15165_v31  ;;  %4696 = vmatprep.subr.bf16.mxu1 %v15668_v32  ;;  %v799_v31 = vld [vmem:[#allocation3 + $0x5a8] sm:$0xff]  ;;  %v19487_v32 = vpack.c.bf16 %v19438_v36, %v19438_v36 }
 0x21f   :  { %4737 = vmatprep.subr.bf16.mxu0 %v15158_v33  ;;  %v923_v33 = vld [vmem:[#allocation3 + $0x988] sm:$0xff]  ;;  %v15238_v46 = vcombine.high %v795_v29, %v799_v31  ;;  %v15237_v36 = vcombine.low %v795_v29, %v799_v31 }
 0x220   :  { %v15365_v57 = vcombine.low %v923_v33, %v927_v37 }
 0x221   :  { %4697 = vmatpush2.bf16.msra.mxu1 %v15667_v50  ;;  %v15366_v50 = vcombine.high %v923_v33, %v927_v37 }
 0x222   :  { %4738 = vmatpush2.bf16.msra.mxu0 %v15157_v34  ;;  %4698 = vmatprep.subr.bf16.mxu1 %v15660_v52  ;;  %v787_v34 = vld [vmem:[#allocation3 + $0x548] sm:$0xff] }
 0x223   :  { %4739 = vmatprep.subr.bf16.mxu0 %v15150_v53  ;;  %v791_v52 = vld [vmem:[#allocation3 + $0x568] sm:$0xff] }
 0x224   :  { %v915_v53 = vld [vmem:[#allocation3 + $0x948] sm:$0xff]  ;;  %v15230_v55 = vcombine.high %v787_v34, %v791_v52  ;;  %v15229_v63 = vcombine.low %v787_v34, %v791_v52 }
 0x225   :  { %4699 = vmatpush2.bf16.msra.mxu1 %v15659_v19  ;;  %v15358_v59 = vcombine.high %v915_v53, %v919_v56  ;;  %v779_v19 = vld [vmem:[#allocation3 + $0x508] sm:$0xff]  ;;  %v15357_v0 = vcombine.low %v915_v53, %v919_v56 }
 0x226   :  { %4740 = vmatpush2.bf16.msra.mxu0 %v15149_v60  ;;  %4700 = vmatprep.subr.bf16.mxu1 %v15652_v61  ;;  %v783_v60 = vld [vmem:[#allocation3 + $0x528] sm:$0xff] }
 0x227   :  { %4741 = vmatprep.subr.bf16.mxu0 %v15142_v62  ;;  %v907_v61 = vld [vmem:[#allocation3 + $0x908] sm:$0xff]  ;;  %v15222_v39 = vcombine.high %v779_v19, %v783_v60  ;;  %v15221_v26 = vcombine.low %v779_v19, %v783_v60 }
 0x228   :  { %v911_v62 = vld [vmem:[#allocation3 + $0x928] sm:$0xff] }
 0x229   :  { %4701 = vmatpush2.bf16.msra.mxu1 %v15651_v17  ;;  %v15350_v2 = vcombine.high %v907_v61, %v911_v62  ;;  %v771_v17 = vld [vmem:[#allocation3 + $0x4c8] sm:$0xff]  ;;  %v15349_v6 = vcombine.low %v907_v61, %v911_v62 }
 0x22a   :  { %4742 = vmatpush2.bf16.msra.mxu0 %v15141_v3  ;;  %4702 = vmatprep.subr.bf16.mxu1 %v15644_v4  ;;  %v775_v3 = vld [vmem:[#allocation3 + $0x4e8] sm:$0xff] }
 0x22b   :  { %4743 = vmatprep.subr.bf16.mxu0 %v15134_v5  ;;  %v899_v4 = vld [vmem:[#allocation3 + $0x8c8] sm:$0xff]  ;;  %v15214_v7 = vcombine.high %v771_v17, %v775_v3  ;;  %v15213_v14 = vcombine.low %v771_v17, %v775_v3 }
 0x22c   :  { %v903_v5 = vld [vmem:[#allocation3 + $0x8e8] sm:$0xff] }
 0x22d   :  { %4703 = vmatpush2.bf16.msra.mxu1 %v15643_v9  ;;  %v15342_v8 = vcombine.high %v899_v4, %v903_v5  ;;  %v763_v9 = vld [vmem:[#allocation3 + $0x488] sm:$0xff]  ;;  %v15341_v15 = vcombine.low %v899_v4, %v903_v5 }
 0x22e   :  { %4744 = vmatpush2.bf16.msra.mxu0 %v15133_v10  ;;  %4704 = vmatprep.subr.bf16.mxu1 %v15636_v12  ;;  %v767_v10 = vld [vmem:[#allocation3 + $0x4a8] sm:$0xff] }
 0x22f   :  { %4745 = vmatprep.subr.bf16.mxu0 %v15126_v13  ;;  %v891_v12 = vld [vmem:[#allocation3 + $0x888] sm:$0xff]  ;;  %v15206_v16 = vcombine.high %v763_v9, %v767_v10  ;;  %v15205_v29 = vcombine.low %v763_v9, %v767_v10 }
 0x230   :  { %v895_v13 = vld [vmem:[#allocation3 + $0x8a8] sm:$0xff] }
 0x231   :  { %4705 = vmatpush2.bf16.msra.mxu1 %v15635_v20  ;;  %v15334_v18 = vcombine.high %v891_v12, %v895_v13  ;;  %v755_v20 = vld [vmem:[#allocation3 + $0x448] sm:$0xff]  ;;  %v15333_v31 = vcombine.low %v891_v12, %v895_v13 }
 0x232   :  { %4746 = vmatpush2.bf16.msra.mxu0 %v15125_v21  ;;  %4756 = vmatprep.subr.bf16.mxu1 %v15246_v22  ;;  %v759_v21 = vld [vmem:[#allocation3 + $0x468] sm:$0xff] }
 0x233   :  { %4797 = vmatprep.subr.bf16.mxu0 %v15374_v23  ;;  %v883_v22 = vld [vmem:[#allocation3 + $0x848] sm:$0xff]  ;;  %v15198_v33 = vcombine.high %v755_v20, %v759_v21  ;;  %v15197_v34 = vcombine.low %v755_v20, %v759_v21 }
 0x234   :  { %4707 = vmatmul.mubr.bf16.vlgmr.msra.gmra.mxu1 %v19487_v32  ;;  %v887_v23 = vld [vmem:[#allocation3 + $0x868] sm:$0xff] }
 0x235   :  { %4748 = vmatmul.mubr.bf16.vlgmr.msra.gmra.mxu0 %v19451_v49  ;;  %4757 = vmatpush1.bf16.msra.mxu1 %v15245_v38  ;;  %v15326_v37 = vcombine.high %v883_v22, %v887_v23  ;;  %v747_v38 = vld [vmem:[#allocation3 + $0x408] sm:$0xff]  ;;  %v15325_v52 = vcombine.low %v883_v22, %v887_v23 }
 0x236   :  { %4798 = vmatpush1.bf16.msra.mxu0 %v15373_v45  ;;  %4758 = vmatprep.subr.bf16.mxu1 %v15238_v46  ;;  %v751_v45 = vld [vmem:[#allocation3 + $0x428] sm:$0xff] }
 0x237   :  { %4799 = vmatprep.subr.bf16.mxu0 %v15366_v50  ;;  %4788 = vmatprep.mubr.bf16.mxu1 %v19445_v43  ;;  %v875_v46 = vld [vmem:[#allocation3 + $0x808] sm:$0xff]  ;;  %v15190_v53 = vcombine.high %v747_v38, %v751_v45  ;;  %v15189_v19 = vcombine.low %v747_v38, %v751_v45 }
 0x238   :  { %4829 = vmatprep.mubr.bf16.mxu0 %v19459_v48  ;;  %v879_v50 = vld [vmem:[#allocation3 + $0x828] sm:$0xff] }
 0x239   :  { %4759 = vmatpush1.bf16.msra.mxu1 %v15237_v36  ;;  %v15318_v56 = vcombine.high %v875_v46, %v879_v50  ;;  %v867_v36 = vld [vmem:[#allocation3 + $0x7c8] sm:$0xff]  ;;  %v15317_v60 = vcombine.low %v875_v46, %v879_v50 }
 0x23a   :  { %4800 = vmatpush1.bf16.msra.mxu0 %v15365_v57  ;;  %4760 = vmatprep.subr.bf16.mxu1 %v15230_v55  ;;  %v871_v57 = vld [vmem:[#allocation3 + $0x7e8] sm:$0xff] }
 0x23b   :  { %4801 = vmatprep.subr.bf16.mxu0 %v15358_v59  ;;  %v995_v55 = vld [vmem:[#allocation3 + $0xbc8] sm:$0xff]  ;;  %v15310_v61 = vcombine.high %v867_v36, %v871_v57  ;;  %v15309_v17 = vcombine.low %v867_v36, %v871_v57 }
 0x23c   :  { %v999_v59 = vld [vmem:[#allocation3 + $0xbe8] sm:$0xff] }
 0x23d   :  { %4761 = vmatpush1.bf16.msra.mxu1 %v15229_v63  ;;  %v15438_v62 = vcombine.high %v995_v55, %v999_v59  ;;  %v859_v63 = vld [vmem:[#allocation3 + $0x788] sm:$0xff]  ;;  %v15437_v3 = vcombine.low %v995_v55, %v999_v59 }
 0x23e   :  { %4802 = vmatpush1.bf16.msra.mxu0 %v15357_v0  ;;  %4762 = vmatprep.subr.bf16.mxu1 %v15222_v39  ;;  %v863_v0 = vld [vmem:[#allocation3 + $0x7a8] sm:$0xff] }
 0x23f   :  { %4803 = vmatprep.subr.bf16.mxu0 %v15350_v2  ;;  %v987_v39 = vld [vmem:[#allocation3 + $0xb88] sm:$0xff]  ;;  %v15302_v4 = vcombine.high %v859_v63, %v863_v0  ;;  %v15301_v9 = vcombine.low %v859_v63, %v863_v0 }
 0x240   :  { %v991_v2 = vld [vmem:[#allocation3 + $0xba8] sm:$0xff] }
 0x241   :  { %4763 = vmatpush1.bf16.msra.mxu1 %v15221_v26  ;;  %v15430_v5 = vcombine.high %v987_v39, %v991_v2  ;;  %v851_v26 = vld [vmem:[#allocation3 + $0x748] sm:$0xff]  ;;  %v15429_v10 = vcombine.low %v987_v39, %v991_v2 }
 0x242   :  { %4804 = vmatpush1.bf16.msra.mxu0 %v15349_v6  ;;  %4764 = vmatprep.subr.bf16.mxu1 %v15214_v7  ;;  %v855_v6 = vld [vmem:[#allocation3 + $0x768] sm:$0xff] }
 0x243   :  { %4805 = vmatprep.subr.bf16.mxu0 %v15342_v8  ;;  %v979_v7 = vld [vmem:[#allocation3 + $0xb48] sm:$0xff]  ;;  %v15294_v12 = vcombine.high %v851_v26, %v855_v6  ;;  %v15293_v20 = vcombine.low %v851_v26, %v855_v6 }
 0x244   :  { %v983_v8 = vld [vmem:[#allocation3 + $0xb68] sm:$0xff] }
 0x245   :  { %4765 = vmatpush1.bf16.msra.mxu1 %v15213_v14  ;;  %v15422_v13 = vcombine.high %v979_v7, %v983_v8  ;;  %v843_v14 = vld [vmem:[#allocation3 + $0x708] sm:$0xff]  ;;  %v15421_v21 = vcombine.low %v979_v7, %v983_v8 }
 0x246   :  { %4806 = vmatpush1.bf16.msra.mxu0 %v15341_v15  ;;  %4766 = vmatprep.subr.bf16.mxu1 %v15206_v16  ;;  %v847_v15 = vld [vmem:[#allocation3 + $0x728] sm:$0xff] }
 0x247   :  { %4807 = vmatprep.subr.bf16.mxu0 %v15334_v18  ;;  %v971_v16 = vld [vmem:[#allocation3 + $0xb08] sm:$0xff]  ;;  %v15286_v22 = vcombine.high %v843_v14, %v847_v15  ;;  %v15285_v38 = vcombine.low %v843_v14, %v847_v15 }
 0x248   :  { %v975_v18 = vld [vmem:[#allocation3 + $0xb28] sm:$0xff] }
 0x249   :  { %4767 = vmatpush1.bf16.msra.mxu1 %v15205_v29  ;;  %v15414_v23 = vcombine.high %v971_v16, %v975_v18  ;;  %v835_v29 = vld [vmem:[#allocation3 + $0x6c8] sm:$0xff]  ;;  %v15413_v45 = vcombine.low %v971_v16, %v975_v18 }
 0x24a   :  { %4808 = vmatpush1.bf16.msra.mxu0 %v15333_v31  ;;  %4768 = vmatprep.subr.bf16.mxu1 %v15198_v33  ;;  %v839_v31 = vld [vmem:[#allocation3 + $0x6e8] sm:$0xff] }
 0x24b   :  { %4809 = vmatprep.subr.bf16.mxu0 %v15326_v37  ;;  %v963_v33 = vld [vmem:[#allocation3 + $0xac8] sm:$0xff]  ;;  %v15278_v46 = vcombine.high %v835_v29, %v839_v31  ;;  %v15277_v36 = vcombine.low %v835_v29, %v839_v31 }
 0x24c   :  { %v967_v37 = vld [vmem:[#allocation3 + $0xae8] sm:$0xff] }
 0x24d   :  { %4769 = vmatpush1.bf16.msra.mxu1 %v15197_v34  ;;  %v15406_v50 = vcombine.high %v963_v33, %v967_v37  ;;  %v827_v34 = vld [vmem:[#allocation3 + $0x688] sm:$0xff]  ;;  %v15405_v57 = vcombine.low %v963_v33, %v967_v37 }
 0x24e   :  { %4810 = vmatpush1.bf16.msra.mxu0 %v15325_v52  ;;  %4770 = vmatprep.subr.bf16.mxu1 %v15190_v53  ;;  %v831_v52 = vld [vmem:[#allocation3 + $0x6a8] sm:$0xff] }
 0x24f   :  { %4811 = vmatprep.subr.bf16.mxu0 %v15318_v56  ;;  %v955_v53 = vld [vmem:[#allocation3 + $0xa88] sm:$0xff]  ;;  %v15270_v55 = vcombine.high %v827_v34, %v831_v52  ;;  %v15269_v63 = vcombine.low %v827_v34, %v831_v52 }
 0x250   :  { %v959_v56 = vld [vmem:[#allocation3 + $0xaa8] sm:$0xff] }
 0x251   :  { %4771 = vmatpush1.bf16.msra.mxu1 %v15189_v19  ;;  %v15398_v59 = vcombine.high %v955_v53, %v959_v56  ;;  %v819_v19 = vld [vmem:[#allocation3 + $0x648] sm:$0xff]  ;;  %v15397_v0 = vcombine.low %v955_v53, %v959_v56 }
 0x252   :  { %4812 = vmatpush1.bf16.msra.mxu0 %v15317_v60  ;;  %4772 = vmatprep.subr.bf16.mxu1 %v15310_v61  ;;  %v823_v60 = vld [vmem:[#allocation3 + $0x668] sm:$0xff] }
 0x253   :  { %4813 = vmatprep.subr.bf16.mxu0 %v15438_v62  ;;  %v947_v61 = vld [vmem:[#allocation3 + $0xa48] sm:$0xff]  ;;  %v15262_v39 = vcombine.high %v819_v19, %v823_v60  ;;  %v15261_v26 = vcombine.low %v819_v19, %v823_v60 }
 0x254   :  { %v951_v62 = vld [vmem:[#allocation3 + $0xa68] sm:$0xff] }
 0x255   :  { %4773 = vmatpush2.bf16.msra.mxu1 %v15309_v17  ;;  %v15390_v2 = vcombine.high %v947_v61, %v951_v62  ;;  %v811_v17 = vld [vmem:[#allocation3 + $0x608] sm:$0xff]  ;;  %v15389_v6 = vcombine.low %v947_v61, %v951_v62 }
 0x256   :  { %4814 = vmatpush2.bf16.msra.mxu0 %v15437_v3  ;;  %4774 = vmatprep.subr.bf16.mxu1 %v15302_v4  ;;  %v815_v3 = vld [vmem:[#allocation3 + $0x628] sm:$0xff] }
 0x257   :  { %4815 = vmatprep.subr.bf16.mxu0 %v15430_v5  ;;  %v939_v4 = vld [vmem:[#allocation3 + $0xa08] sm:$0xff]  ;;  %v15254_v7 = vcombine.high %v811_v17, %v815_v3  ;;  %v15253_v14 = vcombine.low %v811_v17, %v815_v3 }
 0x258   :  { %v943_v5 = vld [vmem:[#allocation3 + $0xa28] sm:$0xff] }
 0x259   :  { %4775 = vmatpush2.bf16.msra.mxu1 %v15301_v9  ;;  %v15382_v8 = vcombine.high %v939_v4, %v943_v5  ;;  %v1059_v9 = vld [vmem:[#allocation3 + $0xdc8] sm:$0xff]  ;;  %v15381_v15 = vcombine.low %v939_v4, %v943_v5 }
 0x25a   :  { %4816 = vmatpush2.bf16.msra.mxu0 %v15429_v10  ;;  %4776 = vmatprep.subr.bf16.mxu1 %v15294_v12  ;;  %v1063_v10 = vld [vmem:[#allocation3 + $0xde8] sm:$0xff] }
 0x25b   :  { %4817 = vmatprep.subr.bf16.mxu0 %v15422_v13  ;;  %v1187_v12 = vld [vmem:[#allocation3 + $0x11c8] sm:$0xff]  ;;  %v15502_v18 = vcombine.high %v1059_v9, %v1063_v10  ;;  %v15501_v33 = vcombine.low %v1059_v9, %v1063_v10 }
 0x25c   :  { %v1191_v13 = vld [vmem:[#allocation3 + $0x11e8] sm:$0xff] }
 0x25d   :  { %4777 = vmatpush2.bf16.msra.mxu1 %v15293_v20  ;;  %v1268_v16 = vld [vmem:[#allocation15 + $0xa] sm:$0xff]  ;;  %v15630_v20 = vcombine.high %v1187_v12, %v1191_v13  ;;  %v15629_v37 = vcombine.low %v1187_v12, %v1191_v13 }
 0x25e   :  { %4818 = vmatpush2.bf16.msra.mxu0 %v15421_v21  ;;  %4778 = vmatprep.subr.bf16.mxu1 %v15286_v22  ;;  %v1051_v21 = vld [vmem:[#allocation3 + $0xd88] sm:$0xff]  ;;  %v1273_v31 = vrot.slane %v1268_v16, %v19383_v25 }
 0x25f   :  { %4819 = vmatprep.subr.bf16.mxu0 %v15414_v23  ;;  %v1055_v22 = vld [vmem:[#allocation3 + $0xda8] sm:$0xff] }
 0x260   :  { %v1179_v23 = vld [vmem:[#allocation3 + $0x1188] sm:$0xff] }
 0x261   :  { %4779 = vmatpush2.bf16.msra.mxu1 %v15285_v38  ;;  %v1183_v29 = vld [vmem:[#allocation3 + $0x11a8] sm:$0xff]  ;;  %v15494_v38 = vcombine.high %v1051_v21, %v1055_v22 }
 0x262   :  { %4820 = vmatpush2.bf16.msra.mxu0 %v15413_v45  ;;  %4780 = vmatprep.subr.bf16.mxu1 %v15278_v46  ;;  %v1277_v45 = vrot.slane %v1268_v16, %v19386_v27  ;;  %v15622_v46 = vcombine.high %v1179_v23, %v1183_v29  ;;  %v1047_v34 = vld [vmem:[#allocation3 + $0xd68] sm:$0xff]  ;;  %v15621_v19 = vcombine.low %v1179_v23, %v1183_v29 }
 0x263   :  { %4821 = vmatprep.subr.bf16.mxu0 %v15406_v50  ;;  %v1043_v50 = vld [vmem:[#allocation3 + $0xd48] sm:$0xff] }
 0x264   :  { %v1171_v53 = vld [vmem:[#allocation3 + $0x1148] sm:$0xff]  ;;  %v15486_v60 = vcombine.high %v1043_v50, %v1047_v34 }
 0x265   :  { %4781 = vmatpush2.bf16.msra.mxu1 %v15277_v36  ;;  %v1175_v56 = vld [vmem:[#allocation3 + $0x1168] sm:$0xff] }
 0x266   :  { %4822 = vmatpush2.bf16.msra.mxu0 %v15405_v57  ;;  %4782 = vmatprep.subr.bf16.mxu1 %v15270_v55  ;;  %v15493_v55 = vcombine.low %v1051_v21, %v1055_v22  ;;  %v1163_v3 = vld [vmem:[#allocation3 + $0x1108] sm:$0xff] }
 0x267   :  { %4823 = vmatprep.subr.bf16.mxu0 %v15398_v59  ;;  %v1167_v4 = vld [vmem:[#allocation3 + $0x1128] sm:$0xff] }
 0x268   :  { %v15606_v12 = vcombine.high %v1163_v3, %v1167_v4  ;;  %v1027_v13 = vld [vmem:[#allocation3 + $0xcc8] sm:$0xff] }
 0x269   :  { %4783 = vmatpush2.bf16.msra.mxu1 %v15269_v63  ;;  %v1159_v16 = vld [vmem:[#allocation3 + $0x10e8] sm:$0xff] }
 0x26a   :  { %4824 = vmatpush2.bf16.msra.mxu0 %v15397_v0  ;;  %4784 = vmatprep.subr.bf16.mxu1 %v15262_v39  ;;  %v15614_v0 = vcombine.high %v1171_v53, %v1175_v56  ;;  %v1035_v39 = vld [vmem:[#allocation3 + $0xd08] sm:$0xff] }
 0x26b   :  { %4825 = vmatprep.subr.bf16.mxu0 %v15390_v2  ;;  %v1039_v2 = vld [vmem:[#allocation3 + $0xd28] sm:$0xff] }
 0x26c   :  { %v15478_v9 = vcombine.high %v1035_v39, %v1039_v2  ;;  %v1019_v23 = vld [vmem:[#allocation3 + $0xc88] sm:$0xff] }
 0x26d   :  { %4785 = vmatpush2.bf16.msra.mxu1 %v15261_v26  ;;  %v1023_v29 = vld [vmem:[#allocation3 + $0xca8] sm:$0xff] }
 0x26e   :  { %4826 = vmatpush2.bf16.msra.mxu0 %v15389_v6  ;;  %4786 = vmatprep.subr.bf16.mxu1 %v15254_v7  ;;  %v15485_v6 = vcombine.low %v1043_v50, %v1047_v34  ;;  %v1011_v50 = vld [vmem:[#allocation3 + $0xc48] sm:$0xff] }
 0x26f   :  { %4827 = vmatprep.subr.bf16.mxu0 %v15382_v8  ;;  %v15613_v8 = vcombine.low %v1171_v53, %v1175_v56  ;;  %v1015_v34 = vld [vmem:[#allocation3 + $0xc68] sm:$0xff]  ;;  %v15461_v56 = vcombine.low %v1019_v23, %v1023_v29 }
 0x270   :  { %v1143_v53 = vld [vmem:[#allocation3 + $0x1068] sm:$0xff] }
 0x271   :  { %4787 = vmatpush2.bf16.msra.mxu1 %v15253_v14  ;;  %v1031_v14 = vld [vmem:[#allocation3 + $0xce8] sm:$0xff] }
 0x272   :  { %4828 = vmatpush2.bf16.msra.mxu0 %v15381_v15  ;;  %4838 = vmatprep.subr.bf16.mxu1 %v15502_v18  ;;  %v1155_v15 = vld [vmem:[#allocation3 + $0x10c8] sm:$0xff]  ;;  %v15477_v18 = vcombine.low %v1035_v39, %v1039_v2  ;;  %v15470_v21 = vcombine.high %v1027_v13, %v1031_v14 }
 0x273   :  { %4879 = vmatprep.subr.bf16.mxu0 %v15630_v20  ;;  %v4544_v52 = vpop.f32.mrf.mxu1  ;;  %v15605_v20 = vcombine.low %v1163_v3, %v1167_v4  ;;  %v15598_v22 = vcombine.high %v1155_v15, %v1159_v16  ;;  %v1127_v3 = vld [vmem:[#allocation3 + $0xfe8] sm:$0xff] }
 0x274   :  { %4789 = vmatmul.mubr.bf16.vlgmr.msra.gmra.mxu1 %v19455_v51  ;;  %v4545_v36 = vadd.f32 %v4544_v52, %v1273_v31  ;;  %v1147_v31 = vld [vmem:[#allocation3 + $0x1088] sm:$0xff] }
 0x275   :  { %v4585_v57 = vpop.f32.mrf.mxu0  ;;  %4830 = vmatmul.mubr.bf16.vlgmr.msra.gmra.mxu0 %v19471_v44  ;;  %4839 = vmatpush1.bf16.msra.mxu1 %v15501_v33  ;;  %v4546_v59 = vpop.f32.mrf.mxu1  ;;  %v1151_v33 = vld [vmem:[#allocation3 + $0x10a8] sm:$0xff] }
 0x276   :  { %4880 = vmatpush1.bf16.msra.mxu0 %v15629_v37  ;;  %4840 = vmatprep.subr.bf16.mxu1 %v15494_v38  ;;  %v19497_v61 = vadd.f32 %v4585_v57, %v4545_v36  ;;  %v4547_v62 = vadd.f32 %v4546_v59, %v1277_v45  ;;  %v15469_v37 = vcombine.low %v1027_v13, %v1031_v14  ;;  %v1139_v52 = vld [vmem:[#allocation3 + $0x1048] sm:$0xff] }
 0x277   :  { %v4587_v63 = vpop.f32.mrf.mxu0  ;;  %4881 = vmatprep.subr.bf16.mxu0 %v15622_v46  ;;  %4870 = vmatprep.mubr.bf16.mxu1 %v19464_v58  ;;  %v4548_v17 = vpop.f32.mrf.mxu1  ;;  %v15597_v38 = vcombine.low %v1155_v15, %v1159_v16  ;;  %v15462_v45 = vcombine.high %v1019_v23, %v1023_v29  ;;  %v15590_v46 = vcombine.high %v1147_v31, %v1151_v33  ;;  %v1003_v59 = vld [vmem:[#allocation3 + $0xc08] sm:$0xff] }
 0x278   :  { %4911 = vmatprep.mubr.bf16.mxu0 %v19479_v11  ;;  %v19501_v5 = vadd.f32 %v4587_v63, %v4547_v62  ;;  %v15589_v36 = vcombine.low %v1147_v31, %v1151_v33  ;;  %v15454_v57 = vcombine.high %v1011_v50, %v1015_v34  ;;  %v1135_v62 = vld [vmem:[#allocation3 + $0x1028] sm:$0xff]  ;;  %v15453_v63 = vcombine.low %v1011_v50, %v1015_v34 }
 0x279   :  { %v4589_v26 = vpop.f32.mrf.mxu0  ;;  %4841 = vmatpush1.bf16.msra.mxu1 %v15493_v55  ;;  %v4549_v7 = vpop.f32.mrf.mxu1  ;;  %v15582_v55 = vcombine.high %v1139_v52, %v1143_v53  ;;  %v1123_v17 = vld [vmem:[#allocation3 + $0xfc8] sm:$0xff] }
 0x27a   :  { %4882 = vmatpush1.bf16.msra.mxu0 %v15621_v19  ;;  %4842 = vmatprep.subr.bf16.mxu1 %v15486_v60  ;;  %v1007_v19 = vld [vmem:[#allocation3 + $0xc28] sm:$0xff]  ;;  %v15565_v15 = vcombine.low %v1123_v17, %v1127_v3 }
 0x27b   :  { %v4590_v10 = vpop.f32.mrf.mxu0  ;;  %4883 = vmatprep.subr.bf16.mxu0 %v15614_v0  ;;  %v1131_v60 = vld [vmem:[#allocation3 + $0x1008] sm:$0xff]  ;;  %v15581_v0 = vcombine.low %v1139_v52, %v1143_v53  ;;  %v15446_v39 = vcombine.high %v1003_v59, %v1007_v19 }
 0x27c   :  { %v15574_v2 = vcombine.high %v1131_v60, %v1135_v62  ;;  %v1251_v4 = vld [vmem:[#allocation3 + $0x13c8] sm:$0xff]  ;;  %v15573_v7 = vcombine.low %v1131_v60, %v1135_v62 }
 0x27d   :  { %4843 = vmatpush1.bf16.msra.mxu1 %v15485_v6  ;;  %v1255_v26 = vld [vmem:[#allocation3 + $0x13e8] sm:$0xff]  ;;  %v15445_v6 = vcombine.low %v1003_v59, %v1007_v19 }
 0x27e   :  { %4884 = vmatpush1.bf16.msra.mxu0 %v15613_v8  ;;  %4844 = vmatprep.subr.bf16.mxu1 %v15478_v9  ;;  %v15566_v8 = vcombine.high %v1123_v17, %v1127_v3  ;;  %v15694_v9 = vcombine.high %v1251_v4, %v1255_v26  ;;  %v1115_v10 = vld [vmem:[#allocation3 + $0xf88] sm:$0xff]  ;;  %v15693_v16 = vcombine.low %v1251_v4, %v1255_v26 }
 0x27f   :  { %4885 = vmatprep.subr.bf16.mxu0 %v15606_v12  ;;  %v1119_v12 = vld [vmem:[#allocation3 + $0xfa8] sm:$0xff] }
 0x280   :  { %v1243_v13 = vld [vmem:[#allocation3 + $0x1388] sm:$0xff]  ;;  %v15557_v31 = vcombine.low %v1115_v10, %v1119_v12 }
 0x281   :  { %4845 = vmatpush1.bf16.msra.mxu1 %v15477_v18  ;;  %v1247_v14 = vld [vmem:[#allocation3 + $0x13a8] sm:$0xff]  ;;  %v15558_v18 = vcombine.high %v1115_v10, %v1119_v12 }
 0x282   :  { %4886 = vmatpush1.bf16.msra.mxu0 %v15605_v20  ;;  %4846 = vmatprep.subr.bf16.mxu1 %v15470_v21  ;;  %v15686_v20 = vcombine.high %v1243_v13, %v1247_v14  ;;  %v1107_v21 = vld [vmem:[#allocation3 + $0xf48] sm:$0xff]  ;;  %v15685_v33 = vcombine.low %v1243_v13, %v1247_v14 }
 0x283   :  { %4887 = vmatprep.subr.bf16.mxu0 %v15598_v22  ;;  %v1111_v22 = vld [vmem:[#allocation3 + $0xf68] sm:$0xff] }
 0x284   :  { %v1235_v23 = vld [vmem:[#allocation3 + $0x1348] sm:$0xff]  ;;  %v15549_v52 = vcombine.low %v1107_v21, %v1111_v22 }
 0x285   :  { %4847 = vmatpush1.bf16.msra.mxu1 %v15469_v37  ;;  %v1239_v29 = vld [vmem:[#allocation3 + $0x1368] sm:$0xff]  ;;  %v15550_v37 = vcombine.high %v1107_v21, %v1111_v22 }
 0x286   :  { %4888 = vmatpush1.bf16.msra.mxu0 %v15597_v38  ;;  %4848 = vmatprep.subr.bf16.mxu1 %v15462_v45  ;;  %v15678_v38 = vcombine.high %v1235_v23, %v1239_v29  ;;  %v1099_v45 = vld [vmem:[#allocation3 + $0xf08] sm:$0xff]  ;;  %v15677_v53 = vcombine.low %v1235_v23, %v1239_v29 }
 0x287   :  { %4889 = vmatprep.subr.bf16.mxu0 %v15590_v46  ;;  %v1103_v46 = vld [vmem:[#allocation3 + $0xf28] sm:$0xff] }
 0x288   :  { %v1227_v50 = vld [vmem:[#allocation3 + $0x1308] sm:$0xff]  ;;  %v15541_v60 = vcombine.low %v1099_v45, %v1103_v46 }
 0x289   :  { %4849 = vmatpush1.bf16.msra.mxu1 %v15461_v56  ;;  %v1231_v34 = vld [vmem:[#allocation3 + $0x1328] sm:$0xff]  ;;  %v15542_v56 = vcombine.high %v1099_v45, %v1103_v46  ;;  %v804_v45 = vld [vmem:[#allocation3 + $0x5d0] sm:$0xff] }
 0x28a   :  { %4890 = vmatpush1.bf16.msra.mxu0 %v15589_v36  ;;  %4850 = vmatprep.subr.bf16.mxu1 %v15454_v57  ;;  %v15670_v36 = vcombine.high %v1227_v50, %v1231_v34  ;;  %v1091_v57 = vld [vmem:[#allocation3 + $0xec8] sm:$0xff]  ;;  %v15669_v62 = vcombine.low %v1227_v50, %v1231_v34  ;;  %v808_v46 = vld [vmem:[#allocation3 + $0x5f0] sm:$0xff] }
 0x28b   :  { %4891 = vmatprep.subr.bf16.mxu0 %v15582_v55  ;;  %v1095_v55 = vld [vmem:[#allocation3 + $0xee8] sm:$0xff] }
 0x28c   :  { %v1219_v59 = vld [vmem:[#allocation3 + $0x12c8] sm:$0xff]  ;;  %v15533_v4 = vcombine.low %v1091_v57, %v1095_v55 }
 0x28d   :  { %4851 = vmatpush1.bf16.msra.mxu1 %v15453_v63  ;;  %v1223_v19 = vld [vmem:[#allocation3 + $0x12e8] sm:$0xff]  ;;  %v15534_v63 = vcombine.high %v1091_v57, %v1095_v55  ;;  %v796_v57 = vld [vmem:[#allocation3 + $0x590] sm:$0xff] }
 0x28e   :  { %4892 = vmatpush1.bf16.msra.mxu0 %v15581_v0  ;;  %4852 = vmatprep.subr.bf16.mxu1 %v15446_v39  ;;  %v15662_v0 = vcombine.high %v1219_v59, %v1223_v19  ;;  %v1083_v39 = vld [vmem:[#allocation3 + $0xe88] sm:$0xff]  ;;  %v15661_v26 = vcombine.low %v1219_v59, %v1223_v19  ;;  %v800_v55 = vld [vmem:[#allocation3 + $0x5b0] sm:$0xff]  ;;  %v15247_v19 = vcombine.low %v804_v45, %v808_v46 }
 0x28f   :  { %4893 = vmatprep.subr.bf16.mxu0 %v15574_v2  ;;  %v1087_v2 = vld [vmem:[#allocation3 + $0xea8] sm:$0xff] }
 0x290   :  { %v1211_v17 = vld [vmem:[#allocation3 + $0x1288] sm:$0xff]  ;;  %v15525_v13 = vcombine.low %v1083_v39, %v1087_v2 }
 0x291   :  { %4853 = vmatpush1.bf16.msra.mxu1 %v15445_v6  ;;  %v1215_v3 = vld [vmem:[#allocation3 + $0x12a8] sm:$0xff]  ;;  %v15526_v6 = vcombine.high %v1083_v39, %v1087_v2  ;;  %v788_v2 = vld [vmem:[#allocation3 + $0x550] sm:$0xff] }
 0x292   :  { %4894 = vmatpush1.bf16.msra.mxu0 %v15573_v7  ;;  %4854 = vmatprep.subr.bf16.mxu1 %v15566_v8  ;;  %v15654_v7 = vcombine.high %v1211_v17, %v1215_v3  ;;  %v1075_v8 = vld [vmem:[#allocation3 + $0xe48] sm:$0xff]  ;;  %v15653_v14 = vcombine.low %v1211_v17, %v1215_v3  ;;  %v792_v17 = vld [vmem:[#allocation3 + $0x570] sm:$0xff] }
 0x293   :  { %4895 = vmatprep.subr.bf16.mxu0 %v15694_v9  ;;  %v1079_v9 = vld [vmem:[#allocation3 + $0xe68] sm:$0xff] }
 0x294   :  { %v1203_v10 = vld [vmem:[#allocation3 + $0x1248] sm:$0xff]  ;;  %v15517_v23 = vcombine.low %v1075_v8, %v1079_v9 }
 0x295   :  { %4855 = vmatpush2.bf16.msra.mxu1 %v15565_v15  ;;  %v1207_v12 = vld [vmem:[#allocation3 + $0x1268] sm:$0xff]  ;;  %v15518_v15 = vcombine.high %v1075_v8, %v1079_v9 }
 0x296   :  { %4896 = vmatpush2.bf16.msra.mxu0 %v15693_v16  ;;  %4856 = vmatprep.subr.bf16.mxu1 %v15558_v18  ;;  %v15646_v16 = vcombine.high %v1203_v10, %v1207_v12  ;;  %v1067_v18 = vld [vmem:[#allocation3 + $0xe08] sm:$0xff]  ;;  %v15645_v29 = vcombine.low %v1203_v10, %v1207_v12 }
 0x297   :  { %4897 = vmatprep.subr.bf16.mxu0 %v15686_v20  ;;  %v1071_v20 = vld [vmem:[#allocation3 + $0xe28] sm:$0xff] }
 0x298   :  { %v1195_v21 = vld [vmem:[#allocation3 + $0x1208] sm:$0xff]  ;;  %v15509_v50 = vcombine.low %v1067_v18, %v1071_v20 }
 0x299   :  { %4857 = vmatpush2.bf16.msra.mxu1 %v15557_v31  ;;  %v1199_v22 = vld [vmem:[#allocation3 + $0x1228] sm:$0xff]  ;;  %v15510_v31 = vcombine.high %v1067_v18, %v1071_v20  ;;  %v784_v18 = vld [vmem:[#allocation3 + $0x530] sm:$0xff] }
 0x29a   :  { %4898 = vmatpush2.bf16.msra.mxu0 %v15685_v33  ;;  %4858 = vmatprep.subr.bf16.mxu1 %v15550_v37  ;;  %v15638_v33 = vcombine.high %v1195_v21, %v1199_v22  ;;  %v676_v37 = vld [vmem:[#allocation3 + $0x1d0] sm:$0xff]  ;;  %v15637_v34 = vcombine.low %v1195_v21, %v1199_v22 }
 0x29b   :  { %4899 = vmatprep.subr.bf16.mxu0 %v15678_v38  ;;  %v680_v38 = vld [vmem:[#allocation3 + $0x1f0] sm:$0xff] }
 0x29c   :  { %v15119_v59 = vcombine.low %v676_v37, %v680_v38 }
 0x29d   :  { %4859 = vmatpush2.bf16.msra.mxu1 %v15549_v52  ;;  %v15120_v52 = vcombine.high %v676_v37, %v680_v38  ;;  %v644_v37 = vld [vmem:[#allocation3 + $0xd0] sm:$0xff] }
 0x29e   :  { %4900 = vmatpush2.bf16.msra.mxu0 %v15677_v53  ;;  %4860 = vmatprep.subr.bf16.mxu1 %v15542_v56  ;;  %v15248_v53 = vcombine.high %v804_v45, %v808_v46  ;;  %v668_v56 = vld [vmem:[#allocation3 + $0x190] sm:$0xff] }
 0x29f   :  { %4901 = vmatprep.subr.bf16.mxu0 %v15670_v36  ;;  %v672_v36 = vld [vmem:[#allocation3 + $0x1b0] sm:$0xff] }
 0x2a0   :  { %v648_v38 = vld [vmem:[#allocation3 + $0xf0] sm:$0xff] }
 0x2a1   :  { %4861 = vmatpush2.bf16.msra.mxu1 %v15541_v60  ;;  %v15112_v60 = vcombine.high %v668_v56, %v672_v36  ;;  %v772_v45 = vld [vmem:[#allocation3 + $0x4d0] sm:$0xff] }
 0x2a2   :  { %4902 = vmatpush2.bf16.msra.mxu0 %v15669_v62  ;;  %4862 = vmatprep.subr.bf16.mxu1 %v15534_v63  ;;  %v15240_v62 = vcombine.high %v796_v57, %v800_v55  ;;  %v660_v63 = vld [vmem:[#allocation3 + $0x150] sm:$0xff] }
 0x2a3   :  { %4903 = vmatprep.subr.bf16.mxu0 %v15662_v0  ;;  %v664_v0 = vld [vmem:[#allocation3 + $0x170] sm:$0xff] }
 0x2a4   :  { %v15104_v8 = vcombine.high %v660_v63, %v664_v0  ;;  %v15103_v22 = vcombine.low %v660_v63, %v664_v0  ;;  %v776_v46 = vld [vmem:[#allocation3 + $0x4f0] sm:$0xff] }
 0x2a5   :  { %4863 = vmatpush2.bf16.msra.mxu1 %v15533_v4  ;;  %v628_v63 = vld [vmem:[#allocation3 + $0x50] sm:$0xff] }
 0x2a6   :  { %4904 = vmatpush2.bf16.msra.mxu0 %v15661_v26  ;;  %4864 = vmatprep.subr.bf16.mxu1 %v15526_v6  ;;  %v15111_v26 = vcombine.low %v668_v56, %v672_v36  ;;  %v636_v56 = vld [vmem:[#allocation3 + $0x90] sm:$0xff] }
 0x2a7   :  { %4905 = vmatprep.subr.bf16.mxu0 %v15654_v7  ;;  %v15239_v7 = vcombine.low %v796_v57, %v800_v55  ;;  %v640_v36 = vld [vmem:[#allocation3 + $0xb0] sm:$0xff] }
 0x2a8   :  { %v764_v57 = vld [vmem:[#allocation3 + $0x490] sm:$0xff] }
 0x2a9   :  { %4865 = vmatpush2.bf16.msra.mxu1 %v15525_v13  ;;  %v15232_v13 = vcombine.high %v788_v2, %v792_v17  ;;  %v768_v55 = vld [vmem:[#allocation3 + $0x4b0] sm:$0xff] }
 0x2aa   :  { %4906 = vmatpush2.bf16.msra.mxu0 %v15653_v14  ;;  %4866 = vmatprep.subr.bf16.mxu1 %v15518_v15  ;;  %v652_v14 = vld [vmem:[#allocation3 + $0x110] sm:$0xff] }
 0x2ab   :  { %4907 = vmatprep.subr.bf16.mxu0 %v15646_v16  ;;  %v656_v15 = vld [vmem:[#allocation3 + $0x130] sm:$0xff] }
 0x2ac   :  { %v780_v16 = vld [vmem:[#allocation3 + $0x510] sm:$0xff] }
 0x2ad   :  { %4867 = vmatpush2.bf16.msra.mxu1 %v15517_v23  ;;  %v632_v0 = vld [vmem:[#allocation3 + $0x70] sm:$0xff] }
 0x2ae   :  { %4908 = vmatpush2.bf16.msra.mxu0 %v15645_v29  ;;  %4868 = vmatprep.subr.bf16.mxu1 %v15510_v31  ;;  %v15096_v29 = vcombine.high %v652_v14, %v656_v15 }
 0x2af   :  { %4909 = vmatprep.subr.bf16.mxu0 %v15638_v33  ;;  %v15224_v33 = vcombine.high %v780_v16, %v784_v18 }
 0x2b1   :  { %4869 = vmatpush2.bf16.msra.mxu1 %v15509_v50  ;;  %v15095_v50 = vcombine.low %v652_v14, %v656_v15 }
 0x2b2   :  { %4910 = vmatpush2.bf16.msra.mxu0 %v15637_v34  ;;  %4920 = vmatprep.subr.bf16.mxu1 %v15120_v52  ;;  %v15223_v34 = vcombine.low %v780_v16, %v784_v18  ;;  %v15088_v52 = vcombine.high %v644_v37, %v648_v38  ;;  %v744_v16 = vld [vmem:[#allocation3 + $0x3f0] sm:$0xff] }
 0x2b3   :  { %4961 = vmatprep.subr.bf16.mxu0 %v15248_v53  ;;  %v15216_v53 = vcombine.high %v772_v45, %v776_v46  ;;  %v868_v18 = vld [vmem:[#allocation3 + $0x7d0] sm:$0xff] }
 0x2b4   :  { %v4626_v39 = vpop.f32.mrf.mxu1  ;;  %4871 = vmatmul.mubr.bf16.vlgmr.msra.gmra.mxu1 %v19475_v47 }
 0x2b5   :  { %v4627_v3 = vadd.f32 %v4626_v39, %v19497_v61  ;;  %v4667_v4 = vpop.f32.mrf.mxu0  ;;  %4912 = vmatmul.mubr.bf16.vlgmr.msra.gmra.mxu0 %v19487_v32  ;;  %4921 = vmatpush1.bf16.msra.mxu1 %v15119_v59  ;;  %v15087_v59 = vcombine.low %v644_v37, %v648_v38  ;;  %v756_v39 = vld [vmem:[#allocation3 + $0x450] sm:$0xff] }
 0x2b6   :  { %4962 = vmatpush1.bf16.msra.mxu0 %v15247_v19  ;;  %v4628_v6 = vpop.f32.mrf.mxu1  ;;  %4922 = vmatprep.subr.bf16.mxu1 %v15112_v60  ;;  %v15215_v19 = vcombine.low %v772_v45, %v776_v46  ;;  %v15080_v60 = vcombine.high %v636_v56, %v640_v36  ;;  %v860_v37 = vld [vmem:[#allocation3 + $0x790] sm:$0xff] }
 0x2b7   :  { %v19506_v9 = vadd.f32 %v4667_v4, %v4627_v3  ;;  %v4629_v10 = vadd.f32 %v4628_v6, %v19501_v5  ;;  %v4669_v12 = vpop.f32.mrf.mxu0  ;;  %4963 = vmatprep.subr.bf16.mxu0 %v15240_v62  ;;  %4952 = vmatprep.mubr.bf16.mxu1 %v19443_v42  ;;  %v15231_v5 = vcombine.low %v788_v2, %v792_v17  ;;  %v760_v2 = vld [vmem:[#allocation3 + $0x470] sm:$0xff] }
 0x2b8   :  { %v4630_v61 = vpop.f32.mrf.mxu1  ;;  %4993 = vmatprep.mubr.bf16.mxu0 %v19445_v43  ;;  %v15208_v62 = vcombine.high %v764_v57, %v768_v55  ;;  %v15079_v17 = vcombine.low %v636_v56, %v640_v36  ;;  %v15207_v3 = vcombine.low %v764_v57, %v768_v55  ;;  %v15072_v4 = vcombine.high %v628_v63, %v632_v0  ;;  %v620_v6 = vld [vmem:[#allocation3 + $0x10] sm:$0xff] }
 0x2b9   :  { %v19511_v20 = vadd.f32 %v4669_v12, %v4629_v10  ;;  %v4671_v21 = vpop.f32.mrf.mxu0  ;;  %4923 = vmatpush1.bf16.msra.mxu1 %v15111_v26  ;;  %v15200_v26 = vcombine.high %v756_v39, %v760_v2  ;;  %v752_v10 = vld [vmem:[#allocation3 + $0x430] sm:$0xff]  ;;  %v15071_v12 = vcombine.low %v628_v63, %v632_v0 }
 0x2ba   :  { %4964 = vmatpush1.bf16.msra.mxu0 %v15239_v7  ;;  %v4631_v23 = vpop.f32.mrf.mxu1  ;;  %4924 = vmatprep.subr.bf16.mxu1 %v15104_v8  ;;  %v624_v7 = vld [vmem:[#allocation3 + $0x30] sm:$0xff] }
 0x2bb   :  { %v4672_v31 = vpop.f32.mrf.mxu0  ;;  %4965 = vmatprep.subr.bf16.mxu0 %v15232_v13  ;;  %v748_v8 = vld [vmem:[#allocation3 + $0x410] sm:$0xff]  ;;  %v15199_v13 = vcombine.low %v756_v39, %v760_v2  ;;  %v15064_v14 = vcombine.high %v620_v6, %v624_v7 }
 0x2bc   :  { %v15192_v15 = vcombine.high %v748_v8, %v752_v10  ;;  %v740_v61 = vld [vmem:[#allocation3 + $0x3d0] sm:$0xff]  ;;  %v15191_v23 = vcombine.low %v748_v8, %v752_v10 }
 0x2bd   :  { %4925 = vmatpush1.bf16.msra.mxu1 %v15103_v22  ;;  %v872_v21 = vld [vmem:[#allocation3 + $0x7f0] sm:$0xff]  ;;  %v15063_v22 = vcombine.low %v620_v6, %v624_v7  ;;  %v15183_v45 = vcombine.low %v740_v61, %v744_v16 }
 0x2be   :  { %4966 = vmatpush1.bf16.msra.mxu0 %v15231_v5  ;;  %4926 = vmatprep.subr.bf16.mxu1 %v15096_v29  ;;  %v15184_v5 = vcombine.high %v740_v61, %v744_v16  ;;  %v15312_v29 = vcombine.high %v868_v18, %v872_v21  ;;  %v732_v31 = vld [vmem:[#allocation3 + $0x390] sm:$0xff]  ;;  %v15311_v46 = vcombine.low %v868_v18, %v872_v21 }
 0x2bf   :  { %4967 = vmatprep.subr.bf16.mxu0 %v15224_v33  ;;  %v736_v33 = vld [vmem:[#allocation3 + $0x3b0] sm:$0xff] }
 0x2c0   :  { %v864_v38 = vld [vmem:[#allocation3 + $0x7b0] sm:$0xff]  ;;  %v15175_v57 = vcombine.low %v732_v31, %v736_v33 }
 0x2c1   :  { %4927 = vmatpush1.bf16.msra.mxu1 %v15095_v50  ;;  %v15176_v50 = vcombine.high %v732_v31, %v736_v33  ;;  %v852_v56 = vld [vmem:[#allocation3 + $0x750] sm:$0xff]  ;;  %v15303_v55 = vcombine.low %v860_v37, %v864_v38 }
 0x2c2   :  { %4968 = vmatpush1.bf16.msra.mxu0 %v15223_v34  ;;  %4928 = vmatprep.subr.bf16.mxu1 %v15088_v52  ;;  %v15304_v34 = vcombine.high %v860_v37, %v864_v38  ;;  %v724_v52 = vld [vmem:[#allocation3 + $0x350] sm:$0xff] }
 0x2c3   :  { %4969 = vmatprep.subr.bf16.mxu0 %v15216_v53  ;;  %v728_v53 = vld [vmem:[#allocation3 + $0x370] sm:$0xff] }
 0x2c4   :  { %v856_v36 = vld [vmem:[#allocation3 + $0x770] sm:$0xff]  ;;  %v15167_v39 = vcombine.low %v724_v52, %v728_v53 }
 0x2c5   :  { %4929 = vmatpush1.bf16.msra.mxu1 %v15087_v59  ;;  %v15168_v59 = vcombine.high %v724_v52, %v728_v53  ;;  %v844_v63 = vld [vmem:[#allocation3 + $0x710] sm:$0xff]  ;;  %v15295_v2 = vcombine.low %v852_v56, %v856_v36 }
 0x2c6   :  { %4970 = vmatpush1.bf16.msra.mxu0 %v15215_v19  ;;  %4930 = vmatprep.subr.bf16.mxu1 %v15080_v60  ;;  %v15296_v19 = vcombine.high %v852_v56, %v856_v36  ;;  %v716_v60 = vld [vmem:[#allocation3 + $0x310] sm:$0xff] }
 0x2c7   :  { %4971 = vmatprep.subr.bf16.mxu0 %v15208_v62  ;;  %v720_v62 = vld [vmem:[#allocation3 + $0x330] sm:$0xff] }
 0x2c8   :  { %v848_v0 = vld [vmem:[#allocation3 + $0x730] sm:$0xff]  ;;  %v15159_v8 = vcombine.low %v716_v60, %v720_v62 }
 0x2c9   :  { %4931 = vmatpush1.bf16.msra.mxu1 %v15079_v17  ;;  %v15160_v17 = vcombine.high %v716_v60, %v720_v62  ;;  %v836_v6 = vld [vmem:[#allocation3 + $0x6d0] sm:$0xff]  ;;  %v15287_v10 = vcombine.low %v844_v63, %v848_v0 }
 0x2ca   :  { %4972 = vmatpush1.bf16.msra.mxu0 %v15207_v3  ;;  %4932 = vmatprep.subr.bf16.mxu1 %v15072_v4  ;;  %v15288_v3 = vcombine.high %v844_v63, %v848_v0  ;;  %v708_v4 = vld [vmem:[#allocation3 + $0x2d0] sm:$0xff] }
 0x2cb   :  { %4973 = vmatprep.subr.bf16.mxu0 %v15200_v26  ;;  %v712_v26 = vld [vmem:[#allocation3 + $0x2f0] sm:$0xff] }
 0x2cc   :  { %v840_v7 = vld [vmem:[#allocation3 + $0x6f0] sm:$0xff]  ;;  %v15151_v18 = vcombine.low %v708_v4, %v712_v26 }
 0x2cd   :  { %4933 = vmatpush1.bf16.msra.mxu1 %v15071_v12  ;;  %v15152_v12 = vcombine.high %v708_v4, %v712_v26  ;;  %v828_v61 = vld [vmem:[#allocation3 + $0x690] sm:$0xff]  ;;  %v15279_v21 = vcombine.low %v836_v6, %v840_v7 }
 0x2ce   :  { %4974 = vmatpush1.bf16.msra.mxu0 %v15199_v13  ;;  %4934 = vmatprep.subr.bf16.mxu1 %v15064_v14  ;;  %v15280_v13 = vcombine.high %v836_v6, %v840_v7  ;;  %v700_v14 = vld [vmem:[#allocation3 + $0x290] sm:$0xff] }
 0x2cf   :  { %4975 = vmatprep.subr.bf16.mxu0 %v15192_v15  ;;  %v704_v15 = vld [vmem:[#allocation3 + $0x2b0] sm:$0xff] }
 0x2d0   :  { %v832_v16 = vld [vmem:[#allocation3 + $0x6b0] sm:$0xff]  ;;  %v15143_v37 = vcombine.low %v700_v14, %v704_v15 }
 0x2d1   :  { %4935 = vmatpush1.bf16.msra.mxu1 %v15063_v22  ;;  %v15144_v22 = vcombine.high %v700_v14, %v704_v15  ;;  %v820_v31 = vld [vmem:[#allocation3 + $0x650] sm:$0xff]  ;;  %v15271_v38 = vcombine.low %v828_v61, %v832_v16  ;;  %v19513_v15 = vstv %s15699_s12 }
 0x2d2   :  { %4976 = vmatpush1.bf16.msra.mxu0 %v15191_v23  ;;  %4936 = vmatprep.subr.bf16.mxu1 %v15184_v5  ;;  %v15272_v23 = vcombine.high %v828_v61, %v832_v16  ;;  %v692_v5 = vld [vmem:[#allocation3 + $0x250] sm:$0xff] }
 0x2d3   :  { %4977 = vmatprep.subr.bf16.mxu0 %v15312_v29  ;;  %v696_v29 = vld [vmem:[#allocation3 + $0x270] sm:$0xff] }
 0x2d4   :  { %v824_v33 = vld [vmem:[#allocation3 + $0x670] sm:$0xff]  ;;  %v15135_v56 = vcombine.low %v692_v5, %v696_v29 }
 0x2d5   :  { %4937 = vmatpush2.bf16.msra.mxu1 %v15183_v45  ;;  %v15136_v45 = vcombine.high %v692_v5, %v696_v29  ;;  %v812_v52 = vld [vmem:[#allocation3 + $0x610] sm:$0xff]  ;;  %v15263_v36 = vcombine.low %v820_v31, %v824_v33 }
 0x2d6   :  { %4978 = vmatpush2.bf16.msra.mxu0 %v15311_v46  ;;  %4938 = vmatprep.subr.bf16.mxu1 %v15176_v50  ;;  %v15264_v46 = vcombine.high %v820_v31, %v824_v33  ;;  %v684_v50 = vld [vmem:[#allocation3 + $0x210] sm:$0xff] }
 0x2d7   :  { %4979 = vmatprep.subr.bf16.mxu0 %v15304_v34  ;;  %v688_v34 = vld [vmem:[#allocation3 + $0x230] sm:$0xff] }
 0x2d8   :  { %v816_v53 = vld [vmem:[#allocation3 + $0x630] sm:$0xff]  ;;  %v15127_v63 = vcombine.low %v684_v50, %v688_v34 }
 0x2d9   :  { %4939 = vmatpush2.bf16.msra.mxu1 %v15175_v57  ;;  %v15128_v57 = vcombine.high %v684_v50, %v688_v34  ;;  %v1060_v60 = vld [vmem:[#allocation3 + $0xdd0] sm:$0xff]  ;;  %v15255_v0 = vcombine.low %v812_v52, %v816_v53 }
 0x2da   :  { %4980 = vmatpush2.bf16.msra.mxu0 %v15303_v55  ;;  %4940 = vmatprep.subr.bf16.mxu1 %v15168_v59  ;;  %v15256_v55 = vcombine.high %v812_v52, %v816_v53  ;;  %v932_v59 = vld [vmem:[#allocation3 + $0x9d0] sm:$0xff] }
 0x2db   :  { %4981 = vmatprep.subr.bf16.mxu0 %v15296_v19  ;;  %v936_v19 = vld [vmem:[#allocation3 + $0x9f0] sm:$0xff] }
 0x2dc   :  { %v1064_v62 = vld [vmem:[#allocation3 + $0xdf0] sm:$0xff]  ;;  %v15375_v6 = vcombine.low %v932_v59, %v936_v19 }
 0x2dd   :  { %4941 = vmatpush2.bf16.msra.mxu1 %v15167_v39  ;;  %v15376_v39 = vcombine.high %v932_v59, %v936_v19  ;;  %v1052_v4 = vld [vmem:[#allocation3 + $0xd90] sm:$0xff]  ;;  %v15503_v7 = vcombine.low %v1060_v60, %v1064_v62 }
 0x2de   :  { %4982 = vmatpush2.bf16.msra.mxu0 %v15295_v2  ;;  %4942 = vmatprep.subr.bf16.mxu1 %v15160_v17  ;;  %v15504_v2 = vcombine.high %v1060_v60, %v1064_v62  ;;  %v924_v17 = vld [vmem:[#allocation3 + $0x990] sm:$0xff] }
 0x2df   :  { %4983 = vmatprep.subr.bf16.mxu0 %v15288_v3  ;;  %v928_v3 = vld [vmem:[#allocation3 + $0x9b0] sm:$0xff] }
 0x2e0   :  { %v1056_v26 = vld [vmem:[#allocation3 + $0xdb0] sm:$0xff] }
 0x2e1   :  { %4943 = vmatpush2.bf16.msra.mxu1 %v15159_v8  ;;  %v15368_v8 = vcombine.high %v924_v17, %v928_v3  ;;  %v1044_v61 = vld [vmem:[#allocation3 + $0xd50] sm:$0xff]  ;;  %v15495_v5 = vcombine.low %v1052_v4, %v1056_v26 }
 0x2e2   :  { %4984 = vmatpush2.bf16.msra.mxu0 %v15287_v10  ;;  %4944 = vmatprep.subr.bf16.mxu1 %v15152_v12  ;;  %v15496_v10 = vcombine.high %v1052_v4, %v1056_v26  ;;  %v916_v12 = vld [vmem:[#allocation3 + $0x950] sm:$0xff] }
 0x2e3   :  { %4985 = vmatprep.subr.bf16.mxu0 %v15280_v13  ;;  %v920_v13 = vld [vmem:[#allocation3 + $0x970] sm:$0xff] }
 0x2e4   :  { %v1048_v16 = vld [vmem:[#allocation3 + $0xd70] sm:$0xff]  ;;  %v15360_v29 = vcombine.high %v916_v12, %v920_v13 }
 0x2e5   :  { %4945 = vmatpush2.bf16.msra.mxu1 %v15151_v18  ;;  %v1036_v50 = vld [vmem:[#allocation3 + $0xd10] sm:$0xff] }
 0x2e6   :  { %4986 = vmatpush2.bf16.msra.mxu0 %v15279_v21  ;;  %4946 = vmatprep.subr.bf16.mxu1 %v15144_v22  ;;  %v15367_v22 = vcombine.low %v924_v17, %v928_v3  ;;  %v1040_v34 = vld [vmem:[#allocation3 + $0xd30] sm:$0xff] }
 0x2e7   :  { %4987 = vmatprep.subr.bf16.mxu0 %v15272_v23  ;;  %v15480_v60 = vcombine.high %v1036_v50, %v1040_v34  ;;  %v900_v62 = vld [vmem:[#allocation3 + $0x8d0] sm:$0xff]  ;;  %v15479_v17 = vcombine.low %v1036_v50, %v1040_v34 }
 0x2e8   :  { %v892_v26 = vld [vmem:[#allocation3 + $0x890] sm:$0xff] }
 0x2e9   :  { %4947 = vmatpush2.bf16.msra.mxu1 %v15143_v37 }
 0x2ea   :  { %4988 = vmatpush2.bf16.msra.mxu0 %v15271_v38  ;;  %4948 = vmatprep.subr.bf16.mxu1 %v15136_v45  ;;  %v908_v38 = vld [vmem:[#allocation3 + $0x910] sm:$0xff] }
 0x2eb   :  { %4989 = vmatprep.subr.bf16.mxu0 %v15264_v46  ;;  %v912_v45 = vld [vmem:[#allocation3 + $0x930] sm:$0xff] }
 0x2ed   :  { %4949 = vmatpush2.bf16.msra.mxu1 %v15135_v56 }
 0x2ee   :  { %4990 = vmatpush2.bf16.msra.mxu0 %v15263_v36  ;;  %4950 = vmatprep.subr.bf16.mxu1 %v15128_v57  ;;  %v15487_v57 = vcombine.low %v1044_v61, %v1048_v16 }
 0x2ef   :  { %4991 = vmatprep.subr.bf16.mxu0 %v15256_v55  ;;  %v15352_v55 = vcombine.high %v908_v38, %v912_v45 }
 0x2f1   :  { %4951 = vmatpush2.bf16.msra.mxu1 %v15127_v63  ;;  %v904_v63 = vld [vmem:[#allocation3 + $0x8f0] sm:$0xff] }
 0x2f2   :  { %4992 = vmatpush2.bf16.msra.mxu0 %v15255_v0  ;;  %5002 = vmatprep.subr.bf16.mxu1 %v15376_v39  ;;  %v1028_v0 = vld [vmem:[#allocation3 + $0xcd0] sm:$0xff]  ;;  %v15344_v3 = vcombine.high %v900_v62, %v904_v63 }
 0x2f3   :  { %5043 = vmatprep.subr.bf16.mxu0 %v15504_v2  ;;  %v1032_v39 = vld [vmem:[#allocation3 + $0xcf0] sm:$0xff]  ;;  %v15351_v2 = vcombine.low %v908_v38, %v912_v45 }
 0x2f4   :  { %v4708_v14 = vpop.f32.mrf.mxu1  ;;  %4953 = vmatmul.mubr.bf16.vlgmr.msra.gmra.mxu1 %v19451_v49  ;;  %v15472_v4 = vcombine.high %v1028_v0, %v1032_v39  ;;  %v1004_v38 = vld [vmem:[#allocation3 + $0xc10] sm:$0xff] }
 0x2f5   :  { %v4709_v18 = vadd.f32 %v4708_v14, %v19506_v9  ;;  %v19517_v21 = vpop.f32.mrf.mxu0  ;;  %4994 = vmatmul.mubr.bf16.vlgmr.msra.gmra.mxu0 %v19455_v51  ;;  %5003 = vmatpush1.bf16.msra.mxu1 %v15375_v6  ;;  %v15488_v9 = vcombine.high %v1044_v61, %v1048_v16  ;;  %v896_v6 = vld [vmem:[#allocation3 + $0x8b0] sm:$0xff] }
 0x2f6   :  { %5044 = vmatpush1.bf16.msra.mxu0 %v15503_v7  ;;  %v4710_v23 = vpop.f32.mrf.mxu1  ;;  %5004 = vmatprep.subr.bf16.mxu1 %v15368_v8  ;;  %v1020_v7 = vld [vmem:[#allocation3 + $0xc90] sm:$0xff] }
 0x2f7   :  { %vm5331_vm11 = vcmp.ge.f32.partialorder %v4709_v18, 0.0  ;;  %v5340_v31 = vmul.f32 %v19513_v15, %v4709_v18  ;;  %v4711_v33 = vadd.f32 %v4710_v23, %v19511_v20  ;;  %v19522_v37 = vpop.f32.mrf.mxu0  ;;  %5045 = vmatprep.subr.bf16.mxu0 %v15496_v10  ;;  %5034 = vmatprep.mubr.bf16.mxu1 %v19459_v48  ;;  %v15359_v20 = vcombine.low %v916_v12, %v920_v13  ;;  %v1024_v8 = vld [vmem:[#allocation3 + $0xcb0] sm:$0xff] }
 0x2f8   :  { %v4712_v46 = vpop.f32.mrf.mxu1  ;;  %5075 = vmatprep.mubr.bf16.mxu0 %v19464_v58  ;;  %v15343_v10 = vcombine.low %v900_v62, %v904_v63  ;;  %v15471_v12 = vcombine.low %v1028_v0, %v1032_v39  ;;  %v15336_v13 = vcombine.high %v892_v26, %v896_v6  ;;  %v15464_v14 = vcombine.high %v1020_v7, %v1024_v8  ;;  %v884_v61 = vld [vmem:[#allocation3 + $0x850] sm:$0xff] }
 0x2f9   :  { %v19526_v52 = vsel %vm5331_vm11, %v4709_v18, %v5340_v31  ;;  %vm5332_vm12 = vcmp.ge.f32.partialorder %v4711_v33, 0.0  ;;  %v5341_v53 = vmul.f32 %v19513_v15, %v4711_v33  ;;  %v4753_v56 = vpop.f32.mrf.mxu0  ;;  %5005 = vmatpush1.bf16.msra.mxu1 %v15367_v22  ;;  %v888_v16 = vld [vmem:[#allocation3 + $0x870] sm:$0xff]  ;;  %v15335_v23 = vcombine.low %v892_v26, %v896_v6 }
 0x2fa   :  { %5046 = vmatpush1.bf16.msra.mxu0 %v15495_v5  ;;  %v4713_v36 = vpop.f32.mrf.mxu1  ;;  %5006 = vmatprep.subr.bf16.mxu1 %v15360_v29  ;;  %v1012_v18 = vld [vmem:[#allocation3 + $0xc50] sm:$0xff]  ;;  %v15463_v5 = vcombine.low %v1020_v7, %v1024_v8  ;;  %v15328_v29 = vcombine.high %v884_v61, %v888_v16  ;;  %v15327_v46 = vcombine.low %v884_v61, %v888_v16 }
 0x2fb   :  { %v19529_v59 = vsel %vm5332_vm12, %v4711_v33, %v5341_v53  ;;  %v4754_v19 = vpop.f32.mrf.mxu0  ;;  %5047 = vmatprep.subr.bf16.mxu0 %v15488_v9  ;;  %v1016_v22 = vld [vmem:[#allocation3 + $0xc70] sm:$0xff] }
 0x2fc   :  { %v15456_v31 = vcombine.high %v1012_v18, %v1016_v22  ;;  %v876_v33 = vld [vmem:[#allocation3 + $0x810] sm:$0xff]  ;;  %v15455_v50 = vcombine.low %v1012_v18, %v1016_v22 }
 0x2fd   :  { %5007 = vmatpush1.bf16.msra.mxu1 %v15359_v20  ;;  %v880_v9 = vld [vmem:[#allocation3 + $0x830] sm:$0xff] }
 0x2fe   :  { %5048 = vmatpush1.bf16.msra.mxu0 %v15487_v57  ;;  %5008 = vmatprep.subr.bf16.mxu1 %v15352_v55  ;;  %v1008_v45 = vld [vmem:[#allocation3 + $0xc30] sm:$0xff]  ;;  %v15320_v34 = vcombine.high %v876_v33, %v880_v9  ;;  %v15319_v55 = vcombine.low %v876_v33, %v880_v9 }
 0x2ff   :  { %5049 = vmatprep.subr.bf16.mxu0 %v15480_v60  ;;  %v15448_v53 = vcombine.high %v1004_v38, %v1008_v45  ;;  %v996_v56 = vld [vmem:[#allocation3 + $0xbd0] sm:$0xff]  ;;  %v15447_v19 = vcombine.low %v1004_v38, %v1008_v45 }
 0x300   :  { %v1000_v20 = vld [vmem:[#allocation3 + $0xbf0] sm:$0xff] }
 0x301   :  { %5009 = vmatpush1.bf16.msra.mxu1 %v15351_v2  ;;  %v1124_v36 = vld [vmem:[#allocation3 + $0xfd0] sm:$0xff]  ;;  %v15440_v60 = vcombine.high %v996_v56, %v1000_v20 }
 0x302   :  { %5050 = vmatpush1.bf16.msra.mxu0 %v15479_v17  ;;  %5010 = vmatprep.subr.bf16.mxu1 %v15344_v3  ;;  %v1128_v57 = vld [vmem:[#allocation3 + $0xff0] sm:$0xff]  ;;  %v15439_v17 = vcombine.low %v996_v56, %v1000_v20 }
 0x303   :  { %5051 = vmatprep.subr.bf16.mxu0 %v15472_v4  ;;  %v15568_v62 = vcombine.high %v1124_v36, %v1128_v57  ;;  %v988_v63 = vld [vmem:[#allocation3 + $0xb90] sm:$0xff]  ;;  %v15567_v3 = vcombine.low %v1124_v36, %v1128_v57 }
 0x304   :  { %v992_v0 = vld [vmem:[#allocation3 + $0xbb0] sm:$0xff] }
 0x305   :  { %5011 = vmatpush1.bf16.msra.mxu1 %v15343_v10  ;;  %v1116_v39 = vld [vmem:[#allocation3 + $0xf90] sm:$0xff]  ;;  %v15432_v4 = vcombine.high %v988_v63, %v992_v0 }
 0x306   :  { %5052 = vmatpush1.bf16.msra.mxu0 %v15471_v12  ;;  %5012 = vmatprep.subr.bf16.mxu1 %v15336_v13  ;;  %v1120_v2 = vld [vmem:[#allocation3 + $0xfb0] sm:$0xff]  ;;  %v15431_v12 = vcombine.low %v988_v63, %v992_v0 }
 0x307   :  { %5053 = vmatprep.subr.bf16.mxu0 %v15464_v14  ;;  %v15560_v26 = vcombine.high %v1116_v39, %v1120_v2  ;;  %v980_v6 = vld [vmem:[#allocation3 + $0xb50] sm:$0xff]  ;;  %v15559_v13 = vcombine.low %v1116_v39, %v1120_v2 }
 0x308   :  { %v984_v7 = vld [vmem:[#allocation3 + $0xb70] sm:$0xff] }
 0x309   :  { %5013 = vmatpush1.bf16.msra.mxu1 %v15335_v23  ;;  %v1108_v8 = vld [vmem:[#allocation3 + $0xf50] sm:$0xff]  ;;  %v15424_v14 = vcombine.high %v980_v6, %v984_v7 }
 0x30a   :  { %5054 = vmatpush1.bf16.msra.mxu0 %v15463_v5  ;;  %5014 = vmatprep.subr.bf16.mxu1 %v15328_v29  ;;  %v1112_v10 = vld [vmem:[#allocation3 + $0xf70] sm:$0xff]  ;;  %v15423_v5 = vcombine.low %v980_v6, %v984_v7 }
 0x30b   :  { %5055 = vmatprep.subr.bf16.mxu0 %v15456_v31  ;;  %v15552_v61 = vcombine.high %v1108_v8, %v1112_v10  ;;  %v972_v16 = vld [vmem:[#allocation3 + $0xb10] sm:$0xff]  ;;  %v15551_v29 = vcombine.low %v1108_v8, %v1112_v10 }
 0x30c   :  { %v976_v18 = vld [vmem:[#allocation3 + $0xb30] sm:$0xff] }
 0x30d   :  { %5015 = vmatpush1.bf16.msra.mxu1 %v15327_v46  ;;  %v1100_v22 = vld [vmem:[#allocation3 + $0xf10] sm:$0xff]  ;;  %v15416_v31 = vcombine.high %v972_v16, %v976_v18 }
 0x30e   :  { %5056 = vmatpush1.bf16.msra.mxu0 %v15455_v50  ;;  %5016 = vmatprep.subr.bf16.mxu1 %v15320_v34  ;;  %v1104_v23 = vld [vmem:[#allocation3 + $0xf30] sm:$0xff]  ;;  %v15415_v50 = vcombine.low %v972_v16, %v976_v18 }
 0x30f   :  { %5057 = vmatprep.subr.bf16.mxu0 %v15448_v53  ;;  %v15544_v33 = vcombine.high %v1100_v22, %v1104_v23  ;;  %v964_v9 = vld [vmem:[#allocation3 + $0xad0] sm:$0xff]  ;;  %v15543_v34 = vcombine.low %v1100_v22, %v1104_v23  ;;  %v677_v23 = vld [vmem:[#allocation3 + $0x1d8] sm:$0xff] }
 0x310   :  { %v968_v38 = vld [vmem:[#allocation3 + $0xaf0] sm:$0xff] }
 0x311   :  { %5017 = vmatpush1.bf16.msra.mxu1 %v15319_v55  ;;  %v1092_v45 = vld [vmem:[#allocation3 + $0xed0] sm:$0xff]  ;;  %v15408_v53 = vcombine.high %v964_v9, %v968_v38 }
 0x312   :  { %5058 = vmatpush1.bf16.msra.mxu0 %v15447_v19  ;;  %5018 = vmatprep.subr.bf16.mxu1 %v15440_v60  ;;  %v1096_v46 = vld [vmem:[#allocation3 + $0xef0] sm:$0xff]  ;;  %v15407_v19 = vcombine.low %v964_v9, %v968_v38 }
 0x313   :  { %5059 = vmatprep.subr.bf16.mxu0 %v15568_v62  ;;  %v15536_v56 = vcombine.high %v1092_v45, %v1096_v46  ;;  %v956_v20 = vld [vmem:[#allocation3 + $0xa90] sm:$0xff]  ;;  %v15535_v60 = vcombine.low %v1092_v45, %v1096_v46 }
 0x314   :  { %v960_v36 = vld [vmem:[#allocation3 + $0xab0] sm:$0xff] }
 0x315   :  { %5019 = vmatpush2.bf16.msra.mxu1 %v15439_v17  ;;  %v1084_v57 = vld [vmem:[#allocation3 + $0xe90] sm:$0xff]  ;;  %v15400_v62 = vcombine.high %v956_v20, %v960_v36 }
 0x316   :  { %5060 = vmatpush2.bf16.msra.mxu0 %v15567_v3  ;;  %5020 = vmatprep.subr.bf16.mxu1 %v15432_v4  ;;  %v1088_v55 = vld [vmem:[#allocation3 + $0xeb0] sm:$0xff]  ;;  %v15399_v3 = vcombine.low %v956_v20, %v960_v36 }
 0x317   :  { %5061 = vmatprep.subr.bf16.mxu0 %v15560_v26  ;;  %v15528_v63 = vcombine.high %v1084_v57, %v1088_v55  ;;  %v948_v0 = vld [vmem:[#allocation3 + $0xa50] sm:$0xff]  ;;  %v15527_v4 = vcombine.low %v1084_v57, %v1088_v55 }
 0x318   :  { %v952_v39 = vld [vmem:[#allocation3 + $0xa70] sm:$0xff] }
 0x319   :  { %5021 = vmatpush2.bf16.msra.mxu1 %v15431_v12  ;;  %v1076_v2 = vld [vmem:[#allocation3 + $0xe50] sm:$0xff]  ;;  %v15392_v26 = vcombine.high %v948_v0, %v952_v39 }
 0x31a   :  { %5062 = vmatpush2.bf16.msra.mxu0 %v15559_v13  ;;  %5022 = vmatprep.subr.bf16.mxu1 %v15424_v14  ;;  %v1080_v17 = vld [vmem:[#allocation3 + $0xe70] sm:$0xff]  ;;  %v15391_v13 = vcombine.low %v948_v0, %v952_v39  ;;  %v661_v0 = vld [vmem:[#allocation3 + $0x158] sm:$0xff] }
 0x31b   :  { %5063 = vmatprep.subr.bf16.mxu0 %v15552_v61  ;;  %v15520_v6 = vcombine.high %v1076_v2, %v1080_v17  ;;  %v940_v7 = vld [vmem:[#allocation3 + $0xa10] sm:$0xff]  ;;  %v15519_v14 = vcombine.low %v1076_v2, %v1080_v17  ;;  %v665_v39 = vld [vmem:[#allocation3 + $0x178] sm:$0xff] }
 0x31c   :  { %v944_v8 = vld [vmem:[#allocation3 + $0xa30] sm:$0xff] }
 0x31d   :  { %5023 = vmatpush2.bf16.msra.mxu1 %v15423_v5  ;;  %v1068_v10 = vld [vmem:[#allocation3 + $0xe10] sm:$0xff]  ;;  %v15384_v61 = vcombine.high %v940_v7, %v944_v8  ;;  %v681_v5 = vld [vmem:[#allocation3 + $0x1f8] sm:$0xff] }
 0x31e   :  { %5064 = vmatpush2.bf16.msra.mxu0 %v15551_v29  ;;  %5024 = vmatprep.subr.bf16.mxu1 %v15416_v31  ;;  %v1072_v12 = vld [vmem:[#allocation3 + $0xe30] sm:$0xff]  ;;  %v15383_v29 = vcombine.low %v940_v7, %v944_v8  ;;  %v15122_v45 = vcombine.high %v677_v23, %v681_v5  ;;  %v15121_v36 = vcombine.low %v677_v23, %v681_v5 }
 0x31f   :  { %5065 = vmatprep.subr.bf16.mxu0 %v15544_v33  ;;  %v15512_v16 = vcombine.high %v1068_v10, %v1072_v12  ;;  %v1188_v18 = vld [vmem:[#allocation3 + $0x11d0] sm:$0xff]  ;;  %v15511_v31 = vcombine.low %v1068_v10, %v1072_v12  ;;  %v15106_v12 = vcombine.high %v661_v0, %v665_v39 }
 0x320   :  { %v1192_v22 = vld [vmem:[#allocation3 + $0x11f0] sm:$0xff] }
 0x321   :  { %5025 = vmatpush2.bf16.msra.mxu1 %v15415_v50  ;;  %v15632_v33 = vcombine.high %v1188_v18, %v1192_v22  ;;  %v19531_v9 = vld [vmem:[#allocation15 + $0xa] sm:$0xff]  ;;  %v15631_v20 = vcombine.low %v1188_v18, %v1192_v22 }
 0x322   :  { %5066 = vmatpush2.bf16.msra.mxu0 %v15543_v34  ;;  %5026 = vmatprep.subr.bf16.mxu1 %v15408_v53  ;;  %v1281_v38 = vrot.slane %v19531_v9, %v19389_v28  ;;  %v1180_v46 = vld [vmem:[#allocation3 + $0x1190] sm:$0xff]  ;;  %v669_v34 = vld [vmem:[#allocation3 + $0x198] sm:$0xff] }
 0x323   :  { %5067 = vmatprep.subr.bf16.mxu0 %v15536_v56  ;;  %v1184_v50 = vld [vmem:[#allocation3 + $0x11b0] sm:$0xff]  ;;  %v673_v53 = vld [vmem:[#allocation3 + $0x1b8] sm:$0xff]  ;;  %v1285_v56 = vrot.slane %v19531_v9, %v19393_v30 }
 0x324   :  { %v15624_v57 = vcombine.high %v1180_v46, %v1184_v50  ;;  %v4750_v55 = vadd.f32 %v19517_v21, %v1281_v38  ;;  %v15113_v21 = vcombine.low %v669_v34, %v673_v53 }
 0x325   :  { %5027 = vmatpush2.bf16.msra.mxu1 %v15407_v19  ;;  %v15114_v19 = vcombine.high %v669_v34, %v673_v53  ;;  %v4752_v2 = vadd.f32 %v19522_v37, %v1285_v56  ;;  %v649_v34 = vld [vmem:[#allocation3 + $0xf8] sm:$0xff] }
 0x326   :  { %5068 = vmatpush2.bf16.msra.mxu0 %v15535_v60  ;;  %5028 = vmatprep.subr.bf16.mxu1 %v15400_v62  ;;  %v1172_v60 = vld [vmem:[#allocation3 + $0x1150] sm:$0xff] }
 0x327   :  { %5069 = vmatprep.subr.bf16.mxu0 %v15528_v63  ;;  %v1176_v62 = vld [vmem:[#allocation3 + $0x1170] sm:$0xff] }
 0x328   :  { %v15615_v23 = vcombine.low %v1172_v60, %v1176_v62 }
 0x329   :  { %5029 = vmatpush2.bf16.msra.mxu1 %v15399_v3 }
 0x32a   :  { %5070 = vmatpush2.bf16.msra.mxu0 %v15527_v4  ;;  %5030 = vmatprep.subr.bf16.mxu1 %v15392_v26  ;;  %v15623_v4 = vcombine.low %v1180_v46, %v1184_v50  ;;  %v1160_v46 = vld [vmem:[#allocation3 + $0x10f0] sm:$0xff]  ;;  %v645_v50 = vld [vmem:[#allocation3 + $0xd8] sm:$0xff] }
 0x32b   :  { %5071 = vmatprep.subr.bf16.mxu0 %v15520_v6  ;;  %v15616_v6 = vcombine.high %v1172_v60, %v1176_v62  ;;  %v15089_v62 = vcombine.low %v645_v50, %v649_v34 }
 0x32d   :  { %5031 = vmatpush2.bf16.msra.mxu1 %v15391_v13  ;;  %v1164_v13 = vld [vmem:[#allocation3 + $0x1110] sm:$0xff] }
 0x32e   :  { %5072 = vmatpush2.bf16.msra.mxu0 %v15519_v14  ;;  %5032 = vmatprep.subr.bf16.mxu1 %v15384_v61  ;;  %v1168_v14 = vld [vmem:[#allocation3 + $0x1130] sm:$0xff]  ;;  %v653_v61 = vld [vmem:[#allocation3 + $0x118] sm:$0xff] }
 0x32f   :  { %5073 = vmatprep.subr.bf16.mxu0 %v15512_v16  ;;  %v657_v16 = vld [vmem:[#allocation3 + $0x138] sm:$0xff]  ;;  %v15607_v53 = vcombine.low %v1164_v13, %v1168_v14 }
 0x330   :  { %v15098_v38 = vcombine.high %v653_v61, %v657_v16 }
 0x331   :  { %5033 = vmatpush2.bf16.msra.mxu1 %v15383_v29  ;;  %v15105_v29 = vcombine.low %v661_v0, %v665_v39  ;;  %v1140_v39 = vld [vmem:[#allocation3 + $0x1050] sm:$0xff] }
 0x332   :  { %5074 = vmatpush2.bf16.msra.mxu0 %v15511_v31  ;;  %5084 = vmatprep.subr.bf16.mxu1 %v15632_v33  ;;  %v15608_v31 = vcombine.high %v1164_v13, %v1168_v14  ;;  %v625_v13 = vld [vmem:[#allocation3 + $0x38] sm:$0xff] }
 0x333   :  { %5125 = vmatprep.subr.bf16.mxu0 %v15122_v45  ;;  %v1156_v45 = vld [vmem:[#allocation3 + $0x10d0] sm:$0xff] }
 0x334   :  { %v4790_v63 = vpop.f32.mrf.mxu1  ;;  %5035 = vmatmul.mubr.bf16.vlgmr.msra.gmra.mxu1 %v19471_v44  ;;  %v15600_v56 = vcombine.high %v1156_v45, %v1160_v46  ;;  %v15599_v60 = vcombine.low %v1156_v45, %v1160_v46  ;;  %v1244_v46 = vld [vmem:[#allocation3 + $0x1390] sm:$0xff] }
 0x335   :  { %v4791_v17 = vadd.f32 %v4790_v63, %v4750_v55  ;;  %v4831_v3 = vpop.f32.mrf.mxu0  ;;  %5076 = vmatmul.mubr.bf16.vlgmr.msra.gmra.mxu0 %v19475_v47  ;;  %5085 = vmatpush1.bf16.msra.mxu1 %v15631_v20  ;;  %v15090_v20 = vcombine.high %v645_v50, %v649_v34  ;;  %v637_v55 = vld [vmem:[#allocation3 + $0x98] sm:$0xff]  ;;  %v1248_v50 = vld [vmem:[#allocation3 + $0x13b0] sm:$0xff] }
 0x336   :  { %5126 = vmatpush1.bf16.msra.mxu0 %v15121_v36  ;;  %v4792_v26 = vpop.f32.mrf.mxu1  ;;  %5086 = vmatprep.subr.bf16.mxu1 %v15624_v57  ;;  %v1148_v36 = vld [vmem:[#allocation3 + $0x1090] sm:$0xff]  ;;  %v733_v34 = vld [vmem:[#allocation3 + $0x398] sm:$0xff] }
 0x337   :  { %v19541_v7 = vadd.f32 %v4831_v3, %v4791_v17  ;;  %v4793_v8 = vadd.f32 %v4792_v26, %v4752_v2  ;;  %v4833_v10 = vpop.f32.mrf.mxu0  ;;  %5127 = vmatprep.subr.bf16.mxu0 %v15114_v19  ;;  %5116 = vmatprep.mubr.bf16.mxu1 %v19479_v11  ;;  %v1152_v57 = vld [vmem:[#allocation3 + $0x10b0] sm:$0xff]  ;;  %v641_v19 = vld [vmem:[#allocation3 + $0xb8] sm:$0xff] }
 0x338   :  { %v4794_v37 = vpop.f32.mrf.mxu1  ;;  %5157 = vmatprep.mubr.bf16.mxu0 %v19443_v42  ;;  %v15097_v42 = vcombine.low %v653_v61, %v657_v16  ;;  %v15592_v63 = vcombine.high %v1148_v36, %v1152_v57  ;;  %v15082_v0 = vcombine.high %v637_v55, %v641_v19  ;;  %v1144_v2 = vld [vmem:[#allocation3 + $0x1070] sm:$0xff]  ;;  %v629_v17 = vld [vmem:[#allocation3 + $0x58] sm:$0xff]  ;;  %v15081_v26 = vcombine.low %v637_v55, %v641_v19 }
 0x339   :  { %v19545_v18 = vadd.f32 %v4833_v10, %v4793_v8  ;;  %v4835_v22 = vpop.f32.mrf.mxu0  ;;  %5087 = vmatpush1.bf16.msra.mxu1 %v15623_v4  ;;  %v633_v3 = vld [vmem:[#allocation3 + $0x78] sm:$0xff]  ;;  %v15591_v4 = vcombine.low %v1148_v36, %v1152_v57  ;;  %v1132_v8 = vld [vmem:[#allocation3 + $0x1010] sm:$0xff]  ;;  %v15583_v14 = vcombine.low %v1140_v39, %v1144_v2 }
 0x33a   :  { %5128 = vmatpush1.bf16.msra.mxu0 %v15113_v21  ;;  %v4795_v5 = vpop.f32.mrf.mxu1  ;;  %5088 = vmatprep.subr.bf16.mxu1 %v15616_v6  ;;  %v15584_v21 = vcombine.high %v1140_v39, %v1144_v2  ;;  %v15074_v6 = vcombine.high %v629_v17, %v633_v3  ;;  %v1136_v10 = vld [vmem:[#allocation3 + $0x1030] sm:$0xff]  ;;  %v15073_v37 = vcombine.low %v629_v17, %v633_v3  ;;  %v725_v19 = vld [vmem:[#allocation3 + $0x358] sm:$0xff] }
 0x33b   :  { %v4836_v33 = vpop.f32.mrf.mxu0  ;;  %5129 = vmatprep.subr.bf16.mxu0 %v15106_v12  ;;  %v621_v12 = vld [vmem:[#allocation3 + $0x18] sm:$0xff]  ;;  %v15576_v61 = vcombine.high %v1132_v8, %v1136_v10  ;;  %v1252_v22 = vld [vmem:[#allocation3 + $0x13d0] sm:$0xff] }
 0x33c   :  { %v15066_v16 = vcombine.high %v621_v12, %v625_v13  ;;  %v741_v5 = vld [vmem:[#allocation3 + $0x3d8] sm:$0xff]  ;;  %v15065_v33 = vcombine.low %v621_v12, %v625_v13  ;;  %v1236_v57 = vld [vmem:[#allocation3 + $0x1350] sm:$0xff] }
 0x33d   :  { %5089 = vmatpush1.bf16.msra.mxu1 %v15615_v23  ;;  %v1256_v23 = vld [vmem:[#allocation3 + $0x13f0] sm:$0xff]  ;;  %v717_v3 = vld [vmem:[#allocation3 + $0x318] sm:$0xff] }
 0x33e   :  { %5130 = vmatpush1.bf16.msra.mxu0 %v15105_v29  ;;  %5090 = vmatprep.subr.bf16.mxu1 %v15608_v31  ;;  %v745_v29 = vld [vmem:[#allocation3 + $0x3f8] sm:$0xff]  ;;  %v15575_v31 = vcombine.low %v1132_v8, %v1136_v10  ;;  %v1240_v55 = vld [vmem:[#allocation3 + $0x1370] sm:$0xff] }
 0x33f   :  { %5131 = vmatprep.subr.bf16.mxu0 %v15098_v38  ;;  %v15696_v38 = vcombine.high %v1252_v22, %v1256_v23  ;;  %v15186_v45 = vcombine.high %v741_v5, %v745_v29  ;;  %v1228_v2 = vld [vmem:[#allocation3 + $0x1310] sm:$0xff]  ;;  %v709_v13 = vld [vmem:[#allocation3 + $0x2d8] sm:$0xff] }
 0x340   :  { %v1232_v17 = vld [vmem:[#allocation3 + $0x1330] sm:$0xff] }
 0x341   :  { %5091 = vmatpush1.bf16.msra.mxu1 %v15607_v53  ;;  %v737_v53 = vld [vmem:[#allocation3 + $0x3b8] sm:$0xff]  ;;  %v1220_v10 = vld [vmem:[#allocation3 + $0x12d0] sm:$0xff] }
 0x342   :  { %5132 = vmatpush1.bf16.msra.mxu0 %v15097_v42  ;;  %5092 = vmatprep.subr.bf16.mxu1 %v15600_v56  ;;  %v15695_v42 = vcombine.low %v1252_v22, %v1256_v23  ;;  %v15185_v56 = vcombine.low %v741_v5, %v745_v29  ;;  %v15178_v36 = vcombine.high %v733_v34, %v737_v53  ;;  %v1224_v12 = vld [vmem:[#allocation3 + $0x12f0] sm:$0xff]  ;;  %v701_v29 = vld [vmem:[#allocation3 + $0x298] sm:$0xff] }
 0x343   :  { %5133 = vmatprep.subr.bf16.mxu0 %v15090_v20  ;;  %v15688_v20 = vcombine.high %v1244_v46, %v1248_v50  ;;  %v1212_v23 = vld [vmem:[#allocation3 + $0x1290] sm:$0xff] }
 0x344   :  { %v1216_v5 = vld [vmem:[#allocation3 + $0x12b0] sm:$0xff] }
 0x345   :  { %5093 = vmatpush1.bf16.msra.mxu1 %v15599_v60  ;;  %v729_v60 = vld [vmem:[#allocation3 + $0x378] sm:$0xff] }
 0x346   :  { %5134 = vmatpush1.bf16.msra.mxu0 %v15089_v62  ;;  %5094 = vmatprep.subr.bf16.mxu1 %v15592_v63  ;;  %v15687_v62 = vcombine.low %v1244_v46, %v1248_v50  ;;  %v15177_v63 = vcombine.low %v733_v34, %v737_v53  ;;  %v15170_v39 = vcombine.high %v725_v19, %v729_v60  ;;  %v1204_v50 = vld [vmem:[#allocation3 + $0x1250] sm:$0xff]  ;;  %v693_v53 = vld [vmem:[#allocation3 + $0x258] sm:$0xff] }
 0x347   :  { %5135 = vmatprep.subr.bf16.mxu0 %v15082_v0  ;;  %v15680_v0 = vcombine.high %v1236_v57, %v1240_v55  ;;  %v1208_v34 = vld [vmem:[#allocation3 + $0x1270] sm:$0xff] }
 0x349   :  { %5095 = vmatpush1.bf16.msra.mxu1 %v15591_v4  ;;  %v721_v4 = vld [vmem:[#allocation3 + $0x338] sm:$0xff] }
 0x34a   :  { %5136 = vmatpush1.bf16.msra.mxu0 %v15081_v26  ;;  %5096 = vmatprep.subr.bf16.mxu1 %v15584_v21  ;;  %v15679_v26 = vcombine.low %v1236_v57, %v1240_v55  ;;  %v15169_v21 = vcombine.low %v725_v19, %v729_v60  ;;  %v15162_v8 = vcombine.high %v717_v3, %v721_v4  ;;  %v1196_v55 = vld [vmem:[#allocation3 + $0x1210] sm:$0xff]  ;;  %v685_v60 = vld [vmem:[#allocation3 + $0x218] sm:$0xff] }
 0x34b   :  { %5137 = vmatprep.subr.bf16.mxu0 %v15074_v6  ;;  %v15672_v6 = vcombine.high %v1228_v2, %v1232_v17  ;;  %v1200_v19 = vld [vmem:[#allocation3 + $0x1230] sm:$0xff] }
 0x34d   :  { %5097 = vmatpush1.bf16.msra.mxu1 %v15583_v14  ;;  %v713_v14 = vld [vmem:[#allocation3 + $0x2f8] sm:$0xff] }
 0x34e   :  { %5138 = vmatpush1.bf16.msra.mxu0 %v15073_v37  ;;  %5098 = vmatprep.subr.bf16.mxu1 %v15576_v61  ;;  %v15671_v37 = vcombine.low %v1228_v2, %v1232_v17  ;;  %v15161_v61 = vcombine.low %v717_v3, %v721_v4  ;;  %v15154_v22 = vcombine.high %v709_v13, %v713_v14  ;;  %v805_v17 = vld [vmem:[#allocation3 + $0x5d8] sm:$0xff] }
 0x34f   :  { %5139 = vmatprep.subr.bf16.mxu0 %v15066_v16  ;;  %v15664_v16 = vcombine.high %v1220_v10, %v1224_v12  ;;  %v809_v3 = vld [vmem:[#allocation3 + $0x5f8] sm:$0xff] }
 0x350   :  { %v933_v4 = vld [vmem:[#allocation3 + $0x9d8] sm:$0xff] }
 0x351   :  { %5099 = vmatpush1.bf16.msra.mxu1 %v15575_v31  ;;  %v705_v31 = vld [vmem:[#allocation3 + $0x2b8] sm:$0xff] }
 0x352   :  { %5140 = vmatpush1.bf16.msra.mxu0 %v15065_v33  ;;  %5100 = vmatprep.subr.bf16.mxu1 %v15696_v38  ;;  %v15663_v33 = vcombine.low %v1220_v10, %v1224_v12  ;;  %v15153_v38 = vcombine.low %v709_v13, %v713_v14  ;;  %v15146_v46 = vcombine.high %v701_v29, %v705_v31  ;;  %v797_v12 = vld [vmem:[#allocation3 + $0x598] sm:$0xff] }
 0x353   :  { %5141 = vmatprep.subr.bf16.mxu0 %v15186_v45  ;;  %v15656_v45 = vcombine.high %v1212_v23, %v1216_v5  ;;  %v801_v13 = vld [vmem:[#allocation3 + $0x5b8] sm:$0xff] }
 0x354   :  { %v925_v14 = vld [vmem:[#allocation3 + $0x998] sm:$0xff] }
 0x355   :  { %5101 = vmatpush2.bf16.msra.mxu1 %v15695_v42  ;;  %v697_v42 = vld [vmem:[#allocation3 + $0x278] sm:$0xff] }
 0x356   :  { %5142 = vmatpush2.bf16.msra.mxu0 %v15185_v56  ;;  %5102 = vmatprep.subr.bf16.mxu1 %v15688_v20  ;;  %v15655_v56 = vcombine.low %v1212_v23, %v1216_v5  ;;  %v15145_v20 = vcombine.low %v701_v29, %v705_v31  ;;  %v15138_v57 = vcombine.high %v693_v53, %v697_v42  ;;  %v789_v5 = vld [vmem:[#allocation3 + $0x558] sm:$0xff] }
 0x357   :  { %5143 = vmatprep.subr.bf16.mxu0 %v15178_v36  ;;  %v15648_v36 = vcombine.high %v1204_v50, %v1208_v34  ;;  %v793_v29 = vld [vmem:[#allocation3 + $0x578] sm:$0xff] }
 0x359   :  { %5103 = vmatpush2.bf16.msra.mxu1 %v15687_v62  ;;  %v689_v62 = vld [vmem:[#allocation3 + $0x238] sm:$0xff] }
 0x35a   :  { %5144 = vmatpush2.bf16.msra.mxu0 %v15177_v63  ;;  %5104 = vmatprep.subr.bf16.mxu1 %v15680_v0  ;;  %v15647_v63 = vcombine.low %v1204_v50, %v1208_v34  ;;  %v15137_v0 = vcombine.low %v693_v53, %v697_v42  ;;  %v15130_v2 = vcombine.high %v685_v60, %v689_v62 }
 0x35b   :  { %5145 = vmatprep.subr.bf16.mxu0 %v15170_v39  ;;  %v15640_v39 = vcombine.high %v1196_v55, %v1200_v19  ;;  %v15241_v50 = vcombine.low %v797_v12, %v801_v13  ;;  %v15234_v42 = vcombine.high %v789_v5, %v793_v29 }
 0x35d   :  { %5105 = vmatpush2.bf16.msra.mxu1 %v15679_v26  ;;  %v937_v26 = vld [vmem:[#allocation3 + $0x9f8] sm:$0xff] }
 0x35e   :  { %5146 = vmatpush2.bf16.msra.mxu0 %v15169_v21  ;;  %5106 = vmatprep.subr.bf16.mxu1 %v15672_v6  ;;  %v15639_v21 = vcombine.low %v1196_v55, %v1200_v19  ;;  %v15129_v6 = vcombine.low %v685_v60, %v689_v62  ;;  %v15378_v10 = vcombine.high %v933_v4, %v937_v26  ;;  %v781_v55 = vld [vmem:[#allocation3 + $0x518] sm:$0xff] }
 0x35f   :  { %5147 = vmatprep.subr.bf16.mxu0 %v15162_v8  ;;  %v15250_v8 = vcombine.high %v805_v17, %v809_v3  ;;  %v785_v19 = vld [vmem:[#allocation3 + $0x538] sm:$0xff] }
 0x360   :  { %v909_v60 = vld [vmem:[#allocation3 + $0x918] sm:$0xff] }
 0x361   :  { %5107 = vmatpush2.bf16.msra.mxu1 %v15671_v37  ;;  %v929_v37 = vld [vmem:[#allocation3 + $0x9b8] sm:$0xff] }
 0x362   :  { %5148 = vmatpush2.bf16.msra.mxu0 %v15161_v61  ;;  %5108 = vmatprep.subr.bf16.mxu1 %v15664_v16  ;;  %v15249_v61 = vcombine.low %v805_v17, %v809_v3  ;;  %v15377_v16 = vcombine.low %v933_v4, %v937_v26  ;;  %v15370_v23 = vcombine.high %v925_v14, %v929_v37  ;;  %v773_v26 = vld [vmem:[#allocation3 + $0x4d8] sm:$0xff] }
 0x363   :  { %5149 = vmatprep.subr.bf16.mxu0 %v15154_v22  ;;  %v15242_v22 = vcombine.high %v797_v12, %v801_v13  ;;  %v15369_v53 = vcombine.low %v925_v14, %v929_v37  ;;  %v15226_v17 = vcombine.high %v781_v55, %v785_v19  ;;  %v15225_v12 = vcombine.low %v781_v55, %v785_v19  ;;  %v881_v55 = vld [vmem:[#allocation3 + $0x838] sm:$0xff] }
 0x365   :  { %5109 = vmatpush2.bf16.msra.mxu1 %v15663_v33  ;;  %v917_v33 = vld [vmem:[#allocation3 + $0x958] sm:$0xff] }
 0x366   :  { %5150 = vmatpush2.bf16.msra.mxu0 %v15153_v38  ;;  %5110 = vmatprep.subr.bf16.mxu1 %v15656_v45  ;;  %v921_v38 = vld [vmem:[#allocation3 + $0x978] sm:$0xff] }
 0x367   :  { %5151 = vmatprep.subr.bf16.mxu0 %v15146_v46 }
 0x369   :  { %5111 = vmatpush2.bf16.msra.mxu1 %v15655_v56 }
 0x36a   :  { %5152 = vmatpush2.bf16.msra.mxu0 %v15145_v20  ;;  %5112 = vmatprep.subr.bf16.mxu1 %v15648_v36 }
 0x36b   :  { %5153 = vmatprep.subr.bf16.mxu0 %v15138_v57  ;;  %v15362_v57 = vcombine.high %v917_v33, %v921_v38 }
 0x36d   :  { %5113 = vmatpush2.bf16.msra.mxu1 %v15647_v63 }
 0x36e   :  { %5154 = vmatpush2.bf16.msra.mxu0 %v15137_v0  ;;  %5114 = vmatprep.subr.bf16.mxu1 %v15640_v39  ;;  %v15233_v39 = vcombine.low %v789_v5, %v793_v29 }
 0x36f   :  { %5155 = vmatprep.subr.bf16.mxu0 %v15130_v2  ;;  %v15361_v2 = vcombine.low %v917_v33, %v921_v38  ;;  %v757_v38 = vld [vmem:[#allocation3 + $0x458] sm:$0xff] }
 0x371   :  { %5115 = vmatpush2.bf16.msra.mxu1 %v15639_v21  ;;  %v777_v21 = vld [vmem:[#allocation3 + $0x4f8] sm:$0xff] }
 0x372   :  { %5156 = vmatpush2.bf16.msra.mxu0 %v15129_v6  ;;  %5166 = vmatprep.subr.bf16.mxu1 %v15250_v8  ;;  %v901_v6 = vld [vmem:[#allocation3 + $0x8d8] sm:$0xff]  ;;  %v15218_v14 = vcombine.high %v773_v26, %v777_v21  ;;  %v15217_v5 = vcombine.low %v773_v26, %v777_v21 }
 0x373   :  { %5207 = vmatprep.subr.bf16.mxu0 %v15378_v10  ;;  %v905_v8 = vld [vmem:[#allocation3 + $0x8f8] sm:$0xff] }
 0x374   :  { %v4872_v31 = vpop.f32.mrf.mxu1  ;;  %5117 = vmatmul.mubr.bf16.vlgmr.msra.gmra.mxu1 %v19487_v32  ;;  %v15346_v37 = vcombine.high %v901_v6, %v905_v8  ;;  %v15345_v29 = vcombine.low %v901_v6, %v905_v8  ;;  %v989_v26 = vld [vmem:[#allocation3 + $0xb98] sm:$0xff] }
 0x375   :  { %v4873_v45 = vadd.f32 %v4872_v31, %v19541_v7  ;;  %v4913_v46 = vpop.f32.mrf.mxu0  ;;  %5158 = vmatmul.mubr.bf16.vlgmr.msra.gmra.mxu0 %v19451_v49  ;;  %5167 = vmatpush1.bf16.msra.mxu1 %v15249_v61  ;;  %v913_v49 = vld [vmem:[#allocation3 + $0x938] sm:$0xff] }
 0x376   :  { %5208 = vmatpush1.bf16.msra.mxu0 %v15377_v16  ;;  %v4874_v34 = vpop.f32.mrf.mxu1  ;;  %5168 = vmatprep.subr.bf16.mxu1 %v15242_v22  ;;  %v15353_v13 = vcombine.low %v909_v60, %v913_v49  ;;  %v765_v61 = vld [vmem:[#allocation3 + $0x498] sm:$0xff] }
 0x377   :  { %v4914_v56 = vadd.f32 %v4913_v46, %v4873_v45  ;;  %v4875_v20 = vadd.f32 %v4874_v34, %v19545_v18  ;;  %v4915_v36 = vpop.f32.mrf.mxu0  ;;  %5209 = vmatprep.subr.bf16.mxu0 %v15370_v23  ;;  %5198 = vmatprep.mubr.bf16.mxu1 %v19445_v43  ;;  %v769_v16 = vld [vmem:[#allocation3 + $0x4b8] sm:$0xff] }
 0x378   :  { %v4876_v7 = vpop.f32.mrf.mxu1  ;;  %5239 = vmatprep.mubr.bf16.mxu0 %v19459_v48  ;;  %v15354_v48 = vcombine.high %v909_v60, %v913_v49  ;;  %v893_v22 = vld [vmem:[#allocation3 + $0x898] sm:$0xff]  ;;  %v15210_v31 = vcombine.high %v765_v61, %v769_v16  ;;  %v15209_v34 = vcombine.low %v765_v61, %v769_v16 }
 0x379   :  { %vm5333_vm13 = vcmp.ge.f32.partialorder %v4914_v56, 0.0  ;;  %v5342_v62 = vmul.f32 %v19513_v15, %v4914_v56  ;;  %v4916_v63 = vadd.f32 %v4915_v36, %v4875_v20  ;;  %v4917_v0 = vpop.f32.mrf.mxu0  ;;  %5169 = vmatpush1.bf16.msra.mxu1 %v15241_v50  ;;  %v897_v23 = vld [vmem:[#allocation3 + $0x8b8] sm:$0xff] }
 0x37a   :  { %5210 = vmatpush1.bf16.msra.mxu0 %v15369_v53  ;;  %v4877_v18 = vpop.f32.mrf.mxu1  ;;  %5170 = vmatprep.subr.bf16.mxu1 %v15234_v42  ;;  %v15338_v33 = vcombine.high %v893_v22, %v897_v23  ;;  %v761_v45 = vld [vmem:[#allocation3 + $0x478] sm:$0xff]  ;;  %v15337_v53 = vcombine.low %v893_v22, %v897_v23 }
 0x37b   :  { %v19554_v3 = vsel %vm5333_vm13, %v4914_v56, %v5342_v62  ;;  %vm5334_vm14 = vcmp.ge.f32.partialorder %v4916_v63, 0.0  ;;  %v5343_v43 = vmul.f32 %v19513_v15, %v4916_v63  ;;  %v4918_v4 = vpop.f32.mrf.mxu0  ;;  %5211 = vmatprep.subr.bf16.mxu0 %v15362_v57  ;;  %v885_v46 = vld [vmem:[#allocation3 + $0x858] sm:$0xff]  ;;  %v15202_v42 = vcombine.high %v757_v38, %v761_v45 }
 0x37c   :  { %v889_v50 = vld [vmem:[#allocation3 + $0x878] sm:$0xff]  ;;  %v15201_v19 = vcombine.low %v757_v38, %v761_v45 }
 0x37d   :  { %v19557_v10 = vsel %vm5334_vm14, %v4916_v63, %v5343_v43  ;;  %5171 = vmatpush1.bf16.msra.mxu1 %v15233_v39  ;;  %v15330_v56 = vcombine.high %v885_v46, %v889_v50  ;;  %v749_v20 = vld [vmem:[#allocation3 + $0x418] sm:$0xff]  ;;  %v15329_v7 = vcombine.low %v885_v46, %v889_v50 }
 0x37e   :  { %5212 = vmatpush1.bf16.msra.mxu0 %v15361_v2  ;;  %5172 = vmatprep.subr.bf16.mxu1 %v15226_v17  ;;  %v753_v36 = vld [vmem:[#allocation3 + $0x438] sm:$0xff] }
 0x37f   :  { %5213 = vmatprep.subr.bf16.mxu0 %v15354_v48  ;;  %v877_v57 = vld [vmem:[#allocation3 + $0x818] sm:$0xff]  ;;  %v15194_v60 = vcombine.high %v749_v20, %v753_v36  ;;  %v15193_v18 = vcombine.low %v749_v20, %v753_v36 }
 0x380   :  { %v15322_v49 = vcombine.high %v877_v57, %v881_v55  ;;  %v869_v62 = vld [vmem:[#allocation3 + $0x7d8] sm:$0xff]  ;;  %v15321_v2 = vcombine.low %v877_v57, %v881_v55 }
 0x381   :  { %5173 = vmatpush1.bf16.msra.mxu1 %v15225_v12  ;;  %v873_v63 = vld [vmem:[#allocation3 + $0x7f8] sm:$0xff] }
 0x382   :  { %5214 = vmatpush1.bf16.msra.mxu0 %v15353_v13  ;;  %5174 = vmatprep.subr.bf16.mxu1 %v15218_v14  ;;  %v997_v0 = vld [vmem:[#allocation3 + $0xbd8] sm:$0xff]  ;;  %v15314_v17 = vcombine.high %v869_v62, %v873_v63  ;;  %v15313_v6 = vcombine.low %v869_v62, %v873_v63 }
 0x383   :  { %5215 = vmatprep.subr.bf16.mxu0 %v15346_v37  ;;  %v1001_v39 = vld [vmem:[#allocation3 + $0xbf8] sm:$0xff] }
 0x384   :  { %v15442_v43 = vcombine.high %v997_v0, %v1001_v39  ;;  %v861_v4 = vld [vmem:[#allocation3 + $0x798] sm:$0xff]  ;;  %v15441_v8 = vcombine.low %v997_v0, %v1001_v39 }
 0x385   :  { %5175 = vmatpush1.bf16.msra.mxu1 %v15217_v5  ;;  %v865_v48 = vld [vmem:[#allocation3 + $0x7b8] sm:$0xff] }
 0x386   :  { %5216 = vmatpush1.bf16.msra.mxu0 %v15345_v29  ;;  %5176 = vmatprep.subr.bf16.mxu1 %v15210_v31  ;;  %v993_v21 = vld [vmem:[#allocation3 + $0xbb8] sm:$0xff]  ;;  %v15306_v12 = vcombine.high %v861_v4, %v865_v48  ;;  %v15305_v22 = vcombine.low %v861_v4, %v865_v48 }
 0x387   :  { %5217 = vmatprep.subr.bf16.mxu0 %v15338_v33  ;;  %v15434_v13 = vcombine.high %v989_v26, %v993_v21  ;;  %v853_v14 = vld [vmem:[#allocation3 + $0x758] sm:$0xff]  ;;  %v15433_v23 = vcombine.low %v989_v26, %v993_v21 }
 0x388   :  { %v857_v37 = vld [vmem:[#allocation3 + $0x778] sm:$0xff] }
 0x389   :  { %5177 = vmatpush1.bf16.msra.mxu1 %v15209_v34  ;;  %v981_v61 = vld [vmem:[#allocation3 + $0xb58] sm:$0xff]  ;;  %v15298_v5 = vcombine.high %v853_v14, %v857_v37  ;;  %v15297_v46 = vcombine.low %v853_v14, %v857_v37 }
 0x38a   :  { %5218 = vmatpush1.bf16.msra.mxu0 %v15337_v53  ;;  %5178 = vmatprep.subr.bf16.mxu1 %v15202_v42  ;;  %v985_v16 = vld [vmem:[#allocation3 + $0xb78] sm:$0xff] }
 0x38b   :  { %5219 = vmatprep.subr.bf16.mxu0 %v15330_v56  ;;  %v15426_v29 = vcombine.high %v981_v61, %v985_v16  ;;  %v845_v31 = vld [vmem:[#allocation3 + $0x718] sm:$0xff]  ;;  %v15425_v50 = vcombine.low %v981_v61, %v985_v16 }
 0x38c   :  { %v849_v33 = vld [vmem:[#allocation3 + $0x738] sm:$0xff] }
 0x38d   :  { %5179 = vmatpush1.bf16.msra.mxu1 %v15201_v19  ;;  %v973_v38 = vld [vmem:[#allocation3 + $0xb18] sm:$0xff]  ;;  %v15290_v34 = vcombine.high %v845_v31, %v849_v33  ;;  %v15289_v57 = vcombine.low %v845_v31, %v849_v33 }
 0x38e   :  { %5220 = vmatpush1.bf16.msra.mxu0 %v15329_v7  ;;  %5180 = vmatprep.subr.bf16.mxu1 %v15194_v60  ;;  %v977_v45 = vld [vmem:[#allocation3 + $0xb38] sm:$0xff] }
 0x38f   :  { %5221 = vmatprep.subr.bf16.mxu0 %v15322_v49  ;;  %v15418_v53 = vcombine.high %v973_v38, %v977_v45  ;;  %v837_v42 = vld [vmem:[#allocation3 + $0x6d8] sm:$0xff]  ;;  %v15417_v55 = vcombine.low %v973_v38, %v977_v45 }
 0x390   :  { %v841_v56 = vld [vmem:[#allocation3 + $0x6f8] sm:$0xff] }
 0x391   :  { %5181 = vmatpush1.bf16.msra.mxu1 %v15193_v18  ;;  %v965_v20 = vld [vmem:[#allocation3 + $0xad8] sm:$0xff]  ;;  %v15282_v19 = vcombine.high %v837_v42, %v841_v56  ;;  %v15281_v0 = vcombine.low %v837_v42, %v841_v56 }
 0x392   :  { %5222 = vmatpush1.bf16.msra.mxu0 %v15321_v2  ;;  %5182 = vmatprep.subr.bf16.mxu1 %v15314_v17  ;;  %v969_v36 = vld [vmem:[#allocation3 + $0xaf8] sm:$0xff] }
 0x393   :  { %5223 = vmatprep.subr.bf16.mxu0 %v15442_v43  ;;  %v15410_v7 = vcombine.high %v965_v20, %v969_v36  ;;  %v829_v60 = vld [vmem:[#allocation3 + $0x698] sm:$0xff]  ;;  %v15409_v39 = vcombine.low %v965_v20, %v969_v36  ;;  %v1289_v20 = vrot.slane %v19531_v9, %v19400_v35 }
 0x394   :  { %v833_v49 = vld [vmem:[#allocation3 + $0x6b8] sm:$0xff] }
 0x395   :  { %5183 = vmatpush2.bf16.msra.mxu1 %v15313_v6  ;;  %v957_v62 = vld [vmem:[#allocation3 + $0xa98] sm:$0xff]  ;;  %v15274_v18 = vcombine.high %v829_v60, %v833_v49  ;;  %v15273_v26 = vcombine.low %v829_v60, %v833_v49 }
 0x396   :  { %5224 = vmatpush2.bf16.msra.mxu0 %v15441_v8  ;;  %5184 = vmatprep.subr.bf16.mxu1 %v15306_v12  ;;  %v961_v63 = vld [vmem:[#allocation3 + $0xab8] sm:$0xff] }
 0x397   :  { %5225 = vmatprep.subr.bf16.mxu0 %v15434_v13  ;;  %v15402_v2 = vcombine.high %v957_v62, %v961_v63  ;;  %v821_v17 = vld [vmem:[#allocation3 + $0x658] sm:$0xff]  ;;  %v15401_v21 = vcombine.low %v957_v62, %v961_v63 }
 0x398   :  { %v825_v43 = vld [vmem:[#allocation3 + $0x678] sm:$0xff] }
 0x399   :  { %5185 = vmatpush2.bf16.msra.mxu1 %v15305_v22  ;;  %v949_v4 = vld [vmem:[#allocation3 + $0xa58] sm:$0xff]  ;;  %v15266_v6 = vcombine.high %v821_v17, %v825_v43  ;;  %v15265_v61 = vcombine.low %v821_v17, %v825_v43 }
 0x39a   :  { %5226 = vmatpush2.bf16.msra.mxu0 %v15433_v23  ;;  %5186 = vmatprep.subr.bf16.mxu1 %v15298_v5  ;;  %v953_v48 = vld [vmem:[#allocation3 + $0xa78] sm:$0xff] }
 0x39b   :  { %5227 = vmatprep.subr.bf16.mxu0 %v15426_v29  ;;  %v15394_v8 = vcombine.high %v949_v4, %v953_v48  ;;  %v813_v12 = vld [vmem:[#allocation3 + $0x618] sm:$0xff]  ;;  %v15393_v16 = vcombine.low %v949_v4, %v953_v48 }
 0x39c   :  { %v817_v13 = vld [vmem:[#allocation3 + $0x638] sm:$0xff] }
 0x39d   :  { %5187 = vmatpush2.bf16.msra.mxu1 %v15297_v46  ;;  %v941_v14 = vld [vmem:[#allocation3 + $0xa18] sm:$0xff]  ;;  %v15258_v22 = vcombine.high %v813_v12, %v817_v13  ;;  %v15257_v38 = vcombine.low %v813_v12, %v817_v13 }
 0x39e   :  { %5228 = vmatpush2.bf16.msra.mxu0 %v15425_v50  ;;  %5188 = vmatprep.subr.bf16.mxu1 %v15290_v34  ;;  %v945_v37 = vld [vmem:[#allocation3 + $0xa38] sm:$0xff] }
 0x39f   :  { %5229 = vmatprep.subr.bf16.mxu0 %v15418_v53  ;;  %v15386_v23 = vcombine.high %v941_v14, %v945_v37  ;;  %v1061_v5 = vld [vmem:[#allocation3 + $0xdd8] sm:$0xff]  ;;  %v15385_v45 = vcombine.low %v941_v14, %v945_v37 }
 0x3a0   :  { %v1065_v29 = vld [vmem:[#allocation3 + $0xdf8] sm:$0xff] }
 0x3a1   :  { %5189 = vmatpush2.bf16.msra.mxu1 %v15289_v57  ;;  %v1189_v31 = vld [vmem:[#allocation3 + $0x11d8] sm:$0xff]  ;;  %v15506_v46 = vcombine.high %v1061_v5, %v1065_v29  ;;  %v15505_v36 = vcombine.low %v1061_v5, %v1065_v29 }
 0x3a2   :  { %5230 = vmatpush2.bf16.msra.mxu0 %v15417_v55  ;;  %5190 = vmatprep.subr.bf16.mxu1 %v15282_v19  ;;  %v1193_v33 = vld [vmem:[#allocation3 + $0x11f8] sm:$0xff]  ;;  %v1293_v19 = vrot.slane %v19531_v9, %v19404_v40 }
 0x3a3   :  { %5231 = vmatprep.subr.bf16.mxu0 %v15410_v7  ;;  %v15634_v50 = vcombine.high %v1189_v31, %v1193_v33  ;;  %v1053_v34 = vld [vmem:[#allocation3 + $0xd98] sm:$0xff]  ;;  %v15633_v57 = vcombine.low %v1189_v31, %v1193_v33 }
 0x3a4   :  { %v1057_v53 = vld [vmem:[#allocation3 + $0xdb8] sm:$0xff] }
 0x3a5   :  { %5191 = vmatpush2.bf16.msra.mxu1 %v15281_v0  ;;  %v1181_v42 = vld [vmem:[#allocation3 + $0x1198] sm:$0xff]  ;;  %v15498_v55 = vcombine.high %v1053_v34, %v1057_v53 }
 0x3a6   :  { %5232 = vmatpush2.bf16.msra.mxu0 %v15409_v39  ;;  %5192 = vmatprep.subr.bf16.mxu1 %v15274_v18  ;;  %v1185_v56 = vld [vmem:[#allocation3 + $0x11b8] sm:$0xff] }
 0x3a7   :  { %5233 = vmatprep.subr.bf16.mxu0 %v15402_v2  ;;  %v15626_v7 = vcombine.high %v1181_v42, %v1185_v56  ;;  %v1045_v60 = vld [vmem:[#allocation3 + $0xd58] sm:$0xff]  ;;  %v15497_v2 = vcombine.low %v1053_v34, %v1057_v53  ;;  %v15625_v43 = vcombine.low %v1181_v42, %v1185_v56 }
 0x3a8   :  { %v1049_v49 = vld [vmem:[#allocation3 + $0xd78] sm:$0xff] }
 0x3a9   :  { %5193 = vmatpush2.bf16.msra.mxu1 %v15273_v26  ;;  %v1173_v63 = vld [vmem:[#allocation3 + $0x1158] sm:$0xff]  ;;  %v15490_v4 = vcombine.high %v1045_v60, %v1049_v49  ;;  %v15489_v37 = vcombine.low %v1045_v60, %v1049_v49 }
 0x3aa   :  { %5234 = vmatpush2.bf16.msra.mxu0 %v15401_v21  ;;  %5194 = vmatprep.subr.bf16.mxu1 %v15266_v6  ;;  %v1177_v0 = vld [vmem:[#allocation3 + $0x1178] sm:$0xff] }
 0x3ab   :  { %5235 = vmatprep.subr.bf16.mxu0 %v15394_v8  ;;  %v15618_v21 = vcombine.high %v1173_v63, %v1177_v0  ;;  %v1041_v6 = vld [vmem:[#allocation3 + $0xd38] sm:$0xff] }
 0x3ac   :  { %v1165_v12 = vld [vmem:[#allocation3 + $0x1118] sm:$0xff] }
 0x3ad   :  { %5195 = vmatpush2.bf16.msra.mxu1 %v15265_v61  ;;  %v1029_v29 = vld [vmem:[#allocation3 + $0xcd8] sm:$0xff] }
 0x3ae   :  { %5236 = vmatpush2.bf16.msra.mxu0 %v15393_v16  ;;  %5196 = vmatprep.subr.bf16.mxu1 %v15258_v22  ;;  %v15617_v16 = vcombine.low %v1173_v63, %v1177_v0  ;;  %v1157_v31 = vld [vmem:[#allocation3 + $0x10d8] sm:$0xff] }
 0x3af   :  { %5237 = vmatprep.subr.bf16.mxu0 %v15386_v23  ;;  %v1161_v33 = vld [vmem:[#allocation3 + $0x10f8] sm:$0xff] }
 0x3b0   :  { %v1025_v34 = vld [vmem:[#allocation3 + $0xcb8] sm:$0xff] }
 0x3b1   :  { %5197 = vmatpush2.bf16.msra.mxu1 %v15257_v38  ;;  %v1149_v53 = vld [vmem:[#allocation3 + $0x1098] sm:$0xff] }
 0x3b2   :  { %5238 = vmatpush2.bf16.msra.mxu0 %v15385_v45  ;;  %5248 = vmatprep.subr.bf16.mxu1 %v15506_v46  ;;  %v15602_v46 = vcombine.high %v1157_v31, %v1161_v33  ;;  %v1153_v42 = vld [vmem:[#allocation3 + $0x10b8] sm:$0xff] }
 0x3b3   :  { %5289 = vmatprep.subr.bf16.mxu0 %v15634_v50  ;;  %v1021_v50 = vld [vmem:[#allocation3 + $0xc98] sm:$0xff] }
 0x3b4   :  { %v4954_v62 = vpop.f32.mrf.mxu1  ;;  %5199 = vmatmul.mubr.bf16.vlgmr.msra.gmra.mxu1 %v19455_v51  ;;  %v1037_v51 = vld [vmem:[#allocation3 + $0xd18] sm:$0xff]  ;;  %v15465_v49 = vcombine.low %v1021_v50, %v1025_v34 }
 0x3b5   :  { %v4955_v39 = vadd.f32 %v4954_v62, %v1289_v20  ;;  %v4995_v18 = vpop.f32.mrf.mxu0  ;;  %5240 = vmatmul.mubr.bf16.vlgmr.msra.gmra.mxu0 %v19471_v44  ;;  %5249 = vmatpush1.bf16.msra.mxu1 %v15505_v36  ;;  %v1169_v44 = vld [vmem:[#allocation3 + $0x1138] sm:$0xff]  ;;  %v15482_v22 = vcombine.high %v1037_v51, %v1041_v6  ;;  %v15481_v38 = vcombine.low %v1037_v51, %v1041_v6 }
 0x3b6   :  { %5290 = vmatpush1.bf16.msra.mxu0 %v15633_v57  ;;  %v4956_v17 = vpop.f32.mrf.mxu1  ;;  %5250 = vmatprep.subr.bf16.mxu1 %v15498_v55  ;;  %v15610_v5 = vcombine.high %v1165_v12, %v1169_v44  ;;  %v15601_v20 = vcombine.low %v1157_v31, %v1161_v33  ;;  %v15466_v36 = vcombine.high %v1021_v50, %v1025_v34  ;;  %v1013_v55 = vld [vmem:[#allocation3 + $0xc58] sm:$0xff] }
 0x3b7   :  { %v19565_v9 = vadd.f32 %v4995_v18, %v4955_v39  ;;  %v4957_v48 = vadd.f32 %v4956_v17, %v1293_v19  ;;  %v4997_v26 = vpop.f32.mrf.mxu0  ;;  %5291 = vmatprep.subr.bf16.mxu0 %v15626_v7  ;;  %5280 = vmatprep.mubr.bf16.mxu1 %v19464_v58  ;;  %v1033_v58 = vld [vmem:[#allocation3 + $0xcf8] sm:$0xff]  ;;  %v15594_v57 = vcombine.high %v1149_v53, %v1153_v42 }
 0x3b8   :  { %v4958_v8 = vpop.f32.mrf.mxu1  ;;  %5321 = vmatprep.mubr.bf16.mxu0 %v19479_v11  ;;  %v15609_v11 = vcombine.low %v1165_v12, %v1169_v44  ;;  %v15474_v45 = vcombine.high %v1029_v29, %v1033_v58  ;;  %v15473_v56 = vcombine.low %v1029_v29, %v1033_v58  ;;  %v1017_v19 = vld [vmem:[#allocation3 + $0xc78] sm:$0xff]  ;;  %v15593_v62 = vcombine.low %v1149_v53, %v1153_v42 }
 0x3b9   :  { %v19569_v13 = vadd.f32 %v4997_v26, %v4957_v48  ;;  %v4999_v14 = vpop.f32.mrf.mxu0  ;;  %5251 = vmatpush1.bf16.msra.mxu1 %v15497_v2  ;;  %v1141_v7 = vld [vmem:[#allocation3 + $0x1058] sm:$0xff]  ;;  %v15458_v63 = vcombine.high %v1013_v55, %v1017_v19 }
 0x3ba   :  { %5292 = vmatpush1.bf16.msra.mxu0 %v15625_v43  ;;  %v4959_v61 = vpop.f32.mrf.mxu1  ;;  %5252 = vmatprep.subr.bf16.mxu1 %v15490_v4  ;;  %v1145_v60 = vld [vmem:[#allocation3 + $0x1078] sm:$0xff]  ;;  %v15457_v43 = vcombine.low %v1013_v55, %v1017_v19 }
 0x3bb   :  { %v5000_v23 = vpop.f32.mrf.mxu0  ;;  %5293 = vmatprep.subr.bf16.mxu0 %v15618_v21  ;;  %v15586_v0 = vcombine.high %v1141_v7, %v1145_v60  ;;  %v1005_v39 = vld [vmem:[#allocation3 + $0xc18] sm:$0xff]  ;;  %v15585_v4 = vcombine.low %v1141_v7, %v1145_v60 }
 0x3bc   :  { %v1009_v18 = vld [vmem:[#allocation3 + $0xc38] sm:$0xff] }
 0x3bd   :  { %5253 = vmatpush1.bf16.msra.mxu1 %v15489_v37  ;;  %v1133_v2 = vld [vmem:[#allocation3 + $0x1018] sm:$0xff]  ;;  %v15450_v48 = vcombine.high %v1005_v39, %v1009_v18  ;;  %v15449_v12 = vcombine.low %v1005_v39, %v1009_v18 }
 0x3be   :  { %5294 = vmatpush1.bf16.msra.mxu0 %v15617_v16  ;;  %5254 = vmatprep.subr.bf16.mxu1 %v15482_v22  ;;  %v1137_v17 = vld [vmem:[#allocation3 + $0x1038] sm:$0xff] }
 0x3bf   :  { %5295 = vmatprep.subr.bf16.mxu0 %v15610_v5  ;;  %v15578_v26 = vcombine.high %v1133_v2, %v1137_v17  ;;  %v1125_v21 = vld [vmem:[#allocation3 + $0xfd8] sm:$0xff]  ;;  %v15577_v44 = vcombine.low %v1133_v2, %v1137_v17 }
 0x3c0   :  { %v1129_v51 = vld [vmem:[#allocation3 + $0xff8] sm:$0xff] }
 0x3c1   :  { %5255 = vmatpush1.bf16.msra.mxu1 %v15481_v38  ;;  %v1253_v6 = vld [vmem:[#allocation3 + $0x13d8] sm:$0xff]  ;;  %v15570_v14 = vcombine.high %v1125_v21, %v1129_v51  ;;  %v15569_v5 = vcombine.low %v1125_v21, %v1129_v51 }
 0x3c2   :  { %5296 = vmatpush1.bf16.msra.mxu0 %v15609_v11  ;;  %5256 = vmatprep.subr.bf16.mxu1 %v15474_v45  ;;  %v1257_v8 = vld [vmem:[#allocation3 + $0x13f8] sm:$0xff] }
 0x3c3   :  { %5297 = vmatprep.subr.bf16.mxu0 %v15602_v46  ;;  %v15698_v37 = vcombine.high %v1253_v6, %v1257_v8  ;;  %v1117_v61 = vld [vmem:[#allocation3 + $0xf98] sm:$0xff]  ;;  %v15697_v29 = vcombine.low %v1253_v6, %v1257_v8 }
 0x3c4   :  { %v1121_v16 = vld [vmem:[#allocation3 + $0xfb8] sm:$0xff] }
 0x3c5   :  { %5257 = vmatpush1.bf16.msra.mxu1 %v15473_v56  ;;  %v1245_v22 = vld [vmem:[#allocation3 + $0x1398] sm:$0xff]  ;;  %v15562_v58 = vcombine.high %v1117_v61, %v1121_v16  ;;  %v15561_v46 = vcombine.low %v1117_v61, %v1121_v16 }
 0x3c6   :  { %5298 = vmatpush1.bf16.msra.mxu0 %v15601_v20  ;;  %5258 = vmatprep.subr.bf16.mxu1 %v15466_v36  ;;  %v1249_v23 = vld [vmem:[#allocation3 + $0x13b8] sm:$0xff] }
 0x3c7   :  { %5299 = vmatprep.subr.bf16.mxu0 %v15594_v57  ;;  %v15690_v31 = vcombine.high %v1245_v22, %v1249_v23  ;;  %v1109_v33 = vld [vmem:[#allocation3 + $0xf58] sm:$0xff]  ;;  %v15689_v50 = vcombine.low %v1245_v22, %v1249_v23 }
 0x3c8   :  { %v1113_v38 = vld [vmem:[#allocation3 + $0xf78] sm:$0xff] }
 0x3c9   :  { %5259 = vmatpush1.bf16.msra.mxu1 %v15465_v49  ;;  %v1237_v11 = vld [vmem:[#allocation3 + $0x1358] sm:$0xff]  ;;  %v15554_v34 = vcombine.high %v1109_v33, %v1113_v38  ;;  %v15553_v57 = vcombine.low %v1109_v33, %v1113_v38 }
 0x3ca   :  { %5300 = vmatpush1.bf16.msra.mxu0 %v15593_v62  ;;  %5260 = vmatprep.subr.bf16.mxu1 %v15458_v63  ;;  %v1241_v45 = vld [vmem:[#allocation3 + $0x1378] sm:$0xff] }
 0x3cb   :  { %5301 = vmatprep.subr.bf16.mxu0 %v15586_v0  ;;  %v15682_v53 = vcombine.high %v1237_v11, %v1241_v45  ;;  %v1101_v42 = vld [vmem:[#allocation3 + $0xf18] sm:$0xff]  ;;  %v15681_v55 = vcombine.low %v1237_v11, %v1241_v45 }
 0x3cc   :  { %v1105_v56 = vld [vmem:[#allocation3 + $0xf38] sm:$0xff] }
 0x3cd   :  { %5261 = vmatpush1.bf16.msra.mxu1 %v15457_v43  ;;  %v1229_v20 = vld [vmem:[#allocation3 + $0x1318] sm:$0xff]  ;;  %v15546_v19 = vcombine.high %v1101_v42, %v1105_v56  ;;  %v15545_v0 = vcombine.low %v1101_v42, %v1105_v56 }
 0x3ce   :  { %5302 = vmatpush1.bf16.msra.mxu0 %v15585_v4  ;;  %5262 = vmatprep.subr.bf16.mxu1 %v15450_v48  ;;  %v1233_v36 = vld [vmem:[#allocation3 + $0x1338] sm:$0xff] }
 0x3cf   :  { %5303 = vmatprep.subr.bf16.mxu0 %v15578_v26  ;;  %v15674_v7 = vcombine.high %v1229_v20, %v1233_v36  ;;  %v1093_v60 = vld [vmem:[#allocation3 + $0xed8] sm:$0xff]  ;;  %v15673_v39 = vcombine.low %v1229_v20, %v1233_v36 }
 0x3d0   :  { %v1097_v49 = vld [vmem:[#allocation3 + $0xef8] sm:$0xff] }
 0x3d1   :  { %5263 = vmatpush1.bf16.msra.mxu1 %v15449_v12  ;;  %v1221_v62 = vld [vmem:[#allocation3 + $0x12d8] sm:$0xff]  ;;  %v15538_v18 = vcombine.high %v1093_v60, %v1097_v49  ;;  %v15537_v26 = vcombine.low %v1093_v60, %v1097_v49 }
 0x3d2   :  { %5304 = vmatpush1.bf16.msra.mxu0 %v15577_v44  ;;  %5264 = vmatprep.subr.bf16.mxu1 %v15570_v14  ;;  %v1225_v63 = vld [vmem:[#allocation3 + $0x12f8] sm:$0xff] }
 0x3d3   :  { %5305 = vmatprep.subr.bf16.mxu0 %v15698_v37  ;;  %v15666_v2 = vcombine.high %v1221_v62, %v1225_v63  ;;  %v1085_v17 = vld [vmem:[#allocation3 + $0xe98] sm:$0xff]  ;;  %v15665_v21 = vcombine.low %v1221_v62, %v1225_v63 }
 0x3d4   :  { %v1089_v43 = vld [vmem:[#allocation3 + $0xeb8] sm:$0xff] }
 0x3d5   :  { %5265 = vmatpush2.bf16.msra.mxu1 %v15569_v5  ;;  %v1213_v4 = vld [vmem:[#allocation3 + $0x1298] sm:$0xff]  ;;  %v15530_v51 = vcombine.high %v1085_v17, %v1089_v43  ;;  %v15529_v37 = vcombine.low %v1085_v17, %v1089_v43 }
 0x3d6   :  { %5306 = vmatpush2.bf16.msra.mxu0 %v15697_v29  ;;  %5266 = vmatprep.subr.bf16.mxu1 %v15562_v58  ;;  %v1217_v48 = vld [vmem:[#allocation3 + $0x12b8] sm:$0xff] }
 0x3d7   :  { %5307 = vmatprep.subr.bf16.mxu0 %v15690_v31  ;;  %v15658_v6 = vcombine.high %v1213_v4, %v1217_v48  ;;  %v1077_v8 = vld [vmem:[#allocation3 + $0xe58] sm:$0xff]  ;;  %v15657_v61 = vcombine.low %v1213_v4, %v1217_v48 }
 0x3d8   :  { %v1081_v12 = vld [vmem:[#allocation3 + $0xe78] sm:$0xff] }
 0x3d9   :  { %5267 = vmatpush2.bf16.msra.mxu1 %v15561_v46  ;;  %v1205_v44 = vld [vmem:[#allocation3 + $0x1258] sm:$0xff]  ;;  %v15522_v16 = vcombine.high %v1077_v8, %v1081_v12  ;;  %v15521_v31 = vcombine.low %v1077_v8, %v1081_v12 }
 0x3da   :  { %5308 = vmatpush2.bf16.msra.mxu0 %v15689_v50  ;;  %5268 = vmatprep.subr.bf16.mxu1 %v15554_v34  ;;  %v1209_v14 = vld [vmem:[#allocation3 + $0x1278] sm:$0xff] }
 0x3db   :  { %5309 = vmatprep.subr.bf16.mxu0 %v15682_v53  ;;  %v15650_v22 = vcombine.high %v1205_v44, %v1209_v14  ;;  %v1069_v23 = vld [vmem:[#allocation3 + $0xe18] sm:$0xff]  ;;  %v15649_v33 = vcombine.low %v1205_v44, %v1209_v14  ;;  %v17206_v14 = vld [vmem:[#allocation15 + $0xa] sm:$0xff] }
 0x3dc   :  { %v1073_v5 = vld [vmem:[#allocation3 + $0xe38] sm:$0xff] }
 0x3dd   :  { %5269 = vmatpush2.bf16.msra.mxu1 %v15553_v57  ;;  %v1197_v29 = vld [vmem:[#allocation3 + $0x1218] sm:$0xff]  ;;  %v15514_v38 = vcombine.high %v1069_v23, %v1073_v5  ;;  %v15513_v45 = vcombine.low %v1069_v23, %v1073_v5 }
 0x3de   :  { %5310 = vmatpush2.bf16.msra.mxu0 %v15681_v55  ;;  %5270 = vmatprep.subr.bf16.mxu1 %v15546_v19  ;;  %v1201_v58 = vld [vmem:[#allocation3 + $0x1238] sm:$0xff] }
 0x3df   :  { %5311 = vmatprep.subr.bf16.mxu0 %v15674_v7  ;;  %v15642_v11 = vcombine.high %v1197_v29, %v1201_v58  ;;  %v15641_v46 = vcombine.low %v1197_v29, %v1201_v58 }
 0x3e1   :  { %5271 = vmatpush2.bf16.msra.mxu1 %v15545_v0 }
 0x3e2   :  { %5312 = vmatpush2.bf16.msra.mxu0 %v15673_v39  ;;  %5272 = vmatprep.subr.bf16.mxu1 %v15538_v18 }
 0x3e3   :  { %5313 = vmatprep.subr.bf16.mxu0 %v15666_v2 }
 0x3e5   :  { %5273 = vmatpush2.bf16.msra.mxu1 %v15537_v26 }
 0x3e6   :  { %5314 = vmatpush2.bf16.msra.mxu0 %v15665_v21  ;;  %5274 = vmatprep.subr.bf16.mxu1 %v15530_v51 }
 0x3e7   :  { %5315 = vmatprep.subr.bf16.mxu0 %v15658_v6 }
 0x3e9   :  { %5275 = vmatpush2.bf16.msra.mxu1 %v15529_v37  ;;  %v1297_v37 = vrot.slane %v17206_v14, %v19407_v41 }
 0x3ea   :  { %5316 = vmatpush2.bf16.msra.mxu0 %v15657_v61  ;;  %5276 = vmatprep.subr.bf16.mxu1 %v15522_v16  ;;  %v1301_v61 = vrot.slane %v17206_v14, %v253_v54 }
 0x3eb   :  { %5317 = vmatprep.subr.bf16.mxu0 %v15650_v22 }
 0x3ed   :  { %5277 = vmatpush2.bf16.msra.mxu1 %v15521_v31 }
 0x3ee   :  { %5318 = vmatpush2.bf16.msra.mxu0 %v15649_v33  ;;  %5278 = vmatprep.subr.bf16.mxu1 %v15514_v38 }
 0x3ef   :  { %5319 = vmatprep.subr.bf16.mxu0 %v15642_v11 }
 0x3f1   :  { %5279 = vmatpush2.bf16.msra.mxu1 %v15513_v45 }
 0x3f2   :  { %5320 = vmatpush2.bf16.msra.mxu0 %v15641_v46 }
 0x3f4   :  { %v5036_v50 = vpop.f32.mrf.mxu1  ;;  %5281 = vmatmul.mubr.bf16.vlgmr.msra.gmra.mxu1 %v19475_v47 }
 0x3f5   :  { %v5037_v34 = vadd.f32 %v5036_v50, %v19565_v9  ;;  %v5077_v53 = vpop.f32.mrf.mxu0  ;;  %5322 = vmatmul.mubr.bf16.vlgmr.msra.gmra.mxu0 %v19487_v32 }
 0x3f6   :  { %v5038_v42 = vpop.f32.mrf.mxu1 }
 0x3f7   :  { %v5078_v56 = vadd.f32 %v5077_v53, %v5037_v34  ;;  %v5039_v20 = vadd.f32 %v5038_v42, %v19569_v13  ;;  %v5079_v36 = vpop.f32.mrf.mxu0 }
 0x3f8   :  { %v5040_v57 = vpop.f32.mrf.mxu1 }
 0x3f9   :  { %v5080_v55 = vadd.f32 %v5079_v36, %v5039_v20  ;;  %v5081_v19 = vpop.f32.mrf.mxu0 }
 0x3fa   :  { %v5041_v7 = vpop.f32.mrf.mxu1 }
 0x3fb   :  { %v5082_v60 = vpop.f32.mrf.mxu0 }
 0x434   :  { %v5118_v49 = vpop.f32.mrf.mxu1 }
 0x435   :  { %v5119_v62 = vadd.f32 %v5118_v49, %v5078_v56  ;;  %v5159_v63 = vpop.f32.mrf.mxu0 }
 0x436   :  { %v5120_v0 = vpop.f32.mrf.mxu1  ;;  %v5160_v16 = vadd.f32 %v5159_v63, %v1297_v37 }
 0x437   :  { %vm5335_vm15 = vcmp.ge.f32.partialorder %v5119_v62, 0.0  ;;  %v5344_v47 = vmul.f32 %v19513_v15, %v5119_v62  ;;  %v5121_v9 = vadd.f32 %v5120_v0, %v5080_v55  ;;  %v5161_v39 = vpop.f32.mrf.mxu0 }
 0x438   :  { %v5122_v32 = vpop.f32.mrf.mxu1  ;;  %v5162_v22 = vadd.f32 %v5161_v39, %v1301_v61 }
 0x439   :  { %v19576_v18 = vsel %vm5335_vm15, %v5119_v62, %v5344_v47  ;;  %vm5336_vm0 = vcmp.ge.f32.partialorder %v5121_v9, 0.0  ;;  %v5345_v13 = vmul.f32 %v19513_v15, %v5121_v9  ;;  %v5163_v2 = vpop.f32.mrf.mxu0 }
 0x43a   :  { %v5123_v17 = vpop.f32.mrf.mxu1 }
 0x43b   :  { %v19579_v43 = vsel %vm5336_vm0, %v5121_v9, %v5345_v13  ;;  %v5164_v4 = vpop.f32.mrf.mxu0 }
 0x474   :  { %v5200_v48 = vpop.f32.mrf.mxu1 }
 0x475   :  { %v5241_v26 = vpop.f32.mrf.mxu0  ;;  %v5201_v23 = vadd.f32 %v5200_v48, %v5160_v16 }
 0x476   :  { %v5202_v21 = vpop.f32.mrf.mxu1 }
 0x477   :  { %v5243_v51 = vpop.f32.mrf.mxu0  ;;  %v5203_v5 = vadd.f32 %v5202_v21, %v5162_v22  ;;  %v5242_v29 = vadd.f32 %v5241_v26, %v5201_v23 }
 0x478   :  { %v5204_v6 = vpop.f32.mrf.mxu1 }
 0x479   :  { %v5245_v8 = vpop.f32.mrf.mxu0  ;;  %v5244_v31 = vadd.f32 %v5243_v51, %v5203_v5 }
 0x47a   :  { %v5205_v12 = vpop.f32.mrf.mxu1 }
 0x47b   :  { %v5246_v44 = vpop.f32.mrf.mxu0 }
 0x4b4   :  { %v5282_v58 = vpop.f32.mrf.mxu1 }
 0x4b5   :  { %v5283_v33 = vadd.f32 %v5282_v58, %v5242_v29  ;;  %v5323_v38 = vpop.f32.mrf.mxu0 }
 0x4b6   :  { %v5284_v11 = vpop.f32.mrf.mxu1 }
 0x4b7   :  { %v5324_v45 = vadd.f32 %v5323_v38, %v5283_v33  ;;  %v5285_v46 = vadd.f32 %v5284_v11, %v5244_v31  ;;  %v5325_v50 = vpop.f32.mrf.mxu0 }
 0x4b8   :  { %v5286_v34 = vpop.f32.mrf.mxu1 }
 0x4b9   :  { %vm5337_vm1 = vcmp.ge.f32.partialorder %v5324_v45, 0.0  ;;  %v5346_v53 = vmul.f32 %v19513_v15, %v5324_v45  ;;  %v5326_v42 = vadd.f32 %v5325_v50, %v5285_v46  ;;  %v5327_v24 = vpop.f32.mrf.mxu0 }
 0x4ba   :  { %v5287_v54 = vpop.f32.mrf.mxu1 }
 0x4bb   :  { %v19585_v56 = vsel %vm5337_vm1, %v5324_v45, %v5346_v53  ;;  %vm5338_vm2 = vcmp.ge.f32.partialorder %v5326_v42, 0.0  ;;  %v5347_v20 = vmul.f32 %v19513_v15, %v5326_v42  ;;  %v5328_v36 = vpop.f32.mrf.mxu0 }
 0x4bd   :  { %v19588_v57 = vsel %vm5338_vm2, %v5326_v42, %v5347_v20 }
 0x4be   :  { %19204 = dma.done.wait [#allocation14 + $0x2], 57344 }
 0x4bf   :  { %19205 = vsyncadd [#allocation14 + $0x2], 4294909952  ;;  %v19592_v55 = vpack.c.bf16 %v19529_v59, %v19529_v59  ;;  %v19596_v19 = vpack.c.bf16 %v19557_v10, %v19557_v10  ;;  %v17207_v7 = vld [vmem:[#allocation4 + $0x18c] ss:$28 sps:$4 sm:$0xff]   ;;  %v17213_v62 = vld [vmem:[#allocation4 + $0x154] ss:$28 sps:$4 sm:$0xff]  }
 0x4c0   :  { %v17209_v60 = vld [vmem:[#allocation4 + $0x50c] ss:$28 sps:$4 sm:$0xff]   ;;  %8221 = vmatprep.subr.bf16.mxu1 %v17207_v7  ;;  %v17215_v63 = vld [vmem:[#allocation4 + $0x4d4] ss:$28 sps:$4 sm:$0xff]   ;;  %v17219_v10 = vld [vmem:[#allocation4 + $0x11c] ss:$28 sps:$4 sm:$0xff]  }
 0x4c1   :  { %8253 = vmatprep.mubr.bf16.mxu1 %v19592_v55  ;;  %8294 = vmatprep.mubr.bf16.mxu0 %v19596_v19  ;;  %v17211_v15 = vld [vmem:[#allocation4 + $0x188] ss:$28 sps:$4 sm:$0xff]   ;;  %v17217_v59 = vld [vmem:[#allocation4 + $0x150] ss:$28 sps:$4 sm:$0xff]   ;;  %v17221_v47 = vld [vmem:[#allocation4 + $0x49c] ss:$28 sps:$4 sm:$0xff]  }
 0x4c2   :  { %v17212_v49 = vld [vmem:[#allocation4 + $0x508] ss:$28 sps:$4 sm:$0xff]   ;;  %8262 = vmatprep.subr.bf16.mxu0 %v17209_v60  ;;  %8222 = vmatpush1.bf16.msra.mxu1 %v17211_v15  ;;  %v17218_v0 = vld [vmem:[#allocation4 + $0x4d0] ss:$28 sps:$4 sm:$0xff]   ;;  %v17223_v9 = vld [vmem:[#allocation4 + $0x118] ss:$28 sps:$4 sm:$0xff]  }
 0x4c3   :  { %8263 = vmatpush1.bf16.msra.mxu0 %v17212_v49  ;;  %8223 = vmatprep.subr.bf16.mxu1 %v17213_v62  ;;  %v17224_v39 = vld [vmem:[#allocation4 + $0x498] ss:$28 sps:$4 sm:$0xff]   ;;  %v17225_v32 = vld [vmem:[#allocation4 + $0xe4] ss:$28 sps:$4 sm:$0xff]   ;;  %v17231_v4 = vld [vmem:[#allocation4 + $0xac] ss:$28 sps:$4 sm:$0xff]  }
 0x4c4   :  { %8264 = vmatprep.subr.bf16.mxu0 %v17215_v63  ;;  %v17227_v13 = vld [vmem:[#allocation4 + $0x464] ss:$28 sps:$4 sm:$0xff]   ;;  %v17233_v48 = vld [vmem:[#allocation4 + $0x42c] ss:$28 sps:$4 sm:$0xff]   ;;  %v17237_v51 = vld [vmem:[#allocation4 + $0x74] ss:$28 sps:$4 sm:$0xff]  }
 0x4c5   :  { %v17229_v2 = vld [vmem:[#allocation4 + $0xe0] ss:$28 sps:$4 sm:$0xff]   ;;  %v17235_v26 = vld [vmem:[#allocation4 + $0xa8] ss:$28 sps:$4 sm:$0xff]   ;;  %v17239_v6 = vld [vmem:[#allocation4 + $0x3f4] ss:$28 sps:$4 sm:$0xff]  }
 0x4c6   :  { %8224 = vmatpush1.bf16.msra.mxu1 %v17217_v59  ;;  %v17230_v17 = vld [vmem:[#allocation4 + $0x460] ss:$28 sps:$4 sm:$0xff]   ;;  %v17236_v21 = vld [vmem:[#allocation4 + $0x428] ss:$28 sps:$4 sm:$0xff]   ;;  %v17241_v8 = vld [vmem:[#allocation4 + $0x70] ss:$28 sps:$4 sm:$0xff]  }
 0x4c7   :  { %8265 = vmatpush1.bf16.msra.mxu0 %v17218_v0  ;;  %8225 = vmatprep.subr.bf16.mxu1 %v17219_v10  ;;  %v17242_v12 = vld [vmem:[#allocation4 + $0x3f0] ss:$28 sps:$4 sm:$0xff]   ;;  %v17243_v44 = vld [vmem:[#allocation4 + $0x3c] ss:$28 sps:$4 sm:$0xff]   ;;  %v17249_v16 = vld [vmem:[#allocation4 + $0x4] ss:$28 sps:$4 sm:$0xff]  }
 0x4c8   :  { %8266 = vmatprep.subr.bf16.mxu0 %v17221_v47  ;;  %v17245_v14 = vld [vmem:[#allocation4 + $0x3bc] ss:$28 sps:$4 sm:$0xff]   ;;  %v17251_v22 = vld [vmem:[#allocation4 + $0x384] ss:$28 sps:$4 sm:$0xff]   ;;  %v17255_v29 = vld [vmem:[#allocation4 + $0x34c] ss:$28 sps:$4 sm:$0xff]  }
 0x4c9   :  { %v17247_v37 = vld [vmem:[#allocation4 + $0x38] ss:$28 sps:$4 sm:$0xff]   ;;  %v17253_v23 = vld [vmem:[#allocation4] ss:$28 sps:$4 sm:$0xff]   ;;  %v17257_v58 = vld [vmem:[#allocation4 + $0x6cc] ss:$28 sps:$4 sm:$0xff]  }
 0x4ca   :  { %8226 = vmatpush1.bf16.msra.mxu1 %v17223_v9  ;;  %v17248_v61 = vld [vmem:[#allocation4 + $0x3b8] ss:$28 sps:$4 sm:$0xff]   ;;  %v17254_v5 = vld [vmem:[#allocation4 + $0x380] ss:$28 sps:$4 sm:$0xff]   ;;  %v17259_v31 = vld [vmem:[#allocation4 + $0x348] ss:$28 sps:$4 sm:$0xff]  }
 0x4cb   :  { %8267 = vmatpush1.bf16.msra.mxu0 %v17224_v39  ;;  %8227 = vmatprep.subr.bf16.mxu1 %v17225_v32  ;;  %v17260_v33 = vld [vmem:[#allocation4 + $0x6c8] ss:$28 sps:$4 sm:$0xff]   ;;  %v17261_v38 = vld [vmem:[#allocation4 + $0x314] ss:$28 sps:$4 sm:$0xff]   ;;  %v17267_v50 = vld [vmem:[#allocation4 + $0x2dc] ss:$28 sps:$4 sm:$0xff]  }
 0x4cc   :  { %8268 = vmatprep.subr.bf16.mxu0 %v17227_v13  ;;  %v17263_v11 = vld [vmem:[#allocation4 + $0x694] ss:$28 sps:$4 sm:$0xff]   ;;  %v17269_v34 = vld [vmem:[#allocation4 + $0x65c] ss:$28 sps:$4 sm:$0xff]   ;;  %v17273_v24 = vld [vmem:[#allocation4 + $0x2a4] ss:$28 sps:$4 sm:$0xff]  }
 0x4cd   :  { %v17265_v45 = vld [vmem:[#allocation4 + $0x310] ss:$28 sps:$4 sm:$0xff]   ;;  %v17271_v53 = vld [vmem:[#allocation4 + $0x2d8] ss:$28 sps:$4 sm:$0xff]   ;;  %v17275_v54 = vld [vmem:[#allocation4 + $0x624] ss:$28 sps:$4 sm:$0xff]  }
 0x4ce   :  { %8228 = vmatpush1.bf16.msra.mxu1 %v17229_v2  ;;  %v17266_v46 = vld [vmem:[#allocation4 + $0x690] ss:$28 sps:$4 sm:$0xff]   ;;  %v17272_v42 = vld [vmem:[#allocation4 + $0x658] ss:$28 sps:$4 sm:$0xff]   ;;  %v17277_v20 = vld [vmem:[#allocation4 + $0x2a0] ss:$28 sps:$4 sm:$0xff]  }
 0x4cf   :  { %8269 = vmatpush1.bf16.msra.mxu0 %v17230_v17  ;;  %8229 = vmatprep.subr.bf16.mxu1 %v17231_v4  ;;  %v17278_v36 = vld [vmem:[#allocation4 + $0x620] ss:$28 sps:$4 sm:$0xff]   ;;  %v17279_v7 = vld [vmem:[#allocation4 + $0x26c] ss:$28 sps:$4 sm:$0xff]   ;;  %v17285_v62 = vld [vmem:[#allocation4 + $0x234] ss:$28 sps:$4 sm:$0xff]  }
 0x4d0   :  { %8270 = vmatprep.subr.bf16.mxu0 %v17233_v48  ;;  %v17281_v60 = vld [vmem:[#allocation4 + $0x5ec] ss:$28 sps:$4 sm:$0xff]   ;;  %v17287_v63 = vld [vmem:[#allocation4 + $0x5b4] ss:$28 sps:$4 sm:$0xff]   ;;  %v17291_v10 = vld [vmem:[#allocation4 + $0x1fc] ss:$28 sps:$4 sm:$0xff]  }
 0x4d1   :  { %v17283_v15 = vld [vmem:[#allocation4 + $0x268] ss:$28 sps:$4 sm:$0xff]   ;;  %v17289_v59 = vld [vmem:[#allocation4 + $0x230] ss:$28 sps:$4 sm:$0xff]   ;;  %v17293_v47 = vld [vmem:[#allocation4 + $0x57c] ss:$28 sps:$4 sm:$0xff]  }
 0x4d2   :  { %8230 = vmatpush1.bf16.msra.mxu1 %v17235_v26  ;;  %v17284_v49 = vld [vmem:[#allocation4 + $0x5e8] ss:$28 sps:$4 sm:$0xff]   ;;  %v17290_v0 = vld [vmem:[#allocation4 + $0x5b0] ss:$28 sps:$4 sm:$0xff]   ;;  %v17295_v9 = vld [vmem:[#allocation4 + $0x1f8] ss:$28 sps:$4 sm:$0xff]   ;;  %v19602_v26 = vpack.c.bf16 %v19526_v52, %v19526_v52  ;;  %v19614_v52 = vpack.c.bf16 %v19588_v57, %v19588_v57 }
 0x4d3   :  { %8271 = vmatpush1.bf16.msra.mxu0 %v17236_v21  ;;  %8231 = vmatprep.subr.bf16.mxu1 %v17237_v51  ;;  %v17296_v39 = vld [vmem:[#allocation4 + $0x578] ss:$28 sps:$4 sm:$0xff]   ;;  %v17297_v32 = vld [vmem:[#allocation4 + $0x1c4] ss:$28 sps:$4 sm:$0xff]   ;;  %v17305_v4 = vld [vmem:[#allocation4 + $0x88c] ss:$28 sps:$4 sm:$0xff]   ;;  %v19606_v21 = vpack.c.bf16 %v19554_v3, %v19554_v3 }
 0x4d4   :  { %8272 = vmatprep.subr.bf16.mxu0 %v17239_v6  ;;  %v17299_v13 = vld [vmem:[#allocation4 + $0x544] ss:$28 sps:$4 sm:$0xff]   ;;  %v17308_v48 = vld [vmem:[#allocation4 + $0xc0c] ss:$28 sps:$4 sm:$0xff]   ;;  %s19650_s20 = sld [smem:[#allocation18 + $0x2]] }
 0x4d5   :  { %v17301_v2 = vld [vmem:[#allocation4 + $0x1c0] ss:$28 sps:$4 sm:$0xff]   ;;  %v17303_v51 = vld [vmem:[#allocation4 + $0x888] ss:$28 sps:$4 sm:$0xff]   ;;  %v17309_v3 = vld [vmem:[#allocation4 + $0x850] ss:$28 sps:$4 sm:$0xff]  }
 0x4d6   :  { %8232 = vmatpush1.bf16.msra.mxu1 %v17241_v8  ;;  %v17302_v17 = vld [vmem:[#allocation4 + $0x540] ss:$28 sps:$4 sm:$0xff]   ;;  %v17306_v6 = vld [vmem:[#allocation4 + $0xc08] ss:$28 sps:$4 sm:$0xff]   ;;  %v17311_v8 = vld [vmem:[#allocation4 + $0x854] ss:$28 sps:$4 sm:$0xff]  }
 0x4d7   :  { %8273 = vmatpush1.bf16.msra.mxu0 %v17242_v12  ;;  %8233 = vmatprep.subr.bf16.mxu1 %v17243_v44  ;;  %v17314_v12 = vld [vmem:[#allocation4 + $0xbd4] ss:$28 sps:$4 sm:$0xff]   ;;  %v19610_v44 = vpack.c.bf16 %v19579_v43, %v19579_v43  ;;  %v17323_v57 = vld [vmem:[#allocation4 + $0x7e4] ss:$28 sps:$4 sm:$0xff]  }
 0x4d8   :  { %8274 = vmatprep.subr.bf16.mxu0 %v17245_v14  ;;  %v17312_v14 = vld [vmem:[#allocation4 + $0xbd0] ss:$28 sps:$4 sm:$0xff]   ;;  %v17315_v43 = vld [vmem:[#allocation4 + $0x818] ss:$28 sps:$4 sm:$0xff]  }
 0x4da   :  { %8234 = vmatpush1.bf16.msra.mxu1 %v17247_v37  ;;  %v17317_v37 = vld [vmem:[#allocation4 + $0x81c] ss:$28 sps:$4 sm:$0xff]  }
 0x4db   :  { %8275 = vmatpush1.bf16.msra.mxu0 %v17248_v61  ;;  %8235 = vmatprep.subr.bf16.mxu1 %v17249_v16  ;;  %v17320_v61 = vld [vmem:[#allocation4 + $0xb9c] ss:$28 sps:$4 sm:$0xff]  }
 0x4dc   :  { %8276 = vmatprep.subr.bf16.mxu0 %v17251_v22  ;;  %v17318_v16 = vld [vmem:[#allocation4 + $0xb98] ss:$28 sps:$4 sm:$0xff]   ;;  %v17326_v22 = vld [vmem:[#allocation4 + $0xb64] ss:$28 sps:$4 sm:$0xff]  }
 0x4de   :  { %8236 = vmatpush1.bf16.msra.mxu1 %v17253_v23  ;;  %v17321_v23 = vld [vmem:[#allocation4 + $0x7e0] ss:$28 sps:$4 sm:$0xff]  }
 0x4df   :  { %8277 = vmatpush1.bf16.msra.mxu0 %v17254_v5  ;;  %8237 = vmatprep.subr.bf16.mxu1 %v17255_v29  ;;  %v17324_v5 = vld [vmem:[#allocation4 + $0xb60] ss:$28 sps:$4 sm:$0xff]   ;;  %v17329_v29 = vld [vmem:[#allocation4 + $0x7ac] ss:$28 sps:$4 sm:$0xff]  }
 0x4e0   :  { %8278 = vmatprep.subr.bf16.mxu0 %v17257_v58  ;;  %v17332_v58 = vld [vmem:[#allocation4 + $0xb2c] ss:$28 sps:$4 sm:$0xff]  }
 0x4e2   :  { %8238 = vmatpush2.bf16.msra.mxu1 %v17259_v31  ;;  %v17327_v31 = vld [vmem:[#allocation4 + $0x7a8] ss:$28 sps:$4 sm:$0xff]  }
 0x4e3   :  { %8279 = vmatpush2.bf16.msra.mxu0 %v17260_v33  ;;  %8239 = vmatprep.subr.bf16.mxu1 %v17261_v38  ;;  %v17330_v33 = vld [vmem:[#allocation4 + $0xb28] ss:$28 sps:$4 sm:$0xff]   ;;  %v17335_v38 = vld [vmem:[#allocation4 + $0x774] ss:$28 sps:$4 sm:$0xff]  }
 0x4e4   :  { %8280 = vmatprep.subr.bf16.mxu0 %v17263_v11  ;;  %v17338_v11 = vld [vmem:[#allocation4 + $0xaf4] ss:$28 sps:$4 sm:$0xff]  }
 0x4e6   :  { %8240 = vmatpush2.bf16.msra.mxu1 %v17265_v45  ;;  %v17333_v45 = vld [vmem:[#allocation4 + $0x770] ss:$28 sps:$4 sm:$0xff]  }
 0x4e7   :  { %8281 = vmatpush2.bf16.msra.mxu0 %v17266_v46  ;;  %8241 = vmatprep.subr.bf16.mxu1 %v17267_v50  ;;  %v17336_v46 = vld [vmem:[#allocation4 + $0xaf0] ss:$28 sps:$4 sm:$0xff]   ;;  %v17341_v50 = vld [vmem:[#allocation4 + $0x73c] ss:$28 sps:$4 sm:$0xff]  }
 0x4e8   :  { %8282 = vmatprep.subr.bf16.mxu0 %v17269_v34  ;;  %v17344_v34 = vld [vmem:[#allocation4 + $0xabc] ss:$28 sps:$4 sm:$0xff]  }
 0x4ea   :  { %8242 = vmatpush2.bf16.msra.mxu1 %v17271_v53  ;;  %v17339_v53 = vld [vmem:[#allocation4 + $0x738] ss:$28 sps:$4 sm:$0xff]  }
 0x4eb   :  { %8283 = vmatpush2.bf16.msra.mxu0 %v17272_v42  ;;  %8243 = vmatprep.subr.bf16.mxu1 %v17273_v24  ;;  %v17342_v42 = vld [vmem:[#allocation4 + $0xab8] ss:$28 sps:$4 sm:$0xff]   ;;  %v17347_v24 = vld [vmem:[#allocation4 + $0x704] ss:$28 sps:$4 sm:$0xff]  }
 0x4ec   :  { %8284 = vmatprep.subr.bf16.mxu0 %v17275_v54  ;;  %v17350_v54 = vld [vmem:[#allocation4 + $0xa84] ss:$28 sps:$4 sm:$0xff]  }
 0x4ee   :  { %8244 = vmatpush2.bf16.msra.mxu1 %v17277_v20  ;;  %v17345_v20 = vld [vmem:[#allocation4 + $0x700] ss:$28 sps:$4 sm:$0xff]  }
 0x4ef   :  { %8285 = vmatpush2.bf16.msra.mxu0 %v17278_v36  ;;  %8245 = vmatprep.subr.bf16.mxu1 %v17279_v7  ;;  %v17348_v36 = vld [vmem:[#allocation4 + $0xa80] ss:$28 sps:$4 sm:$0xff]   ;;  %v17353_v7 = vld [vmem:[#allocation4 + $0xa4c] ss:$28 sps:$4 sm:$0xff]  }
 0x4f0   :  { %8286 = vmatprep.subr.bf16.mxu0 %v17281_v60  ;;  %v17356_v60 = vld [vmem:[#allocation4 + $0xdcc] ss:$28 sps:$4 sm:$0xff]  }
 0x4f2   :  { %8246 = vmatpush2.bf16.msra.mxu1 %v17283_v15  ;;  %v17351_v15 = vld [vmem:[#allocation4 + $0xa48] ss:$28 sps:$4 sm:$0xff]  }
 0x4f3   :  { %8287 = vmatpush2.bf16.msra.mxu0 %v17284_v49  ;;  %8247 = vmatprep.subr.bf16.mxu1 %v17285_v62  ;;  %v17354_v49 = vld [vmem:[#allocation4 + $0xdc8] ss:$28 sps:$4 sm:$0xff]   ;;  %v17359_v62 = vld [vmem:[#allocation4 + $0xa14] ss:$28 sps:$4 sm:$0xff]  }
 0x4f4   :  { %8288 = vmatprep.subr.bf16.mxu0 %v17287_v63  ;;  %v17362_v63 = vld [vmem:[#allocation4 + $0xd94] ss:$28 sps:$4 sm:$0xff]  }
 0x4f6   :  { %8248 = vmatpush2.bf16.msra.mxu1 %v17289_v59  ;;  %v17357_v59 = vld [vmem:[#allocation4 + $0xa10] ss:$28 sps:$4 sm:$0xff]  }
 0x4f7   :  { %8289 = vmatpush2.bf16.msra.mxu0 %v17290_v0  ;;  %8249 = vmatprep.subr.bf16.mxu1 %v17291_v10  ;;  %v17360_v0 = vld [vmem:[#allocation4 + $0xd90] ss:$28 sps:$4 sm:$0xff]   ;;  %v17365_v10 = vld [vmem:[#allocation4 + $0x9dc] ss:$28 sps:$4 sm:$0xff]  }
 0x4f8   :  { %8290 = vmatprep.subr.bf16.mxu0 %v17293_v47  ;;  %v17368_v47 = vld [vmem:[#allocation4 + $0xd5c] ss:$28 sps:$4 sm:$0xff]  }
 0x4fa   :  { %8250 = vmatpush2.bf16.msra.mxu1 %v17295_v9  ;;  %v17363_v9 = vld [vmem:[#allocation4 + $0x9d8] ss:$28 sps:$4 sm:$0xff]  }
 0x4fb   :  { %8291 = vmatpush2.bf16.msra.mxu0 %v17296_v39  ;;  %8251 = vmatprep.subr.bf16.mxu1 %v17297_v32  ;;  %v17366_v39 = vld [vmem:[#allocation4 + $0xd58] ss:$28 sps:$4 sm:$0xff]   ;;  %v17371_v32 = vld [vmem:[#allocation4 + $0x9a4] ss:$28 sps:$4 sm:$0xff]  }
 0x4fc   :  { %8292 = vmatprep.subr.bf16.mxu0 %v17299_v13  ;;  %v17374_v13 = vld [vmem:[#allocation4 + $0xd24] ss:$28 sps:$4 sm:$0xff]  }
 0x4fe   :  { %8252 = vmatpush2.bf16.msra.mxu1 %v17301_v2  ;;  %v17369_v2 = vld [vmem:[#allocation4 + $0x9a0] ss:$28 sps:$4 sm:$0xff]  }
 0x4ff   :  { %8293 = vmatpush2.bf16.msra.mxu0 %v17302_v17  ;;  %8303 = vmatprep.subr.bf16.mxu1 %v17305_v4  ;;  %v17372_v17 = vld [vmem:[#allocation4 + $0xd20] ss:$28 sps:$4 sm:$0xff]   ;;  %v17377_v4 = vld [vmem:[#allocation4 + $0x96c] ss:$28 sps:$4 sm:$0xff]  }
 0x500   :  { %8344 = vmatprep.subr.bf16.mxu0 %v17308_v48  ;;  %v17380_v48 = vld [vmem:[#allocation4 + $0xcec] ss:$28 sps:$4 sm:$0xff]  }
 0x501   :  { %8254 = vmatmul.mubr.bf16.vlgmr.msra.gmra.mxu1 %v19602_v26 }
 0x502   :  { %8295 = vmatmul.mubr.bf16.vlgmr.msra.gmra.mxu0 %v19606_v21  ;;  %8304 = vmatpush1.bf16.msra.mxu1 %v17303_v51  ;;  %v17375_v51 = vld [vmem:[#allocation4 + $0x968] ss:$28 sps:$4 sm:$0xff]  }
 0x503   :  { %8345 = vmatpush1.bf16.msra.mxu0 %v17306_v6  ;;  %8305 = vmatprep.subr.bf16.mxu1 %v17311_v8  ;;  %v17378_v6 = vld [vmem:[#allocation4 + $0xce8] ss:$28 sps:$4 sm:$0xff]   ;;  %v17383_v8 = vld [vmem:[#allocation4 + $0x934] ss:$28 sps:$4 sm:$0xff]  }
 0x504   :  { %8346 = vmatprep.subr.bf16.mxu0 %v17314_v12  ;;  %8335 = vmatprep.mubr.bf16.mxu1 %v19610_v44  ;;  %v17386_v12 = vld [vmem:[#allocation4 + $0xcb4] ss:$28 sps:$4 sm:$0xff]  }
 0x505   :  { %8376 = vmatprep.mubr.bf16.mxu0 %v19614_v52 }
 0x506   :  { %8306 = vmatpush1.bf16.msra.mxu1 %v17309_v3  ;;  %v17381_v3 = vld [vmem:[#allocation4 + $0x930] ss:$28 sps:$4 sm:$0xff]  }
 0x507   :  { %8347 = vmatpush1.bf16.msra.mxu0 %v17312_v14  ;;  %8307 = vmatprep.subr.bf16.mxu1 %v17317_v37  ;;  %v17384_v14 = vld [vmem:[#allocation4 + $0xcb0] ss:$28 sps:$4 sm:$0xff]   ;;  %v17389_v37 = vld [vmem:[#allocation4 + $0x8fc] ss:$28 sps:$4 sm:$0xff]  }
 0x508   :  { %8348 = vmatprep.subr.bf16.mxu0 %v17320_v61  ;;  %v17392_v61 = vld [vmem:[#allocation4 + $0xc7c] ss:$28 sps:$4 sm:$0xff]  }
 0x50a   :  { %8308 = vmatpush1.bf16.msra.mxu1 %v17315_v43  ;;  %v17387_v43 = vld [vmem:[#allocation4 + $0x8f8] ss:$28 sps:$4 sm:$0xff]  }
 0x50b   :  { %8349 = vmatpush1.bf16.msra.mxu0 %v17318_v16  ;;  %8309 = vmatprep.subr.bf16.mxu1 %v17323_v57  ;;  %v17390_v16 = vld [vmem:[#allocation4 + $0xc78] ss:$28 sps:$4 sm:$0xff]   ;;  %v17395_v57 = vld [vmem:[#allocation4 + $0x8c4] ss:$28 sps:$4 sm:$0xff]  }
 0x50c   :  { %8350 = vmatprep.subr.bf16.mxu0 %v17326_v22  ;;  %v17398_v22 = vld [vmem:[#allocation4 + $0xc44] ss:$28 sps:$4 sm:$0xff]  }
 0x50e   :  { %8310 = vmatpush1.bf16.msra.mxu1 %v17321_v23  ;;  %v17393_v23 = vld [vmem:[#allocation4 + $0x8c0] ss:$28 sps:$4 sm:$0xff]  }
 0x50f   :  { %8351 = vmatpush1.bf16.msra.mxu0 %v17324_v5  ;;  %8311 = vmatprep.subr.bf16.mxu1 %v17329_v29  ;;  %v17396_v5 = vld [vmem:[#allocation4 + $0xc40] ss:$28 sps:$4 sm:$0xff]   ;;  %v17401_v29 = vld [vmem:[#allocation4 + $0x194] ss:$28 sps:$4 sm:$0xff]  }
 0x510   :  { %8352 = vmatprep.subr.bf16.mxu0 %v17332_v58  ;;  %v17404_v58 = vld [vmem:[#allocation4 + $0x514] ss:$28 sps:$4 sm:$0xff]  }
 0x512   :  { %8312 = vmatpush1.bf16.msra.mxu1 %v17327_v31  ;;  %v19622_v31 = vpack.c.bf16 %v19576_v18, %v19576_v18  ;;  %v17413_v18 = vld [vmem:[#allocation4 + $0x124] ss:$28 sps:$4 sm:$0xff]  }
 0x513   :  { %8353 = vmatpush1.bf16.msra.mxu0 %v17330_v33  ;;  %8313 = vmatprep.subr.bf16.mxu1 %v17335_v38  ;;  %v19626_v33 = vpack.c.bf16 %v19585_v56, %v19585_v56  ;;  %v17399_v38 = vld [vmem:[#allocation4 + $0x190] ss:$28 sps:$4 sm:$0xff]   ;;  %v17416_v56 = vld [vmem:[#allocation4 + $0x4a4] ss:$28 sps:$4 sm:$0xff]  }
 0x514   :  { %8354 = vmatprep.subr.bf16.mxu0 %v17338_v11  ;;  %v17402_v11 = vld [vmem:[#allocation4 + $0x510] ss:$28 sps:$4 sm:$0xff]  }
 0x516   :  { %8314 = vmatpush1.bf16.msra.mxu1 %v17333_v45  ;;  %v17407_v45 = vld [vmem:[#allocation4 + $0x15c] ss:$28 sps:$4 sm:$0xff]  }
 0x517   :  { %8355 = vmatpush1.bf16.msra.mxu0 %v17336_v46  ;;  %8315 = vmatprep.subr.bf16.mxu1 %v17341_v50  ;;  %v17410_v46 = vld [vmem:[#allocation4 + $0x4dc] ss:$28 sps:$4 sm:$0xff]  }
 0x518   :  { %8356 = vmatprep.subr.bf16.mxu0 %v17344_v34  ;;  %v17405_v50 = vld [vmem:[#allocation4 + $0x158] ss:$28 sps:$4 sm:$0xff]  }
 0x519   :  { %v17408_v34 = vld [vmem:[#allocation4 + $0x4d8] ss:$28 sps:$4 sm:$0xff]  }
 0x51a   :  { %8316 = vmatpush1.bf16.msra.mxu1 %v17339_v53  ;;  %v17411_v53 = vld [vmem:[#allocation4 + $0x120] ss:$28 sps:$4 sm:$0xff]  }
 0x51b   :  { %8357 = vmatpush1.bf16.msra.mxu0 %v17342_v42  ;;  %8317 = vmatprep.subr.bf16.mxu1 %v17347_v24  ;;  %v17414_v42 = vld [vmem:[#allocation4 + $0x4a0] ss:$28 sps:$4 sm:$0xff]   ;;  %v17419_v24 = vld [vmem:[#allocation4 + $0xec] ss:$28 sps:$4 sm:$0xff]  }
 0x51c   :  { %8358 = vmatprep.subr.bf16.mxu0 %v17350_v54  ;;  %v17422_v54 = vld [vmem:[#allocation4 + $0x46c] ss:$28 sps:$4 sm:$0xff]  }
 0x51e   :  { %8318 = vmatpush1.bf16.msra.mxu1 %v17345_v20  ;;  %v17417_v20 = vld [vmem:[#allocation4 + $0xe8] ss:$28 sps:$4 sm:$0xff]  }
 0x51f   :  { %8359 = vmatpush1.bf16.msra.mxu0 %v17348_v36  ;;  %8319 = vmatprep.subr.bf16.mxu1 %v17353_v7  ;;  %v17420_v36 = vld [vmem:[#allocation4 + $0x468] ss:$28 sps:$4 sm:$0xff]   ;;  %v17425_v7 = vld [vmem:[#allocation4 + $0xb4] ss:$28 sps:$4 sm:$0xff]  }
 0x520   :  { %8360 = vmatprep.subr.bf16.mxu0 %v17356_v60  ;;  %v17428_v60 = vld [vmem:[#allocation4 + $0x434] ss:$28 sps:$4 sm:$0xff]  }
 0x522   :  { %8320 = vmatpush2.bf16.msra.mxu1 %v17351_v15  ;;  %v17423_v15 = vld [vmem:[#allocation4 + $0xb0] ss:$28 sps:$4 sm:$0xff]  }
 0x523   :  { %8361 = vmatpush2.bf16.msra.mxu0 %v17354_v49  ;;  %8321 = vmatprep.subr.bf16.mxu1 %v17359_v62  ;;  %v17426_v49 = vld [vmem:[#allocation4 + $0x430] ss:$28 sps:$4 sm:$0xff]   ;;  %v17431_v62 = vld [vmem:[#allocation4 + $0x7c] ss:$28 sps:$4 sm:$0xff]  }
 0x524   :  { %8362 = vmatprep.subr.bf16.mxu0 %v17362_v63  ;;  %v17434_v63 = vld [vmem:[#allocation4 + $0x3fc] ss:$28 sps:$4 sm:$0xff]  }
 0x526   :  { %8322 = vmatpush2.bf16.msra.mxu1 %v17357_v59  ;;  %v17429_v59 = vld [vmem:[#allocation4 + $0x78] ss:$28 sps:$4 sm:$0xff]  }
 0x527   :  { %8363 = vmatpush2.bf16.msra.mxu0 %v17360_v0  ;;  %8323 = vmatprep.subr.bf16.mxu1 %v17365_v10  ;;  %v17432_v0 = vld [vmem:[#allocation4 + $0x3f8] ss:$28 sps:$4 sm:$0xff]   ;;  %v17437_v10 = vld [vmem:[#allocation4 + $0x44] ss:$28 sps:$4 sm:$0xff]  }
 0x528   :  { %8364 = vmatprep.subr.bf16.mxu0 %v17368_v47  ;;  %v17440_v47 = vld [vmem:[#allocation4 + $0x3c4] ss:$28 sps:$4 sm:$0xff]  }
 0x52a   :  { %8324 = vmatpush2.bf16.msra.mxu1 %v17363_v9  ;;  %v17435_v9 = vld [vmem:[#allocation4 + $0x40] ss:$28 sps:$4 sm:$0xff]  }
 0x52b   :  { %8365 = vmatpush2.bf16.msra.mxu0 %v17366_v39  ;;  %8325 = vmatprep.subr.bf16.mxu1 %v17371_v32  ;;  %v17438_v39 = vld [vmem:[#allocation4 + $0x3c0] ss:$28 sps:$4 sm:$0xff]   ;;  %v17443_v32 = vld [vmem:[#allocation4 + $0xc] ss:$28 sps:$4 sm:$0xff]  }
 0x52c   :  { %8366 = vmatprep.subr.bf16.mxu0 %v17374_v13  ;;  %v17446_v13 = vld [vmem:[#allocation4 + $0x38c] ss:$28 sps:$4 sm:$0xff]  }
 0x52e   :  { %8326 = vmatpush2.bf16.msra.mxu1 %v17369_v2  ;;  %v17441_v2 = vld [vmem:[#allocation4 + $0x8] ss:$28 sps:$4 sm:$0xff]  }
 0x52f   :  { %8367 = vmatpush2.bf16.msra.mxu0 %v17372_v17  ;;  %8327 = vmatprep.subr.bf16.mxu1 %v17377_v4  ;;  %v17444_v17 = vld [vmem:[#allocation4 + $0x388] ss:$28 sps:$4 sm:$0xff]   ;;  %v17449_v4 = vld [vmem:[#allocation4 + $0x354] ss:$28 sps:$4 sm:$0xff]  }
 0x530   :  { %8368 = vmatprep.subr.bf16.mxu0 %v17380_v48  ;;  %v17452_v48 = vld [vmem:[#allocation4 + $0x6d4] ss:$28 sps:$4 sm:$0xff]  }
 0x532   :  { %8328 = vmatpush2.bf16.msra.mxu1 %v17375_v51  ;;  %v17447_v51 = vld [vmem:[#allocation4 + $0x350] ss:$28 sps:$4 sm:$0xff]  }
 0x533   :  { %8369 = vmatpush2.bf16.msra.mxu0 %v17378_v6  ;;  %8329 = vmatprep.subr.bf16.mxu1 %v17383_v8  ;;  %v17450_v6 = vld [vmem:[#allocation4 + $0x6d0] ss:$28 sps:$4 sm:$0xff]   ;;  %v17455_v8 = vld [vmem:[#allocation4 + $0x31c] ss:$28 sps:$4 sm:$0xff]  }
 0x534   :  { %8370 = vmatprep.subr.bf16.mxu0 %v17386_v12  ;;  %v17458_v12 = vld [vmem:[#allocation4 + $0x69c] ss:$28 sps:$4 sm:$0xff]  }
 0x536   :  { %8330 = vmatpush2.bf16.msra.mxu1 %v17381_v3  ;;  %v17453_v3 = vld [vmem:[#allocation4 + $0x318] ss:$28 sps:$4 sm:$0xff]  }
 0x537   :  { %8371 = vmatpush2.bf16.msra.mxu0 %v17384_v14  ;;  %8331 = vmatprep.subr.bf16.mxu1 %v17389_v37  ;;  %v17456_v14 = vld [vmem:[#allocation4 + $0x698] ss:$28 sps:$4 sm:$0xff]   ;;  %v17461_v37 = vld [vmem:[#allocation4 + $0x2e4] ss:$28 sps:$4 sm:$0xff]  }
 0x538   :  { %8372 = vmatprep.subr.bf16.mxu0 %v17392_v61  ;;  %v17464_v61 = vld [vmem:[#allocation4 + $0x664] ss:$28 sps:$4 sm:$0xff]  }
 0x53a   :  { %8332 = vmatpush2.bf16.msra.mxu1 %v17387_v43  ;;  %v17459_v43 = vld [vmem:[#allocation4 + $0x2e0] ss:$28 sps:$4 sm:$0xff]  }
 0x53b   :  { %8373 = vmatpush2.bf16.msra.mxu0 %v17390_v16  ;;  %8333 = vmatprep.subr.bf16.mxu1 %v17395_v57  ;;  %v17462_v16 = vld [vmem:[#allocation4 + $0x660] ss:$28 sps:$4 sm:$0xff]   ;;  %v17467_v57 = vld [vmem:[#allocation4 + $0x2ac] ss:$28 sps:$4 sm:$0xff]  }
 0x53c   :  { %8374 = vmatprep.subr.bf16.mxu0 %v17398_v22  ;;  %v17470_v22 = vld [vmem:[#allocation4 + $0x62c] ss:$28 sps:$4 sm:$0xff]  }
 0x53e   :  { %8334 = vmatpush2.bf16.msra.mxu1 %v17393_v23  ;;  %v17465_v23 = vld [vmem:[#allocation4 + $0x2a8] ss:$28 sps:$4 sm:$0xff]  }
 0x53f   :  { %8375 = vmatpush2.bf16.msra.mxu0 %v17396_v5  ;;  %8385 = vmatprep.subr.bf16.mxu1 %v17401_v29  ;;  %v17468_v5 = vld [vmem:[#allocation4 + $0x628] ss:$28 sps:$4 sm:$0xff]   ;;  %v17473_v29 = vld [vmem:[#allocation4 + $0x274] ss:$28 sps:$4 sm:$0xff]  }
 0x540   :  { %8426 = vmatprep.subr.bf16.mxu0 %v17404_v58  ;;  %v17476_v58 = vld [vmem:[#allocation4 + $0x5f4] ss:$28 sps:$4 sm:$0xff]  }
 0x541   :  { %8336 = vmatmul.mubr.bf16.vlgmr.msra.gmra.mxu1 %v19622_v31 }
 0x542   :  { %8377 = vmatmul.mubr.bf16.vlgmr.msra.gmra.mxu0 %v19626_v33  ;;  %8386 = vmatpush1.bf16.msra.mxu1 %v17399_v38  ;;  %v17471_v38 = vld [vmem:[#allocation4 + $0x270] ss:$28 sps:$4 sm:$0xff]  }
 0x543   :  { %8427 = vmatpush1.bf16.msra.mxu0 %v17402_v11  ;;  %8387 = vmatprep.subr.bf16.mxu1 %v17407_v45  ;;  %v17474_v11 = vld [vmem:[#allocation4 + $0x5f0] ss:$28 sps:$4 sm:$0xff]   ;;  %v17479_v45 = vld [vmem:[#allocation4 + $0x23c] ss:$28 sps:$4 sm:$0xff]  }
 0x544   :  { %8428 = vmatprep.subr.bf16.mxu0 %v17410_v46  ;;  %8417 = vmatprep.mubr.bf16.mxu1 %v19592_v55  ;;  %v17482_v46 = vld [vmem:[#allocation4 + $0x5bc] ss:$28 sps:$4 sm:$0xff]  }
 0x545   :  { %8458 = vmatprep.mubr.bf16.mxu0 %v19596_v19 }
 0x546   :  { %8388 = vmatpush1.bf16.msra.mxu1 %v17405_v50  ;;  %v17477_v50 = vld [vmem:[#allocation4 + $0x238] ss:$28 sps:$4 sm:$0xff]  }
 0x547   :  { %8429 = vmatpush1.bf16.msra.mxu0 %v17408_v34  ;;  %8389 = vmatprep.subr.bf16.mxu1 %v17413_v18  ;;  %v17480_v34 = vld [vmem:[#allocation4 + $0x5b8] ss:$28 sps:$4 sm:$0xff]   ;;  %v17485_v18 = vld [vmem:[#allocation4 + $0x204] ss:$28 sps:$4 sm:$0xff]  }
 0x548   :  { %8430 = vmatprep.subr.bf16.mxu0 %v17416_v56  ;;  %v17488_v56 = vld [vmem:[#allocation4 + $0x584] ss:$28 sps:$4 sm:$0xff]  }
 0x54a   :  { %8390 = vmatpush1.bf16.msra.mxu1 %v17411_v53  ;;  %v17483_v53 = vld [vmem:[#allocation4 + $0x200] ss:$28 sps:$4 sm:$0xff]  }
 0x54b   :  { %8431 = vmatpush1.bf16.msra.mxu0 %v17414_v42  ;;  %8391 = vmatprep.subr.bf16.mxu1 %v17419_v24  ;;  %v17486_v42 = vld [vmem:[#allocation4 + $0x580] ss:$28 sps:$4 sm:$0xff]   ;;  %v17491_v24 = vld [vmem:[#allocation4 + $0x1cc] ss:$28 sps:$4 sm:$0xff]  }
 0x54c   :  { %8432 = vmatprep.subr.bf16.mxu0 %v17422_v54  ;;  %v17494_v54 = vld [vmem:[#allocation4 + $0x54c] ss:$28 sps:$4 sm:$0xff]  }
 0x54e   :  { %8392 = vmatpush1.bf16.msra.mxu1 %v17417_v20  ;;  %v17489_v20 = vld [vmem:[#allocation4 + $0x1c8] ss:$28 sps:$4 sm:$0xff]  }
 0x54f   :  { %8433 = vmatpush1.bf16.msra.mxu0 %v17420_v36  ;;  %8393 = vmatprep.subr.bf16.mxu1 %v17425_v7  ;;  %v17492_v36 = vld [vmem:[#allocation4 + $0x548] ss:$28 sps:$4 sm:$0xff]   ;;  %v17497_v7 = vld [vmem:[#allocation4 + $0x894] ss:$28 sps:$4 sm:$0xff]  }
 0x550   :  { %8434 = vmatprep.subr.bf16.mxu0 %v17428_v60  ;;  %v17500_v60 = vld [vmem:[#allocation4 + $0xc14] ss:$28 sps:$4 sm:$0xff]  }
 0x552   :  { %8394 = vmatpush1.bf16.msra.mxu1 %v17423_v15  ;;  %v17495_v15 = vld [vmem:[#allocation4 + $0x890] ss:$28 sps:$4 sm:$0xff]  }
 0x553   :  { %8435 = vmatpush1.bf16.msra.mxu0 %v17426_v49  ;;  %8395 = vmatprep.subr.bf16.mxu1 %v17431_v62  ;;  %v17498_v49 = vld [vmem:[#allocation4 + $0xc10] ss:$28 sps:$4 sm:$0xff]   ;;  %v17503_v62 = vld [vmem:[#allocation4 + $0x85c] ss:$28 sps:$4 sm:$0xff]  }
 0x554   :  { %8436 = vmatprep.subr.bf16.mxu0 %v17434_v63  ;;  %v17506_v63 = vld [vmem:[#allocation4 + $0xbdc] ss:$28 sps:$4 sm:$0xff]  }
 0x556   :  { %8396 = vmatpush1.bf16.msra.mxu1 %v17429_v59  ;;  %v17501_v59 = vld [vmem:[#allocation4 + $0x858] ss:$28 sps:$4 sm:$0xff]  }
 0x557   :  { %8437 = vmatpush1.bf16.msra.mxu0 %v17432_v0  ;;  %8397 = vmatprep.subr.bf16.mxu1 %v17437_v10  ;;  %v17504_v0 = vld [vmem:[#allocation4 + $0xbd8] ss:$28 sps:$4 sm:$0xff]   ;;  %v17509_v10 = vld [vmem:[#allocation4 + $0x824] ss:$28 sps:$4 sm:$0xff]  }
 0x558   :  { %8438 = vmatprep.subr.bf16.mxu0 %v17440_v47  ;;  %v17512_v47 = vld [vmem:[#allocation4 + $0xba4] ss:$28 sps:$4 sm:$0xff]  }
 0x55a   :  { %8398 = vmatpush1.bf16.msra.mxu1 %v17435_v9  ;;  %v17507_v9 = vld [vmem:[#allocation4 + $0x820] ss:$28 sps:$4 sm:$0xff]  }
 0x55b   :  { %8439 = vmatpush1.bf16.msra.mxu0 %v17438_v39  ;;  %8399 = vmatprep.subr.bf16.mxu1 %v17443_v32  ;;  %v17510_v39 = vld [vmem:[#allocation4 + $0xba0] ss:$28 sps:$4 sm:$0xff]   ;;  %v17515_v32 = vld [vmem:[#allocation4 + $0x7ec] ss:$28 sps:$4 sm:$0xff]  }
 0x55c   :  { %8440 = vmatprep.subr.bf16.mxu0 %v17446_v13  ;;  %v17518_v13 = vld [vmem:[#allocation4 + $0xb6c] ss:$28 sps:$4 sm:$0xff]  }
 0x55e   :  { %8400 = vmatpush1.bf16.msra.mxu1 %v17441_v2  ;;  %v17513_v2 = vld [vmem:[#allocation4 + $0x7e8] ss:$28 sps:$4 sm:$0xff]  }
 0x55f   :  { %8441 = vmatpush1.bf16.msra.mxu0 %v17444_v17  ;;  %8401 = vmatprep.subr.bf16.mxu1 %v17449_v4  ;;  %v17516_v17 = vld [vmem:[#allocation4 + $0xb68] ss:$28 sps:$4 sm:$0xff]   ;;  %v17521_v4 = vld [vmem:[#allocation4 + $0x7b4] ss:$28 sps:$4 sm:$0xff]  }
 0x560   :  { %8442 = vmatprep.subr.bf16.mxu0 %v17452_v48  ;;  %v17524_v48 = vld [vmem:[#allocation4 + $0xb34] ss:$28 sps:$4 sm:$0xff]  }
 0x562   :  { %8402 = vmatpush2.bf16.msra.mxu1 %v17447_v51  ;;  %v17519_v51 = vld [vmem:[#allocation4 + $0x7b0] ss:$28 sps:$4 sm:$0xff]  }
 0x563   :  { %8443 = vmatpush2.bf16.msra.mxu0 %v17450_v6  ;;  %8403 = vmatprep.subr.bf16.mxu1 %v17455_v8  ;;  %v17522_v6 = vld [vmem:[#allocation4 + $0xb30] ss:$28 sps:$4 sm:$0xff]   ;;  %v17527_v8 = vld [vmem:[#allocation4 + $0x77c] ss:$28 sps:$4 sm:$0xff]  }
 0x564   :  { %8444 = vmatprep.subr.bf16.mxu0 %v17458_v12  ;;  %v17530_v12 = vld [vmem:[#allocation4 + $0xafc] ss:$28 sps:$4 sm:$0xff]  }
 0x566   :  { %8404 = vmatpush2.bf16.msra.mxu1 %v17453_v3  ;;  %v17525_v3 = vld [vmem:[#allocation4 + $0x778] ss:$28 sps:$4 sm:$0xff]  }
 0x567   :  { %8445 = vmatpush2.bf16.msra.mxu0 %v17456_v14  ;;  %8405 = vmatprep.subr.bf16.mxu1 %v17461_v37  ;;  %v17528_v14 = vld [vmem:[#allocation4 + $0xaf8] ss:$28 sps:$4 sm:$0xff]   ;;  %v17533_v37 = vld [vmem:[#allocation4 + $0x744] ss:$28 sps:$4 sm:$0xff]  }
 0x568   :  { %8446 = vmatprep.subr.bf16.mxu0 %v17464_v61  ;;  %v17536_v61 = vld [vmem:[#allocation4 + $0xac4] ss:$28 sps:$4 sm:$0xff]  }
 0x56a   :  { %8406 = vmatpush2.bf16.msra.mxu1 %v17459_v43  ;;  %v17531_v43 = vld [vmem:[#allocation4 + $0x740] ss:$28 sps:$4 sm:$0xff]  }
 0x56b   :  { %8447 = vmatpush2.bf16.msra.mxu0 %v17462_v16  ;;  %8407 = vmatprep.subr.bf16.mxu1 %v17467_v57  ;;  %v17534_v16 = vld [vmem:[#allocation4 + $0xac0] ss:$28 sps:$4 sm:$0xff]   ;;  %v17539_v57 = vld [vmem:[#allocation4 + $0x70c] ss:$28 sps:$4 sm:$0xff]  }
 0x56c   :  { %8448 = vmatprep.subr.bf16.mxu0 %v17470_v22  ;;  %v17542_v22 = vld [vmem:[#allocation4 + $0xa8c] ss:$28 sps:$4 sm:$0xff]  }
 0x56e   :  { %8408 = vmatpush2.bf16.msra.mxu1 %v17465_v23  ;;  %v17537_v23 = vld [vmem:[#allocation4 + $0x708] ss:$28 sps:$4 sm:$0xff]  }
 0x56f   :  { %8449 = vmatpush2.bf16.msra.mxu0 %v17468_v5  ;;  %8409 = vmatprep.subr.bf16.mxu1 %v17473_v29  ;;  %v17540_v5 = vld [vmem:[#allocation4 + $0xa88] ss:$28 sps:$4 sm:$0xff]   ;;  %v17545_v29 = vld [vmem:[#allocation4 + $0xa54] ss:$28 sps:$4 sm:$0xff]  }
 0x570   :  { %8450 = vmatprep.subr.bf16.mxu0 %v17476_v58  ;;  %v17548_v58 = vld [vmem:[#allocation4 + $0xdd4] ss:$28 sps:$4 sm:$0xff]  }
 0x572   :  { %8410 = vmatpush2.bf16.msra.mxu1 %v17471_v38  ;;  %v17543_v38 = vld [vmem:[#allocation4 + $0xa50] ss:$28 sps:$4 sm:$0xff]  }
 0x573   :  { %8451 = vmatpush2.bf16.msra.mxu0 %v17474_v11  ;;  %8411 = vmatprep.subr.bf16.mxu1 %v17479_v45  ;;  %v17546_v11 = vld [vmem:[#allocation4 + $0xdd0] ss:$28 sps:$4 sm:$0xff]   ;;  %v17551_v45 = vld [vmem:[#allocation4 + $0xa1c] ss:$28 sps:$4 sm:$0xff]  }
 0x574   :  { %8452 = vmatprep.subr.bf16.mxu0 %v17482_v46  ;;  %v17554_v46 = vld [vmem:[#allocation4 + $0xd9c] ss:$28 sps:$4 sm:$0xff]  }
 0x576   :  { %8412 = vmatpush2.bf16.msra.mxu1 %v17477_v50  ;;  %v17549_v50 = vld [vmem:[#allocation4 + $0xa18] ss:$28 sps:$4 sm:$0xff]  }
 0x577   :  { %8453 = vmatpush2.bf16.msra.mxu0 %v17480_v34  ;;  %8413 = vmatprep.subr.bf16.mxu1 %v17485_v18  ;;  %v17552_v34 = vld [vmem:[#allocation4 + $0xd98] ss:$28 sps:$4 sm:$0xff]   ;;  %v17557_v18 = vld [vmem:[#allocation4 + $0x9e4] ss:$28 sps:$4 sm:$0xff]  }
 0x578   :  { %8454 = vmatprep.subr.bf16.mxu0 %v17488_v56  ;;  %v17560_v56 = vld [vmem:[#allocation4 + $0xd64] ss:$28 sps:$4 sm:$0xff]  }
 0x57a   :  { %8414 = vmatpush2.bf16.msra.mxu1 %v17483_v53  ;;  %v17555_v53 = vld [vmem:[#allocation4 + $0x9e0] ss:$28 sps:$4 sm:$0xff]  }
 0x57b   :  { %8455 = vmatpush2.bf16.msra.mxu0 %v17486_v42  ;;  %8415 = vmatprep.subr.bf16.mxu1 %v17491_v24  ;;  %v17558_v42 = vld [vmem:[#allocation4 + $0xd60] ss:$28 sps:$4 sm:$0xff]   ;;  %v17563_v24 = vld [vmem:[#allocation4 + $0x9ac] ss:$28 sps:$4 sm:$0xff]  }
 0x57c   :  { %8456 = vmatprep.subr.bf16.mxu0 %v17494_v54  ;;  %v17566_v54 = vld [vmem:[#allocation4 + $0xd2c] ss:$28 sps:$4 sm:$0xff]  }
 0x57e   :  { %8416 = vmatpush2.bf16.msra.mxu1 %v17489_v20  ;;  %v17561_v20 = vld [vmem:[#allocation4 + $0x9a8] ss:$28 sps:$4 sm:$0xff]  }
 0x57f   :  { %8457 = vmatpush2.bf16.msra.mxu0 %v17492_v36  ;;  %8467 = vmatprep.subr.bf16.mxu1 %v17497_v7  ;;  %v17564_v36 = vld [vmem:[#allocation4 + $0xd28] ss:$28 sps:$4 sm:$0xff]   ;;  %v17569_v7 = vld [vmem:[#allocation4 + $0x974] ss:$28 sps:$4 sm:$0xff]  }
 0x580   :  { %8508 = vmatprep.subr.bf16.mxu0 %v17500_v60  ;;  %v17572_v60 = vld [vmem:[#allocation4 + $0xcf4] ss:$28 sps:$4 sm:$0xff]  }
 0x581   :  { %8418 = vmatmul.mubr.bf16.vlgmr.msra.gmra.mxu1 %v19602_v26 }
 0x582   :  { %8459 = vmatmul.mubr.bf16.vlgmr.msra.gmra.mxu0 %v19606_v21  ;;  %8468 = vmatpush1.bf16.msra.mxu1 %v17495_v15  ;;  %v17567_v15 = vld [vmem:[#allocation4 + $0x970] ss:$28 sps:$4 sm:$0xff]  }
 0x583   :  { %8509 = vmatpush1.bf16.msra.mxu0 %v17498_v49  ;;  %8469 = vmatprep.subr.bf16.mxu1 %v17503_v62  ;;  %v17570_v49 = vld [vmem:[#allocation4 + $0xcf0] ss:$28 sps:$4 sm:$0xff]   ;;  %v17575_v62 = vld [vmem:[#allocation4 + $0x93c] ss:$28 sps:$4 sm:$0xff]  }
 0x584   :  { %8510 = vmatprep.subr.bf16.mxu0 %v17506_v63  ;;  %8499 = vmatprep.mubr.bf16.mxu1 %v19610_v44  ;;  %v17578_v63 = vld [vmem:[#allocation4 + $0xcbc] ss:$28 sps:$4 sm:$0xff]  }
 0x585   :  { %8540 = vmatprep.mubr.bf16.mxu0 %v19614_v52 }
 0x586   :  { %8470 = vmatpush1.bf16.msra.mxu1 %v17501_v59  ;;  %v17573_v59 = vld [vmem:[#allocation4 + $0x938] ss:$28 sps:$4 sm:$0xff]  }
 0x587   :  { %8511 = vmatpush1.bf16.msra.mxu0 %v17504_v0  ;;  %8471 = vmatprep.subr.bf16.mxu1 %v17509_v10  ;;  %v17576_v0 = vld [vmem:[#allocation4 + $0xcb8] ss:$28 sps:$4 sm:$0xff]   ;;  %v17581_v10 = vld [vmem:[#allocation4 + $0x904] ss:$28 sps:$4 sm:$0xff]  }
 0x588   :  { %8512 = vmatprep.subr.bf16.mxu0 %v17512_v47  ;;  %v17584_v47 = vld [vmem:[#allocation4 + $0xc84] ss:$28 sps:$4 sm:$0xff]  }
 0x58a   :  { %8472 = vmatpush1.bf16.msra.mxu1 %v17507_v9  ;;  %v17579_v9 = vld [vmem:[#allocation4 + $0x900] ss:$28 sps:$4 sm:$0xff]  }
 0x58b   :  { %8513 = vmatpush1.bf16.msra.mxu0 %v17510_v39  ;;  %8473 = vmatprep.subr.bf16.mxu1 %v17515_v32  ;;  %v17582_v39 = vld [vmem:[#allocation4 + $0xc80] ss:$28 sps:$4 sm:$0xff]   ;;  %v17587_v32 = vld [vmem:[#allocation4 + $0x8cc] ss:$28 sps:$4 sm:$0xff]  }
 0x58c   :  { %8514 = vmatprep.subr.bf16.mxu0 %v17518_v13  ;;  %v17590_v13 = vld [vmem:[#allocation4 + $0xc4c] ss:$28 sps:$4 sm:$0xff]  }
 0x58e   :  { %8474 = vmatpush1.bf16.msra.mxu1 %v17513_v2  ;;  %v17585_v2 = vld [vmem:[#allocation4 + $0x8c8] ss:$28 sps:$4 sm:$0xff]  }
 0x58f   :  { %8515 = vmatpush1.bf16.msra.mxu0 %v17516_v17  ;;  %8475 = vmatprep.subr.bf16.mxu1 %v17521_v4  ;;  %v17588_v17 = vld [vmem:[#allocation4 + $0xc48] ss:$28 sps:$4 sm:$0xff]   ;;  %v19636_v4 = vld [vmem:[#allocation15 + $0x12] sm:$0xff] }
 0x590   :  { %8516 = vmatprep.subr.bf16.mxu0 %v17524_v48  ;;  %v17593_v48 = vld [vmem:[#allocation4 + $0x19c] ss:$28 sps:$4 sm:$0xff]  }
 0x592   :  { %8476 = vmatpush1.bf16.msra.mxu1 %v17519_v51  ;;  %v17596_v51 = vld [vmem:[#allocation4 + $0x51c] ss:$28 sps:$4 sm:$0xff]  }
 0x593   :  { %8517 = vmatpush1.bf16.msra.mxu0 %v17522_v6  ;;  %8477 = vmatprep.subr.bf16.mxu1 %v17527_v8  ;;  %v17591_v6 = vld [vmem:[#allocation4 + $0x198] ss:$28 sps:$4 sm:$0xff]  }
 0x594   :  { %8518 = vmatprep.subr.bf16.mxu0 %v17530_v12  ;;  %v17594_v8 = vld [vmem:[#allocation4 + $0x518] ss:$28 sps:$4 sm:$0xff]   ;;  %v5885_v12 = vrot.slane %v19636_v4, %v19383_v25 }
 0x596   :  { %8478 = vmatpush1.bf16.msra.mxu1 %v17525_v3  ;;  %v17599_v3 = vld [vmem:[#allocation4 + $0x164] ss:$28 sps:$4 sm:$0xff]  }
 0x597   :  { %8519 = vmatpush1.bf16.msra.mxu0 %v17528_v14  ;;  %8479 = vmatprep.subr.bf16.mxu1 %v17533_v37  ;;  %v17602_v14 = vld [vmem:[#allocation4 + $0x4e4] ss:$28 sps:$4 sm:$0xff]   ;;  %v5889_v37 = vrot.slane %v19636_v4, %v19386_v27 }
 0x598   :  { %8520 = vmatprep.subr.bf16.mxu0 %v17536_v61  ;;  %v17597_v61 = vld [vmem:[#allocation4 + $0x160] ss:$28 sps:$4 sm:$0xff]  }
 0x59a   :  { %8480 = vmatpush1.bf16.msra.mxu1 %v17531_v43 }
 0x59b   :  { %8521 = vmatpush1.bf16.msra.mxu0 %v17534_v16  ;;  %8481 = vmatprep.subr.bf16.mxu1 %v17539_v57  ;;  %v17600_v57 = vld [vmem:[#allocation4 + $0x4e0] ss:$28 sps:$4 sm:$0xff]  }
 0x59c   :  { %8522 = vmatprep.subr.bf16.mxu0 %v17542_v22 }
 0x59e   :  { %8482 = vmatpush1.bf16.msra.mxu1 %v17537_v23  ;;  %v17605_v23 = vld [vmem:[#allocation4 + $0x12c] ss:$28 sps:$4 sm:$0xff]  }
 0x59f   :  { %8523 = vmatpush1.bf16.msra.mxu0 %v17540_v5  ;;  %8483 = vmatprep.subr.bf16.mxu1 %v17545_v29 }
 0x5a0   :  { %8524 = vmatprep.subr.bf16.mxu0 %v17548_v58  ;;  %v17608_v58 = vld [vmem:[#allocation4 + $0x4ac] ss:$28 sps:$4 sm:$0xff]  }
 0x5a2   :  { %8484 = vmatpush2.bf16.msra.mxu1 %v17543_v38 }
 0x5a3   :  { %8525 = vmatpush2.bf16.msra.mxu0 %v17546_v11  ;;  %8485 = vmatprep.subr.bf16.mxu1 %v17551_v45  ;;  %v17603_v45 = vld [vmem:[#allocation4 + $0x128] ss:$28 sps:$4 sm:$0xff]  }
 0x5a4   :  { %8526 = vmatprep.subr.bf16.mxu0 %v17554_v46 }
 0x5a6   :  { %8486 = vmatpush2.bf16.msra.mxu1 %v17549_v50 }
 0x5a7   :  { %8527 = vmatpush2.bf16.msra.mxu0 %v17552_v34  ;;  %8487 = vmatprep.subr.bf16.mxu1 %v17557_v18  ;;  %v17606_v34 = vld [vmem:[#allocation4 + $0x4a8] ss:$28 sps:$4 sm:$0xff]  }
 0x5a8   :  { %8528 = vmatprep.subr.bf16.mxu0 %v17560_v56  ;;  %v17611_v56 = vld [vmem:[#allocation4 + $0xf4] ss:$28 sps:$4 sm:$0xff]  }
 0x5aa   :  { %8488 = vmatpush2.bf16.msra.mxu1 %v17555_v53 }
 0x5ab   :  { %8529 = vmatpush2.bf16.msra.mxu0 %v17558_v42  ;;  %8489 = vmatprep.subr.bf16.mxu1 %v17563_v24  ;;  %v17614_v24 = vld [vmem:[#allocation4 + $0x474] ss:$28 sps:$4 sm:$0xff]  }
 0x5ac   :  { %8530 = vmatprep.subr.bf16.mxu0 %v17566_v54  ;;  %v17609_v54 = vld [vmem:[#allocation4 + $0xf0] ss:$28 sps:$4 sm:$0xff]  }
 0x5ae   :  { %8490 = vmatpush2.bf16.msra.mxu1 %v17561_v20  ;;  %v17612_v20 = vld [vmem:[#allocation4 + $0x470] ss:$28 sps:$4 sm:$0xff]  }
 0x5af   :  { %8531 = vmatpush2.bf16.msra.mxu0 %v17564_v36  ;;  %8491 = vmatprep.subr.bf16.mxu1 %v17569_v7  ;;  %v17617_v36 = vld [vmem:[#allocation4 + $0xbc] ss:$28 sps:$4 sm:$0xff]  }
 0x5b0   :  { %8532 = vmatprep.subr.bf16.mxu0 %v17572_v60  ;;  %v17620_v7 = vld [vmem:[#allocation4 + $0x43c] ss:$28 sps:$4 sm:$0xff]  }
 0x5b1   :  { %v17615_v60 = vld [vmem:[#allocation4 + $0xb8] ss:$28 sps:$4 sm:$0xff]  }
 0x5b2   :  { %8492 = vmatpush2.bf16.msra.mxu1 %v17567_v15  ;;  %v17618_v15 = vld [vmem:[#allocation4 + $0x438] ss:$28 sps:$4 sm:$0xff]  }
 0x5b3   :  { %8533 = vmatpush2.bf16.msra.mxu0 %v17570_v49  ;;  %8493 = vmatprep.subr.bf16.mxu1 %v17575_v62  ;;  %v17623_v49 = vld [vmem:[#allocation4 + $0x84] ss:$28 sps:$4 sm:$0xff]  }
 0x5b4   :  { %8534 = vmatprep.subr.bf16.mxu0 %v17578_v63  ;;  %v17626_v62 = vld [vmem:[#allocation4 + $0x404] ss:$28 sps:$4 sm:$0xff]  }
 0x5b5   :  { %v17621_v63 = vld [vmem:[#allocation4 + $0x80] ss:$28 sps:$4 sm:$0xff]  }
 0x5b6   :  { %8494 = vmatpush2.bf16.msra.mxu1 %v17573_v59  ;;  %v17624_v59 = vld [vmem:[#allocation4 + $0x400] ss:$28 sps:$4 sm:$0xff]  }
 0x5b7   :  { %8535 = vmatpush2.bf16.msra.mxu0 %v17576_v0  ;;  %8495 = vmatprep.subr.bf16.mxu1 %v17581_v10  ;;  %v17629_v0 = vld [vmem:[#allocation4 + $0x4c] ss:$28 sps:$4 sm:$0xff]  }
 0x5b8   :  { %8536 = vmatprep.subr.bf16.mxu0 %v17584_v47  ;;  %v17632_v10 = vld [vmem:[#allocation4 + $0x3cc] ss:$28 sps:$4 sm:$0xff]  }
 0x5b9   :  { %v17627_v47 = vld [vmem:[#allocation4 + $0x48] ss:$28 sps:$4 sm:$0xff]  }
 0x5ba   :  { %8496 = vmatpush2.bf16.msra.mxu1 %v17579_v9  ;;  %v17630_v9 = vld [vmem:[#allocation4 + $0x3c8] ss:$28 sps:$4 sm:$0xff]  }
 0x5bb   :  { %8537 = vmatpush2.bf16.msra.mxu0 %v17582_v39  ;;  %8497 = vmatprep.subr.bf16.mxu1 %v17587_v32  ;;  %v17635_v39 = vld [vmem:[#allocation4 + $0x14] ss:$28 sps:$4 sm:$0xff]  }
 0x5bc   :  { %8538 = vmatprep.subr.bf16.mxu0 %v17590_v13  ;;  %v17638_v32 = vld [vmem:[#allocation4 + $0x394] ss:$28 sps:$4 sm:$0xff]  }
 0x5bd   :  { %v17633_v13 = vld [vmem:[#allocation4 + $0x10] ss:$28 sps:$4 sm:$0xff]  }
 0x5be   :  { %8498 = vmatpush2.bf16.msra.mxu1 %v17585_v2  ;;  %v17636_v2 = vld [vmem:[#allocation4 + $0x390] ss:$28 sps:$4 sm:$0xff]  }
 0x5bf   :  { %8539 = vmatpush2.bf16.msra.mxu0 %v17588_v17  ;;  %8549 = vmatprep.subr.bf16.mxu1 %v17593_v48  ;;  %v17641_v17 = vld [vmem:[#allocation4 + $0x35c] ss:$28 sps:$4 sm:$0xff]  }
 0x5c0   :  { %8590 = vmatprep.subr.bf16.mxu0 %v17596_v51  ;;  %v17644_v48 = vld [vmem:[#allocation4 + $0x6dc] ss:$28 sps:$4 sm:$0xff]  }
 0x5c1   :  { %v8255_v43 = vpop.f32.mrf.mxu1  ;;  %8500 = vmatmul.mubr.bf16.vlgmr.msra.gmra.mxu1 %v19622_v31  ;;  %v17639_v51 = vld [vmem:[#allocation4 + $0x358] ss:$28 sps:$4 sm:$0xff]  }
 0x5c2   :  { %v8296_v16 = vpop.f32.mrf.mxu0  ;;  %8541 = vmatmul.mubr.bf16.vlgmr.msra.gmra.mxu0 %v19626_v33  ;;  %v8256_v22 = vadd.f32 %v8255_v43, %v5885_v12  ;;  %8550 = vmatpush1.bf16.msra.mxu1 %v17591_v6  ;;  %v17642_v6 = vld [vmem:[#allocation4 + $0x6d8] ss:$28 sps:$4 sm:$0xff]   ;;  %v17650_v12 = vld [vmem:[#allocation4 + $0x6a4] ss:$28 sps:$4 sm:$0xff]  }
 0x5c3   :  { %8591 = vmatpush1.bf16.msra.mxu0 %v17594_v8  ;;  %v8257_v5 = vpop.f32.mrf.mxu1  ;;  %8551 = vmatprep.subr.bf16.mxu1 %v17599_v3  ;;  %v17647_v8 = vld [vmem:[#allocation4 + $0x324] ss:$28 sps:$4 sm:$0xff]  }
 0x5c4   :  { %v8298_v29 = vpop.f32.mrf.mxu0  ;;  %8592 = vmatprep.subr.bf16.mxu0 %v17602_v14  ;;  %v19644_v38 = vadd.f32 %v8296_v16, %v8256_v22  ;;  %v8258_v11 = vadd.f32 %v8257_v5, %v5889_v37  ;;  %8581 = vmatprep.mubr.bf16.mxu1 %v19592_v55  ;;  %v17645_v3 = vld [vmem:[#allocation4 + $0x320] ss:$28 sps:$4 sm:$0xff]   ;;  %v17653_v37 = vld [vmem:[#allocation4 + $0x2ec] ss:$28 sps:$4 sm:$0xff]   ;;  %v17662_v22 = vld [vmem:[#allocation4 + $0x634] ss:$28 sps:$4 sm:$0xff]  }
 0x5c5   :  { %8622 = vmatprep.mubr.bf16.mxu0 %v19596_v19  ;;  %v8259_v46 = vpop.f32.mrf.mxu1  ;;  %v17648_v14 = vld [vmem:[#allocation4 + $0x6a0] ss:$28 sps:$4 sm:$0xff]   ;;  %v17651_v43 = vld [vmem:[#allocation4 + $0x2e8] ss:$28 sps:$4 sm:$0xff]   ;;  %v17660_v5 = vld [vmem:[#allocation4 + $0x630] ss:$28 sps:$4 sm:$0xff]  }
 0x5c6   :  { %v8300_v50 = vpop.f32.mrf.mxu0  ;;  %v19648_v18 = vadd.f32 %v8298_v29, %v8258_v11  ;;  %8552 = vmatpush1.bf16.msra.mxu1 %v17597_v61  ;;  %v17656_v61 = vld [vmem:[#allocation4 + $0x66c] ss:$28 sps:$4 sm:$0xff]   ;;  %v17665_v29 = vld [vmem:[#allocation4 + $0x27c] ss:$28 sps:$4 sm:$0xff]   ;;  %v17671_v46 = vld [vmem:[#allocation4 + $0x244] ss:$28 sps:$4 sm:$0xff]  }
 0x5c7   :  { %8593 = vmatpush1.bf16.msra.mxu0 %v17600_v57  ;;  %v8260_v53 = vpop.f32.mrf.mxu1  ;;  %8553 = vmatprep.subr.bf16.mxu1 %v17605_v23  ;;  %v17654_v16 = vld [vmem:[#allocation4 + $0x668] ss:$28 sps:$4 sm:$0xff]   ;;  %v17659_v57 = vld [vmem:[#allocation4 + $0x2b4] ss:$28 sps:$4 sm:$0xff]  }
 0x5c8   :  { %v8301_v42 = vpop.f32.mrf.mxu0  ;;  %8594 = vmatprep.subr.bf16.mxu0 %v17608_v58  ;;  %v17657_v23 = vld [vmem:[#allocation4 + $0x2b0] ss:$28 sps:$4 sm:$0xff]   ;;  %v17668_v58 = vld [vmem:[#allocation4 + $0x5fc] ss:$28 sps:$4 sm:$0xff]   ;;  %v17674_v50 = vld [vmem:[#allocation4 + $0x5c4] ss:$28 sps:$4 sm:$0xff]  }
 0x5c9   :  { %v17663_v11 = vld [vmem:[#allocation4 + $0x278] ss:$28 sps:$4 sm:$0xff]   ;;  %v17677_v53 = vld [vmem:[#allocation4 + $0x20c] ss:$28 sps:$4 sm:$0xff]  }
 0x5ca   :  { %8554 = vmatpush1.bf16.msra.mxu1 %v17603_v45  ;;  %v17666_v45 = vld [vmem:[#allocation4 + $0x5f8] ss:$28 sps:$4 sm:$0xff]   ;;  %v17680_v42 = vld [vmem:[#allocation4 + $0x58c] ss:$28 sps:$4 sm:$0xff]  }
 0x5cb   :  { %8595 = vmatpush1.bf16.msra.mxu0 %v17606_v34  ;;  %8555 = vmatprep.subr.bf16.mxu1 %v17611_v56  ;;  %v17669_v34 = vld [vmem:[#allocation4 + $0x240] ss:$28 sps:$4 sm:$0xff]  }
 0x5cc   :  { %8596 = vmatprep.subr.bf16.mxu0 %v17614_v24  ;;  %v17672_v56 = vld [vmem:[#allocation4 + $0x5c0] ss:$28 sps:$4 sm:$0xff]   ;;  %v17675_v24 = vld [vmem:[#allocation4 + $0x208] ss:$28 sps:$4 sm:$0xff]  }
 0x5ce   :  { %8556 = vmatpush1.bf16.msra.mxu1 %v17609_v54  ;;  %v17678_v54 = vld [vmem:[#allocation4 + $0x588] ss:$28 sps:$4 sm:$0xff]  }
 0x5cf   :  { %8597 = vmatpush1.bf16.msra.mxu0 %v17612_v20  ;;  %8557 = vmatprep.subr.bf16.mxu1 %v17617_v36  ;;  %v17683_v20 = vld [vmem:[#allocation4 + $0x1d4] ss:$28 sps:$4 sm:$0xff]  }
 0x5d0   :  { %8598 = vmatprep.subr.bf16.mxu0 %v17620_v7  ;;  %v17686_v36 = vld [vmem:[#allocation4 + $0x554] ss:$28 sps:$4 sm:$0xff]  }
 0x5d1   :  { %v17681_v7 = vld [vmem:[#allocation4 + $0x1d0] ss:$28 sps:$4 sm:$0xff]  }
 0x5d2   :  { %8558 = vmatpush1.bf16.msra.mxu1 %v17615_v60  ;;  %v17684_v60 = vld [vmem:[#allocation4 + $0x550] ss:$28 sps:$4 sm:$0xff]  }
 0x5d3   :  { %8599 = vmatpush1.bf16.msra.mxu0 %v17618_v15  ;;  %8559 = vmatprep.subr.bf16.mxu1 %v17623_v49  ;;  %v17689_v15 = vld [vmem:[#allocation4 + $0x89c] ss:$28 sps:$4 sm:$0xff]  }
 0x5d4   :  { %8600 = vmatprep.subr.bf16.mxu0 %v17626_v62  ;;  %v17692_v49 = vld [vmem:[#allocation4 + $0xc1c] ss:$28 sps:$4 sm:$0xff]  }
 0x5d5   :  { %v17687_v62 = vld [vmem:[#allocation4 + $0x898] ss:$28 sps:$4 sm:$0xff]  }
 0x5d6   :  { %8560 = vmatpush1.bf16.msra.mxu1 %v17621_v63  ;;  %v17690_v63 = vld [vmem:[#allocation4 + $0xc18] ss:$28 sps:$4 sm:$0xff]  }
 0x5d7   :  { %8601 = vmatpush1.bf16.msra.mxu0 %v17624_v59  ;;  %8561 = vmatprep.subr.bf16.mxu1 %v17629_v0  ;;  %v17695_v59 = vld [vmem:[#allocation4 + $0x864] ss:$28 sps:$4 sm:$0xff]  }
 0x5d8   :  { %8602 = vmatprep.subr.bf16.mxu0 %v17632_v10  ;;  %v17698_v0 = vld [vmem:[#allocation4 + $0xbe4] ss:$28 sps:$4 sm:$0xff]  }
 0x5da   :  { %8562 = vmatpush1.bf16.msra.mxu1 %v17627_v47 }
 0x5db   :  { %8603 = vmatpush1.bf16.msra.mxu0 %v17630_v9  ;;  %8563 = vmatprep.subr.bf16.mxu1 %v17635_v39  ;;  %v17693_v39 = vld [vmem:[#allocation4 + $0x860] ss:$28 sps:$4 sm:$0xff]  }
 0x5dc   :  { %8604 = vmatprep.subr.bf16.mxu0 %v17638_v32  ;;  %v17696_v32 = vld [vmem:[#allocation4 + $0xbe0] ss:$28 sps:$4 sm:$0xff]  }
 0x5de   :  { %8564 = vmatpush1.bf16.msra.mxu1 %v17633_v13  ;;  %v19656_v13 = vstv %s19650_s20 }
 0x5df   :  { %8605 = vmatpush1.bf16.msra.mxu0 %v17636_v2  ;;  %8565 = vmatprep.subr.bf16.mxu1 %v17641_v17 }
 0x5e0   :  { %8606 = vmatprep.subr.bf16.mxu0 %v17644_v48  ;;  %v17701_v48 = vld [vmem:[#allocation4 + $0x82c] ss:$28 sps:$4 sm:$0xff]  }
 0x5e2   :  { %8566 = vmatpush2.bf16.msra.mxu1 %v17639_v51  ;;  %v17704_v51 = vld [vmem:[#allocation4 + $0xbac] ss:$28 sps:$4 sm:$0xff]  }
 0x5e3   :  { %8607 = vmatpush2.bf16.msra.mxu0 %v17642_v6  ;;  %8567 = vmatprep.subr.bf16.mxu1 %v17647_v8 }
 0x5e4   :  { %8608 = vmatprep.subr.bf16.mxu0 %v17650_v12 }
 0x5e6   :  { %8568 = vmatpush2.bf16.msra.mxu1 %v17645_v3 }
 0x5e7   :  { %8609 = vmatpush2.bf16.msra.mxu0 %v17648_v14  ;;  %8569 = vmatprep.subr.bf16.mxu1 %v17653_v37  ;;  %v17699_v37 = vld [vmem:[#allocation4 + $0x828] ss:$28 sps:$4 sm:$0xff]  }
 0x5e8   :  { %8610 = vmatprep.subr.bf16.mxu0 %v17656_v61  ;;  %v17702_v61 = vld [vmem:[#allocation4 + $0xba8] ss:$28 sps:$4 sm:$0xff]  }
 0x5ea   :  { %8570 = vmatpush2.bf16.msra.mxu1 %v17651_v43 }
 0x5eb   :  { %8611 = vmatpush2.bf16.msra.mxu0 %v17654_v16  ;;  %8571 = vmatprep.subr.bf16.mxu1 %v17659_v57  ;;  %v17707_v57 = vld [vmem:[#allocation4 + $0x7f4] ss:$28 sps:$4 sm:$0xff]  }
 0x5ec   :  { %8612 = vmatprep.subr.bf16.mxu0 %v17662_v22 }
 0x5ee   :  { %8572 = vmatpush2.bf16.msra.mxu1 %v17657_v23 }
 0x5ef   :  { %8613 = vmatpush2.bf16.msra.mxu0 %v17660_v5  ;;  %8573 = vmatprep.subr.bf16.mxu1 %v17665_v29  ;;  %v17705_v29 = vld [vmem:[#allocation4 + $0x7f0] ss:$28 sps:$4 sm:$0xff]  }
 0x5f0   :  { %8614 = vmatprep.subr.bf16.mxu0 %v17668_v58  ;;  %v17708_v58 = vld [vmem:[#allocation4 + $0xb70] ss:$28 sps:$4 sm:$0xff]  }
 0x5f2   :  { %8574 = vmatpush2.bf16.msra.mxu1 %v17663_v11  ;;  %v17713_v11 = vld [vmem:[#allocation4 + $0x7bc] ss:$28 sps:$4 sm:$0xff]  }
 0x5f3   :  { %8615 = vmatpush2.bf16.msra.mxu0 %v17666_v45  ;;  %8575 = vmatprep.subr.bf16.mxu1 %v17671_v46  ;;  %v17716_v45 = vld [vmem:[#allocation4 + $0xb3c] ss:$28 sps:$4 sm:$0xff]  }
 0x5f4   :  { %8616 = vmatprep.subr.bf16.mxu0 %v17674_v50  ;;  %v17711_v46 = vld [vmem:[#allocation4 + $0x7b8] ss:$28 sps:$4 sm:$0xff]  }
 0x5f5   :  { %v17714_v50 = vld [vmem:[#allocation4 + $0xb38] ss:$28 sps:$4 sm:$0xff]  }
 0x5f6   :  { %8576 = vmatpush2.bf16.msra.mxu1 %v17669_v34  ;;  %v17719_v34 = vld [vmem:[#allocation4 + $0x784] ss:$28 sps:$4 sm:$0xff]  }
 0x5f7   :  { %8617 = vmatpush2.bf16.msra.mxu0 %v17672_v56  ;;  %8577 = vmatprep.subr.bf16.mxu1 %v17677_v53  ;;  %v17722_v56 = vld [vmem:[#allocation4 + $0xb04] ss:$28 sps:$4 sm:$0xff]  }
 0x5f8   :  { %8618 = vmatprep.subr.bf16.mxu0 %v17680_v42  ;;  %v17717_v53 = vld [vmem:[#allocation4 + $0x780] ss:$28 sps:$4 sm:$0xff]  }
 0x5f9   :  { %v17720_v42 = vld [vmem:[#allocation4 + $0xb00] ss:$28 sps:$4 sm:$0xff]  }
 0x5fa   :  { %8578 = vmatpush2.bf16.msra.mxu1 %v17675_v24  ;;  %v17725_v24 = vld [vmem:[#allocation4 + $0x74c] ss:$28 sps:$4 sm:$0xff]  }
 0x5fb   :  { %8619 = vmatpush2.bf16.msra.mxu0 %v17678_v54  ;;  %8579 = vmatprep.subr.bf16.mxu1 %v17683_v20  ;;  %v17728_v54 = vld [vmem:[#allocation4 + $0xacc] ss:$28 sps:$4 sm:$0xff]  }
 0x5fc   :  { %8620 = vmatprep.subr.bf16.mxu0 %v17686_v36  ;;  %v17723_v20 = vld [vmem:[#allocation4 + $0x748] ss:$28 sps:$4 sm:$0xff]  }
 0x5fd   :  { %v17726_v36 = vld [vmem:[#allocation4 + $0xac8] ss:$28 sps:$4 sm:$0xff]  }
 0x5fe   :  { %8580 = vmatpush2.bf16.msra.mxu1 %v17681_v7  ;;  %v17731_v7 = vld [vmem:[#allocation4 + $0x714] ss:$28 sps:$4 sm:$0xff]  }
 0x5ff   :  { %8621 = vmatpush2.bf16.msra.mxu0 %v17684_v60  ;;  %8631 = vmatprep.subr.bf16.mxu1 %v17689_v15  ;;  %v17734_v60 = vld [vmem:[#allocation4 + $0xa94] ss:$28 sps:$4 sm:$0xff]  }
 0x600   :  { %8672 = vmatprep.subr.bf16.mxu0 %v17692_v49  ;;  %v17729_v15 = vld [vmem:[#allocation4 + $0x710] ss:$28 sps:$4 sm:$0xff]  }
 0x601   :  { %v8337_v10 = vpop.f32.mrf.mxu1  ;;  %8582 = vmatmul.mubr.bf16.vlgmr.msra.gmra.mxu1 %v19602_v26  ;;  %v17732_v49 = vld [vmem:[#allocation4 + $0xa90] ss:$28 sps:$4 sm:$0xff]  }
 0x602   :  { %v8378_v47 = vpop.f32.mrf.mxu0  ;;  %8623 = vmatmul.mubr.bf16.vlgmr.msra.gmra.mxu0 %v19606_v21  ;;  %v8338_v9 = vadd.f32 %v8337_v10, %v19644_v38  ;;  %8632 = vmatpush1.bf16.msra.mxu1 %v17687_v62  ;;  %v17737_v62 = vld [vmem:[#allocation4 + $0xa5c] ss:$28 sps:$4 sm:$0xff]   ;;  %v17743_v10 = vld [vmem:[#allocation4 + $0xa24] ss:$28 sps:$4 sm:$0xff]  }
 0x603   :  { %8673 = vmatpush1.bf16.msra.mxu0 %v17690_v63  ;;  %v8339_v2 = vpop.f32.mrf.mxu1  ;;  %8633 = vmatprep.subr.bf16.mxu1 %v17695_v59  ;;  %v17740_v63 = vld [vmem:[#allocation4 + $0xddc] ss:$28 sps:$4 sm:$0xff]  }
 0x604   :  { %v8380_v17 = vpop.f32.mrf.mxu0  ;;  %8674 = vmatprep.subr.bf16.mxu0 %v17698_v0  ;;  %v8379_v6 = vadd.f32 %v8378_v47, %v8338_v9  ;;  %v8340_v8 = vadd.f32 %v8339_v2, %v19648_v18  ;;  %8663 = vmatprep.mubr.bf16.mxu1 %v19610_v44  ;;  %v17710_v18 = vld [vmem:[#allocation4 + $0xb74] ss:$28 sps:$4 sm:$0xff]   ;;  %v17746_v47 = vld [vmem:[#allocation4 + $0xda4] ss:$28 sps:$4 sm:$0xff]   ;;  %v17752_v2 = vld [vmem:[#allocation4 + $0xd6c] ss:$28 sps:$4 sm:$0xff]  }
 0x605   :  { %8704 = vmatprep.mubr.bf16.mxu0 %v19614_v52  ;;  %v8341_v38 = vpop.f32.mrf.mxu1  ;;  %v17735_v59 = vld [vmem:[#allocation4 + $0xa58] ss:$28 sps:$4 sm:$0xff]   ;;  %v17741_v9 = vld [vmem:[#allocation4 + $0xa20] ss:$28 sps:$4 sm:$0xff]  }
 0x606   :  { %v8382_v12 = vpop.f32.mrf.mxu0  ;;  %vm8874_vm3 = vcmp.ge.f32.partialorder %v8379_v6, 0.0  ;;  %v8882_v3 = vmul.f32 %v19656_v13, %v8379_v6  ;;  %v8381_v14 = vadd.f32 %v8380_v17, %v8340_v8  ;;  %8634 = vmatpush1.bf16.msra.mxu1 %v17693_v39  ;;  %v17738_v0 = vld [vmem:[#allocation4 + $0xdd8] ss:$28 sps:$4 sm:$0xff]   ;;  %v17744_v39 = vld [vmem:[#allocation4 + $0xda0] ss:$28 sps:$4 sm:$0xff]  }
 0x607   :  { %8675 = vmatpush1.bf16.msra.mxu0 %v17696_v32  ;;  %v8342_v43 = vpop.f32.mrf.mxu1  ;;  %8635 = vmatprep.subr.bf16.mxu1 %v17701_v48  ;;  %v17749_v32 = vld [vmem:[#allocation4 + $0x9ec] ss:$28 sps:$4 sm:$0xff]   ;;  %v17761_v12 = vld [vmem:[#allocation4 + $0x97c] ss:$28 sps:$4 sm:$0xff]  }
 0x608   :  { %v8383_v16 = vpop.f32.mrf.mxu0  ;;  %8676 = vmatprep.subr.bf16.mxu0 %v17704_v51  ;;  %v19662_v22 = vsel %vm8874_vm3, %v8379_v6, %v8882_v3  ;;  %vm8875_vm4 = vcmp.ge.f32.partialorder %v8381_v14, 0.0  ;;  %v8883_v23 = vmul.f32 %v19656_v13, %v8381_v14  ;;  %v17747_v17 = vld [vmem:[#allocation4 + $0x9e8] ss:$28 sps:$4 sm:$0xff]   ;;  %v17755_v51 = vld [vmem:[#allocation4 + $0x9b4] ss:$28 sps:$4 sm:$0xff]  }
 0x609   :  { %v17750_v48 = vld [vmem:[#allocation4 + $0xd68] ss:$28 sps:$4 sm:$0xff]   ;;  %v17758_v6 = vld [vmem:[#allocation4 + $0xd34] ss:$28 sps:$4 sm:$0xff]   ;;  %v17764_v3 = vld [vmem:[#allocation4 + $0xcfc] ss:$28 sps:$4 sm:$0xff]  }
 0x60a   :  { %v19665_v5 = vsel %vm8875_vm4, %v8381_v14, %v8883_v23  ;;  %8636 = vmatpush1.bf16.msra.mxu1 %v17699_v37  ;;  %v17753_v8 = vld [vmem:[#allocation4 + $0x9b0] ss:$28 sps:$4 sm:$0xff]   ;;  %v17759_v14 = vld [vmem:[#allocation4 + $0x978] ss:$28 sps:$4 sm:$0xff]   ;;  %v17770_v43 = vld [vmem:[#allocation4 + $0xcc4] ss:$28 sps:$4 sm:$0xff]  }
 0x60b   :  { %8677 = vmatpush1.bf16.msra.mxu0 %v17702_v61  ;;  %8637 = vmatprep.subr.bf16.mxu1 %v17707_v57  ;;  %v17756_v38 = vld [vmem:[#allocation4 + $0xd30] ss:$28 sps:$4 sm:$0xff]   ;;  %v17762_v37 = vld [vmem:[#allocation4 + $0xcf8] ss:$28 sps:$4 sm:$0xff]   ;;  %v17767_v61 = vld [vmem:[#allocation4 + $0x944] ss:$28 sps:$4 sm:$0xff]  }
 0x60c   :  { %8678 = vmatprep.subr.bf16.mxu0 %v17710_v18  ;;  %v17765_v16 = vld [vmem:[#allocation4 + $0x940] ss:$28 sps:$4 sm:$0xff]   ;;  %v17773_v18 = vld [vmem:[#allocation4 + $0x90c] ss:$28 sps:$4 sm:$0xff]  }
 0x60d   :  { %v17768_v57 = vld [vmem:[#allocation4 + $0xcc0] ss:$28 sps:$4 sm:$0xff]   ;;  %v17776_v23 = vld [vmem:[#allocation4 + $0xc8c] ss:$28 sps:$4 sm:$0xff]  }
 0x60e   :  { %8638 = vmatpush1.bf16.msra.mxu1 %v17705_v29  ;;  %v17771_v29 = vld [vmem:[#allocation4 + $0x908] ss:$28 sps:$4 sm:$0xff]  }
 0x60f   :  { %8679 = vmatpush1.bf16.msra.mxu0 %v17708_v58  ;;  %8639 = vmatprep.subr.bf16.mxu1 %v17713_v11  ;;  %v17774_v58 = vld [vmem:[#allocation4 + $0xc88] ss:$28 sps:$4 sm:$0xff]   ;;  %v17779_v11 = vld [vmem:[#allocation4 + $0x8d4] ss:$28 sps:$4 sm:$0xff]  }
 0x610   :  { %8680 = vmatprep.subr.bf16.mxu0 %v17716_v45  ;;  %v17782_v45 = vld [vmem:[#allocation4 + $0xc54] ss:$28 sps:$4 sm:$0xff]  }
 0x612   :  { %8640 = vmatpush1.bf16.msra.mxu1 %v17711_v46  ;;  %v17777_v46 = vld [vmem:[#allocation4 + $0x8d0] ss:$28 sps:$4 sm:$0xff]  }
 0x613   :  { %8681 = vmatpush1.bf16.msra.mxu0 %v17714_v50  ;;  %8641 = vmatprep.subr.bf16.mxu1 %v17719_v34  ;;  %v17780_v50 = vld [vmem:[#allocation4 + $0xc50] ss:$28 sps:$4 sm:$0xff]   ;;  %v17783_v34 = vld [vmem:[#allocation4 + $0x360] ss:$28 sps:$4 sm:$0xff]  }
 0x614   :  { %8682 = vmatprep.subr.bf16.mxu0 %v17722_v56  ;;  %v17784_v56 = vld [vmem:[#allocation4 + $0x6e0] ss:$28 sps:$4 sm:$0xff]  }
 0x616   :  { %8642 = vmatpush1.bf16.msra.mxu1 %v17717_v53  ;;  %v5893_v53 = vrot.slane %v19636_v4, %v19389_v28 }
 0x617   :  { %8683 = vmatpush1.bf16.msra.mxu0 %v17720_v42  ;;  %8643 = vmatprep.subr.bf16.mxu1 %v17725_v24  ;;  %v17785_v42 = vld [vmem:[#allocation4 + $0x1a0] ss:$28 sps:$4 sm:$0xff]  }
 0x618   :  { %8684 = vmatprep.subr.bf16.mxu0 %v17728_v54  ;;  %v17786_v24 = vld [vmem:[#allocation4 + $0x520] ss:$28 sps:$4 sm:$0xff]   ;;  %v17787_v54 = vld [vmem:[#allocation4 + $0x328] ss:$28 sps:$4 sm:$0xff]  }
 0x61a   :  { %8644 = vmatpush1.bf16.msra.mxu1 %v17723_v20  ;;  %v17788_v20 = vld [vmem:[#allocation4 + $0x6a8] ss:$28 sps:$4 sm:$0xff]  }
 0x61b   :  { %8685 = vmatpush1.bf16.msra.mxu0 %v17726_v36  ;;  %8645 = vmatprep.subr.bf16.mxu1 %v17731_v7  ;;  %v5897_v36 = vrot.slane %v19636_v4, %v19393_v30 }
 0x61c   :  { %8686 = vmatprep.subr.bf16.mxu0 %v17734_v60 }
 0x61e   :  { %8646 = vmatpush1.bf16.msra.mxu1 %v17729_v15 }
 0x61f   :  { %8687 = vmatpush1.bf16.msra.mxu0 %v17732_v49  ;;  %8647 = vmatprep.subr.bf16.mxu1 %v17737_v62  ;;  %v17789_v49 = vld [vmem:[#allocation4 + $0x168] ss:$28 sps:$4 sm:$0xff]  }
 0x620   :  { %8688 = vmatprep.subr.bf16.mxu0 %v17740_v63  ;;  %v17790_v62 = vld [vmem:[#allocation4 + $0x4e8] ss:$28 sps:$4 sm:$0xff]  }
 0x622   :  { %8648 = vmatpush2.bf16.msra.mxu1 %v17735_v59 }
 0x623   :  { %8689 = vmatpush2.bf16.msra.mxu0 %v17738_v0  ;;  %8649 = vmatprep.subr.bf16.mxu1 %v17743_v10  ;;  %v17791_v0 = vld [vmem:[#allocation4 + $0x2f0] ss:$28 sps:$4 sm:$0xff]  }
 0x624   :  { %8690 = vmatprep.subr.bf16.mxu0 %v17746_v47  ;;  %v17792_v10 = vld [vmem:[#allocation4 + $0x670] ss:$28 sps:$4 sm:$0xff]  }
 0x626   :  { %8650 = vmatpush2.bf16.msra.mxu1 %v17741_v9 }
 0x627   :  { %8691 = vmatpush2.bf16.msra.mxu0 %v17744_v39  ;;  %8651 = vmatprep.subr.bf16.mxu1 %v17749_v32 }
 0x628   :  { %8692 = vmatprep.subr.bf16.mxu0 %v17752_v2  ;;  %v17793_v2 = vld [vmem:[#allocation4 + $0x130] ss:$28 sps:$4 sm:$0xff]  }
 0x62a   :  { %8652 = vmatpush2.bf16.msra.mxu1 %v17747_v17  ;;  %v17794_v17 = vld [vmem:[#allocation4 + $0x4b0] ss:$28 sps:$4 sm:$0xff]  }
 0x62b   :  { %8693 = vmatpush2.bf16.msra.mxu0 %v17750_v48  ;;  %8653 = vmatprep.subr.bf16.mxu1 %v17755_v51 }
 0x62c   :  { %8694 = vmatprep.subr.bf16.mxu0 %v17758_v6  ;;  %v17795_v6 = vld [vmem:[#allocation4 + $0x2b8] ss:$28 sps:$4 sm:$0xff]  }
 0x62e   :  { %8654 = vmatpush2.bf16.msra.mxu1 %v17753_v8  ;;  %v17796_v8 = vld [vmem:[#allocation4 + $0x638] ss:$28 sps:$4 sm:$0xff]  }
 0x62f   :  { %8695 = vmatpush2.bf16.msra.mxu0 %v17756_v38  ;;  %8655 = vmatprep.subr.bf16.mxu1 %v17761_v12  ;;  %v17797_v38 = vld [vmem:[#allocation4 + $0xf8] ss:$28 sps:$4 sm:$0xff]   ;;  %v17800_v12 = vld [vmem:[#allocation4 + $0x600] ss:$28 sps:$4 sm:$0xff]  }
 0x630   :  { %8696 = vmatprep.subr.bf16.mxu0 %v17764_v3  ;;  %v17801_v3 = vld [vmem:[#allocation4 + $0xc0] ss:$28 sps:$4 sm:$0xff]  }
 0x632   :  { %8656 = vmatpush2.bf16.msra.mxu1 %v17759_v14  ;;  %v17802_v14 = vld [vmem:[#allocation4 + $0x440] ss:$28 sps:$4 sm:$0xff]  }
 0x633   :  { %8697 = vmatpush2.bf16.msra.mxu0 %v17762_v37  ;;  %8657 = vmatprep.subr.bf16.mxu1 %v17767_v61  ;;  %v17803_v37 = vld [vmem:[#allocation4 + $0x248] ss:$28 sps:$4 sm:$0xff]  }
 0x634   :  { %8698 = vmatprep.subr.bf16.mxu0 %v17770_v43  ;;  %v17804_v61 = vld [vmem:[#allocation4 + $0x5c8] ss:$28 sps:$4 sm:$0xff]  }
 0x635   :  { %v17805_v43 = vld [vmem:[#allocation4 + $0x88] ss:$28 sps:$4 sm:$0xff]  }
 0x636   :  { %8658 = vmatpush2.bf16.msra.mxu1 %v17765_v16  ;;  %v17806_v16 = vld [vmem:[#allocation4 + $0x408] ss:$28 sps:$4 sm:$0xff]  }
 0x637   :  { %8699 = vmatpush2.bf16.msra.mxu0 %v17768_v57  ;;  %8659 = vmatprep.subr.bf16.mxu1 %v17773_v18  ;;  %v17807_v57 = vld [vmem:[#allocation4 + $0x210] ss:$28 sps:$4 sm:$0xff]  }
 0x638   :  { %8700 = vmatprep.subr.bf16.mxu0 %v17776_v23  ;;  %v17808_v18 = vld [vmem:[#allocation4 + $0x590] ss:$28 sps:$4 sm:$0xff]  }
 0x639   :  { %v17809_v23 = vld [vmem:[#allocation4 + $0x50] ss:$28 sps:$4 sm:$0xff]  }
 0x63a   :  { %8660 = vmatpush2.bf16.msra.mxu1 %v17771_v29  ;;  %v17810_v29 = vld [vmem:[#allocation4 + $0x3d0] ss:$28 sps:$4 sm:$0xff]  }
 0x63b   :  { %8701 = vmatpush2.bf16.msra.mxu0 %v17774_v58  ;;  %8661 = vmatprep.subr.bf16.mxu1 %v17779_v11  ;;  %v17811_v58 = vld [vmem:[#allocation4 + $0x1d8] ss:$28 sps:$4 sm:$0xff]  }
 0x63c   :  { %8702 = vmatprep.subr.bf16.mxu0 %v17782_v45  ;;  %v17812_v11 = vld [vmem:[#allocation4 + $0x558] ss:$28 sps:$4 sm:$0xff]  }
 0x63d   :  { %v17813_v45 = vld [vmem:[#allocation4 + $0x18] ss:$28 sps:$4 sm:$0xff]  }
 0x63e   :  { %8662 = vmatpush2.bf16.msra.mxu1 %v17777_v46  ;;  %v17814_v46 = vld [vmem:[#allocation4 + $0x398] ss:$28 sps:$4 sm:$0xff]  }
 0x63f   :  { %8703 = vmatpush2.bf16.msra.mxu0 %v17780_v50  ;;  %16917 = vmatprep.subr.bf16.mxu1 %v17783_v34  ;;  %v17815_v50 = vld [vmem:[#allocation4 + $0xa60] ss:$28 sps:$4 sm:$0xff]  }
 0x640   :  { %16939 = vmatprep.subr.bf16.mxu0 %v17784_v56  ;;  %v17816_v34 = vld [vmem:[#allocation4 + $0xde0] ss:$28 sps:$4 sm:$0xff]  }
 0x641   :  { %v8419_v7 = vpop.f32.mrf.mxu1  ;;  %8664 = vmatmul.mubr.bf16.vlgmr.msra.gmra.mxu1 %v19622_v31  ;;  %v17817_v56 = vld [vmem:[#allocation4 + $0x8a0] ss:$28 sps:$4 sm:$0xff]  }
 0x642   :  { %v8460_v60 = vpop.f32.mrf.mxu0  ;;  %8705 = vmatmul.mubr.bf16.vlgmr.msra.gmra.mxu0 %v19626_v33  ;;  %v8420_v15 = vadd.f32 %v8419_v7, %v5893_v53  ;;  %16918 = vmatpush3.bf16.msra.mxu1 %v17785_v42  ;;  %v17818_v53 = vld [vmem:[#allocation4 + $0xc20] ss:$28 sps:$4 sm:$0xff]   ;;  %v17819_v42 = vld [vmem:[#allocation4 + $0xa28] ss:$28 sps:$4 sm:$0xff]   ;;  %v17824_v7 = vld [vmem:[#allocation4 + $0xd70] ss:$28 sps:$4 sm:$0xff]  }
 0x643   :  { %16940 = vmatpush3.bf16.msra.mxu0 %v17786_v24  ;;  %v8421_v63 = vpop.f32.mrf.mxu1  ;;  %16919 = vmatprep.subr.bf16.mxu1 %v17787_v54  ;;  %v17820_v24 = vld [vmem:[#allocation4 + $0xda8] ss:$28 sps:$4 sm:$0xff]  }
 0x644   :  { %v8462_v59 = vpop.f32.mrf.mxu0  ;;  %16941 = vmatprep.subr.bf16.mxu0 %v17788_v20  ;;  %v19673_v47 = vadd.f32 %v8460_v60, %v8420_v15  ;;  %v8422_v4 = vadd.f32 %v8421_v63, %v5897_v36  ;;  %8745 = vmatprep.mubr.bf16.mxu1 %v19592_v55  ;;  %v17798_v55 = vld [vmem:[#allocation4 + $0x478] ss:$28 sps:$4 sm:$0xff]   ;;  %v17821_v54 = vld [vmem:[#allocation4 + $0x868] ss:$28 sps:$4 sm:$0xff]   ;;  %v17823_v36 = vld [vmem:[#allocation4 + $0x9f0] ss:$28 sps:$4 sm:$0xff]  }
 0x645   :  { %8785 = vmatprep.mubr.bf16.mxu0 %v19596_v19  ;;  %v8423_v9 = vpop.f32.mrf.mxu1  ;;  %v17799_v19 = vld [vmem:[#allocation4 + $0x280] ss:$28 sps:$4 sm:$0xff]   ;;  %v17822_v20 = vld [vmem:[#allocation4 + $0xbe8] ss:$28 sps:$4 sm:$0xff]   ;;  %v17825_v60 = vld [vmem:[#allocation4 + $0x830] ss:$28 sps:$4 sm:$0xff]  }
 0x646   :  { %v8464_v39 = vpop.f32.mrf.mxu0  ;;  %v19677_v32 = vadd.f32 %v8462_v59, %v8422_v4  ;;  %16920 = vmatpush3.bf16.msra.mxu1 %v17789_v49  ;;  %v17826_v15 = vld [vmem:[#allocation4 + $0xbb0] ss:$28 sps:$4 sm:$0xff]   ;;  %v17829_v49 = vld [vmem:[#allocation4 + $0x7f8] ss:$28 sps:$4 sm:$0xff]   ;;  %v17831_v63 = vld [vmem:[#allocation4 + $0x980] ss:$28 sps:$4 sm:$0xff]  }
 0x647   :  { %16942 = vmatpush3.bf16.msra.mxu0 %v17790_v62  ;;  %v8424_v48 = vpop.f32.mrf.mxu1  ;;  %16921 = vmatprep.subr.bf16.mxu1 %v17791_v0  ;;  %v17830_v62 = vld [vmem:[#allocation4 + $0xb78] ss:$28 sps:$4 sm:$0xff]   ;;  %v17832_v59 = vld [vmem:[#allocation4 + $0xd00] ss:$28 sps:$4 sm:$0xff]   ;;  %v17835_v0 = vld [vmem:[#allocation4 + $0x948] ss:$28 sps:$4 sm:$0xff]  }
 0x648   :  { %v8465_v51 = vpop.f32.mrf.mxu0  ;;  %16943 = vmatprep.subr.bf16.mxu0 %v17792_v10  ;;  %v17836_v10 = vld [vmem:[#allocation4 + $0xcc8] ss:$28 sps:$4 sm:$0xff]   ;;  %v17839_v39 = vld [vmem:[#allocation4 + $0x910] ss:$28 sps:$4 sm:$0xff]  }
 0x649   :  { %v17837_v4 = vld [vmem:[#allocation4 + $0x788] ss:$28 sps:$4 sm:$0xff]   ;;  %v17842_v48 = vld [vmem:[#allocation4 + $0xad0] ss:$28 sps:$4 sm:$0xff]   ;;  %v17843_v51 = vld [vmem:[#allocation4 + $0x8d8] ss:$28 sps:$4 sm:$0xff]  }
 0x64a   :  { %16922 = vmatpush3.bf16.msra.mxu1 %v17793_v2  ;;  %v17838_v9 = vld [vmem:[#allocation4 + $0xb08] ss:$28 sps:$4 sm:$0xff]   ;;  %v17840_v2 = vld [vmem:[#allocation4 + $0xc90] ss:$28 sps:$4 sm:$0xff]  }
 0x64b   :  { %16944 = vmatpush3.bf16.msra.mxu0 %v17794_v17  ;;  %16923 = vmatprep.subr.bf16.mxu1 %v17795_v6  ;;  %v17841_v17 = vld [vmem:[#allocation4 + $0x750] ss:$28 sps:$4 sm:$0xff]   ;;  %v17844_v6 = vld [vmem:[#allocation4 + $0xc58] ss:$28 sps:$4 sm:$0xff]  }
 0x64c   :  { %16945 = vmatprep.subr.bf16.mxu0 %v17796_v8  ;;  %v17845_v8 = vld [vmem:[#allocation4 + $0x718] ss:$28 sps:$4 sm:$0xff]  }
 0x64e   :  { %16924 = vmatpush3.bf16.msra.mxu1 %v17797_v38  ;;  %v17846_v38 = vld [vmem:[#allocation4 + $0xa98] ss:$28 sps:$4 sm:$0xff]  }
 0x64f   :  { %16946 = vmatpush3.bf16.msra.mxu0 %v17798_v55  ;;  %16925 = vmatprep.subr.bf16.mxu1 %v17799_v19 }
 0x650   :  { %16947 = vmatprep.subr.bf16.mxu0 %v17800_v12 }
 0x652   :  { %16926 = vmatpush3.bf16.msra.mxu1 %v17801_v3 }
 0x653   :  { %16948 = vmatpush3.bf16.msra.mxu0 %v17802_v14  ;;  %16927 = vmatprep.subr.bf16.mxu1 %v17803_v37 }
 0x654   :  { %16949 = vmatprep.subr.bf16.mxu0 %v17804_v61 }
 0x656   :  { %16928 = vmatpush3.bf16.msra.mxu1 %v17805_v43 }
 0x657   :  { %16950 = vmatpush3.bf16.msra.mxu0 %v17806_v16  ;;  %16929 = vmatprep.subr.bf16.mxu1 %v17807_v57 }
 0x658   :  { %16951 = vmatprep.subr.bf16.mxu0 %v17808_v18 }
 0x65a   :  { %16930 = vmatpush3.bf16.msra.mxu1 %v17809_v23 }
 0x65b   :  { %16952 = vmatpush3.bf16.msra.mxu0 %v17810_v29  ;;  %16931 = vmatprep.subr.bf16.mxu1 %v17811_v58 }
 0x65c   :  { %16953 = vmatprep.subr.bf16.mxu0 %v17812_v11 }
 0x65e   :  { %16932 = vmatpush3.bf16.msra.mxu1 %v17813_v45 }
 0x65f   :  { %16954 = vmatpush3.bf16.msra.mxu0 %v17814_v46  ;;  %16961 = vmatprep.subr.bf16.mxu1 %v17815_v50 }
 0x660   :  { %16983 = vmatprep.subr.bf16.mxu0 %v17816_v34 }
 0x661   :  { %8746 = vmatmul.mubr.bf16.vlgmr.msra.gmra.mxu1 %v19602_v26  ;;  %v17827_v26 = vld [vmem:[#allocation4 + $0x9b8] ss:$28 sps:$4 sm:$0xff]  }
 0x662   :  { %8786 = vmatmul.mubr.bf16.vlgmr.msra.gmra.mxu0 %v19606_v21  ;;  %16962 = vmatpush3.bf16.msra.mxu1 %v17817_v56  ;;  %v17828_v21 = vld [vmem:[#allocation4 + $0xd38] ss:$28 sps:$4 sm:$0xff]  }
 0x663   :  { %16984 = vmatpush3.bf16.msra.mxu0 %v17818_v53  ;;  %16963 = vmatprep.subr.bf16.mxu1 %v17819_v42 }
 0x664   :  { %16985 = vmatprep.subr.bf16.mxu0 %v17820_v24  ;;  %8825 = vmatprep.mubr.bf16.mxu1 %v19610_v44  ;;  %v17833_v44 = vld [vmem:[#allocation4 + $0x7c0] ss:$28 sps:$4 sm:$0xff]  }
 0x665   :  { %8865 = vmatprep.mubr.bf16.mxu0 %v19614_v52  ;;  %v17834_v52 = vld [vmem:[#allocation4 + $0xb40] ss:$28 sps:$4 sm:$0xff]  }
 0x666   :  { %16964 = vmatpush3.bf16.msra.mxu1 %v17821_v54 }
 0x667   :  { %16986 = vmatpush3.bf16.msra.mxu0 %v17822_v20  ;;  %16965 = vmatprep.subr.bf16.mxu1 %v17823_v36 }
 0x668   :  { %16987 = vmatprep.subr.bf16.mxu0 %v17824_v7 }
 0x66a   :  { %16966 = vmatpush3.bf16.msra.mxu1 %v17825_v60 }
 0x66b   :  { %16988 = vmatpush3.bf16.msra.mxu0 %v17826_v15  ;;  %16967 = vmatprep.subr.bf16.mxu1 %v17827_v26 }
 0x66c   :  { %16989 = vmatprep.subr.bf16.mxu0 %v17828_v21 }
 0x66e   :  { %16968 = vmatpush3.bf16.msra.mxu1 %v17829_v49 }
 0x66f   :  { %16990 = vmatpush3.bf16.msra.mxu0 %v17830_v62  ;;  %16969 = vmatprep.subr.bf16.mxu1 %v17831_v63 }
 0x670   :  { %16991 = vmatprep.subr.bf16.mxu0 %v17832_v59 }
 0x672   :  { %16970 = vmatpush3.bf16.msra.mxu1 %v17833_v44 }
 0x673   :  { %16992 = vmatpush3.bf16.msra.mxu0 %v17834_v52  ;;  %16971 = vmatprep.subr.bf16.mxu1 %v17835_v0 }
 0x674   :  { %16993 = vmatprep.subr.bf16.mxu0 %v17836_v10 }
 0x676   :  { %16972 = vmatpush3.bf16.msra.mxu1 %v17837_v4 }
 0x677   :  { %16994 = vmatpush3.bf16.msra.mxu0 %v17838_v9  ;;  %16973 = vmatprep.subr.bf16.mxu1 %v17839_v39 }
 0x678   :  { %16995 = vmatprep.subr.bf16.mxu0 %v17840_v2 }
 0x67a   :  { %16974 = vmatpush3.bf16.msra.mxu1 %v17841_v17 }
 0x67b   :  { %16996 = vmatpush3.bf16.msra.mxu0 %v17842_v48  ;;  %16975 = vmatprep.subr.bf16.mxu1 %v17843_v51 }
 0x67c   :  { %16997 = vmatprep.subr.bf16.mxu0 %v17844_v6 }
 0x67e   :  { %16976 = vmatpush3.bf16.msra.mxu1 %v17845_v8 }
 0x67f   :  { %16998 = vmatpush3.bf16.msra.mxu0 %v17846_v38 }
 0x681   :  { %v8501_v55 = vpop.f32.mrf.mxu1  ;;  %8826 = vmatmul.mubr.bf16.vlgmr.msra.gmra.mxu1 %v19622_v31 }
 0x682   :  { %v8542_v19 = vpop.f32.mrf.mxu0  ;;  %8866 = vmatmul.mubr.bf16.vlgmr.msra.gmra.mxu0 %v19626_v33  ;;  %v8502_v12 = vadd.f32 %v8501_v55, %v19673_v47  ;;  %v17847_v47 = vld [vmem:[#allocation15 + $0x12] sm:$0xff] }
 0x683   :  { %v8503_v3 = vpop.f32.mrf.mxu1  ;;  %v5901_v11 = vrot.slane %v17847_v47, %v19400_v35 }
 0x684   :  { %v8544_v14 = vpop.f32.mrf.mxu0  ;;  %v8543_v37 = vadd.f32 %v8542_v19, %v8502_v12  ;;  %v8504_v61 = vadd.f32 %v8503_v3, %v19677_v32  ;;  %v5905_v32 = vrot.slane %v17847_v47, %v19404_v40  ;;  %v5909_v12 = vrot.slane %v17847_v47, %v19407_v41 }
 0x685   :  { %v8505_v43 = vpop.f32.mrf.mxu1 }
 0x686   :  { %v8546_v16 = vpop.f32.mrf.mxu0  ;;  %vm8876_vm5 = vcmp.ge.f32.partialorder %v8543_v37, 0.0  ;;  %v8884_v57 = vmul.f32 %v19656_v13, %v8543_v37  ;;  %v8545_v18 = vadd.f32 %v8544_v14, %v8504_v61 }
 0x687   :  { %v8506_v23 = vpop.f32.mrf.mxu1 }
 0x688   :  { %v8547_v29 = vpop.f32.mrf.mxu0  ;;  %v19688_v58 = vsel %vm8876_vm5, %v8543_v37, %v8884_v57  ;;  %vm8877_vm6 = vcmp.ge.f32.partialorder %v8545_v18, 0.0  ;;  %v8885_v31 = vmul.f32 %v19656_v13, %v8545_v18 }
 0x68a   :  { %v19691_v33 = vsel %vm8877_vm6, %v8545_v18, %v8885_v31 }
 0x6c1   :  { %v8583_v45 = vpop.f32.mrf.mxu1 }
 0x6c2   :  { %v8624_v46 = vpop.f32.mrf.mxu0  ;;  %v8584_v50 = vadd.f32 %v8583_v45, %v5901_v11 }
 0x6c3   :  { %v8585_v34 = vpop.f32.mrf.mxu1 }
 0x6c4   :  { %v8626_v56 = vpop.f32.mrf.mxu0  ;;  %v8625_v53 = vadd.f32 %v8624_v46, %v8584_v50  ;;  %v8586_v42 = vadd.f32 %v8585_v34, %v5905_v32 }
 0x6c5   :  { %v8587_v24 = vpop.f32.mrf.mxu1 }
 0x6c6   :  { %v8628_v54 = vpop.f32.mrf.mxu0  ;;  %v8627_v20 = vadd.f32 %v8626_v56, %v8586_v42 }
 0x6c7   :  { %v8588_v36 = vpop.f32.mrf.mxu1 }
 0x6c8   :  { %v8629_v7 = vpop.f32.mrf.mxu0 }
 0x701   :  { %v8665_v60 = vpop.f32.mrf.mxu1 }
 0x702   :  { %v8706_v15 = vpop.f32.mrf.mxu0  ;;  %v8666_v26 = vadd.f32 %v8665_v60, %v8625_v53 }
 0x703   :  { %v8667_v21 = vpop.f32.mrf.mxu1 }
 0x704   :  { %v8708_v49 = vpop.f32.mrf.mxu0  ;;  %v8707_v62 = vadd.f32 %v8706_v15, %v8666_v26  ;;  %v8668_v63 = vadd.f32 %v8667_v21, %v8627_v20 }
 0x705   :  { %v8669_v59 = vpop.f32.mrf.mxu1 }
 0x706   :  { %v8710_v44 = vpop.f32.mrf.mxu0  ;;  %vm8878_vm7 = vcmp.ge.f32.partialorder %v8707_v62, 0.0  ;;  %v8886_v52 = vmul.f32 %v19656_v13, %v8707_v62  ;;  %v8709_v0 = vadd.f32 %v8708_v49, %v8668_v63 }
 0x707   :  { %v8670_v10 = vpop.f32.mrf.mxu1 }
 0x708   :  { %v8711_v4 = vpop.f32.mrf.mxu0  ;;  %v19696_v9 = vsel %vm8878_vm7, %v8707_v62, %v8886_v52  ;;  %vm8879_vm8 = vcmp.ge.f32.partialorder %v8709_v0, 0.0  ;;  %v8887_v39 = vmul.f32 %v19656_v13, %v8709_v0 }
 0x70a   :  { %v19699_v2 = vsel %vm8879_vm8, %v8709_v0, %v8887_v39 }
 0x721   :  { %v16933_v17 = vpop.f32.mrf.mxu1 }
 0x722   :  { %v16955_v48 = vpop.f32.mrf.mxu0 }
 0x723   :  { %v16934_v51 = vpop.f32.mrf.mxu1 }
 0x724   :  { %v16956_v6 = vpop.f32.mrf.mxu0  ;;  %v16935_v3 = vadd.f32 %v16934_v51, %v16933_v17 }
 0x725   :  { %v16936_v8 = vpop.f32.mrf.mxu1  ;;  %v16957_v37 = vadd.f32 %v16956_v6, %v16955_v48 }
 0x726   :  { %v16958_v38 = vpop.f32.mrf.mxu0  ;;  %v8748_v14 = vadd.f32 %v16935_v3, %v5909_v12 }
 0x727   :  { %v16937_v55 = vpop.f32.mrf.mxu1 }
 0x728   :  { %v16959_v19 = vpop.f32.mrf.mxu0  ;;  %v8788_v18 = vadd.f32 %v16957_v37, %v8748_v14 }
 0x741   :  { %v16977_v61 = vpop.f32.mrf.mxu1 }
 0x742   :  { %v16999_v43 = vpop.f32.mrf.mxu0 }
 0x743   :  { %v16978_v16 = vpop.f32.mrf.mxu1 }
 0x744   :  { %v17000_v57 = vpop.f32.mrf.mxu0  ;;  %v16979_v23 = vadd.f32 %v16978_v16, %v16977_v61 }
 0x745   :  { %v16980_v29 = vpop.f32.mrf.mxu1  ;;  %v17001_v32 = vadd.f32 %v17000_v57, %v16999_v43 }
 0x746   :  { %v17002_v31 = vpop.f32.mrf.mxu0  ;;  %v8828_v11 = vadd.f32 %v16979_v23, %v8788_v18 }
 0x747   :  { %v16981_v45 = vpop.f32.mrf.mxu1 }
 0x748   :  { %v17003_v46 = vpop.f32.mrf.mxu0  ;;  %v8868_v50 = vadd.f32 %v17001_v32, %v8828_v11 }
 0x74a   :  { %vm8880_vm9 = vcmp.ge.f32.partialorder %v8868_v50, 0.0  ;;  %v8888_v34 = vmul.f32 %v19656_v13, %v8868_v50 }
 0x74c   :  { %v19703_v41 = vsel %vm8880_vm9, %v8868_v50, %v8888_v34 }
 0x74d   :  { %19206 = dma.done.wait [#allocation14 + $0x3], 43008 }
 0x74e   :  { %19207 = vsyncadd [#allocation14 + $0x3], 4294924288  ;;  %v19707_v47 = vpack.c.bf16 %v19665_v5, %v19665_v5  ;;  %v19711_v56 = vpack.c.bf16 %v19691_v33, %v19691_v33  ;;  %v17848_v53 = vld [vmem:[#allocation5 + $0x154] ss:$24 sps:$4 sm:$0xff]   ;;  %v17852_v13 = vld [vmem:[#allocation5 + $0x150] ss:$24 sps:$4 sm:$0xff]  }
 0x74f   :  { %v17850_v42 = vld [vmem:[#allocation5 + $0x454] ss:$24 sps:$4 sm:$0xff]   ;;  %10955 = vmatprep.subr.bf16.mxu1 %v17848_v53  ;;  %v17853_v24 = vld [vmem:[#allocation5 + $0x450] ss:$24 sps:$4 sm:$0xff]   ;;  %v17854_v54 = vld [vmem:[#allocation5 + $0x124] ss:$24 sps:$4 sm:$0xff]  }
 0x750   :  { %10987 = vmatprep.mubr.bf16.mxu1 %v19707_v47  ;;  %11028 = vmatprep.mubr.bf16.mxu0 %v19711_v56  ;;  %v17856_v20 = vld [vmem:[#allocation5 + $0x424] ss:$24 sps:$4 sm:$0xff]   ;;  %v17858_v5 = vld [vmem:[#allocation5 + $0x120] ss:$24 sps:$4 sm:$0xff]   ;;  %v17860_v33 = vld [vmem:[#allocation5 + $0xf4] ss:$24 sps:$4 sm:$0xff]  }
 0x751   :  { %10996 = vmatprep.subr.bf16.mxu0 %v17850_v42  ;;  %10956 = vmatpush1.bf16.msra.mxu1 %v17852_v13  ;;  %v17859_v36 = vld [vmem:[#allocation5 + $0x420] ss:$24 sps:$4 sm:$0xff]   ;;  %v17862_v7 = vld [vmem:[#allocation5 + $0x3f4] ss:$24 sps:$4 sm:$0xff]   ;;  %v17864_v60 = vld [vmem:[#allocation5 + $0xf0] ss:$24 sps:$4 sm:$0xff]  }
 0x752   :  { %10997 = vmatpush1.bf16.msra.mxu0 %v17853_v24  ;;  %10957 = vmatprep.subr.bf16.mxu1 %v17854_v54  ;;  %v17865_v15 = vld [vmem:[#allocation5 + $0x3f0] ss:$24 sps:$4 sm:$0xff]   ;;  %v17866_v26 = vld [vmem:[#allocation5 + $0xc4] ss:$24 sps:$4 sm:$0xff]   ;;  %v17870_v49 = vld [vmem:[#allocation5 + $0xc0] ss:$24 sps:$4 sm:$0xff]  }
 0x753   :  { %10998 = vmatprep.subr.bf16.mxu0 %v17856_v20  ;;  %v17868_v21 = vld [vmem:[#allocation5 + $0x3c4] ss:$24 sps:$4 sm:$0xff]   ;;  %v17871_v62 = vld [vmem:[#allocation5 + $0x3c0] ss:$24 sps:$4 sm:$0xff]   ;;  %v17872_v63 = vld [vmem:[#allocation5 + $0x94] ss:$24 sps:$4 sm:$0xff]  }
 0x754   :  { %v17874_v59 = vld [vmem:[#allocation5 + $0x394] ss:$24 sps:$4 sm:$0xff]   ;;  %v17876_v44 = vld [vmem:[#allocation5 + $0x90] ss:$24 sps:$4 sm:$0xff]   ;;  %v17878_v0 = vld [vmem:[#allocation5 + $0x64] ss:$24 sps:$4 sm:$0xff]  }
 0x755   :  { %10958 = vmatpush1.bf16.msra.mxu1 %v17858_v5  ;;  %v17877_v52 = vld [vmem:[#allocation5 + $0x390] ss:$24 sps:$4 sm:$0xff]   ;;  %v17880_v10 = vld [vmem:[#allocation5 + $0x364] ss:$24 sps:$4 sm:$0xff]   ;;  %v17882_v4 = vld [vmem:[#allocation5 + $0x60] ss:$24 sps:$4 sm:$0xff]  }
 0x756   :  { %10999 = vmatpush1.bf16.msra.mxu0 %v17859_v36  ;;  %10959 = vmatprep.subr.bf16.mxu1 %v17860_v33  ;;  %v17883_v39 = vld [vmem:[#allocation5 + $0x360] ss:$24 sps:$4 sm:$0xff]   ;;  %v17884_v17 = vld [vmem:[#allocation5 + $0x34] ss:$24 sps:$4 sm:$0xff]   ;;  %v17888_v51 = vld [vmem:[#allocation5 + $0x30] ss:$24 sps:$4 sm:$0xff]  }
 0x757   :  { %11000 = vmatprep.subr.bf16.mxu0 %v17862_v7  ;;  %v17886_v48 = vld [vmem:[#allocation5 + $0x334] ss:$24 sps:$4 sm:$0xff]   ;;  %v17889_v6 = vld [vmem:[#allocation5 + $0x330] ss:$24 sps:$4 sm:$0xff]   ;;  %v17890_v8 = vld [vmem:[#allocation5 + $0x4] ss:$24 sps:$4 sm:$0xff]  }
 0x758   :  { %v17892_v38 = vld [vmem:[#allocation5 + $0x304] ss:$24 sps:$4 sm:$0xff]   ;;  %v17894_v55 = vld [vmem:[#allocation5] ss:$24 sps:$4 sm:$0xff]   ;;  %v17896_v12 = vld [vmem:[#allocation5 + $0x2d4] ss:$24 sps:$4 sm:$0xff]  }
 0x759   :  { %10960 = vmatpush1.bf16.msra.mxu1 %v17864_v60  ;;  %v17895_v19 = vld [vmem:[#allocation5 + $0x300] ss:$24 sps:$4 sm:$0xff]   ;;  %v17898_v3 = vld [vmem:[#allocation5 + $0x5d4] ss:$24 sps:$4 sm:$0xff]   ;;  %v17900_v14 = vld [vmem:[#allocation5 + $0x2d0] ss:$24 sps:$4 sm:$0xff]  }
 0x75a   :  { %11001 = vmatpush1.bf16.msra.mxu0 %v17865_v15  ;;  %10961 = vmatprep.subr.bf16.mxu1 %v17866_v26  ;;  %v17901_v37 = vld [vmem:[#allocation5 + $0x5d0] ss:$24 sps:$4 sm:$0xff]   ;;  %v17902_v61 = vld [vmem:[#allocation5 + $0x2a4] ss:$24 sps:$4 sm:$0xff]   ;;  %v17906_v16 = vld [vmem:[#allocation5 + $0x2a0] ss:$24 sps:$4 sm:$0xff]  }
 0x75b   :  { %11002 = vmatprep.subr.bf16.mxu0 %v17868_v21  ;;  %v17904_v43 = vld [vmem:[#allocation5 + $0x5a4] ss:$24 sps:$4 sm:$0xff]   ;;  %v17907_v57 = vld [vmem:[#allocation5 + $0x5a0] ss:$24 sps:$4 sm:$0xff]   ;;  %v17908_v18 = vld [vmem:[#allocation5 + $0x274] ss:$24 sps:$4 sm:$0xff]  }
 0x75c   :  { %v17910_v23 = vld [vmem:[#allocation5 + $0x574] ss:$24 sps:$4 sm:$0xff]   ;;  %v17912_v29 = vld [vmem:[#allocation5 + $0x270] ss:$24 sps:$4 sm:$0xff]   ;;  %v17914_v11 = vld [vmem:[#allocation5 + $0x244] ss:$24 sps:$4 sm:$0xff]  }
 0x75d   :  { %10962 = vmatpush1.bf16.msra.mxu1 %v17870_v49  ;;  %v17913_v31 = vld [vmem:[#allocation5 + $0x570] ss:$24 sps:$4 sm:$0xff]   ;;  %v17916_v32 = vld [vmem:[#allocation5 + $0x544] ss:$24 sps:$4 sm:$0xff]   ;;  %v17918_v45 = vld [vmem:[#allocation5 + $0x240] ss:$24 sps:$4 sm:$0xff]  }
 0x75e   :  { %11003 = vmatpush1.bf16.msra.mxu0 %v17871_v62  ;;  %10963 = vmatprep.subr.bf16.mxu1 %v17872_v63  ;;  %v17919_v46 = vld [vmem:[#allocation5 + $0x540] ss:$24 sps:$4 sm:$0xff]   ;;  %v17920_v50 = vld [vmem:[#allocation5 + $0x214] ss:$24 sps:$4 sm:$0xff]   ;;  %v17924_v53 = vld [vmem:[#allocation5 + $0x210] ss:$24 sps:$4 sm:$0xff]   ;;  %v19717_v63 = vpack.c.bf16 %v19662_v22, %v19662_v22 }
 0x75f   :  { %11004 = vmatprep.subr.bf16.mxu0 %v17874_v59  ;;  %v17922_v34 = vld [vmem:[#allocation5 + $0x514] ss:$24 sps:$4 sm:$0xff]   ;;  %v17925_v42 = vld [vmem:[#allocation5 + $0x510] ss:$24 sps:$4 sm:$0xff]   ;;  %v17926_v13 = vld [vmem:[#allocation5 + $0x1e4] ss:$24 sps:$4 sm:$0xff]  }
 0x760   :  { %v17928_v24 = vld [vmem:[#allocation5 + $0x4e4] ss:$24 sps:$4 sm:$0xff]   ;;  %v17930_v54 = vld [vmem:[#allocation5 + $0x1e0] ss:$24 sps:$4 sm:$0xff]   ;;  %v17932_v5 = vld [vmem:[#allocation5 + $0x1b4] ss:$24 sps:$4 sm:$0xff]  }
 0x761   :  { %10964 = vmatpush1.bf16.msra.mxu1 %v17876_v44  ;;  %v17931_v20 = vld [vmem:[#allocation5 + $0x4e0] ss:$24 sps:$4 sm:$0xff]   ;;  %v17934_v36 = vld [vmem:[#allocation5 + $0x4b4] ss:$24 sps:$4 sm:$0xff]   ;;  %v17936_v33 = vld [vmem:[#allocation5 + $0x1b0] ss:$24 sps:$4 sm:$0xff]  }
 0x762   :  { %11005 = vmatpush1.bf16.msra.mxu0 %v17877_v52  ;;  %10965 = vmatprep.subr.bf16.mxu1 %v17878_v0  ;;  %v17937_v7 = vld [vmem:[#allocation5 + $0x4b0] ss:$24 sps:$4 sm:$0xff]   ;;  %v17938_v60 = vld [vmem:[#allocation5 + $0x184] ss:$24 sps:$4 sm:$0xff]   ;;  %v17942_v26 = vld [vmem:[#allocation5 + $0x180] ss:$24 sps:$4 sm:$0xff]   ;;  %v19721_v52 = vpack.c.bf16 %v19688_v58, %v19688_v58 }
 0x763   :  { %11006 = vmatprep.subr.bf16.mxu0 %v17880_v10  ;;  %v17940_v15 = vld [vmem:[#allocation5 + $0x484] ss:$24 sps:$4 sm:$0xff]   ;;  %v17943_v21 = vld [vmem:[#allocation5 + $0x480] ss:$24 sps:$4 sm:$0xff]   ;;  %v17946_v49 = vld [vmem:[#allocation5 + $0x754] ss:$24 sps:$4 sm:$0xff]  }
 0x764   :  { %v17949_v62 = vld [vmem:[#allocation5 + $0xa54] ss:$24 sps:$4 sm:$0xff]   ;;  %v17944_v59 = vld [vmem:[#allocation5 + $0x750] ss:$24 sps:$4 sm:$0xff]   ;;  %v17952_v0 = vld [vmem:[#allocation5 + $0x724] ss:$24 sps:$4 sm:$0xff]  }
 0x765   :  { %10966 = vmatpush1.bf16.msra.mxu1 %v17882_v4  ;;  %v17947_v44 = vld [vmem:[#allocation5 + $0xa50] ss:$24 sps:$4 sm:$0xff]   ;;  %v17955_v10 = vld [vmem:[#allocation5 + $0xa24] ss:$24 sps:$4 sm:$0xff]   ;;  %v19725_v4 = vpack.c.bf16 %v19699_v2, %v19699_v2  ;;  %v17950_v22 = vld [vmem:[#allocation5 + $0x720] ss:$24 sps:$4 sm:$0xff]  }
 0x766   :  { %11007 = vmatpush1.bf16.msra.mxu0 %v17883_v39  ;;  %10967 = vmatprep.subr.bf16.mxu1 %v17884_v17  ;;  %v17953_v39 = vld [vmem:[#allocation5 + $0xa20] ss:$24 sps:$4 sm:$0xff]   ;;  %v17958_v58 = vld [vmem:[#allocation5 + $0x6f4] ss:$24 sps:$4 sm:$0xff]   ;;  %v17964_v2 = vld [vmem:[#allocation5 + $0x6c4] ss:$24 sps:$4 sm:$0xff]  }
 0x767   :  { %11008 = vmatprep.subr.bf16.mxu0 %v17886_v48  ;;  %v17961_v17 = vld [vmem:[#allocation5 + $0x9f4] ss:$24 sps:$4 sm:$0xff]   ;;  %v17956_v48 = vld [vmem:[#allocation5 + $0x6f0] ss:$24 sps:$4 sm:$0xff]   ;;  %s16485_s21 = sld [smem:[#allocation18 + $0x3]] }
 0x769   :  { %10968 = vmatpush1.bf16.msra.mxu1 %v17888_v51  ;;  %v17959_v51 = vld [vmem:[#allocation5 + $0x9f0] ss:$24 sps:$4 sm:$0xff]  }
 0x76a   :  { %11009 = vmatpush1.bf16.msra.mxu0 %v17889_v6  ;;  %10969 = vmatprep.subr.bf16.mxu1 %v17890_v8  ;;  %v17967_v6 = vld [vmem:[#allocation5 + $0x9c4] ss:$24 sps:$4 sm:$0xff]   ;;  %v17962_v8 = vld [vmem:[#allocation5 + $0x6c0] ss:$24 sps:$4 sm:$0xff]  }
 0x76b   :  { %11010 = vmatprep.subr.bf16.mxu0 %v17892_v38  ;;  %v17965_v38 = vld [vmem:[#allocation5 + $0x9c0] ss:$24 sps:$4 sm:$0xff]  }
 0x76d   :  { %10970 = vmatpush1.bf16.msra.mxu1 %v17894_v55  ;;  %v17970_v55 = vld [vmem:[#allocation5 + $0x694] ss:$24 sps:$4 sm:$0xff]  }
 0x76e   :  { %11011 = vmatpush1.bf16.msra.mxu0 %v17895_v19  ;;  %10971 = vmatprep.subr.bf16.mxu1 %v17896_v12  ;;  %v17973_v19 = vld [vmem:[#allocation5 + $0x994] ss:$24 sps:$4 sm:$0xff]   ;;  %v17968_v12 = vld [vmem:[#allocation5 + $0x690] ss:$24 sps:$4 sm:$0xff]  }
 0x76f   :  { %11012 = vmatprep.subr.bf16.mxu0 %v17898_v3  ;;  %v17971_v3 = vld [vmem:[#allocation5 + $0x990] ss:$24 sps:$4 sm:$0xff]  }
 0x771   :  { %10972 = vmatpush2.bf16.msra.mxu1 %v17900_v14  ;;  %v17976_v14 = vld [vmem:[#allocation5 + $0x664] ss:$24 sps:$4 sm:$0xff]  }
 0x772   :  { %11013 = vmatpush2.bf16.msra.mxu0 %v17901_v37  ;;  %10973 = vmatprep.subr.bf16.mxu1 %v17902_v61  ;;  %v17979_v37 = vld [vmem:[#allocation5 + $0x964] ss:$24 sps:$4 sm:$0xff]   ;;  %v17974_v61 = vld [vmem:[#allocation5 + $0x660] ss:$24 sps:$4 sm:$0xff]  }
 0x773   :  { %11014 = vmatprep.subr.bf16.mxu0 %v17904_v43  ;;  %v17977_v43 = vld [vmem:[#allocation5 + $0x960] ss:$24 sps:$4 sm:$0xff]  }
 0x775   :  { %10974 = vmatpush2.bf16.msra.mxu1 %v17906_v16  ;;  %v17982_v16 = vld [vmem:[#allocation5 + $0x634] ss:$24 sps:$4 sm:$0xff]  }
 0x776   :  { %11015 = vmatpush2.bf16.msra.mxu0 %v17907_v57  ;;  %10975 = vmatprep.subr.bf16.mxu1 %v17908_v18  ;;  %v17985_v57 = vld [vmem:[#allocation5 + $0x934] ss:$24 sps:$4 sm:$0xff]   ;;  %v17980_v18 = vld [vmem:[#allocation5 + $0x630] ss:$24 sps:$4 sm:$0xff]  }
 0x777   :  { %11016 = vmatprep.subr.bf16.mxu0 %v17910_v23  ;;  %v17983_v23 = vld [vmem:[#allocation5 + $0x930] ss:$24 sps:$4 sm:$0xff]  }
 0x779   :  { %10976 = vmatpush2.bf16.msra.mxu1 %v17912_v29  ;;  %v17988_v29 = vld [vmem:[#allocation5 + $0x604] ss:$24 sps:$4 sm:$0xff]  }
 0x77a   :  { %11017 = vmatpush2.bf16.msra.mxu0 %v17913_v31  ;;  %10977 = vmatprep.subr.bf16.mxu1 %v17914_v11  ;;  %v17991_v31 = vld [vmem:[#allocation5 + $0x904] ss:$24 sps:$4 sm:$0xff]   ;;  %v17986_v11 = vld [vmem:[#allocation5 + $0x600] ss:$24 sps:$4 sm:$0xff]  }
 0x77b   :  { %11018 = vmatprep.subr.bf16.mxu0 %v17916_v32  ;;  %v17989_v32 = vld [vmem:[#allocation5 + $0x900] ss:$24 sps:$4 sm:$0xff]  }
 0x77d   :  { %10978 = vmatpush2.bf16.msra.mxu1 %v17918_v45  ;;  %v17994_v45 = vld [vmem:[#allocation5 + $0x8d4] ss:$24 sps:$4 sm:$0xff]  }
 0x77e   :  { %11019 = vmatpush2.bf16.msra.mxu0 %v17919_v46  ;;  %10979 = vmatprep.subr.bf16.mxu1 %v17920_v50  ;;  %v17997_v46 = vld [vmem:[#allocation5 + $0x15c] ss:$24 sps:$4 sm:$0xff]   ;;  %v17992_v50 = vld [vmem:[#allocation5 + $0x8d0] ss:$24 sps:$4 sm:$0xff]  }
 0x77f   :  { %11020 = vmatprep.subr.bf16.mxu0 %v17922_v34  ;;  %v17995_v34 = vld [vmem:[#allocation5 + $0x158] ss:$24 sps:$4 sm:$0xff]  }
 0x781   :  { %10980 = vmatpush2.bf16.msra.mxu1 %v17924_v53  ;;  %v19733_v53 = vpack.c.bf16 %v19703_v41, %v19703_v41  ;;  %v18004_v41 = vld [vmem:[#allocation5 + $0x870] ss:$24 sps:$4 sm:$0xff]  }
 0x782   :  { %11021 = vmatpush2.bf16.msra.mxu0 %v17925_v42  ;;  %10981 = vmatprep.subr.bf16.mxu1 %v17926_v13  ;;  %v18000_v42 = vld [vmem:[#allocation5 + $0x8a4] ss:$24 sps:$4 sm:$0xff]  }
 0x783   :  { %11022 = vmatprep.subr.bf16.mxu0 %v17928_v24  ;;  %v18003_v13 = vld [vmem:[#allocation5 + $0x12c] ss:$24 sps:$4 sm:$0xff]   ;;  %v17998_v24 = vld [vmem:[#allocation5 + $0x8a0] ss:$24 sps:$4 sm:$0xff]  }
 0x785   :  { %10982 = vmatpush2.bf16.msra.mxu1 %v17930_v54  ;;  %v18001_v54 = vld [vmem:[#allocation5 + $0x128] ss:$24 sps:$4 sm:$0xff]  }
 0x786   :  { %11023 = vmatpush2.bf16.msra.mxu0 %v17931_v20  ;;  %10983 = vmatprep.subr.bf16.mxu1 %v17932_v5  ;;  %v18006_v20 = vld [vmem:[#allocation5 + $0x874] ss:$24 sps:$4 sm:$0xff]  }
 0x787   :  { %11024 = vmatprep.subr.bf16.mxu0 %v17934_v36  ;;  %v18009_v5 = vld [vmem:[#allocation5 + $0xfc] ss:$24 sps:$4 sm:$0xff]   ;;  %v18007_v36 = vld [vmem:[#allocation5 + $0xf8] ss:$24 sps:$4 sm:$0xff]  }
 0x789   :  { %10984 = vmatpush2.bf16.msra.mxu1 %v17936_v33  ;;  %v18012_v33 = vld [vmem:[#allocation5 + $0x844] ss:$24 sps:$4 sm:$0xff]  }
 0x78a   :  { %11025 = vmatpush2.bf16.msra.mxu0 %v17937_v7  ;;  %10985 = vmatprep.subr.bf16.mxu1 %v17938_v60  ;;  %v18015_v7 = vld [vmem:[#allocation5 + $0xcc] ss:$24 sps:$4 sm:$0xff]   ;;  %v18010_v60 = vld [vmem:[#allocation5 + $0x840] ss:$24 sps:$4 sm:$0xff]  }
 0x78b   :  { %11026 = vmatprep.subr.bf16.mxu0 %v17940_v15  ;;  %v18013_v15 = vld [vmem:[#allocation5 + $0xc8] ss:$24 sps:$4 sm:$0xff]  }
 0x78d   :  { %10986 = vmatpush2.bf16.msra.mxu1 %v17942_v26  ;;  %v18018_v26 = vld [vmem:[#allocation5 + $0x814] ss:$24 sps:$4 sm:$0xff]  }
 0x78e   :  { %11027 = vmatpush2.bf16.msra.mxu0 %v17943_v21  ;;  %11037 = vmatprep.subr.bf16.mxu1 %v17946_v49  ;;  %v18021_v21 = vld [vmem:[#allocation5 + $0x9c] ss:$24 sps:$4 sm:$0xff]   ;;  %v18016_v49 = vld [vmem:[#allocation5 + $0x810] ss:$24 sps:$4 sm:$0xff]  }
 0x78f   :  { %11078 = vmatprep.subr.bf16.mxu0 %v17949_v62  ;;  %v18019_v62 = vld [vmem:[#allocation5 + $0x98] ss:$24 sps:$4 sm:$0xff]  }
 0x790   :  { %10988 = vmatmul.mubr.bf16.vlgmr.msra.gmra.mxu1 %v19717_v63 }
 0x791   :  { %11029 = vmatmul.mubr.bf16.vlgmr.msra.gmra.mxu0 %v19721_v52  ;;  %11038 = vmatpush1.bf16.msra.mxu1 %v17944_v59  ;;  %v18024_v59 = vld [vmem:[#allocation5 + $0x7e4] ss:$24 sps:$4 sm:$0xff]  }
 0x792   :  { %11079 = vmatpush1.bf16.msra.mxu0 %v17947_v44  ;;  %11039 = vmatprep.subr.bf16.mxu1 %v17952_v0  ;;  %v18027_v44 = vld [vmem:[#allocation5 + $0x6c] ss:$24 sps:$4 sm:$0xff]   ;;  %v18022_v0 = vld [vmem:[#allocation5 + $0x7e0] ss:$24 sps:$4 sm:$0xff]  }
 0x793   :  { %11080 = vmatprep.subr.bf16.mxu0 %v17955_v10  ;;  %11110 = vmatprep.mubr.bf16.mxu0 %v19238_v1  ;;  %v18025_v10 = vld [vmem:[#allocation5 + $0x68] ss:$24 sps:$4 sm:$0xff]  }
 0x794   :  { %11069 = vmatprep.mubr.bf16.mxu1 %v19725_v4 }
 0x795   :  { %11040 = vmatpush1.bf16.msra.mxu1 %v17950_v22  ;;  %v18030_v22 = vld [vmem:[#allocation5 + $0x7b4] ss:$24 sps:$4 sm:$0xff]  }
 0x796   :  { %11081 = vmatpush1.bf16.msra.mxu0 %v17953_v39  ;;  %11041 = vmatprep.subr.bf16.mxu1 %v17958_v58  ;;  %v18033_v39 = vld [vmem:[#allocation5 + $0x3c] ss:$24 sps:$4 sm:$0xff]   ;;  %v18028_v58 = vld [vmem:[#allocation5 + $0x7b0] ss:$24 sps:$4 sm:$0xff]  }
 0x797   :  { %11082 = vmatprep.subr.bf16.mxu0 %v17961_v17  ;;  %v18031_v17 = vld [vmem:[#allocation5 + $0x38] ss:$24 sps:$4 sm:$0xff]  }
 0x799   :  { %11042 = vmatpush1.bf16.msra.mxu1 %v17956_v48  ;;  %v18036_v48 = vld [vmem:[#allocation5 + $0x784] ss:$24 sps:$4 sm:$0xff]  }
 0x79a   :  { %11083 = vmatpush1.bf16.msra.mxu0 %v17959_v51  ;;  %11043 = vmatprep.subr.bf16.mxu1 %v17964_v2  ;;  %v18039_v51 = vld [vmem:[#allocation5 + $0xc] ss:$24 sps:$4 sm:$0xff]   ;;  %v18034_v2 = vld [vmem:[#allocation5 + $0x780] ss:$24 sps:$4 sm:$0xff]  }
 0x79b   :  { %11084 = vmatprep.subr.bf16.mxu0 %v17967_v6  ;;  %v18037_v6 = vld [vmem:[#allocation5 + $0x8] ss:$24 sps:$4 sm:$0xff]  }
 0x79d   :  { %11044 = vmatpush1.bf16.msra.mxu1 %v17962_v8  ;;  %v18042_v8 = vld [vmem:[#allocation5 + $0x2dc] ss:$24 sps:$4 sm:$0xff]  }
 0x79e   :  { %11085 = vmatpush1.bf16.msra.mxu0 %v17965_v38  ;;  %11045 = vmatprep.subr.bf16.mxu1 %v17970_v55  ;;  %v18045_v38 = vld [vmem:[#allocation5 + $0x45c] ss:$24 sps:$4 sm:$0xff]   ;;  %v19739_v55 = vpack.c.bf16 %v19696_v9, %v19696_v9  ;;  %v18052_v9 = vld [vmem:[#allocation5 + $0x278] ss:$24 sps:$4 sm:$0xff]  }
 0x79f   :  { %11086 = vmatprep.subr.bf16.mxu0 %v17973_v19  ;;  %v18040_v19 = vld [vmem:[#allocation5 + $0x2d8] ss:$24 sps:$4 sm:$0xff]  }
 0x7a1   :  { %11046 = vmatpush1.bf16.msra.mxu1 %v17968_v12  ;;  %v18043_v12 = vld [vmem:[#allocation5 + $0x458] ss:$24 sps:$4 sm:$0xff]  }
 0x7a2   :  { %11087 = vmatpush1.bf16.msra.mxu0 %v17971_v3  ;;  %11047 = vmatprep.subr.bf16.mxu1 %v17976_v14  ;;  %v18048_v3 = vld [vmem:[#allocation5 + $0x2ac] ss:$24 sps:$4 sm:$0xff]  }
 0x7a3   :  { %11088 = vmatprep.subr.bf16.mxu0 %v17979_v37  ;;  %v18051_v14 = vld [vmem:[#allocation5 + $0x42c] ss:$24 sps:$4 sm:$0xff]   ;;  %v18046_v37 = vld [vmem:[#allocation5 + $0x2a8] ss:$24 sps:$4 sm:$0xff]  }
 0x7a5   :  { %11048 = vmatpush1.bf16.msra.mxu1 %v17974_v61  ;;  %v18049_v61 = vld [vmem:[#allocation5 + $0x428] ss:$24 sps:$4 sm:$0xff]  }
 0x7a6   :  { %11089 = vmatpush1.bf16.msra.mxu0 %v17977_v43  ;;  %11049 = vmatprep.subr.bf16.mxu1 %v17982_v16  ;;  %v18054_v43 = vld [vmem:[#allocation5 + $0x27c] ss:$24 sps:$4 sm:$0xff]  }
 0x7a7   :  { %11090 = vmatprep.subr.bf16.mxu0 %v17985_v57  ;;  %v18057_v16 = vld [vmem:[#allocation5 + $0x3fc] ss:$24 sps:$4 sm:$0xff]   ;;  %v18055_v57 = vld [vmem:[#allocation5 + $0x3f8] ss:$24 sps:$4 sm:$0xff]  }
 0x7a9   :  { %11050 = vmatpush1.bf16.msra.mxu1 %v17980_v18  ;;  %v18060_v18 = vld [vmem:[#allocation5 + $0x24c] ss:$24 sps:$4 sm:$0xff]  }
 0x7aa   :  { %11091 = vmatpush1.bf16.msra.mxu0 %v17983_v23  ;;  %11051 = vmatprep.subr.bf16.mxu1 %v17988_v29  ;;  %v18063_v23 = vld [vmem:[#allocation5 + $0x3cc] ss:$24 sps:$4 sm:$0xff]   ;;  %v18058_v29 = vld [vmem:[#allocation5 + $0x248] ss:$24 sps:$4 sm:$0xff]  }
 0x7ab   :  { %11092 = vmatprep.subr.bf16.mxu0 %v17991_v31  ;;  %v18061_v31 = vld [vmem:[#allocation5 + $0x3c8] ss:$24 sps:$4 sm:$0xff]  }
 0x7ad   :  { %11052 = vmatpush1.bf16.msra.mxu1 %v17986_v11  ;;  %v18066_v11 = vld [vmem:[#allocation5 + $0x21c] ss:$24 sps:$4 sm:$0xff]  }
 0x7ae   :  { %11093 = vmatpush1.bf16.msra.mxu0 %v17989_v32  ;;  %11053 = vmatprep.subr.bf16.mxu1 %v17994_v45  ;;  %v18069_v32 = vld [vmem:[#allocation5 + $0x39c] ss:$24 sps:$4 sm:$0xff]   ;;  %v18064_v45 = vld [vmem:[#allocation5 + $0x218] ss:$24 sps:$4 sm:$0xff]  }
 0x7af   :  { %11119 = vmatprep.subr.bf16.mxu0 %v17997_v46  ;;  %v18067_v46 = vld [vmem:[#allocation5 + $0x398] ss:$24 sps:$4 sm:$0xff]  }
 0x7b1   :  { %11111 = vmatmul.mubr.bf16.vlgmr.msra.gmra.mxu0 %v19733_v53  ;;  %11054 = vmatpush2.bf16.msra.mxu1 %v17992_v50  ;;  %v18072_v50 = vld [vmem:[#allocation5 + $0x1ec] ss:$24 sps:$4 sm:$0xff]  }
 0x7b2   :  { %11120 = vmatpush1.bf16.msra.mxu0 %v17995_v34  ;;  %11055 = vmatprep.subr.bf16.mxu1 %v18000_v42  ;;  %v18075_v34 = vld [vmem:[#allocation5 + $0x36c] ss:$24 sps:$4 sm:$0xff]   ;;  %v18070_v42 = vld [vmem:[#allocation5 + $0x1e8] ss:$24 sps:$4 sm:$0xff]  }
 0x7b3   :  { %11121 = vmatprep.subr.bf16.mxu0 %v18003_v13  ;;  %11151 = vmatprep.mubr.bf16.mxu0 %v19707_v47  ;;  %v18073_v13 = vld [vmem:[#allocation5 + $0x368] ss:$24 sps:$4 sm:$0xff]  }
 0x7b5   :  { %11056 = vmatpush2.bf16.msra.mxu1 %v17998_v24  ;;  %v18078_v24 = vld [vmem:[#allocation5 + $0x1bc] ss:$24 sps:$4 sm:$0xff]  }
 0x7b6   :  { %11122 = vmatpush1.bf16.msra.mxu0 %v18001_v54  ;;  %11057 = vmatprep.subr.bf16.mxu1 %v18006_v20  ;;  %v18081_v54 = vld [vmem:[#allocation5 + $0x33c] ss:$24 sps:$4 sm:$0xff]   ;;  %v18076_v20 = vld [vmem:[#allocation5 + $0x1b8] ss:$24 sps:$4 sm:$0xff]  }
 0x7b7   :  { %11123 = vmatprep.subr.bf16.mxu0 %v18009_v5  ;;  %v18079_v5 = vld [vmem:[#allocation5 + $0x338] ss:$24 sps:$4 sm:$0xff]  }
 0x7b9   :  { %11058 = vmatpush2.bf16.msra.mxu1 %v18004_v41  ;;  %v18084_v41 = vld [vmem:[#allocation5 + $0x18c] ss:$24 sps:$4 sm:$0xff]  }
 0x7ba   :  { %11124 = vmatpush1.bf16.msra.mxu0 %v18007_v36  ;;  %11059 = vmatprep.subr.bf16.mxu1 %v18012_v33  ;;  %v18087_v36 = vld [vmem:[#allocation5 + $0x30c] ss:$24 sps:$4 sm:$0xff]   ;;  %v18082_v33 = vld [vmem:[#allocation5 + $0x188] ss:$24 sps:$4 sm:$0xff]  }
 0x7bb   :  { %11125 = vmatprep.subr.bf16.mxu0 %v18015_v7  ;;  %v18085_v7 = vld [vmem:[#allocation5 + $0x308] ss:$24 sps:$4 sm:$0xff]  }
 0x7bd   :  { %11060 = vmatpush2.bf16.msra.mxu1 %v18010_v60  ;;  %v18090_v60 = vld [vmem:[#allocation5 + $0x5dc] ss:$24 sps:$4 sm:$0xff]  }
 0x7be   :  { %11126 = vmatpush1.bf16.msra.mxu0 %v18013_v15  ;;  %11061 = vmatprep.subr.bf16.mxu1 %v18018_v26  ;;  %v18093_v15 = vld [vmem:[#allocation5 + $0x75c] ss:$24 sps:$4 sm:$0xff]   ;;  %v18088_v26 = vld [vmem:[#allocation5 + $0x5d8] ss:$24 sps:$4 sm:$0xff]  }
 0x7bf   :  { %11127 = vmatprep.subr.bf16.mxu0 %v18021_v21  ;;  %v18091_v21 = vld [vmem:[#allocation5 + $0x758] ss:$24 sps:$4 sm:$0xff]  }
 0x7c1   :  { %11062 = vmatpush2.bf16.msra.mxu1 %v18016_v49  ;;  %v18096_v49 = vld [vmem:[#allocation5 + $0x5ac] ss:$24 sps:$4 sm:$0xff]  }
 0x7c2   :  { %11128 = vmatpush1.bf16.msra.mxu0 %v18019_v62  ;;  %11063 = vmatprep.subr.bf16.mxu1 %v18024_v59  ;;  %v18099_v62 = vld [vmem:[#allocation5 + $0x72c] ss:$24 sps:$4 sm:$0xff]   ;;  %v18094_v59 = vld [vmem:[#allocation5 + $0x5a8] ss:$24 sps:$4 sm:$0xff]  }
 0x7c3   :  { %11129 = vmatprep.subr.bf16.mxu0 %v18027_v44  ;;  %v18097_v44 = vld [vmem:[#allocation5 + $0x728] ss:$24 sps:$4 sm:$0xff]  }
 0x7c5   :  { %11064 = vmatpush2.bf16.msra.mxu1 %v18022_v0  ;;  %v18102_v0 = vld [vmem:[#allocation5 + $0x57c] ss:$24 sps:$4 sm:$0xff]  }
 0x7c6   :  { %11130 = vmatpush1.bf16.msra.mxu0 %v18025_v10  ;;  %11065 = vmatprep.subr.bf16.mxu1 %v18030_v22  ;;  %v18105_v10 = vld [vmem:[#allocation5 + $0x6fc] ss:$24 sps:$4 sm:$0xff]   ;;  %v18100_v22 = vld [vmem:[#allocation5 + $0x578] ss:$24 sps:$4 sm:$0xff]  }
 0x7c7   :  { %11131 = vmatprep.subr.bf16.mxu0 %v18033_v39  ;;  %v18103_v39 = vld [vmem:[#allocation5 + $0x6f8] ss:$24 sps:$4 sm:$0xff]  }
 0x7c9   :  { %11066 = vmatpush2.bf16.msra.mxu1 %v18028_v58  ;;  %v18108_v58 = vld [vmem:[#allocation5 + $0x54c] ss:$24 sps:$4 sm:$0xff]  }
 0x7ca   :  { %11132 = vmatpush1.bf16.msra.mxu0 %v18031_v17  ;;  %11067 = vmatprep.subr.bf16.mxu1 %v18036_v48  ;;  %v18111_v17 = vld [vmem:[#allocation5 + $0x6cc] ss:$24 sps:$4 sm:$0xff]   ;;  %v18106_v48 = vld [vmem:[#allocation5 + $0x548] ss:$24 sps:$4 sm:$0xff]  }
 0x7cb   :  { %11133 = vmatprep.subr.bf16.mxu0 %v18039_v51  ;;  %v18109_v51 = vld [vmem:[#allocation5 + $0x6c8] ss:$24 sps:$4 sm:$0xff]  }
 0x7cd   :  { %11068 = vmatpush2.bf16.msra.mxu1 %v18034_v2  ;;  %v18114_v2 = vld [vmem:[#allocation5 + $0x51c] ss:$24 sps:$4 sm:$0xff]  }
 0x7ce   :  { %11134 = vmatpush1.bf16.msra.mxu0 %v18037_v6  ;;  %11160 = vmatprep.subr.bf16.mxu1 %v18045_v38  ;;  %v18117_v6 = vld [vmem:[#allocation5 + $0x69c] ss:$24 sps:$4 sm:$0xff]   ;;  %v18115_v38 = vld [vmem:[#allocation5 + $0x698] ss:$24 sps:$4 sm:$0xff]  }
 0x7cf   :  { %11135 = vmatprep.subr.bf16.mxu0 %v18042_v8  ;;  %v18112_v8 = vld [vmem:[#allocation5 + $0x518] ss:$24 sps:$4 sm:$0xff]  }
 0x7d0   :  { %11070 = vmatmul.mubr.bf16.vlgmr.msra.gmra.mxu1 %v19739_v55 }
 0x7d1   :  { %11161 = vmatpush1.bf16.msra.mxu1 %v18043_v12  ;;  %11192 = vmatprep.mubr.bf16.mxu1 %v19711_v56  ;;  %v18123_v12 = vld [vmem:[#allocation5 + $0x66c] ss:$24 sps:$4 sm:$0xff]  }
 0x7d2   :  { %11136 = vmatpush2.bf16.msra.mxu0 %v18040_v19  ;;  %11162 = vmatprep.subr.bf16.mxu1 %v18051_v14  ;;  %v18120_v19 = vld [vmem:[#allocation5 + $0x4ec] ss:$24 sps:$4 sm:$0xff]   ;;  %v18121_v14 = vld [vmem:[#allocation5 + $0x668] ss:$24 sps:$4 sm:$0xff]  }
 0x7d3   :  { %11137 = vmatprep.subr.bf16.mxu0 %v18048_v3  ;;  %v18118_v3 = vld [vmem:[#allocation5 + $0x4e8] ss:$24 sps:$4 sm:$0xff]  }
 0x7d5   :  { %11163 = vmatpush1.bf16.msra.mxu1 %v18049_v61  ;;  %v18129_v61 = vld [vmem:[#allocation5 + $0x63c] ss:$24 sps:$4 sm:$0xff]  }
 0x7d6   :  { %11138 = vmatpush2.bf16.msra.mxu0 %v18046_v37  ;;  %11164 = vmatprep.subr.bf16.mxu1 %v18057_v16  ;;  %v18126_v37 = vld [vmem:[#allocation5 + $0x4bc] ss:$24 sps:$4 sm:$0xff]   ;;  %v18127_v16 = vld [vmem:[#allocation5 + $0x638] ss:$24 sps:$4 sm:$0xff]  }
 0x7d7   :  { %11139 = vmatprep.subr.bf16.mxu0 %v18054_v43  ;;  %v18124_v43 = vld [vmem:[#allocation5 + $0x4b8] ss:$24 sps:$4 sm:$0xff]  }
 0x7d9   :  { %11165 = vmatpush1.bf16.msra.mxu1 %v18055_v57  ;;  %v18135_v57 = vld [vmem:[#allocation5 + $0x60c] ss:$24 sps:$4 sm:$0xff]  }
 0x7da   :  { %11140 = vmatpush2.bf16.msra.mxu0 %v18052_v9  ;;  %11166 = vmatprep.subr.bf16.mxu1 %v18063_v23  ;;  %v18132_v9 = vld [vmem:[#allocation5 + $0x48c] ss:$24 sps:$4 sm:$0xff]   ;;  %v18133_v23 = vld [vmem:[#allocation5 + $0x608] ss:$24 sps:$4 sm:$0xff]  }
 0x7db   :  { %11141 = vmatprep.subr.bf16.mxu0 %v18060_v18  ;;  %v18130_v18 = vld [vmem:[#allocation5 + $0x488] ss:$24 sps:$4 sm:$0xff]  }
 0x7dd   :  { %11167 = vmatpush1.bf16.msra.mxu1 %v18061_v31  ;;  %v18141_v31 = vld [vmem:[#allocation5 + $0xa5c] ss:$24 sps:$4 sm:$0xff]  }
 0x7de   :  { %11142 = vmatpush2.bf16.msra.mxu0 %v18058_v29  ;;  %11168 = vmatprep.subr.bf16.mxu1 %v18069_v32  ;;  %v18138_v29 = vld [vmem:[#allocation5 + $0x8dc] ss:$24 sps:$4 sm:$0xff]   ;;  %v18139_v32 = vld [vmem:[#allocation5 + $0xa58] ss:$24 sps:$4 sm:$0xff]  }
 0x7df   :  { %11143 = vmatprep.subr.bf16.mxu0 %v18066_v11  ;;  %v18136_v11 = vld [vmem:[#allocation5 + $0x8d8] ss:$24 sps:$4 sm:$0xff]  }
 0x7e1   :  { %11169 = vmatpush1.bf16.msra.mxu1 %v18067_v46  ;;  %v18147_v46 = vld [vmem:[#allocation5 + $0xa2c] ss:$24 sps:$4 sm:$0xff]  }
 0x7e2   :  { %11144 = vmatpush2.bf16.msra.mxu0 %v18064_v45  ;;  %11170 = vmatprep.subr.bf16.mxu1 %v18075_v34  ;;  %v18144_v45 = vld [vmem:[#allocation5 + $0x8ac] ss:$24 sps:$4 sm:$0xff]   ;;  %v18145_v34 = vld [vmem:[#allocation5 + $0xa28] ss:$24 sps:$4 sm:$0xff]  }
 0x7e3   :  { %11145 = vmatprep.subr.bf16.mxu0 %v18072_v50  ;;  %v18142_v50 = vld [vmem:[#allocation5 + $0x8a8] ss:$24 sps:$4 sm:$0xff]  }
 0x7e5   :  { %11171 = vmatpush1.bf16.msra.mxu1 %v18073_v13  ;;  %v18153_v13 = vld [vmem:[#allocation5 + $0x9fc] ss:$24 sps:$4 sm:$0xff]  }
 0x7e6   :  { %11146 = vmatpush2.bf16.msra.mxu0 %v18070_v42  ;;  %11172 = vmatprep.subr.bf16.mxu1 %v18081_v54  ;;  %v18150_v42 = vld [vmem:[#allocation5 + $0x87c] ss:$24 sps:$4 sm:$0xff]   ;;  %v18151_v54 = vld [vmem:[#allocation5 + $0x9f8] ss:$24 sps:$4 sm:$0xff]  }
 0x7e7   :  { %11147 = vmatprep.subr.bf16.mxu0 %v18078_v24  ;;  %v18148_v24 = vld [vmem:[#allocation5 + $0x878] ss:$24 sps:$4 sm:$0xff]  }
 0x7e9   :  { %11173 = vmatpush1.bf16.msra.mxu1 %v18079_v5  ;;  %v18159_v5 = vld [vmem:[#allocation5 + $0x9cc] ss:$24 sps:$4 sm:$0xff]  }
 0x7ea   :  { %11148 = vmatpush2.bf16.msra.mxu0 %v18076_v20  ;;  %11174 = vmatprep.subr.bf16.mxu1 %v18087_v36  ;;  %v18156_v20 = vld [vmem:[#allocation5 + $0x84c] ss:$24 sps:$4 sm:$0xff]   ;;  %v18157_v36 = vld [vmem:[#allocation5 + $0x9c8] ss:$24 sps:$4 sm:$0xff]  }
 0x7eb   :  { %11149 = vmatprep.subr.bf16.mxu0 %v18084_v41  ;;  %v18154_v41 = vld [vmem:[#allocation5 + $0x848] ss:$24 sps:$4 sm:$0xff]  }
 0x7ed   :  { %11175 = vmatpush1.bf16.msra.mxu1 %v18085_v7  ;;  %v18165_v7 = vld [vmem:[#allocation5 + $0x99c] ss:$24 sps:$4 sm:$0xff]  }
 0x7ee   :  { %11150 = vmatpush2.bf16.msra.mxu0 %v18082_v33  ;;  %11176 = vmatprep.subr.bf16.mxu1 %v18090_v60  ;;  %v18162_v33 = vld [vmem:[#allocation5 + $0x81c] ss:$24 sps:$4 sm:$0xff]   ;;  %v18160_v60 = vld [vmem:[#allocation5 + $0x818] ss:$24 sps:$4 sm:$0xff]  }
 0x7ef   :  { %11201 = vmatprep.subr.bf16.mxu0 %v18093_v15  ;;  %v18163_v15 = vld [vmem:[#allocation5 + $0x998] ss:$24 sps:$4 sm:$0xff]  }
 0x7f1   :  { %11152 = vmatmul.mubr.bf16.vlgmr.msra.gmra.mxu0 %v19717_v63  ;;  %11177 = vmatpush2.bf16.msra.mxu1 %v18088_v26  ;;  %v18168_v26 = vld [vmem:[#allocation5 + $0x7ec] ss:$24 sps:$4 sm:$0xff]  }
 0x7f2   :  { %11202 = vmatpush1.bf16.msra.mxu0 %v18091_v21  ;;  %11178 = vmatprep.subr.bf16.mxu1 %v18096_v49  ;;  %v18171_v21 = vld [vmem:[#allocation5 + $0x96c] ss:$24 sps:$4 sm:$0xff]   ;;  %v18166_v49 = vld [vmem:[#allocation5 + $0x7e8] ss:$24 sps:$4 sm:$0xff]  }
 0x7f3   :  { %11203 = vmatprep.subr.bf16.mxu0 %v18099_v62  ;;  %11233 = vmatprep.mubr.bf16.mxu0 %v19725_v4  ;;  %v18169_v62 = vld [vmem:[#allocation5 + $0x968] ss:$24 sps:$4 sm:$0xff]  }
 0x7f5   :  { %11179 = vmatpush2.bf16.msra.mxu1 %v18094_v59  ;;  %v18174_v59 = vld [vmem:[#allocation5 + $0x7bc] ss:$24 sps:$4 sm:$0xff]  }
 0x7f6   :  { %11204 = vmatpush1.bf16.msra.mxu0 %v18097_v44  ;;  %11180 = vmatprep.subr.bf16.mxu1 %v18102_v0  ;;  %v18177_v44 = vld [vmem:[#allocation5 + $0x93c] ss:$24 sps:$4 sm:$0xff]   ;;  %v18172_v0 = vld [vmem:[#allocation5 + $0x7b8] ss:$24 sps:$4 sm:$0xff]  }
 0x7f7   :  { %11205 = vmatprep.subr.bf16.mxu0 %v18105_v10  ;;  %v18175_v10 = vld [vmem:[#allocation5 + $0x938] ss:$24 sps:$4 sm:$0xff]  }
 0x7f9   :  { %11181 = vmatpush2.bf16.msra.mxu1 %v18100_v22  ;;  %v18180_v22 = vld [vmem:[#allocation5 + $0x78c] ss:$24 sps:$4 sm:$0xff]  }
 0x7fa   :  { %11206 = vmatpush1.bf16.msra.mxu0 %v18103_v39  ;;  %11182 = vmatprep.subr.bf16.mxu1 %v18108_v58  ;;  %v18183_v39 = vld [vmem:[#allocation5 + $0x90c] ss:$24 sps:$4 sm:$0xff]   ;;  %v18178_v58 = vld [vmem:[#allocation5 + $0x788] ss:$24 sps:$4 sm:$0xff]  }
 0x7fb   :  { %11207 = vmatprep.subr.bf16.mxu0 %v18111_v17  ;;  %v18181_v17 = vld [vmem:[#allocation5 + $0x908] ss:$24 sps:$4 sm:$0xff]  }
 0x7fd   :  { %11183 = vmatpush2.bf16.msra.mxu1 %v18106_v48  ;;  %v18186_v48 = vld [vmem:[#allocation5 + $0x164] ss:$24 sps:$4 sm:$0xff]  }
 0x7fe   :  { %11208 = vmatpush1.bf16.msra.mxu0 %v18109_v51  ;;  %11184 = vmatprep.subr.bf16.mxu1 %v18114_v2  ;;  %v18189_v51 = vld [vmem:[#allocation5 + $0x464] ss:$24 sps:$4 sm:$0xff]   ;;  %v18184_v2 = vld [vmem:[#allocation5 + $0x160] ss:$24 sps:$4 sm:$0xff]  }
 0x7ff   :  { %11209 = vmatprep.subr.bf16.mxu0 %v18117_v6  ;;  %v18187_v6 = vld [vmem:[#allocation5 + $0x460] ss:$24 sps:$4 sm:$0xff]  }
 0x801   :  { %11185 = vmatpush2.bf16.msra.mxu1 %v18112_v8  ;;  %v18192_v8 = vld [vmem:[#allocation5 + $0x134] ss:$24 sps:$4 sm:$0xff]  }
 0x802   :  { %11210 = vmatpush1.bf16.msra.mxu0 %v18115_v38  ;;  %11186 = vmatprep.subr.bf16.mxu1 %v18120_v19  ;;  %v18195_v38 = vld [vmem:[#allocation5 + $0x434] ss:$24 sps:$4 sm:$0xff]   ;;  %v18190_v19 = vld [vmem:[#allocation5 + $0x130] ss:$24 sps:$4 sm:$0xff]  }
 0x803   :  { %11211 = vmatprep.subr.bf16.mxu0 %v18123_v12  ;;  %v18193_v12 = vld [vmem:[#allocation5 + $0x430] ss:$24 sps:$4 sm:$0xff]  }
 0x805   :  { %11187 = vmatpush2.bf16.msra.mxu1 %v18118_v3  ;;  %v18198_v3 = vld [vmem:[#allocation5 + $0x104] ss:$24 sps:$4 sm:$0xff]  }
 0x806   :  { %11212 = vmatpush1.bf16.msra.mxu0 %v18121_v14  ;;  %11188 = vmatprep.subr.bf16.mxu1 %v18126_v37  ;;  %v18201_v14 = vld [vmem:[#allocation5 + $0x404] ss:$24 sps:$4 sm:$0xff]   ;;  %v18196_v37 = vld [vmem:[#allocation5 + $0x100] ss:$24 sps:$4 sm:$0xff]  }
 0x807   :  { %11213 = vmatprep.subr.bf16.mxu0 %v18129_v61  ;;  %v18199_v61 = vld [vmem:[#allocation5 + $0x400] ss:$24 sps:$4 sm:$0xff]  }
 0x809   :  { %11189 = vmatpush2.bf16.msra.mxu1 %v18124_v43  ;;  %v18204_v43 = vld [vmem:[#allocation5 + $0xd4] ss:$24 sps:$4 sm:$0xff]  }
 0x80a   :  { %11214 = vmatpush1.bf16.msra.mxu0 %v18127_v16  ;;  %11190 = vmatprep.subr.bf16.mxu1 %v18132_v9  ;;  %v18207_v16 = vld [vmem:[#allocation5 + $0x3d4] ss:$24 sps:$4 sm:$0xff]   ;;  %v18202_v9 = vld [vmem:[#allocation5 + $0xd0] ss:$24 sps:$4 sm:$0xff]  }
 0x80b   :  { %11215 = vmatprep.subr.bf16.mxu0 %v18135_v57  ;;  %v18205_v57 = vld [vmem:[#allocation5 + $0x3d0] ss:$24 sps:$4 sm:$0xff]  }
 0x80d   :  { %11191 = vmatpush2.bf16.msra.mxu1 %v18130_v18  ;;  %v18210_v18 = vld [vmem:[#allocation5 + $0xa4] ss:$24 sps:$4 sm:$0xff]  }
 0x80e   :  { %11216 = vmatpush1.bf16.msra.mxu0 %v18133_v23  ;;  %11242 = vmatprep.subr.bf16.mxu1 %v18141_v31  ;;  %v18213_v23 = vld [vmem:[#allocation5 + $0x3a4] ss:$24 sps:$4 sm:$0xff]   ;;  %v18219_v31 = vld [vmem:[#allocation5 + $0x374] ss:$24 sps:$4 sm:$0xff]  }
 0x80f   :  { %11217 = vmatprep.subr.bf16.mxu0 %v18138_v29  ;;  %v18216_v29 = vld [vmem:[#allocation5 + $0x74] ss:$24 sps:$4 sm:$0xff]  }
 0x810   :  { %11193 = vmatmul.mubr.bf16.vlgmr.msra.gmra.mxu1 %v19721_v52 }
 0x811   :  { %11243 = vmatpush1.bf16.msra.mxu1 %v18139_v32  ;;  %11274 = vmatprep.mubr.bf16.mxu1 %v19238_v1  ;;  %v18217_v32 = vld [vmem:[#allocation5 + $0x370] ss:$24 sps:$4 sm:$0xff]  }
 0x812   :  { %11218 = vmatpush2.bf16.msra.mxu0 %v18136_v11  ;;  %11244 = vmatprep.subr.bf16.mxu1 %v18147_v46  ;;  %v18214_v11 = vld [vmem:[#allocation5 + $0x70] ss:$24 sps:$4 sm:$0xff]   ;;  %v18225_v46 = vld [vmem:[#allocation5 + $0x344] ss:$24 sps:$4 sm:$0xff]  }
 0x813   :  { %11219 = vmatprep.subr.bf16.mxu0 %v18144_v45  ;;  %v18222_v45 = vld [vmem:[#allocation5 + $0x44] ss:$24 sps:$4 sm:$0xff]  }
 0x815   :  { %11245 = vmatpush1.bf16.msra.mxu1 %v18145_v34  ;;  %v18223_v34 = vld [vmem:[#allocation5 + $0x340] ss:$24 sps:$4 sm:$0xff]  }
 0x816   :  { %11220 = vmatpush2.bf16.msra.mxu0 %v18142_v50  ;;  %11246 = vmatprep.subr.bf16.mxu1 %v18153_v13  ;;  %v18220_v50 = vld [vmem:[#allocation5 + $0x40] ss:$24 sps:$4 sm:$0xff]   ;;  %v18231_v13 = vld [vmem:[#allocation5 + $0x314] ss:$24 sps:$4 sm:$0xff]  }
 0x817   :  { %11221 = vmatprep.subr.bf16.mxu0 %v18150_v42  ;;  %v18228_v42 = vld [vmem:[#allocation5 + $0x14] ss:$24 sps:$4 sm:$0xff]  }
 0x819   :  { %11247 = vmatpush1.bf16.msra.mxu1 %v18151_v54  ;;  %v18229_v54 = vld [vmem:[#allocation5 + $0x310] ss:$24 sps:$4 sm:$0xff]  }
 0x81a   :  { %11222 = vmatpush2.bf16.msra.mxu0 %v18148_v24  ;;  %11248 = vmatprep.subr.bf16.mxu1 %v18159_v5  ;;  %v18226_v24 = vld [vmem:[#allocation5 + $0x10] ss:$24 sps:$4 sm:$0xff]   ;;  %v18234_v5 = vld [vmem:[#allocation5 + $0x2e4] ss:$24 sps:$4 sm:$0xff]  }
 0x81b   :  { %11223 = vmatprep.subr.bf16.mxu0 %v18156_v20  ;;  %v19751_v20 = vld [vmem:[#allocation15 + $0x19] sm:$0x3f] }
 0x81d   :  { %11249 = vmatpush1.bf16.msra.mxu1 %v18157_v36  ;;  %v9248_v36 = vrot.slane %v19751_v20, %v19383_v25 }
 0x81e   :  { %11224 = vmatpush2.bf16.msra.mxu0 %v18154_v41  ;;  %11250 = vmatprep.subr.bf16.mxu1 %v18165_v7  ;;  %v18237_v41 = vld [vmem:[#allocation5 + $0x5e4] ss:$24 sps:$4 sm:$0xff]   ;;  %v18235_v7 = vld [vmem:[#allocation5 + $0x5e0] ss:$24 sps:$4 sm:$0xff]  }
 0x81f   :  { %11225 = vmatprep.subr.bf16.mxu0 %v18162_v33  ;;  %v18232_v33 = vld [vmem:[#allocation5 + $0x2e0] ss:$24 sps:$4 sm:$0xff]  }
 0x821   :  { %11251 = vmatpush1.bf16.msra.mxu1 %v18163_v15  ;;  %v18243_v15 = vld [vmem:[#allocation5 + $0x5b4] ss:$24 sps:$4 sm:$0xff]  }
 0x822   :  { %11226 = vmatpush2.bf16.msra.mxu0 %v18160_v60  ;;  %11252 = vmatprep.subr.bf16.mxu1 %v18171_v21  ;;  %v18240_v60 = vld [vmem:[#allocation5 + $0x2b4] ss:$24 sps:$4 sm:$0xff]  }
 0x823   :  { %11227 = vmatprep.subr.bf16.mxu0 %v18168_v26  ;;  %v9252_v26 = vrot.slane %v19751_v20, %v19386_v27 }
 0x825   :  { %11253 = vmatpush1.bf16.msra.mxu1 %v18169_v62 }
 0x826   :  { %11228 = vmatpush2.bf16.msra.mxu0 %v18166_v49  ;;  %11254 = vmatprep.subr.bf16.mxu1 %v18177_v44  ;;  %v18241_v44 = vld [vmem:[#allocation5 + $0x5b0] ss:$24 sps:$4 sm:$0xff]  }
 0x827   :  { %11229 = vmatprep.subr.bf16.mxu0 %v18174_v59  ;;  %v18238_v59 = vld [vmem:[#allocation5 + $0x2b0] ss:$24 sps:$4 sm:$0xff]  }
 0x829   :  { %11255 = vmatpush1.bf16.msra.mxu1 %v18175_v10 }
 0x82a   :  { %11230 = vmatpush2.bf16.msra.mxu0 %v18172_v0  ;;  %11256 = vmatprep.subr.bf16.mxu1 %v18183_v39  ;;  %v18249_v39 = vld [vmem:[#allocation5 + $0x584] ss:$24 sps:$4 sm:$0xff]  }
 0x82b   :  { %11231 = vmatprep.subr.bf16.mxu0 %v18180_v22  ;;  %v18246_v22 = vld [vmem:[#allocation5 + $0x284] ss:$24 sps:$4 sm:$0xff]  }
 0x82d   :  { %11257 = vmatpush1.bf16.msra.mxu1 %v18181_v17 }
 0x82e   :  { %11232 = vmatpush2.bf16.msra.mxu0 %v18178_v58  ;;  %11283 = vmatprep.subr.bf16.mxu1 %v18186_v48 }
 0x82f   :  { %11324 = vmatprep.subr.bf16.mxu0 %v18189_v51 }
 0x830   :  { %11275 = vmatmul.mubr.bf16.vlgmr.msra.gmra.mxu1 %v19733_v53 }
 0x831   :  { %11234 = vmatmul.mubr.bf16.vlgmr.msra.gmra.mxu0 %v19739_v55  ;;  %11284 = vmatpush1.bf16.msra.mxu1 %v18184_v2 }
 0x832   :  { %11325 = vmatpush1.bf16.msra.mxu0 %v18187_v6  ;;  %11285 = vmatprep.subr.bf16.mxu1 %v18192_v8  ;;  %v18244_v6 = vld [vmem:[#allocation5 + $0x280] ss:$24 sps:$4 sm:$0xff]  }
 0x833   :  { %11326 = vmatprep.subr.bf16.mxu0 %v18195_v38  ;;  %11315 = vmatprep.mubr.bf16.mxu1 %v19707_v47  ;;  %v18208_v47 = vld [vmem:[#allocation5 + $0xa0] ss:$24 sps:$4 sm:$0xff]  }
 0x834   :  { %11356 = vmatprep.mubr.bf16.mxu0 %v19711_v56  ;;  %v18211_v56 = vld [vmem:[#allocation5 + $0x3a0] ss:$24 sps:$4 sm:$0xff]  }
 0x835   :  { %11286 = vmatpush1.bf16.msra.mxu1 %v18190_v19  ;;  %v18247_v8 = vld [vmem:[#allocation5 + $0x580] ss:$24 sps:$4 sm:$0xff]   ;;  %v18252_v19 = vld [vmem:[#allocation5 + $0x254] ss:$24 sps:$4 sm:$0xff]  }
 0x836   :  { %11327 = vmatpush1.bf16.msra.mxu0 %v18193_v12  ;;  %11287 = vmatprep.subr.bf16.mxu1 %v18198_v3  ;;  %v18255_v12 = vld [vmem:[#allocation5 + $0x554] ss:$24 sps:$4 sm:$0xff]  }
 0x837   :  { %11328 = vmatprep.subr.bf16.mxu0 %v18201_v14  ;;  %v18250_v14 = vld [vmem:[#allocation5 + $0x250] ss:$24 sps:$4 sm:$0xff]  }
 0x839   :  { %11288 = vmatpush1.bf16.msra.mxu1 %v18196_v37  ;;  %v18253_v37 = vld [vmem:[#allocation5 + $0x550] ss:$24 sps:$4 sm:$0xff]  }
 0x83a   :  { %11329 = vmatpush1.bf16.msra.mxu0 %v18199_v61  ;;  %11289 = vmatprep.subr.bf16.mxu1 %v18204_v43  ;;  %v18258_v61 = vld [vmem:[#allocation5 + $0x224] ss:$24 sps:$4 sm:$0xff]  }
 0x83b   :  { %11330 = vmatprep.subr.bf16.mxu0 %v18207_v16  ;;  %v18261_v43 = vld [vmem:[#allocation5 + $0x524] ss:$24 sps:$4 sm:$0xff]   ;;  %v18256_v16 = vld [vmem:[#allocation5 + $0x220] ss:$24 sps:$4 sm:$0xff]  }
 0x83d   :  { %11290 = vmatpush1.bf16.msra.mxu1 %v18202_v9  ;;  %v18259_v9 = vld [vmem:[#allocation5 + $0x520] ss:$24 sps:$4 sm:$0xff]  }
 0x83e   :  { %11331 = vmatpush1.bf16.msra.mxu0 %v18205_v57  ;;  %11291 = vmatprep.subr.bf16.mxu1 %v18210_v18  ;;  %v18264_v57 = vld [vmem:[#allocation5 + $0x1f4] ss:$24 sps:$4 sm:$0xff]  }
 0x83f   :  { %11332 = vmatprep.subr.bf16.mxu0 %v18213_v23  ;;  %v18267_v18 = vld [vmem:[#allocation5 + $0x4f4] ss:$24 sps:$4 sm:$0xff]   ;;  %v18262_v23 = vld [vmem:[#allocation5 + $0x1f0] ss:$24 sps:$4 sm:$0xff]  }
 0x841   :  { %11292 = vmatpush1.bf16.msra.mxu1 %v18208_v47  ;;  %v18265_v47 = vld [vmem:[#allocation5 + $0x4f0] ss:$24 sps:$4 sm:$0xff]  }
 0x842   :  { %11333 = vmatpush1.bf16.msra.mxu0 %v18211_v56  ;;  %11293 = vmatprep.subr.bf16.mxu1 %v18216_v29  ;;  %v18270_v56 = vld [vmem:[#allocation5 + $0x1c4] ss:$24 sps:$4 sm:$0xff]  }
 0x843   :  { %11334 = vmatprep.subr.bf16.mxu0 %v18219_v31  ;;  %v18273_v29 = vld [vmem:[#allocation5 + $0x4c4] ss:$24 sps:$4 sm:$0xff]   ;;  %v18268_v31 = vld [vmem:[#allocation5 + $0x1c0] ss:$24 sps:$4 sm:$0xff]  }
 0x845   :  { %11294 = vmatpush1.bf16.msra.mxu1 %v18214_v11  ;;  %v18271_v11 = vld [vmem:[#allocation5 + $0x4c0] ss:$24 sps:$4 sm:$0xff]  }
 0x846   :  { %11335 = vmatpush1.bf16.msra.mxu0 %v18217_v32  ;;  %11295 = vmatprep.subr.bf16.mxu1 %v18222_v45  ;;  %v18276_v32 = vld [vmem:[#allocation5 + $0x194] ss:$24 sps:$4 sm:$0xff]  }
 0x847   :  { %11336 = vmatprep.subr.bf16.mxu0 %v18225_v46  ;;  %v18279_v45 = vld [vmem:[#allocation5 + $0x494] ss:$24 sps:$4 sm:$0xff]   ;;  %v18274_v46 = vld [vmem:[#allocation5 + $0x190] ss:$24 sps:$4 sm:$0xff]  }
 0x849   :  { %11296 = vmatpush1.bf16.msra.mxu1 %v18220_v50  ;;  %v18277_v50 = vld [vmem:[#allocation5 + $0x490] ss:$24 sps:$4 sm:$0xff]  }
 0x84a   :  { %11337 = vmatpush1.bf16.msra.mxu0 %v18223_v34  ;;  %11297 = vmatprep.subr.bf16.mxu1 %v18228_v42  ;;  %v18282_v34 = vld [vmem:[#allocation5 + $0x764] ss:$24 sps:$4 sm:$0xff]  }
 0x84b   :  { %11338 = vmatprep.subr.bf16.mxu0 %v18231_v13  ;;  %v18306_v42 = vld [vmem:[#allocation5 + $0xa64] ss:$24 sps:$4 sm:$0xff]   ;;  %v18280_v13 = vld [vmem:[#allocation5 + $0x760] ss:$24 sps:$4 sm:$0xff]  }
 0x84d   :  { %11298 = vmatpush1.bf16.msra.mxu1 %v18226_v24  ;;  %v18304_v24 = vld [vmem:[#allocation5 + $0xa60] ss:$24 sps:$4 sm:$0xff]  }
 0x84e   :  { %11339 = vmatpush1.bf16.msra.mxu0 %v18229_v54  ;;  %11299 = vmatprep.subr.bf16.mxu1 %v18234_v5  ;;  %v18285_v54 = vld [vmem:[#allocation5 + $0x734] ss:$24 sps:$4 sm:$0xff]  }
 0x84f   :  { %11340 = vmatprep.subr.bf16.mxu0 %v18237_v41  ;;  %v18312_v5 = vld [vmem:[#allocation5 + $0xa34] ss:$24 sps:$4 sm:$0xff]  }
 0x850   :  { %v10989_v21 = vpop.f32.mrf.mxu1 }
 0x851   :  { %v11030_v49 = vpop.f32.mrf.mxu0  ;;  %v10990_v62 = vadd.f32 %v10989_v21, %v9248_v36  ;;  %11300 = vmatpush2.bf16.msra.mxu1 %v18232_v33  ;;  %v18283_v36 = vld [vmem:[#allocation5 + $0x730] ss:$24 sps:$4 sm:$0xff]   ;;  %v18291_v21 = vld [vmem:[#allocation5 + $0x6d4] ss:$24 sps:$4 sm:$0xff]  }
 0x852   :  { %11341 = vmatpush2.bf16.msra.mxu0 %v18235_v7  ;;  %v10991_v0 = vpop.f32.mrf.mxu1  ;;  %11301 = vmatprep.subr.bf16.mxu1 %v18240_v60  ;;  %v18310_v33 = vld [vmem:[#allocation5 + $0xa30] ss:$24 sps:$4 sm:$0xff]   ;;  %v18288_v7 = vld [vmem:[#allocation5 + $0x704] ss:$24 sps:$4 sm:$0xff]  }
 0x853   :  { %v11032_v10 = vpop.f32.mrf.mxu0  ;;  %11342 = vmatprep.subr.bf16.mxu0 %v18243_v15  ;;  %v10992_v58 = vadd.f32 %v10991_v0, %v9252_v26  ;;  %v19757_v17 = vadd.f32 %v11030_v49, %v10990_v62  ;;  %v18318_v15 = vld [vmem:[#allocation5 + $0xa04] ss:$24 sps:$4 sm:$0xff]   ;;  %v18324_v62 = vld [vmem:[#allocation5 + $0x9d4] ss:$24 sps:$4 sm:$0xff]  }
 0x854   :  { %v10993_v48 = vpop.f32.mrf.mxu1  ;;  %v18294_v0 = vld [vmem:[#allocation5 + $0x6a4] ss:$24 sps:$4 sm:$0xff]  }
 0x855   :  { %v11034_v51 = vpop.f32.mrf.mxu0  ;;  %v19759_v2 = vadd.f32 %v11032_v10, %v10992_v58  ;;  %11302 = vmatpush2.bf16.msra.mxu1 %v18238_v59  ;;  %v18289_v59 = vld [vmem:[#allocation5 + $0x6d0] ss:$24 sps:$4 sm:$0xff]   ;;  %v18330_v10 = vld [vmem:[#allocation5 + $0x9a4] ss:$24 sps:$4 sm:$0xff]   ;;  %v18336_v58 = vld [vmem:[#allocation5 + $0x974] ss:$24 sps:$4 sm:$0xff]  }
 0x856   :  { %11343 = vmatpush2.bf16.msra.mxu0 %v18241_v44  ;;  %v10994_v38 = vpop.f32.mrf.mxu1  ;;  %11303 = vmatprep.subr.bf16.mxu1 %v18246_v22  ;;  %v18322_v44 = vld [vmem:[#allocation5 + $0x9d0] ss:$24 sps:$4 sm:$0xff]   ;;  %v18328_v22 = vld [vmem:[#allocation5 + $0x9a0] ss:$24 sps:$4 sm:$0xff]  }
 0x857   :  { %11344 = vmatprep.subr.bf16.mxu0 %v18249_v39  ;;  %v11035_v3 = vpop.f32.mrf.mxu0  ;;  %v18297_v39 = vld [vmem:[#allocation5 + $0x674] ss:$24 sps:$4 sm:$0xff]   ;;  %v18295_v48 = vld [vmem:[#allocation5 + $0x670] ss:$24 sps:$4 sm:$0xff]   ;;  %v18298_v38 = vld [vmem:[#allocation5 + $0x640] ss:$24 sps:$4 sm:$0xff]  }
 0x858   :  { %v18334_v51 = vld [vmem:[#allocation5 + $0x970] ss:$24 sps:$4 sm:$0xff]   ;;  %v18348_v3 = vld [vmem:[#allocation5 + $0x914] ss:$24 sps:$4 sm:$0xff]  }
 0x859   :  { %11304 = vmatpush2.bf16.msra.mxu1 %v18244_v6  ;;  %v18300_v6 = vld [vmem:[#allocation5 + $0x644] ss:$24 sps:$4 sm:$0xff]  }
 0x85a   :  { %11345 = vmatpush2.bf16.msra.mxu0 %v18247_v8  ;;  %11305 = vmatprep.subr.bf16.mxu1 %v18252_v19  ;;  %v18342_v8 = vld [vmem:[#allocation5 + $0x944] ss:$24 sps:$4 sm:$0xff]   ;;  %v18340_v19 = vld [vmem:[#allocation5 + $0x940] ss:$24 sps:$4 sm:$0xff]  }
 0x85b   :  { %11346 = vmatprep.subr.bf16.mxu0 %v18255_v12  ;;  %v18303_v12 = vld [vmem:[#allocation5 + $0x614] ss:$24 sps:$4 sm:$0xff]  }
 0x85d   :  { %11306 = vmatpush2.bf16.msra.mxu1 %v18250_v14  ;;  %v18301_v14 = vld [vmem:[#allocation5 + $0x610] ss:$24 sps:$4 sm:$0xff]  }
 0x85e   :  { %11347 = vmatpush2.bf16.msra.mxu0 %v18253_v37  ;;  %11307 = vmatprep.subr.bf16.mxu1 %v18258_v61  ;;  %v18346_v37 = vld [vmem:[#allocation5 + $0x910] ss:$24 sps:$4 sm:$0xff]   ;;  %v18309_v61 = vld [vmem:[#allocation5 + $0x8e4] ss:$24 sps:$4 sm:$0xff]  }
 0x85f   :  { %11348 = vmatprep.subr.bf16.mxu0 %v18261_v43  ;;  %v18307_v43 = vld [vmem:[#allocation5 + $0x8e0] ss:$24 sps:$4 sm:$0xff]  }
 0x861   :  { %11308 = vmatpush2.bf16.msra.mxu1 %v18256_v16  ;;  %v18315_v16 = vld [vmem:[#allocation5 + $0x8b4] ss:$24 sps:$4 sm:$0xff]  }
 0x862   :  { %11349 = vmatpush2.bf16.msra.mxu0 %v18259_v9  ;;  %11309 = vmatprep.subr.bf16.mxu1 %v18264_v57 }
 0x863   :  { %11350 = vmatprep.subr.bf16.mxu0 %v18267_v18  ;;  %v18313_v18 = vld [vmem:[#allocation5 + $0x8b0] ss:$24 sps:$4 sm:$0xff]  }
 0x865   :  { %11310 = vmatpush2.bf16.msra.mxu1 %v18262_v23  ;;  %v19771_v23 = vstv %s16485_s21 }
 0x866   :  { %11351 = vmatpush2.bf16.msra.mxu0 %v18265_v47  ;;  %11311 = vmatprep.subr.bf16.mxu1 %v18270_v56  ;;  %v18321_v56 = vld [vmem:[#allocation5 + $0x884] ss:$24 sps:$4 sm:$0xff]  }
 0x867   :  { %11352 = vmatprep.subr.bf16.mxu0 %v18273_v29 }
 0x869   :  { %11312 = vmatpush2.bf16.msra.mxu1 %v18268_v31 }
 0x86a   :  { %11353 = vmatpush2.bf16.msra.mxu0 %v18271_v11  ;;  %11313 = vmatprep.subr.bf16.mxu1 %v18276_v32 }
 0x86b   :  { %11354 = vmatprep.subr.bf16.mxu0 %v18279_v45 }
 0x86d   :  { %11314 = vmatpush2.bf16.msra.mxu1 %v18274_v46  ;;  %v18327_v46 = vld [vmem:[#allocation5 + $0x854] ss:$24 sps:$4 sm:$0xff]  }
 0x86e   :  { %11355 = vmatpush2.bf16.msra.mxu0 %v18277_v50  ;;  %11365 = vmatprep.subr.bf16.mxu1 %v18282_v34 }
 0x86f   :  { %11406 = vmatprep.subr.bf16.mxu0 %v18306_v42 }
 0x870   :  { %11316 = vmatmul.mubr.bf16.vlgmr.msra.gmra.mxu1 %v19717_v63  ;;  %v18286_v63 = vld [vmem:[#allocation5 + $0x700] ss:$24 sps:$4 sm:$0xff]  }
 0x871   :  { %11357 = vmatmul.mubr.bf16.vlgmr.msra.gmra.mxu0 %v19721_v52  ;;  %v19763_v41 = vpop.f32.mrf.mxu0  ;;  %11366 = vmatpush1.bf16.msra.mxu1 %v18280_v13  ;;  %v18316_v52 = vld [vmem:[#allocation5 + $0xa00] ss:$24 sps:$4 sm:$0xff]   ;;  %v18333_v13 = vld [vmem:[#allocation5 + $0x824] ss:$24 sps:$4 sm:$0xff]  }
 0x872   :  { %11407 = vmatpush1.bf16.msra.mxu0 %v18304_v24  ;;  %11367 = vmatprep.subr.bf16.mxu1 %v18285_v54  ;;  %v18331_v24 = vld [vmem:[#allocation5 + $0x820] ss:$24 sps:$4 sm:$0xff]   ;;  %v18339_v54 = vld [vmem:[#allocation5 + $0x7f4] ss:$24 sps:$4 sm:$0xff]  }
 0x873   :  { %v19765_v60 = vpop.f32.mrf.mxu0  ;;  %11408 = vmatprep.subr.bf16.mxu0 %v18312_v5  ;;  %11438 = vmatprep.mubr.bf16.mxu0 %v19238_v1  ;;  %v18337_v5 = vld [vmem:[#allocation5 + $0x7f0] ss:$24 sps:$4 sm:$0xff]  }
 0x874   :  { %11397 = vmatprep.mubr.bf16.mxu1 %v19725_v4  ;;  %v18292_v4 = vld [vmem:[#allocation5 + $0x6a0] ss:$24 sps:$4 sm:$0xff]  }
 0x875   :  { %v11116_v26 = vpop.f32.mrf.mxu0  ;;  %11368 = vmatpush1.bf16.msra.mxu1 %v18283_v36  ;;  %v18343_v36 = vld [vmem:[#allocation5 + $0x7c0] ss:$24 sps:$4 sm:$0xff]  }
 0x876   :  { %11409 = vmatpush1.bf16.msra.mxu0 %v18310_v33  ;;  %11369 = vmatprep.subr.bf16.mxu1 %v18288_v7  ;;  %v18351_v33 = vld [vmem:[#allocation5 + $0x794] ss:$24 sps:$4 sm:$0xff]   ;;  %v18349_v7 = vld [vmem:[#allocation5 + $0x790] ss:$24 sps:$4 sm:$0xff]  }
 0x877   :  { %v11117_v49 = vpop.f32.mrf.mxu0  ;;  %11410 = vmatprep.subr.bf16.mxu0 %v18318_v15 }
 0x879   :  { %11370 = vmatpush1.bf16.msra.mxu1 %v18286_v63 }
 0x87a   :  { %11411 = vmatpush1.bf16.msra.mxu0 %v18316_v52  ;;  %11371 = vmatprep.subr.bf16.mxu1 %v18291_v21  ;;  %v9256_v52 = vrot.slane %v19751_v20, %v19389_v28  ;;  %v9260_v21 = vrot.slane %v19751_v20, %v19393_v30 }
 0x87b   :  { %11412 = vmatprep.subr.bf16.mxu0 %v18324_v62 }
 0x87d   :  { %11372 = vmatpush1.bf16.msra.mxu1 %v18289_v59 }
 0x87e   :  { %11413 = vmatpush1.bf16.msra.mxu0 %v18322_v44  ;;  %11373 = vmatprep.subr.bf16.mxu1 %v18294_v0 }
 0x87f   :  { %11414 = vmatprep.subr.bf16.mxu0 %v18330_v10 }
 0x881   :  { %11374 = vmatpush1.bf16.msra.mxu1 %v18292_v4 }
 0x882   :  { %11415 = vmatpush1.bf16.msra.mxu0 %v18328_v22  ;;  %11375 = vmatprep.subr.bf16.mxu1 %v18297_v39 }
 0x883   :  { %11416 = vmatprep.subr.bf16.mxu0 %v18336_v58 }
 0x885   :  { %11376 = vmatpush1.bf16.msra.mxu1 %v18295_v48 }
 0x886   :  { %11417 = vmatpush1.bf16.msra.mxu0 %v18334_v51  ;;  %11377 = vmatprep.subr.bf16.mxu1 %v18300_v6 }
 0x887   :  { %11418 = vmatprep.subr.bf16.mxu0 %v18342_v8 }
 0x889   :  { %11378 = vmatpush1.bf16.msra.mxu1 %v18298_v38 }
 0x88a   :  { %11419 = vmatpush1.bf16.msra.mxu0 %v18340_v19  ;;  %11379 = vmatprep.subr.bf16.mxu1 %v18303_v12 }
 0x88b   :  { %11420 = vmatprep.subr.bf16.mxu0 %v18348_v3 }
 0x88d   :  { %11380 = vmatpush1.bf16.msra.mxu1 %v18301_v14 }
 0x88e   :  { %11421 = vmatpush1.bf16.msra.mxu0 %v18346_v37  ;;  %11381 = vmatprep.subr.bf16.mxu1 %v18309_v61 }
 0x890   :  { %v11071_v9 = vpop.f32.mrf.mxu1 }
 0x891   :  { %11439 = vmatmul.mubr.bf16.vlgmr.msra.gmra.mxu0 %v19733_v53  ;;  %v11072_v57 = vadd.f32 %v11071_v9, %v19757_v17  ;;  %11382 = vmatpush2.bf16.msra.mxu1 %v18307_v43  ;;  %v18319_v53 = vld [vmem:[#allocation5 + $0x880] ss:$24 sps:$4 sm:$0xff]  }
 0x892   :  { %v11073_v47 = vpop.f32.mrf.mxu1  ;;  %11383 = vmatprep.subr.bf16.mxu1 %v18315_v16 }
 0x893   :  { %v11113_v29 = vadd.f32 %v19763_v41, %v11072_v57  ;;  %v11074_v31 = vadd.f32 %v11073_v47, %v19759_v2  ;;  %v18325_v2 = vld [vmem:[#allocation5 + $0x850] ss:$24 sps:$4 sm:$0xff]   ;;  %v18345_v41 = vld [vmem:[#allocation5 + $0x7c4] ss:$24 sps:$4 sm:$0xff]  }
 0x894   :  { %v11075_v11 = vpop.f32.mrf.mxu1 }
 0x895   :  { %vm11448_vm10 = vcmp.ge.f32.partialorder %v11113_v29, 0.0  ;;  %v11455_v32 = vmul.f32 %v19771_v23, %v11113_v29  ;;  %v11115_v45 = vadd.f32 %v19765_v60, %v11074_v31  ;;  %11384 = vmatpush2.bf16.msra.mxu1 %v18313_v18 }
 0x896   :  { %v11076_v17 = vpop.f32.mrf.mxu1  ;;  %11385 = vmatprep.subr.bf16.mxu1 %v18321_v56 }
 0x897   :  { %v19777_v50 = vsel %vm11448_vm10, %v11113_v29, %v11455_v32  ;;  %vm11449_vm11 = vcmp.ge.f32.partialorder %v11115_v45, 0.0  ;;  %v11456_v34 = vmul.f32 %v19771_v23, %v11115_v45 }
 0x899   :  { %v19780_v42 = vsel %vm11449_vm11, %v11115_v45, %v11456_v34  ;;  %11386 = vmatpush2.bf16.msra.mxu1 %v18319_v53  ;;  %v9268_v34 = vrot.slane %v19751_v20, %v19404_v40 }
 0x89a   :  { %11387 = vmatprep.subr.bf16.mxu1 %v18327_v46  ;;  %v9264_v46 = vrot.slane %v19751_v20, %v19400_v35 }
 0x89d   :  { %11388 = vmatpush2.bf16.msra.mxu1 %v18325_v2 }
 0x89e   :  { %11389 = vmatprep.subr.bf16.mxu1 %v18333_v13 }
 0x8a1   :  { %11390 = vmatpush2.bf16.msra.mxu1 %v18331_v24 }
 0x8a2   :  { %11391 = vmatprep.subr.bf16.mxu1 %v18339_v54 }
 0x8a5   :  { %11392 = vmatpush2.bf16.msra.mxu1 %v18337_v5 }
 0x8a6   :  { %11393 = vmatprep.subr.bf16.mxu1 %v18345_v41 }
 0x8a9   :  { %11394 = vmatpush2.bf16.msra.mxu1 %v18343_v36 }
 0x8aa   :  { %11395 = vmatprep.subr.bf16.mxu1 %v18351_v33 }
 0x8ad   :  { %11396 = vmatpush2.bf16.msra.mxu1 %v18349_v7 }
 0x8b0   :  { %11398 = vmatmul.mubr.bf16.vlgmr.msra.gmra.mxu1 %v19739_v55 }
 0x8b1   :  { %v11153_v60 = vpop.f32.mrf.mxu0 }
 0x8b2   :  { %v11154_v49 = vadd.f32 %v11153_v60, %v9256_v52 }
 0x8b3   :  { %v11155_v15 = vpop.f32.mrf.mxu0 }
 0x8b4   :  { %v11156_v62 = vadd.f32 %v11155_v15, %v9260_v21 }
 0x8b5   :  { %v11157_v26 = vpop.f32.mrf.mxu0 }
 0x8b7   :  { %v11158_v63 = vpop.f32.mrf.mxu0 }
 0x8d0   :  { %v11194_v59 = vpop.f32.mrf.mxu1 }
 0x8d1   :  { %v11195_v44 = vadd.f32 %v11194_v59, %v11154_v49 }
 0x8d2   :  { %v11196_v0 = vpop.f32.mrf.mxu1 }
 0x8d3   :  { %v11197_v10 = vadd.f32 %v11196_v0, %v11156_v62 }
 0x8d4   :  { %v11198_v4 = vpop.f32.mrf.mxu1 }
 0x8d6   :  { %v11199_v22 = vpop.f32.mrf.mxu1 }
 0x8f0   :  { %v11276_v55 = vpop.f32.mrf.mxu1 }
 0x8f1   :  { %v11235_v39 = vpop.f32.mrf.mxu0 }
 0x8f2   :  { %v11236_v58 = vadd.f32 %v11235_v39, %v11195_v44  ;;  %v11278_v51 = vpop.f32.mrf.mxu1 }
 0x8f3   :  { %v11237_v48 = vpop.f32.mrf.mxu0 }
 0x8f4   :  { %v11277_v6 = vadd.f32 %v11276_v55, %v11236_v58  ;;  %v11238_v8 = vadd.f32 %v11237_v48, %v11197_v10  ;;  %v11280_v38 = vpop.f32.mrf.mxu1 }
 0x8f5   :  { %v11239_v19 = vpop.f32.mrf.mxu0 }
 0x8f6   :  { %vm11450_vm12 = vcmp.ge.f32.partialorder %v11277_v6, 0.0  ;;  %v11457_v12 = vmul.f32 %v19771_v23, %v11277_v6  ;;  %v11279_v3 = vadd.f32 %v11278_v51, %v11238_v8  ;;  %v11281_v14 = vpop.f32.mrf.mxu1 }
 0x8f7   :  { %v11240_v37 = vpop.f32.mrf.mxu0 }
 0x8f8   :  { %v19788_v61 = vsel %vm11450_vm12, %v11277_v6, %v11457_v12  ;;  %vm11451_vm13 = vcmp.ge.f32.partialorder %v11279_v3, 0.0  ;;  %v11458_v43 = vmul.f32 %v19771_v23, %v11279_v3 }
 0x8fa   :  { %v11464_v16 = vsel %vm11451_vm13, %v11279_v3, %v11458_v43 }
 0x930   :  { %v11317_v9 = vpop.f32.mrf.mxu1 }
 0x931   :  { %v11358_v57 = vpop.f32.mrf.mxu0  ;;  %v11318_v2 = vadd.f32 %v11317_v9, %v9264_v46 }
 0x932   :  { %v11319_v18 = vpop.f32.mrf.mxu1 }
 0x933   :  { %v11360_v47 = vpop.f32.mrf.mxu0  ;;  %v11320_v13 = vadd.f32 %v11319_v18, %v9268_v34  ;;  %v11359_v24 = vadd.f32 %v11358_v57, %v11318_v2 }
 0x934   :  { %v11321_v56 = vpop.f32.mrf.mxu1 }
 0x935   :  { %v11362_v29 = vpop.f32.mrf.mxu0  ;;  %v11361_v5 = vadd.f32 %v11360_v47, %v11320_v13 }
 0x936   :  { %v11322_v31 = vpop.f32.mrf.mxu1 }
 0x937   :  { %v11363_v11 = vpop.f32.mrf.mxu0 }
 0x951   :  { %v11440_v32 = vpop.f32.mrf.mxu0 }
 0x953   :  { %v11442_v45 = vpop.f32.mrf.mxu0 }
 0x955   :  { %v11444_v53 = vpop.f32.mrf.mxu0 }
 0x957   :  { %v11445_v17 = vpop.f32.mrf.mxu0 }
 0x970   :  { %v11399_v54 = vpop.f32.mrf.mxu1 }
 0x971   :  { %v11400_v41 = vadd.f32 %v11399_v54, %v11359_v24 }
 0x972   :  { %v11401_v36 = vpop.f32.mrf.mxu1 }
 0x973   :  { %v11441_v33 = vadd.f32 %v11440_v32, %v11400_v41  ;;  %v11402_v7 = vadd.f32 %v11401_v36, %v11361_v5 }
 0x974   :  { %v11403_v60 = vpop.f32.mrf.mxu1 }
 0x975   :  { %vm11452_vm14 = vcmp.ge.f32.partialorder %v11441_v33, 0.0  ;;  %v11459_v15 = vmul.f32 %v19771_v23, %v11441_v33  ;;  %v11443_v26 = vadd.f32 %v11442_v45, %v11402_v7 }
 0x976   :  { %v11404_v63 = vpop.f32.mrf.mxu1 }
 0x977   :  { %v19796_v52 = vsel %vm11452_vm14, %v11441_v33, %v11459_v15  ;;  %vm11453_vm15 = vcmp.ge.f32.partialorder %v11443_v26, 0.0  ;;  %v11460_v35 = vmul.f32 %v19771_v23, %v11443_v26 }
 0x979   :  { %v19799_v40 = vsel %vm11453_vm15, %v11443_v26, %v11460_v35 }
 0x97a   :  { %19208 = dma.done.wait [#allocation14 + $0x4], 24576 }
 0x97b   :  { %19209 = vsyncadd [#allocation14 + $0x4], 4294942720  ;;  %v19803_v20 = vpack.c.bf16 %v19780_v42, %v19780_v42  ;;  %v19805_v21 = vpack.c.bf16 %v11464_v16, %v11464_v16  ;;  %v18352_v49 = vld [vmem:[#allocation6 + $0xe4] ss:$16 sps:$4 sm:$0xff]   ;;  %v18356_v59 = vld [vmem:[#allocation6 + $0xe0] ss:$16 sps:$4 sm:$0xff]  }
 0x97c   :  { %v18354_v62 = vld [vmem:[#allocation6 + $0x2e4] ss:$16 sps:$4 sm:$0xff]   ;;  %12651 = vmatprep.subr.bf16.mxu0 %v18352_v49  ;;  %v18357_v44 = vld [vmem:[#allocation6 + $0x2e0] ss:$16 sps:$4 sm:$0xff]   ;;  %s16678_s22 = sld [smem:[#allocation18 + $0x4]] }
 0x97d   :  { %12683 = vmatprep.mubr.bf16.mxu0 %v19803_v20  ;;  %12724 = vmatprep.mubr.bf16.mxu1 %v19805_v21  ;;  %v18358_v23 = vld [vmem:[#allocation6 + $0xc4] ss:$16 sps:$4 sm:$0xff]   ;;  %v18362_v10 = vld [vmem:[#allocation6 + $0xc0] ss:$16 sps:$4 sm:$0xff]  }
 0x97e   :  { %12692 = vmatprep.subr.bf16.mxu1 %v18354_v62  ;;  %12652 = vmatpush1.bf16.msra.mxu0 %v18356_v59  ;;  %v18360_v0 = vld [vmem:[#allocation6 + $0x2c4] ss:$16 sps:$4 sm:$0xff]   ;;  %v18363_v42 = vld [vmem:[#allocation6 + $0x2c0] ss:$16 sps:$4 sm:$0xff]  }
 0x97f   :  { %12693 = vmatpush1.bf16.msra.mxu1 %v18357_v44  ;;  %12653 = vmatprep.subr.bf16.mxu0 %v18358_v23  ;;  %v18364_v4 = vld [vmem:[#allocation6 + $0xa4] ss:$16 sps:$4 sm:$0xff]   ;;  %v18368_v39 = vld [vmem:[#allocation6 + $0xa0] ss:$16 sps:$4 sm:$0xff]  }
 0x980   :  { %12694 = vmatprep.subr.bf16.mxu1 %v18360_v0  ;;  %v18366_v22 = vld [vmem:[#allocation6 + $0x2a4] ss:$16 sps:$4 sm:$0xff]   ;;  %v18369_v55 = vld [vmem:[#allocation6 + $0x2a0] ss:$16 sps:$4 sm:$0xff]  }
 0x981   :  { %v18370_v58 = vld [vmem:[#allocation6 + $0x84] ss:$16 sps:$4 sm:$0xff]   ;;  %v18374_v51 = vld [vmem:[#allocation6 + $0x80] ss:$16 sps:$4 sm:$0xff]  }
 0x982   :  { %12654 = vmatpush1.bf16.msra.mxu0 %v18362_v10  ;;  %v18372_v48 = vld [vmem:[#allocation6 + $0x284] ss:$16 sps:$4 sm:$0xff]   ;;  %v18375_v6 = vld [vmem:[#allocation6 + $0x280] ss:$16 sps:$4 sm:$0xff]  }
 0x983   :  { %12695 = vmatpush1.bf16.msra.mxu1 %v18363_v42  ;;  %12655 = vmatprep.subr.bf16.mxu0 %v18364_v4  ;;  %v18376_v8 = vld [vmem:[#allocation6 + $0x64] ss:$16 sps:$4 sm:$0xff]   ;;  %v18380_v19 = vld [vmem:[#allocation6 + $0x60] ss:$16 sps:$4 sm:$0xff]  }
 0x984   :  { %12696 = vmatprep.subr.bf16.mxu1 %v18366_v22  ;;  %v18378_v38 = vld [vmem:[#allocation6 + $0x264] ss:$16 sps:$4 sm:$0xff]   ;;  %v18381_v12 = vld [vmem:[#allocation6 + $0x260] ss:$16 sps:$4 sm:$0xff]  }
 0x985   :  { %v18382_v3 = vld [vmem:[#allocation6 + $0x44] ss:$16 sps:$4 sm:$0xff]   ;;  %v18386_v37 = vld [vmem:[#allocation6 + $0x40] ss:$16 sps:$4 sm:$0xff]  }
 0x986   :  { %12656 = vmatpush1.bf16.msra.mxu0 %v18368_v39  ;;  %v18384_v14 = vld [vmem:[#allocation6 + $0x244] ss:$16 sps:$4 sm:$0xff]   ;;  %v18387_v43 = vld [vmem:[#allocation6 + $0x240] ss:$16 sps:$4 sm:$0xff]  }
 0x987   :  { %12697 = vmatpush1.bf16.msra.mxu1 %v18369_v55  ;;  %12657 = vmatprep.subr.bf16.mxu0 %v18370_v58  ;;  %v18388_v16 = vld [vmem:[#allocation6 + $0x24] ss:$16 sps:$4 sm:$0xff]   ;;  %v18392_v57 = vld [vmem:[#allocation6 + $0x20] ss:$16 sps:$4 sm:$0xff]   ;;  %v18453_v58 = vld [vmem:[#allocation6 + $0xec] ss:$16 sps:$4 sm:$0xff]  }
 0x988   :  { %12698 = vmatprep.subr.bf16.mxu1 %v18372_v48  ;;  %v18390_v9 = vld [vmem:[#allocation6 + $0x224] ss:$16 sps:$4 sm:$0xff]   ;;  %v18393_v18 = vld [vmem:[#allocation6 + $0x220] ss:$16 sps:$4 sm:$0xff]   ;;  %v19811_v48 = vpack.c.bf16 %v19777_v50, %v19777_v50 }
 0x989   :  { %v18394_v47 = vld [vmem:[#allocation6 + $0x4] ss:$16 sps:$4 sm:$0xff]   ;;  %v18398_v29 = vld [vmem:[#allocation6] ss:$16 sps:$4 sm:$0xff]  }
 0x98a   :  { %12658 = vmatpush1.bf16.msra.mxu0 %v18374_v51  ;;  %v18396_v56 = vld [vmem:[#allocation6 + $0x204] ss:$16 sps:$4 sm:$0xff]   ;;  %v18399_v31 = vld [vmem:[#allocation6 + $0x200] ss:$16 sps:$4 sm:$0xff]   ;;  %v19815_v51 = vpack.c.bf16 %v19788_v61, %v19788_v61 }
 0x98b   :  { %12699 = vmatpush1.bf16.msra.mxu1 %v18375_v6  ;;  %12659 = vmatprep.subr.bf16.mxu0 %v18376_v8  ;;  %v18400_v11 = vld [vmem:[#allocation6 + $0x1e4] ss:$16 sps:$4 sm:$0xff]   ;;  %v18404_v45 = vld [vmem:[#allocation6 + $0x1e0] ss:$16 sps:$4 sm:$0xff]   ;;  %v18451_v8 = vld [vmem:[#allocation6 + $0xe8] ss:$16 sps:$4 sm:$0xff]  }
 0x98c   :  { %12700 = vmatprep.subr.bf16.mxu1 %v18378_v38  ;;  %v18402_v32 = vld [vmem:[#allocation6 + $0x3e4] ss:$16 sps:$4 sm:$0xff]   ;;  %v18405_v53 = vld [vmem:[#allocation6 + $0x3e0] ss:$16 sps:$4 sm:$0xff]  }
 0x98d   :  { %v18406_v17 = vld [vmem:[#allocation6 + $0x1c4] ss:$16 sps:$4 sm:$0xff]   ;;  %v18410_v34 = vld [vmem:[#allocation6 + $0x1c0] ss:$16 sps:$4 sm:$0xff]  }
 0x98e   :  { %12660 = vmatpush1.bf16.msra.mxu0 %v18380_v19  ;;  %v18408_v46 = vld [vmem:[#allocation6 + $0x3c4] ss:$16 sps:$4 sm:$0xff]   ;;  %v18411_v2 = vld [vmem:[#allocation6 + $0x3c0] ss:$16 sps:$4 sm:$0xff]   ;;  %v18459_v19 = vld [vmem:[#allocation6 + $0xcc] ss:$16 sps:$4 sm:$0xff]  }
 0x98f   :  { %12701 = vmatpush1.bf16.msra.mxu1 %v18381_v12  ;;  %12661 = vmatprep.subr.bf16.mxu0 %v18382_v3  ;;  %v18412_v13 = vld [vmem:[#allocation6 + $0x1a4] ss:$16 sps:$4 sm:$0xff]   ;;  %v18416_v54 = vld [vmem:[#allocation6 + $0x1a0] ss:$16 sps:$4 sm:$0xff]   ;;  %v19819_v12 = vpack.c.bf16 %v19799_v40, %v19799_v40  ;;  %v18457_v3 = vld [vmem:[#allocation6 + $0xc8] ss:$16 sps:$4 sm:$0xff]  }
 0x990   :  { %12702 = vmatprep.subr.bf16.mxu1 %v18384_v14  ;;  %v18414_v24 = vld [vmem:[#allocation6 + $0x3a4] ss:$16 sps:$4 sm:$0xff]   ;;  %v18417_v5 = vld [vmem:[#allocation6 + $0x3a0] ss:$16 sps:$4 sm:$0xff]   ;;  %v18465_v14 = vld [vmem:[#allocation6 + $0xac] ss:$16 sps:$4 sm:$0xff]  }
 0x991   :  { %v18418_v41 = vld [vmem:[#allocation6 + $0x184] ss:$16 sps:$4 sm:$0xff]   ;;  %v18422_v33 = vld [vmem:[#allocation6 + $0x180] ss:$16 sps:$4 sm:$0xff]  }
 0x992   :  { %12662 = vmatpush1.bf16.msra.mxu0 %v18386_v37  ;;  %v18420_v36 = vld [vmem:[#allocation6 + $0x384] ss:$16 sps:$4 sm:$0xff]   ;;  %v18423_v7 = vld [vmem:[#allocation6 + $0x380] ss:$16 sps:$4 sm:$0xff]  }
 0x993   :  { %12703 = vmatpush1.bf16.msra.mxu1 %v18387_v43  ;;  %12663 = vmatprep.subr.bf16.mxu0 %v18388_v16  ;;  %v18424_v60 = vld [vmem:[#allocation6 + $0x164] ss:$16 sps:$4 sm:$0xff]   ;;  %v18428_v26 = vld [vmem:[#allocation6 + $0x160] ss:$16 sps:$4 sm:$0xff]   ;;  %v18463_v43 = vld [vmem:[#allocation6 + $0xa8] ss:$16 sps:$4 sm:$0xff]  }
 0x994   :  { %12704 = vmatprep.subr.bf16.mxu1 %v18390_v9  ;;  %v18426_v15 = vld [vmem:[#allocation6 + $0x364] ss:$16 sps:$4 sm:$0xff]   ;;  %v18429_v63 = vld [vmem:[#allocation6 + $0x360] ss:$16 sps:$4 sm:$0xff]   ;;  %v18471_v16 = vld [vmem:[#allocation6 + $0x8c] ss:$16 sps:$4 sm:$0xff]  }
 0x995   :  { %v18430_v35 = vld [vmem:[#allocation6 + $0x144] ss:$16 sps:$4 sm:$0xff]   ;;  %v18434_v62 = vld [vmem:[#allocation6 + $0x140] ss:$16 sps:$4 sm:$0xff]  }
 0x996   :  { %12664 = vmatpush1.bf16.msra.mxu0 %v18392_v57  ;;  %v18432_v49 = vld [vmem:[#allocation6 + $0x344] ss:$16 sps:$4 sm:$0xff]   ;;  %v18435_v59 = vld [vmem:[#allocation6 + $0x340] ss:$16 sps:$4 sm:$0xff]   ;;  %v18469_v57 = vld [vmem:[#allocation6 + $0x88] ss:$16 sps:$4 sm:$0xff]  }
 0x997   :  { %12705 = vmatpush1.bf16.msra.mxu1 %v18393_v18  ;;  %12665 = vmatprep.subr.bf16.mxu0 %v18394_v47  ;;  %v18436_v44 = vld [vmem:[#allocation6 + $0x124] ss:$16 sps:$4 sm:$0xff]   ;;  %v18440_v0 = vld [vmem:[#allocation6 + $0x120] ss:$16 sps:$4 sm:$0xff]   ;;  %v18477_v47 = vld [vmem:[#allocation6 + $0x6c] ss:$16 sps:$4 sm:$0xff]  }
 0x998   :  { %12706 = vmatprep.subr.bf16.mxu1 %v18396_v56  ;;  %v18438_v23 = vld [vmem:[#allocation6 + $0x324] ss:$16 sps:$4 sm:$0xff]   ;;  %v18441_v10 = vld [vmem:[#allocation6 + $0x320] ss:$16 sps:$4 sm:$0xff]  }
 0x999   :  { %v18442_v42 = vld [vmem:[#allocation6 + $0x104] ss:$16 sps:$4 sm:$0xff]   ;;  %v18446_v22 = vld [vmem:[#allocation6 + $0x100] ss:$16 sps:$4 sm:$0xff]  }
 0x99a   :  { %12666 = vmatpush1.bf16.msra.mxu0 %v18398_v29  ;;  %v18444_v4 = vld [vmem:[#allocation6 + $0x304] ss:$16 sps:$4 sm:$0xff]   ;;  %v18447_v39 = vld [vmem:[#allocation6 + $0x300] ss:$16 sps:$4 sm:$0xff]   ;;  %v18475_v29 = vld [vmem:[#allocation6 + $0x68] ss:$16 sps:$4 sm:$0xff]  }
 0x99b   :  { %12707 = vmatpush1.bf16.msra.mxu1 %v18399_v31  ;;  %12667 = vmatprep.subr.bf16.mxu0 %v18400_v11  ;;  %v18450_v55 = vld [vmem:[#allocation6 + $0x4e4] ss:$16 sps:$4 sm:$0xff]   ;;  %v18448_v6 = vld [vmem:[#allocation6 + $0x4e0] ss:$16 sps:$4 sm:$0xff]   ;;  %v18483_v31 = vld [vmem:[#allocation6 + $0x4c] ss:$16 sps:$4 sm:$0xff]  }
 0x99c   :  { %12708 = vmatprep.subr.bf16.mxu1 %v18402_v32  ;;  %v18456_v38 = vld [vmem:[#allocation6 + $0x4c4] ss:$16 sps:$4 sm:$0xff]   ;;  %v18454_v50 = vld [vmem:[#allocation6 + $0x4c0] ss:$16 sps:$4 sm:$0xff]   ;;  %v18481_v32 = vld [vmem:[#allocation6 + $0x48] ss:$16 sps:$4 sm:$0xff]  }
 0x99d   :  { %v18462_v61 = vld [vmem:[#allocation6 + $0x4a4] ss:$16 sps:$4 sm:$0xff]   ;;  %v18460_v37 = vld [vmem:[#allocation6 + $0x4a0] ss:$16 sps:$4 sm:$0xff]  }
 0x99e   :  { %12668 = vmatpush2.bf16.msra.mxu0 %v18404_v45  ;;  %v18468_v40 = vld [vmem:[#allocation6 + $0x484] ss:$16 sps:$4 sm:$0xff]   ;;  %v18466_v9 = vld [vmem:[#allocation6 + $0x480] ss:$16 sps:$4 sm:$0xff]  }
 0x99f   :  { %12709 = vmatpush2.bf16.msra.mxu1 %v18405_v53  ;;  %12669 = vmatprep.subr.bf16.mxu0 %v18406_v17  ;;  %v18474_v18 = vld [vmem:[#allocation6 + $0x464] ss:$16 sps:$4 sm:$0xff]   ;;  %v18472_v56 = vld [vmem:[#allocation6 + $0x460] ss:$16 sps:$4 sm:$0xff]   ;;  %v18489_v53 = vld [vmem:[#allocation6 + $0x2c] ss:$16 sps:$4 sm:$0xff]  }
 0x9a0   :  { %12710 = vmatprep.subr.bf16.mxu1 %v18408_v46  ;;  %v18478_v11 = vld [vmem:[#allocation6 + $0x440] ss:$16 sps:$4 sm:$0xff]   ;;  %v18486_v45 = vld [vmem:[#allocation6 + $0x424] ss:$16 sps:$4 sm:$0xff]   ;;  %v18487_v46 = vld [vmem:[#allocation6 + $0x28] ss:$16 sps:$4 sm:$0xff]  }
 0x9a1   :  { %v18484_v17 = vld [vmem:[#allocation6 + $0x420] ss:$16 sps:$4 sm:$0xff]  }
 0x9a2   :  { %12670 = vmatpush2.bf16.msra.mxu0 %v18410_v34  ;;  %v18492_v34 = vld [vmem:[#allocation6 + $0x404] ss:$16 sps:$4 sm:$0xff]  }
 0x9a3   :  { %12711 = vmatpush2.bf16.msra.mxu1 %v18411_v2  ;;  %12671 = vmatprep.subr.bf16.mxu0 %v18412_v13  ;;  %v18495_v2 = vld [vmem:[#allocation6 + $0xc] ss:$16 sps:$4 sm:$0xff]   ;;  %v18490_v13 = vld [vmem:[#allocation6 + $0x400] ss:$16 sps:$4 sm:$0xff]  }
 0x9a4   :  { %12712 = vmatprep.subr.bf16.mxu1 %v18414_v24  ;;  %v18493_v24 = vld [vmem:[#allocation6 + $0x8] ss:$16 sps:$4 sm:$0xff]  }
 0x9a6   :  { %12672 = vmatpush2.bf16.msra.mxu0 %v18416_v54  ;;  %v18498_v54 = vld [vmem:[#allocation6 + $0x5e4] ss:$16 sps:$4 sm:$0xff]  }
 0x9a7   :  { %12713 = vmatpush2.bf16.msra.mxu1 %v18417_v5  ;;  %12673 = vmatprep.subr.bf16.mxu0 %v18418_v41  ;;  %v18501_v5 = vld [vmem:[#allocation6 + $0x1ec] ss:$16 sps:$4 sm:$0xff]   ;;  %v18496_v41 = vld [vmem:[#allocation6 + $0x5e0] ss:$16 sps:$4 sm:$0xff]  }
 0x9a8   :  { %12714 = vmatprep.subr.bf16.mxu1 %v18420_v36  ;;  %v18499_v36 = vld [vmem:[#allocation6 + $0x1e8] ss:$16 sps:$4 sm:$0xff]  }
 0x9aa   :  { %12674 = vmatpush2.bf16.msra.mxu0 %v18422_v33  ;;  %v18504_v33 = vld [vmem:[#allocation6 + $0x5c4] ss:$16 sps:$4 sm:$0xff]  }
 0x9ab   :  { %12715 = vmatpush2.bf16.msra.mxu1 %v18423_v7  ;;  %12675 = vmatprep.subr.bf16.mxu0 %v18424_v60  ;;  %v18507_v7 = vld [vmem:[#allocation6 + $0x1cc] ss:$16 sps:$4 sm:$0xff]   ;;  %v18502_v60 = vld [vmem:[#allocation6 + $0x5c0] ss:$16 sps:$4 sm:$0xff]  }
 0x9ac   :  { %12716 = vmatprep.subr.bf16.mxu1 %v18426_v15  ;;  %v18505_v15 = vld [vmem:[#allocation6 + $0x1c8] ss:$16 sps:$4 sm:$0xff]  }
 0x9ae   :  { %12676 = vmatpush2.bf16.msra.mxu0 %v18428_v26  ;;  %v18510_v26 = vld [vmem:[#allocation6 + $0x5a4] ss:$16 sps:$4 sm:$0xff]  }
 0x9af   :  { %12717 = vmatpush2.bf16.msra.mxu1 %v18429_v63  ;;  %12677 = vmatprep.subr.bf16.mxu0 %v18430_v35  ;;  %v18513_v63 = vld [vmem:[#allocation6 + $0x1ac] ss:$16 sps:$4 sm:$0xff]   ;;  %v18508_v35 = vld [vmem:[#allocation6 + $0x5a0] ss:$16 sps:$4 sm:$0xff]  }
 0x9b0   :  { %12718 = vmatprep.subr.bf16.mxu1 %v18432_v49  ;;  %v18511_v49 = vld [vmem:[#allocation6 + $0x1a8] ss:$16 sps:$4 sm:$0xff]  }
 0x9b2   :  { %12678 = vmatpush2.bf16.msra.mxu0 %v18434_v62  ;;  %v18516_v62 = vld [vmem:[#allocation6 + $0x584] ss:$16 sps:$4 sm:$0xff]  }
 0x9b3   :  { %12719 = vmatpush2.bf16.msra.mxu1 %v18435_v59  ;;  %12679 = vmatprep.subr.bf16.mxu0 %v18436_v44  ;;  %v18519_v59 = vld [vmem:[#allocation6 + $0x18c] ss:$16 sps:$4 sm:$0xff]   ;;  %v18514_v44 = vld [vmem:[#allocation6 + $0x580] ss:$16 sps:$4 sm:$0xff]  }
 0x9b4   :  { %12720 = vmatprep.subr.bf16.mxu1 %v18438_v23  ;;  %v18517_v23 = vld [vmem:[#allocation6 + $0x188] ss:$16 sps:$4 sm:$0xff]  }
 0x9b6   :  { %12680 = vmatpush2.bf16.msra.mxu0 %v18440_v0  ;;  %v18522_v0 = vld [vmem:[#allocation6 + $0x564] ss:$16 sps:$4 sm:$0xff]  }
 0x9b7   :  { %12721 = vmatpush2.bf16.msra.mxu1 %v18441_v10  ;;  %12681 = vmatprep.subr.bf16.mxu0 %v18442_v42  ;;  %v18525_v10 = vld [vmem:[#allocation6 + $0x16c] ss:$16 sps:$4 sm:$0xff]   ;;  %v18520_v42 = vld [vmem:[#allocation6 + $0x560] ss:$16 sps:$4 sm:$0xff]  }
 0x9b8   :  { %12722 = vmatprep.subr.bf16.mxu1 %v18444_v4  ;;  %v18523_v4 = vld [vmem:[#allocation6 + $0x168] ss:$16 sps:$4 sm:$0xff]  }
 0x9ba   :  { %12682 = vmatpush2.bf16.msra.mxu0 %v18446_v22  ;;  %v18528_v22 = vld [vmem:[#allocation6 + $0x544] ss:$16 sps:$4 sm:$0xff]  }
 0x9bb   :  { %12723 = vmatpush2.bf16.msra.mxu1 %v18447_v39  ;;  %12733 = vmatprep.subr.bf16.mxu0 %v18450_v55  ;;  %v18531_v39 = vld [vmem:[#allocation6 + $0x14c] ss:$16 sps:$4 sm:$0xff]   ;;  %v18526_v55 = vld [vmem:[#allocation6 + $0x540] ss:$16 sps:$4 sm:$0xff]  }
 0x9bc   :  { %12774 = vmatprep.subr.bf16.mxu1 %v18453_v58  ;;  %v18529_v58 = vld [vmem:[#allocation6 + $0x148] ss:$16 sps:$4 sm:$0xff]  }
 0x9bd   :  { %12684 = vmatmul.mubr.bf16.vlgmr.msra.gmra.mxu0 %v19811_v48 }
 0x9be   :  { %12725 = vmatmul.mubr.bf16.vlgmr.msra.gmra.mxu1 %v19815_v51  ;;  %12734 = vmatpush1.bf16.msra.mxu0 %v18448_v6  ;;  %v18534_v6 = vld [vmem:[#allocation6 + $0x524] ss:$16 sps:$4 sm:$0xff]  }
 0x9bf   :  { %12775 = vmatpush1.bf16.msra.mxu1 %v18451_v8  ;;  %12735 = vmatprep.subr.bf16.mxu0 %v18456_v38  ;;  %v18537_v8 = vld [vmem:[#allocation6 + $0x12c] ss:$16 sps:$4 sm:$0xff]   ;;  %v18532_v38 = vld [vmem:[#allocation6 + $0x520] ss:$16 sps:$4 sm:$0xff]  }
 0x9c0   :  { %12776 = vmatprep.subr.bf16.mxu1 %v18459_v19  ;;  %12765 = vmatprep.mubr.bf16.mxu0 %v19819_v12  ;;  %v18535_v19 = vld [vmem:[#allocation6 + $0x128] ss:$16 sps:$4 sm:$0xff]  }
 0x9c1   :  { %12806 = vmatprep.mubr.bf16.mxu1 %v19803_v20  ;;  %v18480_v20 = vld [vmem:[#allocation6 + $0x444] ss:$16 sps:$4 sm:$0xff]  }
 0x9c2   :  { %12736 = vmatpush1.bf16.msra.mxu0 %v18454_v50  ;;  %v18540_v50 = vld [vmem:[#allocation6 + $0x504] ss:$16 sps:$4 sm:$0xff]  }
 0x9c3   :  { %12777 = vmatpush1.bf16.msra.mxu1 %v18457_v3  ;;  %12737 = vmatprep.subr.bf16.mxu0 %v18462_v61  ;;  %v18543_v3 = vld [vmem:[#allocation6 + $0x10c] ss:$16 sps:$4 sm:$0xff]   ;;  %v18538_v61 = vld [vmem:[#allocation6 + $0x500] ss:$16 sps:$4 sm:$0xff]  }
 0x9c4   :  { %12778 = vmatprep.subr.bf16.mxu1 %v18465_v14  ;;  %v18541_v14 = vld [vmem:[#allocation6 + $0x108] ss:$16 sps:$4 sm:$0xff]  }
 0x9c6   :  { %12738 = vmatpush1.bf16.msra.mxu0 %v18460_v37  ;;  %v18546_v37 = vld [vmem:[#allocation6 + $0x2ec] ss:$16 sps:$4 sm:$0xff]  }
 0x9c7   :  { %12779 = vmatpush1.bf16.msra.mxu1 %v18463_v43  ;;  %12739 = vmatprep.subr.bf16.mxu0 %v18468_v40  ;;  %v18549_v43 = vld [vmem:[#allocation6 + $0x4ec] ss:$16 sps:$4 sm:$0xff]   ;;  %v19827_v40 = vpack.c.bf16 %v19796_v52, %v19796_v52 }
 0x9c8   :  { %12780 = vmatprep.subr.bf16.mxu1 %v18471_v16  ;;  %v18544_v16 = vld [vmem:[#allocation6 + $0x2e8] ss:$16 sps:$4 sm:$0xff]   ;;  %v18558_v52 = vld [vmem:[#allocation6 + $0x2ac] ss:$16 sps:$4 sm:$0xff]  }
 0x9ca   :  { %12740 = vmatpush1.bf16.msra.mxu0 %v18466_v9  ;;  %v18547_v9 = vld [vmem:[#allocation6 + $0x4e8] ss:$16 sps:$4 sm:$0xff]  }
 0x9cb   :  { %12781 = vmatpush1.bf16.msra.mxu1 %v18469_v57  ;;  %12741 = vmatprep.subr.bf16.mxu0 %v18474_v18  ;;  %v18552_v57 = vld [vmem:[#allocation6 + $0x2cc] ss:$16 sps:$4 sm:$0xff]  }
 0x9cc   :  { %12782 = vmatprep.subr.bf16.mxu1 %v18477_v47  ;;  %v18555_v18 = vld [vmem:[#allocation6 + $0x4cc] ss:$16 sps:$4 sm:$0xff]   ;;  %v18550_v47 = vld [vmem:[#allocation6 + $0x2c8] ss:$16 sps:$4 sm:$0xff]  }
 0x9ce   :  { %12742 = vmatpush1.bf16.msra.mxu0 %v18472_v56  ;;  %v18553_v56 = vld [vmem:[#allocation6 + $0x4c8] ss:$16 sps:$4 sm:$0xff]  }
 0x9cf   :  { %12783 = vmatpush1.bf16.msra.mxu1 %v18475_v29  ;;  %12743 = vmatprep.subr.bf16.mxu0 %v18480_v20  ;;  %v18561_v29 = vld [vmem:[#allocation6 + $0x4ac] ss:$16 sps:$4 sm:$0xff]   ;;  %v18556_v20 = vld [vmem:[#allocation6 + $0x2a8] ss:$16 sps:$4 sm:$0xff]  }
 0x9d0   :  { %12784 = vmatprep.subr.bf16.mxu1 %v18483_v31  ;;  %v18559_v31 = vld [vmem:[#allocation6 + $0x4a8] ss:$16 sps:$4 sm:$0xff]  }
 0x9d2   :  { %12744 = vmatpush1.bf16.msra.mxu0 %v18478_v11  ;;  %v18564_v11 = vld [vmem:[#allocation6 + $0x28c] ss:$16 sps:$4 sm:$0xff]  }
 0x9d3   :  { %12785 = vmatpush1.bf16.msra.mxu1 %v18481_v32  ;;  %12745 = vmatprep.subr.bf16.mxu0 %v18486_v45  ;;  %v18562_v32 = vld [vmem:[#allocation6 + $0x288] ss:$16 sps:$4 sm:$0xff]  }
 0x9d4   :  { %12786 = vmatprep.subr.bf16.mxu1 %v18489_v53  ;;  %v18565_v45 = vld [vmem:[#allocation6 + $0x488] ss:$16 sps:$4 sm:$0xff]   ;;  %v18570_v53 = vld [vmem:[#allocation6 + $0x26c] ss:$16 sps:$4 sm:$0xff]  }
 0x9d6   :  { %12746 = vmatpush1.bf16.msra.mxu0 %v18484_v17  ;;  %v18573_v17 = vld [vmem:[#allocation6 + $0x46c] ss:$16 sps:$4 sm:$0xff]  }
 0x9d7   :  { %12787 = vmatpush1.bf16.msra.mxu1 %v18487_v46  ;;  %12747 = vmatprep.subr.bf16.mxu0 %v18492_v34  ;;  %v18576_v46 = vld [vmem:[#allocation6 + $0x24c] ss:$16 sps:$4 sm:$0xff]  }
 0x9d8   :  { %12788 = vmatprep.subr.bf16.mxu1 %v18495_v2  ;;  %v18579_v34 = vld [vmem:[#allocation6 + $0x44c] ss:$16 sps:$4 sm:$0xff]   ;;  %v18574_v2 = vld [vmem:[#allocation6 + $0x248] ss:$16 sps:$4 sm:$0xff]  }
 0x9da   :  { %12748 = vmatpush1.bf16.msra.mxu0 %v18490_v13  ;;  %v18577_v13 = vld [vmem:[#allocation6 + $0x448] ss:$16 sps:$4 sm:$0xff]  }
 0x9db   :  { %12789 = vmatpush1.bf16.msra.mxu1 %v18493_v24  ;;  %12749 = vmatprep.subr.bf16.mxu0 %v18498_v54  ;;  %v18582_v24 = vld [vmem:[#allocation6 + $0x22c] ss:$16 sps:$4 sm:$0xff]  }
 0x9dc   :  { %12790 = vmatprep.subr.bf16.mxu1 %v18501_v5  ;;  %v18585_v54 = vld [vmem:[#allocation6 + $0x42c] ss:$16 sps:$4 sm:$0xff]   ;;  %v18580_v5 = vld [vmem:[#allocation6 + $0x228] ss:$16 sps:$4 sm:$0xff]  }
 0x9de   :  { %12750 = vmatpush2.bf16.msra.mxu0 %v18496_v41  ;;  %v18583_v41 = vld [vmem:[#allocation6 + $0x428] ss:$16 sps:$4 sm:$0xff]  }
 0x9df   :  { %12791 = vmatpush2.bf16.msra.mxu1 %v18499_v36  ;;  %12751 = vmatprep.subr.bf16.mxu0 %v18504_v33  ;;  %v18588_v36 = vld [vmem:[#allocation6 + $0x20c] ss:$16 sps:$4 sm:$0xff]  }
 0x9e0   :  { %12792 = vmatprep.subr.bf16.mxu1 %v18507_v7  ;;  %v18591_v33 = vld [vmem:[#allocation6 + $0x40c] ss:$16 sps:$4 sm:$0xff]   ;;  %v18586_v7 = vld [vmem:[#allocation6 + $0x208] ss:$16 sps:$4 sm:$0xff]  }
 0x9e2   :  { %12752 = vmatpush2.bf16.msra.mxu0 %v18502_v60  ;;  %v18589_v60 = vld [vmem:[#allocation6 + $0x408] ss:$16 sps:$4 sm:$0xff]  }
 0x9e3   :  { %12793 = vmatpush2.bf16.msra.mxu1 %v18505_v15  ;;  %12753 = vmatprep.subr.bf16.mxu0 %v18510_v26  ;;  %v18594_v15 = vld [vmem:[#allocation6 + $0x3ec] ss:$16 sps:$4 sm:$0xff]  }
 0x9e4   :  { %12794 = vmatprep.subr.bf16.mxu1 %v18513_v63  ;;  %v18597_v26 = vld [vmem:[#allocation6 + $0x5ec] ss:$16 sps:$4 sm:$0xff]   ;;  %v18592_v63 = vld [vmem:[#allocation6 + $0x3e8] ss:$16 sps:$4 sm:$0xff]  }
 0x9e6   :  { %12754 = vmatpush2.bf16.msra.mxu0 %v18508_v35  ;;  %v18595_v35 = vld [vmem:[#allocation6 + $0x5e8] ss:$16 sps:$4 sm:$0xff]  }
 0x9e7   :  { %12795 = vmatpush2.bf16.msra.mxu1 %v18511_v49  ;;  %12755 = vmatprep.subr.bf16.mxu0 %v18516_v62  ;;  %v18600_v49 = vld [vmem:[#allocation6 + $0x3cc] ss:$16 sps:$4 sm:$0xff]  }
 0x9e8   :  { %12796 = vmatprep.subr.bf16.mxu1 %v18519_v59  ;;  %v18603_v62 = vld [vmem:[#allocation6 + $0x5cc] ss:$16 sps:$4 sm:$0xff]   ;;  %v18598_v59 = vld [vmem:[#allocation6 + $0x3c8] ss:$16 sps:$4 sm:$0xff]  }
 0x9ea   :  { %12756 = vmatpush2.bf16.msra.mxu0 %v18514_v44  ;;  %v18601_v44 = vld [vmem:[#allocation6 + $0x5c8] ss:$16 sps:$4 sm:$0xff]  }
 0x9eb   :  { %12797 = vmatpush2.bf16.msra.mxu1 %v18517_v23  ;;  %12757 = vmatprep.subr.bf16.mxu0 %v18522_v0  ;;  %v18606_v23 = vld [vmem:[#allocation6 + $0x3ac] ss:$16 sps:$4 sm:$0xff]  }
 0x9ec   :  { %12798 = vmatprep.subr.bf16.mxu1 %v18525_v10  ;;  %v18609_v0 = vld [vmem:[#allocation6 + $0x5ac] ss:$16 sps:$4 sm:$0xff]   ;;  %v18604_v10 = vld [vmem:[#allocation6 + $0x3a8] ss:$16 sps:$4 sm:$0xff]  }
 0x9ee   :  { %12758 = vmatpush2.bf16.msra.mxu0 %v18520_v42  ;;  %v18607_v42 = vld [vmem:[#allocation6 + $0x5a8] ss:$16 sps:$4 sm:$0xff]  }
 0x9ef   :  { %12799 = vmatpush2.bf16.msra.mxu1 %v18523_v4  ;;  %12759 = vmatprep.subr.bf16.mxu0 %v18528_v22  ;;  %v18612_v4 = vld [vmem:[#allocation6 + $0x38c] ss:$16 sps:$4 sm:$0xff]  }
 0x9f0   :  { %12800 = vmatprep.subr.bf16.mxu1 %v18531_v39  ;;  %v18615_v22 = vld [vmem:[#allocation6 + $0x58c] ss:$16 sps:$4 sm:$0xff]   ;;  %v18610_v39 = vld [vmem:[#allocation6 + $0x388] ss:$16 sps:$4 sm:$0xff]  }
 0x9f2   :  { %12760 = vmatpush2.bf16.msra.mxu0 %v18526_v55  ;;  %v18613_v55 = vld [vmem:[#allocation6 + $0x588] ss:$16 sps:$4 sm:$0xff]  }
 0x9f3   :  { %12801 = vmatpush2.bf16.msra.mxu1 %v18529_v58  ;;  %12761 = vmatprep.subr.bf16.mxu0 %v18534_v6  ;;  %v18618_v58 = vld [vmem:[#allocation6 + $0x36c] ss:$16 sps:$4 sm:$0xff]  }
 0x9f4   :  { %12802 = vmatprep.subr.bf16.mxu1 %v18537_v8  ;;  %v18621_v6 = vld [vmem:[#allocation6 + $0x56c] ss:$16 sps:$4 sm:$0xff]   ;;  %v18616_v8 = vld [vmem:[#allocation6 + $0x368] ss:$16 sps:$4 sm:$0xff]  }
 0x9f6   :  { %12762 = vmatpush2.bf16.msra.mxu0 %v18532_v38  ;;  %v18619_v38 = vld [vmem:[#allocation6 + $0x568] ss:$16 sps:$4 sm:$0xff]  }
 0x9f7   :  { %12803 = vmatpush2.bf16.msra.mxu1 %v18535_v19  ;;  %12763 = vmatprep.subr.bf16.mxu0 %v18540_v50  ;;  %v18624_v19 = vld [vmem:[#allocation6 + $0x34c] ss:$16 sps:$4 sm:$0xff]  }
 0x9f8   :  { %12804 = vmatprep.subr.bf16.mxu1 %v18543_v3  ;;  %v18627_v50 = vld [vmem:[#allocation6 + $0x54c] ss:$16 sps:$4 sm:$0xff]   ;;  %v18622_v3 = vld [vmem:[#allocation6 + $0x348] ss:$16 sps:$4 sm:$0xff]  }
 0x9fa   :  { %12764 = vmatpush2.bf16.msra.mxu0 %v18538_v61  ;;  %v18625_v61 = vld [vmem:[#allocation6 + $0x548] ss:$16 sps:$4 sm:$0xff]  }
 0x9fb   :  { %12805 = vmatpush2.bf16.msra.mxu1 %v18541_v14  ;;  %12815 = vmatprep.subr.bf16.mxu0 %v18546_v37  ;;  %v18630_v14 = vld [vmem:[#allocation6 + $0x32c] ss:$16 sps:$4 sm:$0xff]  }
 0x9fc   :  { %12856 = vmatprep.subr.bf16.mxu1 %v18549_v43  ;;  %v18633_v37 = vld [vmem:[#allocation6 + $0x52c] ss:$16 sps:$4 sm:$0xff]   ;;  %v18628_v43 = vld [vmem:[#allocation6 + $0x328] ss:$16 sps:$4 sm:$0xff]  }
 0x9fd   :  { %12766 = vmatmul.mubr.bf16.vlgmr.msra.gmra.mxu0 %v19827_v40 }
 0x9fe   :  { %12807 = vmatmul.mubr.bf16.vlgmr.msra.gmra.mxu1 %v19811_v48  ;;  %12816 = vmatpush1.bf16.msra.mxu0 %v18544_v16  ;;  %v18567_v48 = vld [vmem:[#allocation6 + $0x48c] ss:$16 sps:$4 sm:$0xff]   ;;  %v18631_v16 = vld [vmem:[#allocation6 + $0x528] ss:$16 sps:$4 sm:$0xff]  }
 0x9ff   :  { %12857 = vmatpush1.bf16.msra.mxu1 %v18547_v9  ;;  %12817 = vmatprep.subr.bf16.mxu0 %v18552_v57  ;;  %v18636_v9 = vld [vmem:[#allocation6 + $0x30c] ss:$16 sps:$4 sm:$0xff]  }
 0xa00   :  { %12858 = vmatprep.subr.bf16.mxu1 %v18555_v18  ;;  %12847 = vmatprep.mubr.bf16.mxu0 %v19805_v21  ;;  %v18568_v21 = vld [vmem:[#allocation6 + $0x268] ss:$16 sps:$4 sm:$0xff]   ;;  %v18639_v57 = vld [vmem:[#allocation6 + $0x50c] ss:$16 sps:$4 sm:$0xff]  }
 0xa01   :  { %12888 = vmatprep.mubr.bf16.mxu1 %v19819_v12  ;;  %v18571_v12 = vld [vmem:[#allocation6 + $0x468] ss:$16 sps:$4 sm:$0xff]  }
 0xa02   :  { %12818 = vmatpush1.bf16.msra.mxu0 %v18550_v47  ;;  %v18634_v18 = vld [vmem:[#allocation6 + $0x308] ss:$16 sps:$4 sm:$0xff]  }
 0xa03   :  { %12859 = vmatpush1.bf16.msra.mxu1 %v18553_v56  ;;  %12819 = vmatprep.subr.bf16.mxu0 %v18558_v52  ;;  %v18637_v47 = vld [vmem:[#allocation6 + $0x508] ss:$16 sps:$4 sm:$0xff]   ;;  %v11669_v56 = vld [vmem:[#allocation15 + $0x1f] sm:$0xf] }
 0xa04   :  { %12860 = vmatprep.subr.bf16.mxu1 %v18561_v29  ;;  %v11674_v52 = vrot.slane %v11669_v56, %v19383_v25  ;;  %v11678_v29 = vrot.slane %v11669_v56, %v19386_v27 }
 0xa06   :  { %12820 = vmatpush1.bf16.msra.mxu0 %v18556_v20 }
 0xa07   :  { %12861 = vmatpush1.bf16.msra.mxu1 %v18559_v31  ;;  %12821 = vmatprep.subr.bf16.mxu0 %v18564_v11 }
 0xa08   :  { %12862 = vmatprep.subr.bf16.mxu1 %v18567_v48 }
 0xa0a   :  { %12822 = vmatpush1.bf16.msra.mxu0 %v18562_v32 }
 0xa0b   :  { %12863 = vmatpush1.bf16.msra.mxu1 %v18565_v45  ;;  %12823 = vmatprep.subr.bf16.mxu0 %v18570_v53 }
 0xa0c   :  { %12864 = vmatprep.subr.bf16.mxu1 %v18573_v17 }
 0xa0e   :  { %12824 = vmatpush1.bf16.msra.mxu0 %v18568_v21 }
 0xa0f   :  { %12865 = vmatpush1.bf16.msra.mxu1 %v18571_v12  ;;  %12825 = vmatprep.subr.bf16.mxu0 %v18576_v46 }
 0xa10   :  { %12866 = vmatprep.subr.bf16.mxu1 %v18579_v34 }
 0xa12   :  { %12826 = vmatpush1.bf16.msra.mxu0 %v18574_v2 }
 0xa13   :  { %12867 = vmatpush1.bf16.msra.mxu1 %v18577_v13  ;;  %12827 = vmatprep.subr.bf16.mxu0 %v18582_v24 }
 0xa14   :  { %12868 = vmatprep.subr.bf16.mxu1 %v18585_v54 }
 0xa16   :  { %12828 = vmatpush1.bf16.msra.mxu0 %v18580_v5 }
 0xa17   :  { %12869 = vmatpush1.bf16.msra.mxu1 %v18583_v41  ;;  %12829 = vmatprep.subr.bf16.mxu0 %v18588_v36 }
 0xa18   :  { %12870 = vmatprep.subr.bf16.mxu1 %v18591_v33 }
 0xa1a   :  { %12830 = vmatpush1.bf16.msra.mxu0 %v18586_v7 }
 0xa1b   :  { %12871 = vmatpush1.bf16.msra.mxu1 %v18589_v60  ;;  %12831 = vmatprep.subr.bf16.mxu0 %v18594_v15 }
 0xa1c   :  { %12872 = vmatprep.subr.bf16.mxu1 %v18597_v26 }
 0xa1e   :  { %12832 = vmatpush2.bf16.msra.mxu0 %v18592_v63 }
 0xa1f   :  { %12873 = vmatpush2.bf16.msra.mxu1 %v18595_v35  ;;  %12833 = vmatprep.subr.bf16.mxu0 %v18600_v49  ;;  %v11682_v35 = vrot.slane %v11669_v56, %v19389_v28  ;;  %v11686_v49 = vrot.slane %v11669_v56, %v19393_v30 }
 0xa20   :  { %12874 = vmatprep.subr.bf16.mxu1 %v18603_v62 }
 0xa22   :  { %12834 = vmatpush2.bf16.msra.mxu0 %v18598_v59 }
 0xa23   :  { %12875 = vmatpush2.bf16.msra.mxu1 %v18601_v44  ;;  %12835 = vmatprep.subr.bf16.mxu0 %v18606_v23 }
 0xa24   :  { %12876 = vmatprep.subr.bf16.mxu1 %v18609_v0 }
 0xa26   :  { %12836 = vmatpush2.bf16.msra.mxu0 %v18604_v10 }
 0xa27   :  { %12877 = vmatpush2.bf16.msra.mxu1 %v18607_v42  ;;  %12837 = vmatprep.subr.bf16.mxu0 %v18612_v4 }
 0xa28   :  { %12878 = vmatprep.subr.bf16.mxu1 %v18615_v22 }
 0xa2a   :  { %12838 = vmatpush2.bf16.msra.mxu0 %v18610_v39 }
 0xa2b   :  { %12879 = vmatpush2.bf16.msra.mxu1 %v18613_v55  ;;  %12839 = vmatprep.subr.bf16.mxu0 %v18618_v58 }
 0xa2c   :  { %12880 = vmatprep.subr.bf16.mxu1 %v18621_v6 }
 0xa2e   :  { %12840 = vmatpush2.bf16.msra.mxu0 %v18616_v8 }
 0xa2f   :  { %12881 = vmatpush2.bf16.msra.mxu1 %v18619_v38  ;;  %12841 = vmatprep.subr.bf16.mxu0 %v18624_v19 }
 0xa30   :  { %12882 = vmatprep.subr.bf16.mxu1 %v18627_v50 }
 0xa32   :  { %12842 = vmatpush2.bf16.msra.mxu0 %v18622_v3 }
 0xa33   :  { %12883 = vmatpush2.bf16.msra.mxu1 %v18625_v61  ;;  %12843 = vmatprep.subr.bf16.mxu0 %v18630_v14 }
 0xa34   :  { %12884 = vmatprep.subr.bf16.mxu1 %v18633_v37 }
 0xa36   :  { %12844 = vmatpush2.bf16.msra.mxu0 %v18628_v43 }
 0xa37   :  { %12885 = vmatpush2.bf16.msra.mxu1 %v18631_v16  ;;  %12845 = vmatprep.subr.bf16.mxu0 %v18636_v9 }
 0xa38   :  { %12886 = vmatprep.subr.bf16.mxu1 %v18639_v57 }
 0xa3a   :  { %12846 = vmatpush2.bf16.msra.mxu0 %v18634_v18 }
 0xa3b   :  { %12887 = vmatpush2.bf16.msra.mxu1 %v18637_v47 }
 0xa3d   :  { %12848 = vmatmul.mubr.bf16.vlgmr.msra.gmra.mxu0 %v19815_v51 }
 0xa3e   :  { %12889 = vmatmul.mubr.bf16.vlgmr.msra.gmra.mxu1 %v19827_v40  ;;  %v12902_v40 = vstv %s16678_s22 }
 0xa7d   :  { %v12685_v20 = vpop.f32.mrf.mxu0 }
 0xa7e   :  { %v12726_v31 = vpop.f32.mrf.mxu1  ;;  %v12686_v11 = vadd.f32 %v12685_v20, %v11674_v52 }
 0xa7f   :  { %v12687_v48 = vpop.f32.mrf.mxu0 }
 0xa80   :  { %v12728_v32 = vpop.f32.mrf.mxu1  ;;  %v12727_v45 = vadd.f32 %v12726_v31, %v12686_v11  ;;  %v12688_v53 = vadd.f32 %v12687_v48, %v11678_v29 }
 0xa81   :  { %v12689_v17 = vpop.f32.mrf.mxu0 }
 0xa82   :  { %v12730_v21 = vpop.f32.mrf.mxu1  ;;  %v12729_v12 = vadd.f32 %v12728_v32, %v12688_v53 }
 0xa83   :  { %v12690_v46 = vpop.f32.mrf.mxu0 }
 0xa84   :  { %v12731_v34 = vpop.f32.mrf.mxu1 }
 0xabd   :  { %v12767_v51 = vpop.f32.mrf.mxu0 }
 0xabe   :  { %v12808_v2 = vpop.f32.mrf.mxu1  ;;  %v12768_v13 = vadd.f32 %v12767_v51, %v12727_v45 }
 0xabf   :  { %v12769_v24 = vpop.f32.mrf.mxu0  ;;  %v12809_v62 = vadd.f32 %v12808_v2, %v11682_v35 }
 0xac0   :  { %v12810_v54 = vpop.f32.mrf.mxu1  ;;  %vm12898_vm0 = vcmp.ge.f32.partialorder %v12768_v13, 0.0  ;;  %v12903_v5 = vmul.f32 %v12902_v40, %v12768_v13  ;;  %v12770_v41 = vadd.f32 %v12769_v24, %v12729_v12 }
 0xac1   :  { %v12771_v36 = vpop.f32.mrf.mxu0  ;;  %v12811_v23 = vadd.f32 %v12810_v54, %v11686_v49 }
 0xac2   :  { %v12812_v33 = vpop.f32.mrf.mxu1  ;;  %v19837_v7 = vsel %vm12898_vm0, %v12768_v13, %v12903_v5  ;;  %vm12899_vm1 = vcmp.ge.f32.partialorder %v12770_v41, 0.0  ;;  %v12904_v60 = vmul.f32 %v12902_v40, %v12770_v41 }
 0xac3   :  { %v12772_v15 = vpop.f32.mrf.mxu0 }
 0xac4   :  { %v12813_v26 = vpop.f32.mrf.mxu1  ;;  %v12908_v63 = vsel %vm12899_vm1, %v12770_v41, %v12904_v60 }
 0xafd   :  { %v12849_v59 = vpop.f32.mrf.mxu0 }
 0xafe   :  { %v12890_v44 = vpop.f32.mrf.mxu1  ;;  %v12850_v0 = vadd.f32 %v12849_v59, %v12809_v62 }
 0xaff   :  { %v12851_v10 = vpop.f32.mrf.mxu0 }
 0xb00   :  { %v12892_v42 = vpop.f32.mrf.mxu1  ;;  %v12891_v4 = vadd.f32 %v12890_v44, %v12850_v0  ;;  %v12852_v22 = vadd.f32 %v12851_v10, %v12811_v23 }
 0xb01   :  { %v12853_v39 = vpop.f32.mrf.mxu0 }
 0xb02   :  { %v12894_v55 = vpop.f32.mrf.mxu1  ;;  %vm12900_vm2 = vcmp.ge.f32.partialorder %v12891_v4, 0.0  ;;  %v12905_v58 = vmul.f32 %v12902_v40, %v12891_v4  ;;  %v12893_v6 = vadd.f32 %v12892_v42, %v12852_v22 }
 0xb03   :  { %v12854_v8 = vpop.f32.mrf.mxu0 }
 0xb04   :  { %v12895_v38 = vpop.f32.mrf.mxu1  ;;  %v19841_v19 = vsel %vm12900_vm2, %v12891_v4, %v12905_v58  ;;  %vm12901_vm3 = vcmp.ge.f32.partialorder %v12893_v6, 0.0  ;;  %v12906_v30 = vmul.f32 %v12902_v40, %v12893_v6 }
 0xb06   :  { %v12910_v50 = vsel %vm12901_vm3, %v12893_v6, %v12906_v30 }
 0xb07   :  { %19210 = dma.done.wait [#allocation14 + $0x5], 12288 }
 0xb08   :  { %19211 = vsyncadd [#allocation14 + $0x5], 4294955008  ;;  %v19843_v3 = vpack.c.bf16 %v12908_v63, %v12908_v63  ;;  %v19845_v61 = vpack.c.bf16 %v12910_v50, %v12910_v50  ;;  %v18640_v14 = vld [vmem:[#allocation7 + $0xac] ss:$12 sps:$4 sm:$0xff]   ;;  %v18644_v43 = vld [vmem:[#allocation7 + $0xa8] ss:$12 sps:$4 sm:$0xff]  }
 0xb09   :  { %v18642_v37 = vld [vmem:[#allocation7 + $0x22c] ss:$12 sps:$4 sm:$0xff]   ;;  %13576 = vmatprep.subr.bf16.mxu0 %v18640_v14  ;;  %v18645_v16 = vld [vmem:[#allocation7 + $0x228] ss:$12 sps:$4 sm:$0xff]   ;;  %v18650_v18 = vld [vmem:[#allocation7 + $0x90] ss:$12 sps:$4 sm:$0xff]  }
 0xb0a   :  { %13608 = vmatprep.mubr.bf16.mxu0 %v19843_v3  ;;  %13649 = vmatprep.mubr.bf16.mxu1 %v19845_v61  ;;  %v18646_v9 = vld [vmem:[#allocation7 + $0x94] ss:$12 sps:$4 sm:$0xff]   ;;  %v18651_v47 = vld [vmem:[#allocation7 + $0x210] ss:$12 sps:$4 sm:$0xff]   ;;  %v18656_v29 = vld [vmem:[#allocation7 + $0x78] ss:$12 sps:$4 sm:$0xff]  }
 0xb0b   :  { %13617 = vmatprep.subr.bf16.mxu1 %v18642_v37  ;;  %13577 = vmatpush1.bf16.msra.mxu0 %v18644_v43  ;;  %v18648_v57 = vld [vmem:[#allocation7 + $0x214] ss:$12 sps:$4 sm:$0xff]   ;;  %v18652_v56 = vld [vmem:[#allocation7 + $0x7c] ss:$12 sps:$4 sm:$0xff]   ;;  %v18657_v20 = vld [vmem:[#allocation7 + $0x1f8] ss:$12 sps:$4 sm:$0xff]  }
 0xb0c   :  { %13618 = vmatpush1.bf16.msra.mxu1 %v18645_v16  ;;  %13578 = vmatprep.subr.bf16.mxu0 %v18646_v9  ;;  %v18654_v52 = vld [vmem:[#allocation7 + $0x1fc] ss:$12 sps:$4 sm:$0xff]   ;;  %v18658_v31 = vld [vmem:[#allocation7 + $0x64] ss:$12 sps:$4 sm:$0xff]   ;;  %v18662_v48 = vld [vmem:[#allocation7 + $0x60] ss:$12 sps:$4 sm:$0xff]  }
 0xb0d   :  { %13619 = vmatprep.subr.bf16.mxu1 %v18648_v57  ;;  %v18660_v11 = vld [vmem:[#allocation7 + $0x1e4] ss:$12 sps:$4 sm:$0xff]   ;;  %v18663_v32 = vld [vmem:[#allocation7 + $0x1e0] ss:$12 sps:$4 sm:$0xff]   ;;  %v18668_v17 = vld [vmem:[#allocation7 + $0x48] ss:$12 sps:$4 sm:$0xff]  }
 0xb0e   :  { %v18664_v45 = vld [vmem:[#allocation7 + $0x4c] ss:$12 sps:$4 sm:$0xff]   ;;  %v18669_v21 = vld [vmem:[#allocation7 + $0x1c8] ss:$12 sps:$4 sm:$0xff]   ;;  %v18674_v34 = vld [vmem:[#allocation7 + $0x30] ss:$12 sps:$4 sm:$0xff]  }
 0xb0f   :  { %13579 = vmatpush1.bf16.msra.mxu0 %v18650_v18  ;;  %v18666_v53 = vld [vmem:[#allocation7 + $0x1cc] ss:$12 sps:$4 sm:$0xff]   ;;  %v18670_v12 = vld [vmem:[#allocation7 + $0x34] ss:$12 sps:$4 sm:$0xff]   ;;  %v18675_v51 = vld [vmem:[#allocation7 + $0x1b0] ss:$12 sps:$4 sm:$0xff]  }
 0xb10   :  { %13620 = vmatpush1.bf16.msra.mxu1 %v18651_v47  ;;  %13580 = vmatprep.subr.bf16.mxu0 %v18652_v56  ;;  %v18672_v46 = vld [vmem:[#allocation7 + $0x1b4] ss:$12 sps:$4 sm:$0xff]   ;;  %v18676_v40 = vld [vmem:[#allocation7 + $0x1c] ss:$12 sps:$4 sm:$0xff]   ;;  %v18680_v13 = vld [vmem:[#allocation7 + $0x18] ss:$12 sps:$4 sm:$0xff]  }
 0xb11   :  { %13621 = vmatprep.subr.bf16.mxu1 %v18654_v52  ;;  %v18678_v2 = vld [vmem:[#allocation7 + $0x19c] ss:$12 sps:$4 sm:$0xff]   ;;  %v18681_v24 = vld [vmem:[#allocation7 + $0x198] ss:$12 sps:$4 sm:$0xff]   ;;  %v18686_v41 = vld [vmem:[#allocation7] ss:$12 sps:$4 sm:$0xff]  }
 0xb12   :  { %v18682_v54 = vld [vmem:[#allocation7 + $0x4] ss:$12 sps:$4 sm:$0xff]   ;;  %v18687_v36 = vld [vmem:[#allocation7 + $0x180] ss:$12 sps:$4 sm:$0xff]   ;;  %v18692_v15 = vld [vmem:[#allocation7 + $0x168] ss:$12 sps:$4 sm:$0xff]  }
 0xb13   :  { %13581 = vmatpush1.bf16.msra.mxu0 %v18656_v29  ;;  %v18684_v5 = vld [vmem:[#allocation7 + $0x184] ss:$12 sps:$4 sm:$0xff]   ;;  %v18688_v33 = vld [vmem:[#allocation7 + $0x16c] ss:$12 sps:$4 sm:$0xff]   ;;  %v18693_v26 = vld [vmem:[#allocation7 + $0x2e8] ss:$12 sps:$4 sm:$0xff]  }
 0xb14   :  { %13622 = vmatpush1.bf16.msra.mxu1 %v18657_v20  ;;  %13582 = vmatprep.subr.bf16.mxu0 %v18658_v31  ;;  %v18690_v60 = vld [vmem:[#allocation7 + $0x2ec] ss:$12 sps:$4 sm:$0xff]   ;;  %v18694_v63 = vld [vmem:[#allocation7 + $0x154] ss:$12 sps:$4 sm:$0xff]   ;;  %v18698_v49 = vld [vmem:[#allocation7 + $0x150] ss:$12 sps:$4 sm:$0xff]   ;;  %v19851_v20 = vpack.c.bf16 %v19837_v7, %v19837_v7  ;;  %v19855_v31 = vpack.c.bf16 %v19841_v19, %v19841_v19 }
 0xb15   :  { %13623 = vmatprep.subr.bf16.mxu1 %v18660_v11  ;;  %v18696_v35 = vld [vmem:[#allocation7 + $0x2d4] ss:$12 sps:$4 sm:$0xff]   ;;  %v18699_v62 = vld [vmem:[#allocation7 + $0x2d0] ss:$12 sps:$4 sm:$0xff]   ;;  %v18704_v23 = vld [vmem:[#allocation7 + $0x138] ss:$12 sps:$4 sm:$0xff]  }
 0xb16   :  { %v18700_v59 = vld [vmem:[#allocation7 + $0x13c] ss:$12 sps:$4 sm:$0xff]   ;;  %v18705_v0 = vld [vmem:[#allocation7 + $0x2b8] ss:$12 sps:$4 sm:$0xff]   ;;  %v18710_v4 = vld [vmem:[#allocation7 + $0x120] ss:$12 sps:$4 sm:$0xff]  }
 0xb17   :  { %13583 = vmatpush1.bf16.msra.mxu0 %v18662_v48  ;;  %v18702_v44 = vld [vmem:[#allocation7 + $0x2bc] ss:$12 sps:$4 sm:$0xff]   ;;  %v18706_v10 = vld [vmem:[#allocation7 + $0x124] ss:$12 sps:$4 sm:$0xff]   ;;  %v18711_v22 = vld [vmem:[#allocation7 + $0x2a0] ss:$12 sps:$4 sm:$0xff]  }
 0xb18   :  { %13624 = vmatpush1.bf16.msra.mxu1 %v18663_v32  ;;  %13584 = vmatprep.subr.bf16.mxu0 %v18664_v45  ;;  %v18708_v42 = vld [vmem:[#allocation7 + $0x2a4] ss:$12 sps:$4 sm:$0xff]   ;;  %v18712_v39 = vld [vmem:[#allocation7 + $0x10c] ss:$12 sps:$4 sm:$0xff]   ;;  %v18716_v58 = vld [vmem:[#allocation7 + $0x108] ss:$12 sps:$4 sm:$0xff]  }
 0xb19   :  { %13625 = vmatprep.subr.bf16.mxu1 %v18666_v53  ;;  %v18714_v55 = vld [vmem:[#allocation7 + $0x28c] ss:$12 sps:$4 sm:$0xff]   ;;  %v18717_v6 = vld [vmem:[#allocation7 + $0x288] ss:$12 sps:$4 sm:$0xff]   ;;  %v18722_v30 = vld [vmem:[#allocation7 + $0xf0] ss:$12 sps:$4 sm:$0xff]  }
 0xb1a   :  { %v18718_v8 = vld [vmem:[#allocation7 + $0xf4] ss:$12 sps:$4 sm:$0xff]   ;;  %v18723_v50 = vld [vmem:[#allocation7 + $0x270] ss:$12 sps:$4 sm:$0xff]   ;;  %v18728_v43 = vld [vmem:[#allocation7 + $0xd8] ss:$12 sps:$4 sm:$0xff]  }
 0xb1b   :  { %13585 = vmatpush1.bf16.msra.mxu0 %v18668_v17  ;;  %v18720_v38 = vld [vmem:[#allocation7 + $0x274] ss:$12 sps:$4 sm:$0xff]   ;;  %v18724_v14 = vld [vmem:[#allocation7 + $0xdc] ss:$12 sps:$4 sm:$0xff]   ;;  %v18729_v16 = vld [vmem:[#allocation7 + $0x258] ss:$12 sps:$4 sm:$0xff]  }
 0xb1c   :  { %13626 = vmatpush1.bf16.msra.mxu1 %v18669_v21  ;;  %13586 = vmatprep.subr.bf16.mxu0 %v18670_v12  ;;  %v18726_v37 = vld [vmem:[#allocation7 + $0x25c] ss:$12 sps:$4 sm:$0xff]   ;;  %v18730_v9 = vld [vmem:[#allocation7 + $0xc4] ss:$12 sps:$4 sm:$0xff]   ;;  %v18734_v18 = vld [vmem:[#allocation7 + $0xc0] ss:$12 sps:$4 sm:$0xff]  }
 0xb1d   :  { %13627 = vmatprep.subr.bf16.mxu1 %v18672_v46  ;;  %v18732_v57 = vld [vmem:[#allocation7 + $0x244] ss:$12 sps:$4 sm:$0xff]   ;;  %v18735_v47 = vld [vmem:[#allocation7 + $0x240] ss:$12 sps:$4 sm:$0xff]   ;;  %v18748_v12 = vld [vmem:[#allocation7 + $0x128] ss:$12 sps:$4 sm:$0xff]  }
 0xb1e   :  { %v18736_v56 = vld [vmem:[#allocation7 + $0x170] ss:$12 sps:$4 sm:$0xff]   ;;  %v18740_v48 = vld [vmem:[#allocation7 + $0x158] ss:$12 sps:$4 sm:$0xff]   ;;  %v18744_v7 = vld [vmem:[#allocation7 + $0x140] ss:$12 sps:$4 sm:$0xff]  }
 0xb1f   :  { %13587 = vmatpush1.bf16.msra.mxu0 %v18674_v34  ;;  %v18737_v52 = vld [vmem:[#allocation7 + $0x2f0] ss:$12 sps:$4 sm:$0xff]   ;;  %v18741_v32 = vld [vmem:[#allocation7 + $0x2d8] ss:$12 sps:$4 sm:$0xff]   ;;  %v18745_v19 = vld [vmem:[#allocation7 + $0x2c0] ss:$12 sps:$4 sm:$0xff]  }
 0xb20   :  { %13628 = vmatpush1.bf16.msra.mxu1 %v18675_v51  ;;  %13588 = vmatprep.subr.bf16.mxu0 %v18676_v40  ;;  %v18738_v29 = vld [vmem:[#allocation7 + $0xb0] ss:$12 sps:$4 sm:$0xff]   ;;  %v18742_v45 = vld [vmem:[#allocation7 + $0x98] ss:$12 sps:$4 sm:$0xff]   ;;  %v18746_v17 = vld [vmem:[#allocation7 + $0x80] ss:$12 sps:$4 sm:$0xff]  }
 0xb21   :  { %13629 = vmatprep.subr.bf16.mxu1 %v18678_v2  ;;  %v18739_v11 = vld [vmem:[#allocation7 + $0x230] ss:$12 sps:$4 sm:$0xff]   ;;  %v18743_v53 = vld [vmem:[#allocation7 + $0x218] ss:$12 sps:$4 sm:$0xff]   ;;  %v18747_v21 = vld [vmem:[#allocation7 + $0x200] ss:$12 sps:$4 sm:$0xff]  }
 0xb22   :  { %v18749_v46 = vld [vmem:[#allocation7 + $0x2a8] ss:$12 sps:$4 sm:$0xff]   ;;  %v18752_v40 = vld [vmem:[#allocation7 + $0x110] ss:$12 sps:$4 sm:$0xff]   ;;  %s16775_s5 = sld [smem:[#allocation18 + $0x5]] }
 0xb23   :  { %13589 = vmatpush1.bf16.msra.mxu0 %v18680_v13  ;;  %v18750_v34 = vld [vmem:[#allocation7 + $0x68] ss:$12 sps:$4 sm:$0xff]   ;;  %v18753_v2 = vld [vmem:[#allocation7 + $0x290] ss:$12 sps:$4 sm:$0xff]  }
 0xb24   :  { %13630 = vmatpush1.bf16.msra.mxu1 %v18681_v24  ;;  %13590 = vmatprep.subr.bf16.mxu0 %v18682_v54  ;;  %v18751_v51 = vld [vmem:[#allocation7 + $0x1e8] ss:$12 sps:$4 sm:$0xff]   ;;  %v18755_v13 = vld [vmem:[#allocation7 + $0x1d0] ss:$12 sps:$4 sm:$0xff]   ;;  %v18757_v24 = vld [vmem:[#allocation7 + $0x278] ss:$12 sps:$4 sm:$0xff]  }
 0xb25   :  { %13631 = vmatprep.subr.bf16.mxu1 %v18684_v5  ;;  %v18758_v54 = vld [vmem:[#allocation7 + $0x38] ss:$12 sps:$4 sm:$0xff]  }
 0xb26   :  { %v18759_v5 = vld [vmem:[#allocation7 + $0x1b8] ss:$12 sps:$4 sm:$0xff]  }
 0xb27   :  { %13591 = vmatpush1.bf16.msra.mxu0 %v18686_v41  ;;  %v18760_v41 = vld [vmem:[#allocation7 + $0xe0] ss:$12 sps:$4 sm:$0xff]  }
 0xb28   :  { %13632 = vmatpush1.bf16.msra.mxu1 %v18687_v36  ;;  %13592 = vmatprep.subr.bf16.mxu0 %v18688_v33  ;;  %v18761_v36 = vld [vmem:[#allocation7 + $0x260] ss:$12 sps:$4 sm:$0xff]  }
 0xb29   :  { %13633 = vmatprep.subr.bf16.mxu1 %v18690_v60  ;;  %v18762_v33 = vld [vmem:[#allocation7 + $0x20] ss:$12 sps:$4 sm:$0xff]  }
 0xb2a   :  { %v18763_v60 = vld [vmem:[#allocation7 + $0x1a0] ss:$12 sps:$4 sm:$0xff]  }
 0xb2b   :  { %13593 = vmatpush2.bf16.msra.mxu0 %v18692_v15  ;;  %v18764_v15 = vld [vmem:[#allocation7 + $0xc8] ss:$12 sps:$4 sm:$0xff]  }
 0xb2c   :  { %13634 = vmatpush2.bf16.msra.mxu1 %v18693_v26  ;;  %13594 = vmatprep.subr.bf16.mxu0 %v18694_v63  ;;  %v18765_v26 = vld [vmem:[#allocation7 + $0x248] ss:$12 sps:$4 sm:$0xff]  }
 0xb2d   :  { %13635 = vmatprep.subr.bf16.mxu1 %v18696_v35  ;;  %v18766_v63 = vld [vmem:[#allocation7 + $0x8] ss:$12 sps:$4 sm:$0xff]  }
 0xb2e   :  { %v18767_v35 = vld [vmem:[#allocation7 + $0x188] ss:$12 sps:$4 sm:$0xff]  }
 0xb2f   :  { %13595 = vmatpush2.bf16.msra.mxu0 %v18698_v49  ;;  %v13047_v49 = vld [vmem:[#allocation15 + $0x23] sm:$0x7] }
 0xb30   :  { %13636 = vmatpush2.bf16.msra.mxu1 %v18699_v62  ;;  %13596 = vmatprep.subr.bf16.mxu0 %v18700_v59  ;;  %v13052_v62 = vrot.slane %v13047_v49, %v19383_v25  ;;  %v13056_v59 = vrot.slane %v13047_v49, %v19386_v27 }
 0xb31   :  { %13637 = vmatprep.subr.bf16.mxu1 %v18702_v44 }
 0xb33   :  { %13597 = vmatpush2.bf16.msra.mxu0 %v18704_v23 }
 0xb34   :  { %13638 = vmatpush2.bf16.msra.mxu1 %v18705_v0  ;;  %13598 = vmatprep.subr.bf16.mxu0 %v18706_v10  ;;  %v13742_v10 = vstv %s16775_s5 }
 0xb35   :  { %13639 = vmatprep.subr.bf16.mxu1 %v18708_v42 }
 0xb37   :  { %13599 = vmatpush2.bf16.msra.mxu0 %v18710_v4 }
 0xb38   :  { %13640 = vmatpush2.bf16.msra.mxu1 %v18711_v22  ;;  %13600 = vmatprep.subr.bf16.mxu0 %v18712_v39 }
 0xb39   :  { %13641 = vmatprep.subr.bf16.mxu1 %v18714_v55 }
 0xb3b   :  { %13601 = vmatpush2.bf16.msra.mxu0 %v18716_v58 }
 0xb3c   :  { %13642 = vmatpush2.bf16.msra.mxu1 %v18717_v6  ;;  %13602 = vmatprep.subr.bf16.mxu0 %v18718_v8 }
 0xb3d   :  { %13643 = vmatprep.subr.bf16.mxu1 %v18720_v38 }
 0xb3f   :  { %13603 = vmatpush2.bf16.msra.mxu0 %v18722_v30 }
 0xb40   :  { %13644 = vmatpush2.bf16.msra.mxu1 %v18723_v50  ;;  %13604 = vmatprep.subr.bf16.mxu0 %v18724_v14 }
 0xb41   :  { %13645 = vmatprep.subr.bf16.mxu1 %v18726_v37 }
 0xb43   :  { %13605 = vmatpush2.bf16.msra.mxu0 %v18728_v43 }
 0xb44   :  { %13646 = vmatpush2.bf16.msra.mxu1 %v18729_v16  ;;  %13606 = vmatprep.subr.bf16.mxu0 %v18730_v9  ;;  %v13060_v9 = vrot.slane %v13047_v49, %v19389_v28 }
 0xb45   :  { %13647 = vmatprep.subr.bf16.mxu1 %v18732_v57 }
 0xb47   :  { %13607 = vmatpush2.bf16.msra.mxu0 %v18734_v18 }
 0xb48   :  { %13648 = vmatpush2.bf16.msra.mxu1 %v18735_v47  ;;  %17005 = vmatprep.subr.bf16.mxu0 %v18736_v56 }
 0xb49   :  { %17027 = vmatprep.subr.bf16.mxu1 %v18737_v52 }
 0xb4a   :  { %13609 = vmatmul.mubr.bf16.vlgmr.msra.gmra.mxu0 %v19851_v20 }
 0xb4b   :  { %13650 = vmatmul.mubr.bf16.vlgmr.msra.gmra.mxu1 %v19855_v31  ;;  %17006 = vmatpush3.bf16.msra.mxu0 %v18738_v29 }
 0xb4c   :  { %17028 = vmatpush3.bf16.msra.mxu1 %v18739_v11  ;;  %17007 = vmatprep.subr.bf16.mxu0 %v18740_v48 }
 0xb4d   :  { %17029 = vmatprep.subr.bf16.mxu1 %v18741_v32  ;;  %13690 = vmatprep.mubr.bf16.mxu0 %v19843_v3  ;;  %v18754_v3 = vld [vmem:[#allocation7 + $0x50] ss:$12 sps:$4 sm:$0xff]  }
 0xb4e   :  { %13730 = vmatprep.mubr.bf16.mxu1 %v19845_v61  ;;  %v18756_v61 = vld [vmem:[#allocation7 + $0xf8] ss:$12 sps:$4 sm:$0xff]  }
 0xb4f   :  { %17008 = vmatpush3.bf16.msra.mxu0 %v18742_v45 }
 0xb50   :  { %17030 = vmatpush3.bf16.msra.mxu1 %v18743_v53  ;;  %17009 = vmatprep.subr.bf16.mxu0 %v18744_v7 }
 0xb51   :  { %17031 = vmatprep.subr.bf16.mxu1 %v18745_v19 }
 0xb53   :  { %17010 = vmatpush3.bf16.msra.mxu0 %v18746_v17 }
 0xb54   :  { %17032 = vmatpush3.bf16.msra.mxu1 %v18747_v21  ;;  %17011 = vmatprep.subr.bf16.mxu0 %v18748_v12 }
 0xb55   :  { %17033 = vmatprep.subr.bf16.mxu1 %v18749_v46 }
 0xb57   :  { %17012 = vmatpush3.bf16.msra.mxu0 %v18750_v34 }
 0xb58   :  { %17034 = vmatpush3.bf16.msra.mxu1 %v18751_v51  ;;  %17013 = vmatprep.subr.bf16.mxu0 %v18752_v40 }
 0xb59   :  { %17035 = vmatprep.subr.bf16.mxu1 %v18753_v2 }
 0xb5b   :  { %17014 = vmatpush3.bf16.msra.mxu0 %v18754_v3 }
 0xb5c   :  { %17036 = vmatpush3.bf16.msra.mxu1 %v18755_v13  ;;  %17015 = vmatprep.subr.bf16.mxu0 %v18756_v61 }
 0xb5d   :  { %17037 = vmatprep.subr.bf16.mxu1 %v18757_v24 }
 0xb5f   :  { %17016 = vmatpush3.bf16.msra.mxu0 %v18758_v54 }
 0xb60   :  { %17038 = vmatpush3.bf16.msra.mxu1 %v18759_v5  ;;  %17017 = vmatprep.subr.bf16.mxu0 %v18760_v41 }
 0xb61   :  { %17039 = vmatprep.subr.bf16.mxu1 %v18761_v36 }
 0xb63   :  { %17018 = vmatpush3.bf16.msra.mxu0 %v18762_v33 }
 0xb64   :  { %17040 = vmatpush3.bf16.msra.mxu1 %v18763_v60  ;;  %17019 = vmatprep.subr.bf16.mxu0 %v18764_v15 }
 0xb65   :  { %17041 = vmatprep.subr.bf16.mxu1 %v18765_v26 }
 0xb67   :  { %17020 = vmatpush3.bf16.msra.mxu0 %v18766_v63 }
 0xb68   :  { %17042 = vmatpush3.bf16.msra.mxu1 %v18767_v35 }
 0xb6a   :  { %13691 = vmatmul.mubr.bf16.vlgmr.msra.gmra.mxu0 %v19851_v20 }
 0xb6b   :  { %13731 = vmatmul.mubr.bf16.vlgmr.msra.gmra.mxu1 %v19855_v31 }
 0xc0a   :  { %v13610_v44 = vpop.f32.mrf.mxu0 }
 0xc0b   :  { %v13651_v23 = vpop.f32.mrf.mxu1  ;;  %v13611_v0 = vadd.f32 %v13610_v44, %v13052_v62 }
 0xc0c   :  { %v13612_v42 = vpop.f32.mrf.mxu0 }
 0xc0d   :  { %v13653_v4 = vpop.f32.mrf.mxu1  ;;  %v13652_v22 = vadd.f32 %v13651_v23, %v13611_v0  ;;  %v13613_v39 = vadd.f32 %v13612_v42, %v13056_v59 }
 0xc0e   :  { %v13614_v55 = vpop.f32.mrf.mxu0 }
 0xc0f   :  { %v13655_v58 = vpop.f32.mrf.mxu1  ;;  %vm13739_vm4 = vcmp.ge.f32.partialorder %v13652_v22, 0.0  ;;  %v13743_v6 = vmul.f32 %v13742_v10, %v13652_v22  ;;  %v13654_v8 = vadd.f32 %v13653_v4, %v13613_v39 }
 0xc10   :  { %v13615_v38 = vpop.f32.mrf.mxu0 }
 0xc11   :  { %v13656_v30 = vpop.f32.mrf.mxu1  ;;  %v19865_v50 = vsel %vm13739_vm4, %v13652_v22, %v13743_v6  ;;  %vm13740_vm5 = vcmp.ge.f32.partialorder %v13654_v8, 0.0  ;;  %v13744_v14 = vmul.f32 %v13742_v10, %v13654_v8 }
 0xc13   :  { %v13747_v37 = vsel %vm13740_vm5, %v13654_v8, %v13744_v14 }
 0xc2a   :  { %v17021_v43 = vpop.f32.mrf.mxu0 }
 0xc2b   :  { %v17043_v16 = vpop.f32.mrf.mxu1 }
 0xc2c   :  { %v17022_v57 = vpop.f32.mrf.mxu0 }
 0xc2d   :  { %v17044_v18 = vpop.f32.mrf.mxu1  ;;  %v17023_v47 = vadd.f32 %v17022_v57, %v17021_v43 }
 0xc2e   :  { %v17024_v56 = vpop.f32.mrf.mxu0  ;;  %v17045_v20 = vadd.f32 %v17044_v18, %v17043_v16 }
 0xc2f   :  { %v17046_v52 = vpop.f32.mrf.mxu1  ;;  %v13693_v29 = vadd.f32 %v17023_v47, %v13060_v9 }
 0xc30   :  { %v17025_v31 = vpop.f32.mrf.mxu0 }
 0xc31   :  { %v17047_v11 = vpop.f32.mrf.mxu1  ;;  %v13733_v48 = vadd.f32 %v17045_v20, %v13693_v29 }
 0xc33   :  { %vm13741_vm6 = vcmp.ge.f32.partialorder %v13733_v48, 0.0  ;;  %v13745_v32 = vmul.f32 %v13742_v10, %v13733_v48 }
 0xc35   :  { %v19868_v45 = vsel %vm13741_vm6, %v13733_v48, %v13745_v32 }
 0xc36   :  { %19212 = dma.done.wait [#allocation14 + $0x6], 6144 }
 0xc37   :  { %19213 = vsyncadd [#allocation14 + $0x6], 4294961152  ;;  %14129 = vmatprep.mubr.bf16.mxu1 %v19238_v1  ;;  %v13802_v53 = vpack.c.bf16 %v13747_v37, %v13747_v37  ;;  %v18768_v28 = vld [vmem:[#allocation8 + $0x74] ss:$8 sps:$4 sm:$0xff]   ;;  %v18770_v7 = vld [vmem:[#allocation8 + $0x70] ss:$8 sps:$4 sm:$0xff]   ;;  %v13803_v6 = vpack.c.bf16 %v19868_v45, %v19868_v45  ;;  %v13801_v18 = vpack.c.bf16 %v19865_v50, %v19865_v50 }
 0xc38   :  { %14056 = vmatprep.subr.bf16.mxu0 %v18768_v28  ;;  %v18771_v19 = vld [vmem:[#allocation8 + $0x64] ss:$8 sps:$4 sm:$0xff]   ;;  %v18773_v17 = vld [vmem:[#allocation8 + $0x60] ss:$8 sps:$4 sm:$0xff]   ;;  %v18774_v21 = vld [vmem:[#allocation8 + $0x54] ss:$8 sps:$4 sm:$0xff]  }
 0xc39   :  { %14088 = vmatprep.mubr.bf16.mxu0 %v13802_v53  ;;  %14057 = vmatpush1.bf16.msra.mxu0 %v18770_v7  ;;  %v18776_v12 = vld [vmem:[#allocation8 + $0x50] ss:$8 sps:$4 sm:$0xff]   ;;  %v18777_v46 = vld [vmem:[#allocation8 + $0x44] ss:$8 sps:$4 sm:$0xff]   ;;  %v18779_v34 = vld [vmem:[#allocation8 + $0x40] ss:$8 sps:$4 sm:$0xff]  }
 0xc3a   :  { %14058 = vmatprep.subr.bf16.mxu0 %v18771_v19  ;;  %v18791_v51 = vld [vmem:[#allocation8 + $0x174] ss:$8 sps:$4 sm:$0xff]   ;;  %v18794_v40 = vld [vmem:[#allocation8 + $0x170] ss:$8 sps:$4 sm:$0xff]   ;;  %v18797_v2 = vld [vmem:[#allocation8 + $0x164] ss:$8 sps:$4 sm:$0xff]  }
 0xc3b   :  { %v18780_v1 = vld [vmem:[#allocation8 + $0x34] ss:$8 sps:$4 sm:$0xff]   ;;  %14097 = vmatprep.subr.bf16.mxu1 %v18791_v51  ;;  %v18800_v3 = vld [vmem:[#allocation8 + $0x160] ss:$8 sps:$4 sm:$0xff]   ;;  %v18782_v13 = vld [vmem:[#allocation8 + $0x30] ss:$8 sps:$4 sm:$0xff]  }
 0xc3c   :  { %14098 = vmatpush1.bf16.msra.mxu1 %v18794_v40  ;;  %v18783_v61 = vld [vmem:[#allocation8 + $0x24] ss:$8 sps:$4 sm:$0xff]   ;;  %v18803_v24 = vld [vmem:[#allocation8 + $0x154] ss:$8 sps:$4 sm:$0xff]   ;;  %v18806_v54 = vld [vmem:[#allocation8 + $0x150] ss:$8 sps:$4 sm:$0xff]  }
 0xc3d   :  { %14059 = vmatpush1.bf16.msra.mxu0 %v18773_v17  ;;  %14099 = vmatprep.subr.bf16.mxu1 %v18797_v2  ;;  %v18785_v5 = vld [vmem:[#allocation8 + $0x20] ss:$8 sps:$4 sm:$0xff]   ;;  %v18809_v41 = vld [vmem:[#allocation8 + $0x144] ss:$8 sps:$4 sm:$0xff]   ;;  %v18786_v36 = vld [vmem:[#allocation8 + $0x14] ss:$8 sps:$4 sm:$0xff]  }
 0xc3e   :  { %14060 = vmatprep.subr.bf16.mxu0 %v18774_v21  ;;  %v18788_v33 = vld [vmem:[#allocation8 + $0x10] ss:$8 sps:$4 sm:$0xff]   ;;  %v18812_v60 = vld [vmem:[#allocation8 + $0x140] ss:$8 sps:$4 sm:$0xff]   ;;  %v18815_v15 = vld [vmem:[#allocation8 + $0x134] ss:$8 sps:$4 sm:$0xff]  }
 0xc3f   :  { %v18789_v26 = vld [vmem:[#allocation8 + $0x4] ss:$8 sps:$4 sm:$0xff]   ;;  %v18818_v63 = vld [vmem:[#allocation8 + $0x130] ss:$8 sps:$4 sm:$0xff]   ;;  %v18793_v35 = vld [vmem:[#allocation8] ss:$8 sps:$4 sm:$0xff]  }
 0xc40   :  { %14100 = vmatpush1.bf16.msra.mxu1 %v18800_v3  ;;  %v18821_v49 = vld [vmem:[#allocation8 + $0x124] ss:$8 sps:$4 sm:$0xff]   ;;  %v18795_v62 = vld [vmem:[#allocation8 + $0xf4] ss:$8 sps:$4 sm:$0xff]   ;;  %v18824_v59 = vld [vmem:[#allocation8 + $0x120] ss:$8 sps:$4 sm:$0xff]  }
 0xc41   :  { %14061 = vmatpush1.bf16.msra.mxu0 %v18776_v12  ;;  %14101 = vmatprep.subr.bf16.mxu1 %v18803_v24  ;;  %v18799_v44 = vld [vmem:[#allocation8 + $0xf0] ss:$8 sps:$4 sm:$0xff]   ;;  %v18827_v23 = vld [vmem:[#allocation8 + $0x114] ss:$8 sps:$4 sm:$0xff]   ;;  %v18801_v0 = vld [vmem:[#allocation8 + $0xe4] ss:$8 sps:$4 sm:$0xff]  }
 0xc42   :  { %14062 = vmatprep.subr.bf16.mxu0 %v18777_v46  ;;  %v18830_v10 = vld [vmem:[#allocation8 + $0x110] ss:$8 sps:$4 sm:$0xff]   ;;  %v18805_v42 = vld [vmem:[#allocation8 + $0xe0] ss:$8 sps:$4 sm:$0xff]   ;;  %v18833_v4 = vld [vmem:[#allocation8 + $0x104] ss:$8 sps:$4 sm:$0xff]  }
 0xc43   :  { %v18807_v22 = vld [vmem:[#allocation8 + $0xd4] ss:$8 sps:$4 sm:$0xff]   ;;  %v18836_v39 = vld [vmem:[#allocation8 + $0x100] ss:$8 sps:$4 sm:$0xff]   ;;  %v18811_v55 = vld [vmem:[#allocation8 + $0xd0] ss:$8 sps:$4 sm:$0xff]  }
 0xc44   :  { %14102 = vmatpush1.bf16.msra.mxu1 %v18806_v54  ;;  %v18813_v58 = vld [vmem:[#allocation8 + $0xc4] ss:$8 sps:$4 sm:$0xff]   ;;  %v18817_v8 = vld [vmem:[#allocation8 + $0xc0] ss:$8 sps:$4 sm:$0xff]   ;;  %v18819_v38 = vld [vmem:[#allocation8 + $0xb4] ss:$8 sps:$4 sm:$0xff]  }
 0xc45   :  { %14063 = vmatpush1.bf16.msra.mxu0 %v18779_v34  ;;  %14103 = vmatprep.subr.bf16.mxu1 %v18809_v41  ;;  %v18823_v30 = vld [vmem:[#allocation8 + $0xb0] ss:$8 sps:$4 sm:$0xff]   ;;  %v18825_v14 = vld [vmem:[#allocation8 + $0xa4] ss:$8 sps:$4 sm:$0xff]   ;;  %v18829_v37 = vld [vmem:[#allocation8 + $0xa0] ss:$8 sps:$4 sm:$0xff]  }
 0xc46   :  { %14064 = vmatprep.subr.bf16.mxu0 %v18780_v1  ;;  %v18831_v43 = vld [vmem:[#allocation8 + $0x94] ss:$8 sps:$4 sm:$0xff]   ;;  %v18835_v16 = vld [vmem:[#allocation8 + $0x90] ss:$8 sps:$4 sm:$0xff]   ;;  %v18837_v9 = vld [vmem:[#allocation8 + $0x84] ss:$8 sps:$4 sm:$0xff]  }
 0xc47   :  { %v18839_v57 = vld [vmem:[#allocation8 + $0x80] ss:$8 sps:$4 sm:$0xff]   ;;  %v13804_v20 = vld [vmem:[#allocation15 + $0x26] sm:$0x3]  ;;  %s16824_s23 = sld [smem:[#allocation18 + $0x6]] }
 0xc48   :  { %14104 = vmatpush1.bf16.msra.mxu1 %v18812_v60  ;;  %v13809_v31 = vrot.slane %v13804_v20, %v19383_v25  ;;  %v13813_v11 = vrot.slane %v13804_v20, %v19386_v27 }
 0xc49   :  { %14065 = vmatpush1.bf16.msra.mxu0 %v18782_v13  ;;  %14105 = vmatprep.subr.bf16.mxu1 %v18815_v15 }
 0xc4a   :  { %14066 = vmatprep.subr.bf16.mxu0 %v18783_v61 }
 0xc4c   :  { %14106 = vmatpush1.bf16.msra.mxu1 %v18818_v63 }
 0xc4d   :  { %14067 = vmatpush1.bf16.msra.mxu0 %v18785_v5  ;;  %14107 = vmatprep.subr.bf16.mxu1 %v18821_v49  ;;  %v14141_v45 = vstv %s16824_s23 }
 0xc4e   :  { %14068 = vmatprep.subr.bf16.mxu0 %v18786_v36 }
 0xc50   :  { %14108 = vmatpush1.bf16.msra.mxu1 %v18824_v59 }
 0xc51   :  { %14069 = vmatpush1.bf16.msra.mxu0 %v18788_v33  ;;  %14109 = vmatprep.subr.bf16.mxu1 %v18827_v23 }
 0xc52   :  { %14070 = vmatprep.subr.bf16.mxu0 %v18789_v26 }
 0xc54   :  { %14110 = vmatpush1.bf16.msra.mxu1 %v18830_v10 }
 0xc55   :  { %14071 = vmatpush1.bf16.msra.mxu0 %v18793_v35  ;;  %14111 = vmatprep.subr.bf16.mxu1 %v18833_v4 }
 0xc56   :  { %14072 = vmatprep.subr.bf16.mxu0 %v18795_v62 }
 0xc58   :  { %14112 = vmatpush1.bf16.msra.mxu1 %v18836_v39 }
 0xc59   :  { %14073 = vmatpush2.bf16.msra.mxu0 %v18799_v44 }
 0xc5a   :  { %14074 = vmatprep.subr.bf16.mxu0 %v18801_v0 }
 0xc5b   :  { %14130 = vmatmul.mubr.bf16.vlgmr.msra.gmra.mxu1 %v13803_v6 }
 0xc5d   :  { %14075 = vmatpush2.bf16.msra.mxu0 %v18805_v42 }
 0xc5e   :  { %14076 = vmatprep.subr.bf16.mxu0 %v18807_v22 }
 0xc61   :  { %14077 = vmatpush2.bf16.msra.mxu0 %v18811_v55 }
 0xc62   :  { %14078 = vmatprep.subr.bf16.mxu0 %v18813_v58 }
 0xc65   :  { %14079 = vmatpush2.bf16.msra.mxu0 %v18817_v8 }
 0xc66   :  { %14080 = vmatprep.subr.bf16.mxu0 %v18819_v38 }
 0xc69   :  { %14081 = vmatpush2.bf16.msra.mxu0 %v18823_v30 }
 0xc6a   :  { %14082 = vmatprep.subr.bf16.mxu0 %v18825_v14 }
 0xc6d   :  { %14083 = vmatpush2.bf16.msra.mxu0 %v18829_v37 }
 0xc6e   :  { %14084 = vmatprep.subr.bf16.mxu0 %v18831_v43 }
 0xc71   :  { %14085 = vmatpush2.bf16.msra.mxu0 %v18835_v16 }
 0xc72   :  { %14086 = vmatprep.subr.bf16.mxu0 %v18837_v9 }
 0xc75   :  { %14087 = vmatpush2.bf16.msra.mxu0 %v18839_v57 }
 0xc78   :  { %14089 = vmatmul.mubr.bf16.vlgmr.msra.gmra.mxu0 %v13801_v18 }
 0xd1b   :  { %v14131_v47 = vpop.f32.mrf.mxu1 }
 0xd1d   :  { %v14133_v56 = vpop.f32.mrf.mxu1 }
 0xd1f   :  { %v14135_v52 = vpop.f32.mrf.mxu1 }
 0xd21   :  { %v14136_v29 = vpop.f32.mrf.mxu1 }
 0xd38   :  { %v14090_v48 = vpop.f32.mrf.mxu0 }
 0xd39   :  { %v14091_v32 = vadd.f32 %v14090_v48, %v13809_v31 }
 0xd3a   :  { %v14092_v53 = vpop.f32.mrf.mxu0 }
 0xd3b   :  { %v14132_v28 = vadd.f32 %v14131_v47, %v14091_v32  ;;  %v14093_v7 = vadd.f32 %v14092_v53, %v13813_v11 }
 0xd3c   :  { %v14094_v19 = vpop.f32.mrf.mxu0 }
 0xd3d   :  { %vm14139_vm7 = vcmp.ge.f32.partialorder %v14132_v28, 0.0  ;;  %v14142_v50 = vmul.f32 %v14141_v45, %v14132_v28  ;;  %v14134_v17 = vadd.f32 %v14133_v56, %v14093_v7 }
 0xd3e   :  { %v14095_v21 = vpop.f32.mrf.mxu0 }
 0xd3f   :  { %v19877_v12 = vsel %vm14139_vm7, %v14132_v28, %v14142_v50  ;;  %vm14140_vm8 = vcmp.ge.f32.partialorder %v14134_v17, 0.0  ;;  %v14143_v46 = vmul.f32 %v14141_v45, %v14134_v17 }
 0xd41   :  { %v14145_v34 = vsel %vm14140_vm8, %v14134_v17, %v14143_v46 }
 0xd42   :  { %19214 = dma.done.wait [#allocation14 + $0x7], 4096 }
 0xd43   :  { %19215 = vsyncadd [#allocation14 + $0x7], 4294963200  ;;  %v14183_v51 = vpack.c.bf16 %v14145_v34, %v14145_v34  ;;  %v18840_v40 = vld [vmem:[#allocation9 + $0x74] ss:$8 sps:$4 sm:$0xff]   ;;  %v18842_v1 = vld [vmem:[#allocation9 + $0x70] ss:$8 sps:$4 sm:$0xff]   ;;  %v14182_v38 = vpack.c.bf16 %v19877_v12, %v19877_v12 }
 0xd44   :  { %14356 = vmatprep.subr.bf16.mxu1 %v18840_v40  ;;  %v18843_v2 = vld [vmem:[#allocation9 + $0x64] ss:$8 sps:$4 sm:$0xff]   ;;  %v18845_v3 = vld [vmem:[#allocation9 + $0x60] ss:$8 sps:$4 sm:$0xff]   ;;  %v18846_v13 = vld [vmem:[#allocation9 + $0x54] ss:$8 sps:$4 sm:$0xff]  }
 0xd45   :  { %14388 = vmatprep.mubr.bf16.mxu1 %v14183_v51  ;;  %14357 = vmatpush1.bf16.msra.mxu1 %v18842_v1  ;;  %v18848_v61 = vld [vmem:[#allocation9 + $0x50] ss:$8 sps:$4 sm:$0xff]   ;;  %v18849_v24 = vld [vmem:[#allocation9 + $0x44] ss:$8 sps:$4 sm:$0xff]   ;;  %v18851_v54 = vld [vmem:[#allocation9 + $0x40] ss:$8 sps:$4 sm:$0xff]  }
 0xd46   :  { %14358 = vmatprep.subr.bf16.mxu1 %v18843_v2  ;;  %v18852_v5 = vld [vmem:[#allocation9 + $0x34] ss:$8 sps:$4 sm:$0xff]   ;;  %v18854_v41 = vld [vmem:[#allocation9 + $0x30] ss:$8 sps:$4 sm:$0xff]   ;;  %v18855_v36 = vld [vmem:[#allocation9 + $0x24] ss:$8 sps:$4 sm:$0xff]  }
 0xd47   :  { %v18857_v33 = vld [vmem:[#allocation9 + $0x20] ss:$8 sps:$4 sm:$0xff]   ;;  %v18858_v60 = vld [vmem:[#allocation9 + $0x14] ss:$8 sps:$4 sm:$0xff]   ;;  %v18860_v15 = vld [vmem:[#allocation9 + $0x10] ss:$8 sps:$4 sm:$0xff]  }
 0xd48   :  { %v18861_v26 = vld [vmem:[#allocation9 + $0x4] ss:$8 sps:$4 sm:$0xff]   ;;  %v18863_v63 = vld [vmem:[#allocation9] ss:$8 sps:$4 sm:$0xff]   ;;  %v18864_v35 = vld [vmem:[#allocation9 + $0xf4] ss:$8 sps:$4 sm:$0xff]  }
 0xd49   :  { %14359 = vmatpush1.bf16.msra.mxu1 %v18845_v3  ;;  %v18866_v49 = vld [vmem:[#allocation9 + $0xf0] ss:$8 sps:$4 sm:$0xff]   ;;  %v18867_v62 = vld [vmem:[#allocation9 + $0xe4] ss:$8 sps:$4 sm:$0xff]   ;;  %v18869_v59 = vld [vmem:[#allocation9 + $0xe0] ss:$8 sps:$4 sm:$0xff]  }
 0xd4a   :  { %14360 = vmatprep.subr.bf16.mxu1 %v18846_v13  ;;  %v18870_v44 = vld [vmem:[#allocation9 + $0xd4] ss:$8 sps:$4 sm:$0xff]   ;;  %v18872_v23 = vld [vmem:[#allocation9 + $0xd0] ss:$8 sps:$4 sm:$0xff]   ;;  %v18873_v0 = vld [vmem:[#allocation9 + $0xc4] ss:$8 sps:$4 sm:$0xff]  }
 0xd4b   :  { %v18875_v10 = vld [vmem:[#allocation9 + $0xc0] ss:$8 sps:$4 sm:$0xff]   ;;  %v18876_v42 = vld [vmem:[#allocation9 + $0xb4] ss:$8 sps:$4 sm:$0xff]   ;;  %v18878_v4 = vld [vmem:[#allocation9 + $0xb0] ss:$8 sps:$4 sm:$0xff]  }
 0xd4c   :  { %v18879_v22 = vld [vmem:[#allocation9 + $0xa4] ss:$8 sps:$4 sm:$0xff]   ;;  %v18881_v39 = vld [vmem:[#allocation9 + $0xa0] ss:$8 sps:$4 sm:$0xff]   ;;  %v18882_v55 = vld [vmem:[#allocation9 + $0x94] ss:$8 sps:$4 sm:$0xff]  }
 0xd4d   :  { %14361 = vmatpush1.bf16.msra.mxu1 %v18848_v61  ;;  %v18884_v58 = vld [vmem:[#allocation9 + $0x90] ss:$8 sps:$4 sm:$0xff]   ;;  %v18885_v6 = vld [vmem:[#allocation9 + $0x84] ss:$8 sps:$4 sm:$0xff]   ;;  %v18887_v8 = vld [vmem:[#allocation9 + $0x80] ss:$8 sps:$4 sm:$0xff]  }
 0xd4e   :  { %14362 = vmatprep.subr.bf16.mxu1 %v18849_v24  ;;  %s16857_s24 = sld [smem:[#allocation18 + $0x7]]  ;;  %v14184_v30 = vld [vmem:[#allocation15 + $0x28] sm:$0x3] }
 0xd4f   :  { %v14189_v14 = vrot.slane %v14184_v30, %v19383_v25  ;;  %v14193_v37 = vrot.slane %v14184_v30, %v19386_v27 }
 0xd51   :  { %14363 = vmatpush1.bf16.msra.mxu1 %v18851_v54 }
 0xd52   :  { %14364 = vmatprep.subr.bf16.mxu1 %v18852_v5 }
 0xd54   :  { %v14400_v16 = vstv %s16857_s24 }
 0xd55   :  { %14365 = vmatpush1.bf16.msra.mxu1 %v18854_v41 }
 0xd56   :  { %14366 = vmatprep.subr.bf16.mxu1 %v18855_v36 }
 0xd59   :  { %14367 = vmatpush1.bf16.msra.mxu1 %v18857_v33 }
 0xd5a   :  { %14368 = vmatprep.subr.bf16.mxu1 %v18858_v60 }
 0xd5d   :  { %14369 = vmatpush1.bf16.msra.mxu1 %v18860_v15 }
 0xd5e   :  { %14370 = vmatprep.subr.bf16.mxu1 %v18861_v26 }
 0xd61   :  { %14371 = vmatpush1.bf16.msra.mxu1 %v18863_v63 }
 0xd62   :  { %14372 = vmatprep.subr.bf16.mxu1 %v18864_v35 }
 0xd65   :  { %14373 = vmatpush2.bf16.msra.mxu1 %v18866_v49 }
 0xd66   :  { %14374 = vmatprep.subr.bf16.mxu1 %v18867_v62 }
 0xd69   :  { %14375 = vmatpush2.bf16.msra.mxu1 %v18869_v59 }
 0xd6a   :  { %14376 = vmatprep.subr.bf16.mxu1 %v18870_v44 }
 0xd6d   :  { %14377 = vmatpush2.bf16.msra.mxu1 %v18872_v23 }
 0xd6e   :  { %14378 = vmatprep.subr.bf16.mxu1 %v18873_v0 }
 0xd71   :  { %14379 = vmatpush2.bf16.msra.mxu1 %v18875_v10 }
 0xd72   :  { %14380 = vmatprep.subr.bf16.mxu1 %v18876_v42 }
 0xd75   :  { %14381 = vmatpush2.bf16.msra.mxu1 %v18878_v4 }
 0xd76   :  { %14382 = vmatprep.subr.bf16.mxu1 %v18879_v22 }
 0xd79   :  { %14383 = vmatpush2.bf16.msra.mxu1 %v18881_v39 }
 0xd7a   :  { %14384 = vmatprep.subr.bf16.mxu1 %v18882_v55 }
 0xd7d   :  { %14385 = vmatpush2.bf16.msra.mxu1 %v18884_v58 }
 0xd7e   :  { %14386 = vmatprep.subr.bf16.mxu1 %v18885_v6 }
 0xd81   :  { %14387 = vmatpush2.bf16.msra.mxu1 %v18887_v8 }
 0xd84   :  { %14389 = vmatmul.mubr.bf16.vlgmr.msra.gmra.mxu1 %v14182_v38 }
 0xe44   :  { %v14390_v43 = vpop.f32.mrf.mxu1 }
 0xe45   :  { %v14391_v9 = vadd.f32 %v14390_v43, %v14189_v14 }
 0xe46   :  { %v14392_v57 = vpop.f32.mrf.mxu1 }
 0xe47   :  { %vm14398_vm9 = vcmp.ge.f32.partialorder %v14391_v9, 0.0  ;;  %v14401_v18 = vmul.f32 %v14400_v16, %v14391_v9  ;;  %v14393_v47 = vadd.f32 %v14392_v57, %v14193_v37 }
 0xe48   :  { %v14394_v56 = vpop.f32.mrf.mxu1 }
 0xe49   :  { %v14403_v52 = vsel %vm14398_vm9, %v14391_v9, %v14401_v18  ;;  %vm14399_vm10 = vcmp.ge.f32.partialorder %v14393_v47, 0.0  ;;  %v14402_v29 = vmul.f32 %v14400_v16, %v14393_v47 }
 0xe4a   :  { %v14395_v20 = vpop.f32.mrf.mxu1 }
 0xe4b   :  { %v14404_v31 = vsel %vm14399_vm10, %v14393_v47, %v14402_v29 }
 0xe4c   :  { %19216 = dma.done.wait [#allocation14 + $0x8], 2048 }
 0xe4d   :  { %19217 = vsyncadd [#allocation14 + $0x8], 4294965248  ;;  %v14441_v11 = vpack.c.bf16 %v14404_v31, %v14404_v31  ;;  %v18888_v25 = vld [vmem:[#allocation10 + $0x78] sm:$0xff]   ;;  %v18890_v27 = vld [vmem:[#allocation10 + $0x70] sm:$0xff]   ;;  %v14440_v40 = vpack.c.bf16 %v14403_v52, %v14403_v52  ;;  %s16875_s6 = sld [smem:[#allocation18 + $0x8]] }
 0xe4e   :  { %v18889_v48 = vld [vmem:[#allocation10 + $0x38] sm:$0xff]   ;;  %17049 = vmatprep.subr.bf16.mxu0 %v18888_v25  ;;  %v18891_v32 = vld [vmem:[#allocation10 + $0x30] sm:$0xff]   ;;  %v18892_v45 = vld [vmem:[#allocation10 + $0x68] sm:$0xff]  }
 0xe4f   :  { %14577 = vmatprep.mubr.bf16.mxu0 %v14441_v11  ;;  %17050 = vmatpush3.bf16.msra.mxu0 %v18889_v48  ;;  %v18893_v53 = vld [vmem:[#allocation10 + $0x28] sm:$0xff]   ;;  %v18894_v28 = vld [vmem:[#allocation10 + $0x60] sm:$0xff]   ;;  %v18896_v19 = vld [vmem:[#allocation10 + $0x58] sm:$0xff]  }
 0xe50   :  { %17051 = vmatprep.subr.bf16.mxu0 %v18890_v27  ;;  %v18895_v7 = vld [vmem:[#allocation10 + $0x20] sm:$0xff]   ;;  %v18897_v50 = vld [vmem:[#allocation10 + $0x18] sm:$0xff]   ;;  %v18898_v17 = vld [vmem:[#allocation10 + $0x50] sm:$0xff]  }
 0xe51   :  { %v18899_v21 = vld [vmem:[#allocation10 + $0x10] sm:$0xff]   ;;  %v18900_v12 = vld [vmem:[#allocation10 + $0x48] sm:$0xff]   ;;  %v18902_v34 = vld [vmem:[#allocation10 + $0x40] sm:$0xff]  }
 0xe52   :  { %v18901_v46 = vld [vmem:[#allocation10 + $0x8] sm:$0xff]   ;;  %v18903_v51 = vld [vmem:[#allocation10] sm:$0xff]  }
 0xe53   :  { %17052 = vmatpush3.bf16.msra.mxu0 %v18891_v32  ;;  %v16858_v2 = vld [vmem:[#allocation15 + $0x2a] ss:$0 sm:$0xff]  ;;  %v14587_v61 = vstv %s16875_s6 }
 0xe54   :  { %17053 = vmatprep.subr.bf16.mxu0 %v18892_v45 }
 0xe57   :  { %17054 = vmatpush3.bf16.msra.mxu0 %v18893_v53 }
 0xe58   :  { %17055 = vmatprep.subr.bf16.mxu0 %v18894_v28 }
 0xe5b   :  { %17056 = vmatpush3.bf16.msra.mxu0 %v18895_v7 }
 0xe5c   :  { %17057 = vmatprep.subr.bf16.mxu0 %v18896_v19 }
 0xe5f   :  { %17058 = vmatpush3.bf16.msra.mxu0 %v18897_v50 }
 0xe60   :  { %17059 = vmatprep.subr.bf16.mxu0 %v18898_v17 }
 0xe63   :  { %17060 = vmatpush3.bf16.msra.mxu0 %v18899_v21 }
 0xe64   :  { %17061 = vmatprep.subr.bf16.mxu0 %v18900_v12 }
 0xe67   :  { %17062 = vmatpush3.bf16.msra.mxu0 %v18901_v46 }
 0xe68   :  { %17063 = vmatprep.subr.bf16.mxu0 %v18902_v34 }
 0xe6b   :  { %17064 = vmatpush3.bf16.msra.mxu0 %v18903_v51 }
 0xe6e   :  { %14578 = vmatmul.mubr.bf16.vlgmr.msra.gmra.mxu0 %v14440_v40 }
 0xf2e   :  { %v17065_v1 = vpop.f32.mrf.mxu0 }
 0xf30   :  { %v17066_v3 = vpop.f32.mrf.mxu0 }
 0xf31   :  { %v17067_v13 = vadd.f32 %v17066_v3, %v17065_v1 }
 0xf32   :  { %v17068_v24 = vpop.f32.mrf.mxu0 }
 0xf33   :  { %v14580_v54 = vadd.f32 %v17067_v13, %v16858_v2 }
 0xf34   :  { %v17069_v5 = vpop.f32.mrf.mxu0 }
 0xf35   :  { %vm14586_vm11 = vcmp.ge.f32.partialorder %v14580_v54, 0.0  ;;  %v14588_v41 = vmul.f32 %v14587_v61, %v14580_v54 }
 0xf37   :  { %v14589_v36 = vsel %vm14586_vm11, %v14580_v54, %v14588_v41 }
 0xf38   :  { %19218 = dma.done.wait [#allocation14 + $0x9], 1024 }
 0xf39   :  { %19219 = vsyncadd [#allocation14 + $0x9], 4294966272  ;;  %v19239_v33 = vmov 0.0   ;;  %vm19240_vm12 = vmmov 0   ;;  %v18904_v60 = vld [vmem:[#allocation11 + $0x38] sm:$0xff]   ;;  %v18905_v15 = vld [vmem:[#allocation11 + $0x30] sm:$0xff]   ;;  %v14610_v44 = vpack.c.bf16 %v14589_v36, %v14589_v36 }
 0xf3a   :  { %17098 = vmatprep.subr.bf16.mxu0 %v19239_v33  ;;  %17114 = vmatprep.mubr.msk.bf16.mxu0 %vm19240_vm12, %v19239_v33  ;;  %v18906_v26 = vld [vmem:[#allocation11 + $0x28] sm:$0xff]   ;;  %v18907_v63 = vld [vmem:[#allocation11 + $0x20] sm:$0xff]   ;;  %v18908_v35 = vld [vmem:[#allocation11 + $0x18] sm:$0xff]   ;;  %s16885_s1 = sld [smem:[#allocation18 + $0x9]] }
 0xf3b   :  { %17099 = vmatpush3.bf16.msra.mxu0 %v18904_v60  ;;  %v18909_v49 = vld [vmem:[#allocation11 + $0x10] sm:$0xff]   ;;  %v18910_v62 = vld [vmem:[#allocation11 + $0x8] sm:$0xff]   ;;  %v18911_v59 = vld [vmem:[#allocation11] sm:$0xff]  }
 0xf3c   :  { %17100 = vmatprep.subr.bf16.mxu0 %v19239_v33  ;;  %v16876_v23 = vld [vmem:[#allocation15 + $0x2b] ss:$0 sm:$0xff] }
 0xf3f   :  { %17101 = vmatpush3.bf16.msra.mxu0 %v18905_v15 }
 0xf40   :  { %17102 = vmatprep.subr.bf16.mxu0 %v19239_v33  ;;  %v14708_v10 = vstv %s16885_s1 }
 0xf43   :  { %17103 = vmatpush3.bf16.msra.mxu0 %v18906_v26 }
 0xf44   :  { %17104 = vmatprep.subr.bf16.mxu0 %v19239_v33 }
 0xf47   :  { %17105 = vmatpush3.bf16.msra.mxu0 %v18907_v63 }
 0xf48   :  { %17106 = vmatprep.subr.bf16.mxu0 %v19239_v33 }
 0xf4b   :  { %17107 = vmatpush3.bf16.msra.mxu0 %v18908_v35 }
 0xf4c   :  { %17108 = vmatprep.subr.bf16.mxu0 %v19239_v33 }
 0xf4f   :  { %17109 = vmatpush3.bf16.msra.mxu0 %v18909_v49 }
 0xf50   :  { %17110 = vmatprep.subr.bf16.mxu0 %v19239_v33 }
 0xf53   :  { %17111 = vmatpush3.bf16.msra.mxu0 %v18910_v62 }
 0xf54   :  { %17112 = vmatprep.subr.bf16.mxu0 %v19239_v33 }
 0xf57   :  { %17113 = vmatpush3.bf16.msra.mxu0 %v18911_v59 }
 0xf5a   :  { %17115 = vmatmul.mubr.bf16.vlgmr.msra.gmra.mxu0 %v14610_v44 }
0x101a   :  { %v14700_v0 = vpop.f32.mrf.mxu0 }
0x101b   :  { %v14701_v42 = vadd.f32 %v16876_v23, %v14700_v0 }
0x101c   :  { %v17116_v4 = vpop.f32.mrf.mxu0 }
0x101d   :  { %vm14707_vm13 = vcmp.ge.f32.partialorder %v14701_v42, 0.0  ;;  %v14709_v22 = vmul.f32 %v14708_v10, %v14701_v42 }
0x101e   :  { %v14703_v39 = vpop.f32.mrf.mxu0 }
0x101f   :  { %v14710_v55 = vsel %vm14707_vm13, %v14701_v42, %v14709_v22 }
0x1020   :  { %v17117_v58 = vpop.f32.mrf.mxu0 }
0x1021   :  { %19220 = dma.done.wait [#allocation14 + $0xa], 1024 }
0x1022   :  { %19221 = vsyncadd [#allocation14 + $0xa], 4294966272  ;;  %17118 = vmatprep.subr.bf16.mxu1 %v19239_v33  ;;  %17134 = vmatprep.mubr.msk.bf16.mxu1 %vm19240_vm12, %v19239_v33  ;;  %v18912_v6 = vld [vmem:[#allocation12 + $0x38] sm:$0xff]   ;;  %v18913_v8 = vld [vmem:[#allocation12 + $0x30] sm:$0xff]   ;;  %v14729_v9 = vpack.c.bf16 %v14710_v55, %v14710_v55  ;;  %s16895_s25 = sld [smem:[#allocation18 + $0xa]] }
0x1023   :  { %17119 = vmatpush3.bf16.msra.mxu1 %v18912_v6  ;;  %v18914_v38 = vld [vmem:[#allocation12 + $0x28] sm:$0xff]   ;;  %v18915_v30 = vld [vmem:[#allocation12 + $0x20] sm:$0xff]   ;;  %v18916_v14 = vld [vmem:[#allocation12 + $0x18] sm:$0xff]  }
0x1024   :  { %17120 = vmatprep.subr.bf16.mxu1 %v19239_v33  ;;  %v18917_v37 = vld [vmem:[#allocation12 + $0x10] sm:$0xff]   ;;  %v18918_v43 = vld [vmem:[#allocation12 + $0x8] sm:$0xff]   ;;  %v18919_v16 = vld [vmem:[#allocation12] sm:$0xff]  }
0x1025   :  { %v16886_v57 = vld [vmem:[#allocation15 + $0x2c] ss:$0 sm:$0xff] }
0x1027   :  { %17121 = vmatpush3.bf16.msra.mxu1 %v18913_v8 }
0x1028   :  { %17122 = vmatprep.subr.bf16.mxu1 %v19239_v33  ;;  %v14827_v47 = vstv %s16895_s25 }
0x102b   :  { %17123 = vmatpush3.bf16.msra.mxu1 %v18914_v38 }
0x102c   :  { %17124 = vmatprep.subr.bf16.mxu1 %v19239_v33 }
0x102f   :  { %17125 = vmatpush3.bf16.msra.mxu1 %v18915_v30 }
0x1030   :  { %17126 = vmatprep.subr.bf16.mxu1 %v19239_v33 }
0x1033   :  { %17127 = vmatpush3.bf16.msra.mxu1 %v18916_v14 }
0x1034   :  { %17128 = vmatprep.subr.bf16.mxu1 %v19239_v33 }
0x1037   :  { %17129 = vmatpush3.bf16.msra.mxu1 %v18917_v37 }
0x1038   :  { %17130 = vmatprep.subr.bf16.mxu1 %v19239_v33 }
0x103b   :  { %17131 = vmatpush3.bf16.msra.mxu1 %v18918_v43 }
0x103c   :  { %17132 = vmatprep.subr.bf16.mxu1 %v19239_v33 }
0x103f   :  { %17133 = vmatpush3.bf16.msra.mxu1 %v18919_v16 }
0x1042   :  { %17135 = vmatmul.mubr.bf16.vlgmr.msra.gmra.mxu1 %v14729_v9 }
0x1102   :  { %v14819_v18 = vpop.f32.mrf.mxu1 }
0x1103   :  { %v14820_v56 = vadd.f32 %v16886_v57, %v14819_v18 }
0x1104   :  { %v17136_v52 = vpop.f32.mrf.mxu1 }
0x1105   :  { %vm14826_vm14 = vcmp.ge.f32.partialorder %v14820_v56, 0.0  ;;  %v14828_v29 = vmul.f32 %v14827_v47, %v14820_v56 }
0x1106   :  { %v14822_v20 = vpop.f32.mrf.mxu1 }
0x1107   :  { %v14829_v31 = vsel %vm14826_vm14, %v14820_v56, %v14828_v29 }
0x1108   :  { %v17137_v11 = vpop.f32.mrf.mxu1 }
0x1109   :  { %19222 = dma.done.wait [#allocation14 + $0xb], 1024 }
0x110a   :  { %19223 = vsyncadd [#allocation14 + $0xb], 4294966272  ;;  %17138 = vmatprep.subr.bf16.mxu0 %v19239_v33  ;;  %17154 = vmatprep.mubr.msk.bf16.mxu0 %vm19240_vm12, %v19239_v33  ;;  %v18920_v25 = vld [vmem:[#allocation13 + $0x38] sm:$0xff]   ;;  %v18921_v48 = vld [vmem:[#allocation13 + $0x30] sm:$0xff]   ;;  %v14848_v19 = vpack.c.bf16 %v14829_v31, %v14829_v31 }
0x110b   :  { %17139 = vmatpush3.bf16.msra.mxu0 %v18920_v25  ;;  %v18922_v27 = vld [vmem:[#allocation13 + $0x28] sm:$0xff]   ;;  %v18923_v32 = vld [vmem:[#allocation13 + $0x20] sm:$0xff]   ;;  %v18924_v45 = vld [vmem:[#allocation13 + $0x18] sm:$0xff]  }
0x110c   :  { %17140 = vmatprep.subr.bf16.mxu0 %v19239_v33  ;;  %v18925_v53 = vld [vmem:[#allocation13 + $0x10] sm:$0xff]   ;;  %v18926_v28 = vld [vmem:[#allocation13 + $0x8] sm:$0xff]   ;;  %v18927_v7 = vld [vmem:[#allocation13] sm:$0xff]  }
0x110d   :  { %v16896_v50 = vld [vmem:[#allocation15 + $0x2d] ss:$0 sm:$0xff] }
0x110f   :  { %17141 = vmatpush3.bf16.msra.mxu0 %v18921_v48 }
0x1110   :  { %17142 = vmatprep.subr.bf16.mxu0 %v19239_v33 }
0x1113   :  { %17143 = vmatpush3.bf16.msra.mxu0 %v18922_v27 }
0x1114   :  { %17144 = vmatprep.subr.bf16.mxu0 %v19239_v33 }
0x1117   :  { %17145 = vmatpush3.bf16.msra.mxu0 %v18923_v32 }
0x1118   :  { %17146 = vmatprep.subr.bf16.mxu0 %v19239_v33 }
0x111b   :  { %17147 = vmatpush3.bf16.msra.mxu0 %v18924_v45 }
0x111c   :  { %17148 = vmatprep.subr.bf16.mxu0 %v19239_v33 }
0x111f   :  { %17149 = vmatpush3.bf16.msra.mxu0 %v18925_v53 }
0x1120   :  { %17150 = vmatprep.subr.bf16.mxu0 %v19239_v33 }
0x1123   :  { %17151 = vmatpush3.bf16.msra.mxu0 %v18926_v28 }
0x1124   :  { %17152 = vmatprep.subr.bf16.mxu0 %v19239_v33 }
0x1127   :  { %17153 = vmatpush3.bf16.msra.mxu0 %v18927_v7 }
0x112a   :  { %17155 = vmatmul.mubr.bf16.vlgmr.msra.gmra.mxu0 %v14848_v19 }
0x11ea   :  { %v14938_v17 = vpop.f32.mrf.mxu0 }
0x11eb   :  { %v14939_v21 = vadd.f32 %v16896_v50, %v14938_v17 }
0x11ec   :  { %v17156_v12 = vpop.f32.mrf.mxu0 }
0x11ed   :  { %14944 = vst [vmem:[%s19931_s15] sm:$0xff] %v14939_v21 }
0x11ee   :  { %v14941_v46 = vpop.f32.mrf.mxu0 }
0x11f0   :  { %v17157_v34 = vpop.f32.mrf.mxu0 }
0x11f1   :  { %14949 = vsyncpa [#allocation16], 1 }
0x11f2   :  { %14950 = vsyncpa [#allocation17], 1 }
0x11f3   :  { %14951 = vsyncmov [#allocation14] }
0x11f6   :  { %s14952_s27 = vpop.sfrf %14951 }
0x11f7   :  { %p16905_p9 = scmp.ne.s32.totalorder %s14952_s27, 0 }
0x11f9   :  { %14956 = shalt.err (%p16905_p9)  }
0x11fa   :  { %14958 = vsyncmov [#allocation14 + $0x1] }
0x11fd   :  { %s14959_s28 = vpop.sfrf %14958 }
0x11fe   :  { %p16906_p10 = scmp.ne.s32.totalorder %s14959_s28, 0 }
0x1200   :  { %14963 = shalt.err (%p16906_p10)  }
0x1201   :  { %14965 = vsyncmov [#allocation14 + $0x2] }
0x1204   :  { %s14966_s7 = vpop.sfrf %14965 }
0x1205   :  { %p16907_p11 = scmp.ne.s32.totalorder %s14966_s7, 0 }
0x1207   :  { %14970 = shalt.err (%p16907_p11)  }
0x1208   :  { %14972 = vsyncmov [#allocation14 + $0x3] }
0x120b   :  { %s14973_s29 = vpop.sfrf %14972 }
0x120c   :  { %p16908_p12 = scmp.ne.s32.totalorder %s14973_s29, 0 }
0x120e   :  { %14977 = shalt.err (%p16908_p12)  }
0x120f   :  { %14979 = vsyncmov [#allocation14 + $0x4] }
0x1212   :  { %s14980_s15 = vpop.sfrf %14979 }
0x1213   :  { %p16909_p13 = scmp.ne.s32.totalorder %s14980_s15, 0 }
0x1215   :  { %14984 = shalt.err (%p16909_p13)  }
0x1216   :  { %14986 = vsyncmov [#allocation14 + $0x5] }
0x1219   :  { %s14987_s30 = vpop.sfrf %14986 }
0x121a   :  { %p16910_p0 = scmp.ne.s32.totalorder %s14987_s30, 0 }
0x121c   :  { %14991 = shalt.err (%p16910_p0)  }
0x121d   :  { %14993 = vsyncmov [#allocation14 + $0x6] }
0x1220   :  { %s14994_s8 = vpop.sfrf %14993 }
0x1221   :  { %p16911_p1 = scmp.ne.s32.totalorder %s14994_s8, 0 }
0x1223   :  { %14998 = shalt.err (%p16911_p1)  }
0x1224   :  { %15000 = vsyncmov [#allocation14 + $0x7] }
0x1227   :  { %s15001_s16 = vpop.sfrf %15000 }
0x1228   :  { %p16912_p2 = scmp.ne.s32.totalorder %s15001_s16, 0 }
0x122a   :  { %15005 = shalt.err (%p16912_p2)  }
0x122b   :  { %15007 = vsyncmov [#allocation14 + $0x8] }
0x122e   :  { %s15008_s13 = vpop.sfrf %15007 }
0x122f   :  { %p16913_p3 = scmp.ne.s32.totalorder %s15008_s13, 0 }
0x1231   :  { %15012 = shalt.err (%p16913_p3)  }
0x1232   :  { %15014 = vsyncmov [#allocation14 + $0x9] }
0x1235   :  { %s15015_s3 = vpop.sfrf %15014 }
0x1236   :  { %p16914_p4 = scmp.ne.s32.totalorder %s15015_s3, 0 }
0x1238   :  { %15019 = shalt.err (%p16914_p4)  }
0x1239   :  { %15021 = vsyncmov [#allocation14 + $0xa] }
0x123c   :  { %s15022_s14 = vpop.sfrf %15021 }
0x123d   :  { %p16915_p5 = scmp.ne.s32.totalorder %s15022_s14, 0 }
0x123f   :  { %15026 = shalt.err (%p16915_p5)  }
0x1240   :  { %15028 = vsyncmov [#allocation14 + $0xb] }
0x1243   :  { %s15029_s17 = vpop.sfrf %15028 }
0x1244   :  { %p16916_p6 = scmp.ne.s32.totalorder %s15029_s17, 0 }
0x1246   :  { %15033 = shalt.err (%p16916_p6)  }

</bundles_post_ra>
